<compile_context>
chip_gen: v7x
topology: tpu7x:2x2x1
jax: 0.10.0
libtpu: 0.0.40
codegen_flags: <defaults>
</compile_context>

<pallas_src>
import functools

import jax
import jax.numpy as jnp
import numpy as np
from jax.experimental import pallas as pl
from jax.experimental.pallas import tpu as pltpu

_EPS = 1e-5
_PAD = 8   # zero rows added in-kernel around a tile so every tap slice is in
           # range; 8 keeps the dy-shifted (dx == 0) slices sublane aligned
           # whenever W % 8 == 0.


def _round_up(n, m=128):
    return ((n + m - 1) // m) * m


# ------------------------------- kernel --------------------------------------
def _conv3x3(inp_bf16, w_ref, out_rows, W):
    """3x3 / stride-1 / pad-1 conv of a row tile as 3 accumulating MXU matmuls.

    inp_bf16 : (out_rows + 2*W, C) bf16 -- tile plus one image-row halo per side
               (halo rows already hold correct neighbour / zero-padding values).
    w_ref    : (9*C, Cout) bf16 ref, rows ordered (dy, dx, cin).
    returns  : (out_rows, Cout) float32.
    """
    cin = inp_bf16.shape[-1]
    zpad = jnp.zeros((_PAD, cin), jnp.bfloat16)
    xc = jnp.concatenate([zpad, inp_bf16, zpad], axis=0)      # (rows + 2*_PAD, C)

    # Pre-masked copies (applied once, not per tap): dx=-1 taps must never read
    # a source pixel in the last image column, dx=+1 taps never the first.
    off = (W - (_PAD % W)) % W                                 # static Python int
    col = (jax.lax.broadcasted_iota(jnp.int32, (xc.shape[0], 1), 0) + off) % W
    xl = jnp.where(col != (W - 1), xc, 0)
    xr = jnp.where(col != 0, xc, 0)

    acc = None
    for g, dy in enumerate((-1, 0, 1)):
        base = _PAD + W + dy * W                               # static, >= _PAD-1+1
        patch = jnp.concatenate(                               # (out_rows, 3*C)
            [xl[base - 1:base - 1 + out_rows, :],              # dx = -1
             xc[base:base + out_rows, :],                      # dx =  0
             xr[base + 1:base + 1 + out_rows, :]], axis=1)     # dx = +1
        part = jnp.dot(patch, w_ref[g * 3 * cin:(g + 1) * 3 * cin, :],
                       preferred_element_type=jnp.float32)
        acc = part if acc is None else acc + part
    return acc


def _basic_block_kernel(*refs, tile_h, W, short_cut):
    if short_cut:
        (x_ref, w1_ref, s1_ref, b1_ref, w2_ref, s2_ref, b2_ref,
         wsc_ref, ssc_ref, bsc_ref, o_ref) = refs
    else:
        (x_ref, w1_ref, s1_ref, b1_ref, w2_ref, s2_ref, b2_ref, o_ref) = refs

    R = tile_h * W                       # output pixels of this tile
    R1 = (tile_h + 2) * W                # conv1 output pixels (tile + 1-row halo)
    x = x_ref[0, 0]                      # ((tile_h + 4) * W, Cin_p) bf16

    # conv1 -> bn1 -> relu over the tile plus one halo row on each side.
    h = _conv3x3(x, w1_ref, R1, W)
    h = jnp.maximum(h * s1_ref[...] + b1_ref[...], 0.0)

    # conv2's vertical zero padding: rows of `h` that fall outside the image
    # (top halo of the first tile, bottom halo of the last tile) must be zero,
    # not relu(bn1(conv1(zeros))) = relu(b1).
    t = pl.program_id(1)
    nt = pl.num_programs(1)
    row = jax.lax.broadcasted_iota(jnp.int32, (R1, 1), 0)
    inside = jnp.logical_and(jnp.logical_or(t > 0, row >= W),
                             jnp.logical_or(t < nt - 1, row < R1 - W))
    h = jnp.where(inside, h, 0.0)

    # conv2 -> bn2 -> relu (exactly the tile's own rows).
    out = _conv3x3(h.astype(jnp.bfloat16), w2_ref, R, W)
    out = jnp.maximum(out * s2_ref[...] + b2_ref[...], 0.0)

    # Residual branch on the tile's own rows of x.
    x_c = x[2 * W:2 * W + R, :]
    if short_cut:
        res = jnp.dot(x_c, wsc_ref[...], preferred_element_type=jnp.float32)
        res = res * ssc_ref[...] + bsc_ref[...]
    else:
        res = x_c.astype(jnp.float32)    # requires Cin == planes (as in PyTorch)

    o_ref[0] = jnp.maximum(out + res, 0.0).astype(o_ref.dtype)


# --------------------------- parameter preparation ---------------------------
def _fold_bn(g, b, m, v, p_pad):
    s = g / jnp.sqrt(v + _EPS)
    bias = b - m * s
    n = s.shape[0]
    s = jnp.pad(s, (0, p_pad - n), constant_values=1.0)
    bias = jnp.pad(bias, (0, p_pad - n))
    return (s.reshape(1, -1).astype(jnp.float32),
            bias.reshape(1, -1).astype(jnp.float32))


def _prep_conv3x3_w(w, cin_p, cout_p):
    # (O, I, 3, 3) -> (9*I_p, O_p) bf16, rows ordered (dy, dx, cin).
    cout, cin = w.shape[0], w.shape[1]
    w = jnp.transpose(w, (2, 3, 1, 0)).reshape(9, cin, cout)
    w = jnp.pad(w, ((0, 0), (0, cin_p - cin), (0, cout_p - cout)))
    return w.reshape(9 * cin_p, cout_p).astype(jnp.bfloat16)


# ------------------------------- tile sizing ----------------------------------
def _vmem_estimate(tile_h, W, cin_p, p_p, short_cut):
    RH = (tile_h + 4) * W
    R1 = (tile_h + 2) * W
    R = tile_h * W
    b = 0
    b += 2 * RH * cin_p * 2                           # x tile (double-buffered bf16)
    b += 2 * R * p_p * 2                              # out tile (double-buffered bf16)
    w_bytes = (9 * cin_p * p_p + 9 * p_p * p_p) * 2
    if short_cut:
        w_bytes += cin_p * p_p * 2
    b += 2 * w_bytes                                  # weights (default double buffer)
    b += 3 * (RH + 2 * _PAD) * cin_p * 2              # conv1 xc / xl / xr copies
    b += 2 * R1 * 3 * cin_p * 2                       # conv1 dy-patches (~2 live)
    b += R1 * p_p * (4 + 2)                           # conv1 acc f32 + h bf16
    b += 3 * (R1 + 2 * _PAD) * p_p * 2                # conv2 xc / xl / xr copies
    b += 2 * R * 3 * p_p * 2                          # conv2 dy-patches
    b += 2 * R * p_p * 4                              # conv2 acc + residual (f32)
    return b


def _pick_tile_h(N, H, W, cin_p, p_p, short_cut, budget):
    if W % 8 != 0:
        return H                      # single tile: block rows == full array dim
    divisors = [d for d in range(H, 0, -1) if H % d == 0 and (d * W) % 8 == 0]
    if not divisors:
        return H
    fitting = [d for d in divisors
               if int(1.5 * _vmem_estimate(d, W, cin_p, p_p, short_cut)) <= budget]
    if not fitting:
        return divisors[-1]
    want_min_steps = 2 if (N * H) >= 2 else 1
    for d in fitting:                 # descending: biggest tile that still gives
        if N * (H // d) >= want_min_steps:          # >=2 grid steps (dual-TC v7x)
            return d
    return fitting[-1]


# --------------------------------- wrapper ------------------------------------
def basic_block_forward(x_nchw, params, short_cut, tile_h=None):
    """Pallas implementation of basic_block.forward. x_nchw: (N, Cin, H, W)."""
    N, Cin, H, W = x_nchw.shape
    P = params['w1'].shape[0]
    if not short_cut:
        assert Cin == P, "short_cut=False requires inplanes == planes"
    Cin_p = _round_up(Cin)
    P_p = _round_up(P)

    try:
        phys_vmem = int(pltpu.get_tpu_info().vmem_capacity_bytes)
    except Exception:
        phys_vmem = 64 * 1024 * 1024          # v7x per-TensorCore VMEM (smallest)
    budget = min(int(0.75 * phys_vmem), 96 * 1024 * 1024)

    if tile_h is None:
        tile_h = _pick_tile_h(N, H, W, Cin_p, P_p, short_cut, budget)
    assert H % tile_h == 0
    nt = H // tile_h
    RH = (tile_h + 4) * W
    R = tile_h * W

    # NCHW -> channels-last bf16, lane-dense 128-padded channels, 2-image-row
    # zero frame, then materialize the overlapping per-tile row windows (2-row
    # halo) so the kernel's BlockSpec pipeline stays plain non-overlapping
    # double-buffered blocks.
    x_hwc = jnp.transpose(x_nchw, (0, 2, 3, 1)).astype(jnp.bfloat16)
    x_hwc = jnp.pad(x_hwc, ((0, 0), (2, 2), (0, 0), (0, Cin_p - Cin)))
    x_tiles = jnp.stack(
        [x_hwc[:, t * tile_h: t * tile_h + tile_h + 4] for t in range(nt)],
        axis=1).reshape(N, nt, RH, Cin_p)

    w1 = _prep_conv3x3_w(params['w1'], Cin_p, P_p)
    w2 = _prep_conv3x3_w(params['w2'], P_p, P_p)
    s1, b1 = _fold_bn(params['g1'], params['b1'], params['m1'], params['v1'], P_p)
    s2, b2 = _fold_bn(params['g2'], params['b2'], params['m2'], params['v2'], P_p)

    vec_spec = pl.BlockSpec((1, P_p), lambda n, t: (0, 0))
    args = [x_tiles, w1, s1, b1, w2, s2, b2]
    in_specs = [
        pl.BlockSpec((1, 1, RH, Cin_p), lambda n, t: (n, t, 0, 0)),   # x tile
        pl.BlockSpec((9 * Cin_p, P_p), lambda n, t: (0, 0)),          # w1
        vec_spec, vec_spec,                                           # bn1
        pl.BlockSpec((9 * P_p, P_p), lambda n, t: (0, 0)),            # w2
        vec_spec, vec_spec,                                           # bn2
    ]
    if short_cut:
        wsc = jnp.transpose(params['wsc'][:, :, 0, 0], (1, 0))        # (Cin, P)
        wsc = jnp.pad(wsc, ((0, Cin_p - Cin), (0, P_p - P))).astype(jnp.bfloat16)
        ssc, bsc = _fold_bn(params['gsc'], params['bsc'],
                            params['msc'], params['vsc'], P_p)
        args += [wsc, ssc, bsc]
        in_specs += [pl.BlockSpec((Cin_p, P_p), lambda n, t: (0, 0)),
                     vec_spec, vec_spec]

    need = int(1.5 * _vmem_estimate(tile_h, W, Cin_p, P_p, short_cut))
    vmem_limit = int(min(budget, max(32 * 1024 * 1024, need)))

    kernel = functools.partial(_basic_block_kernel,
                               tile_h=tile_h, W=W, short_cut=short_cut)
    out_flat = pl.pallas_call(
        kernel,
        out_shape=jax.ShapeDtypeStruct((N, H * W, P_p), jnp.bfloat16),
        grid=(N, nt),
        in_specs=in_specs,
        out_specs=pl.BlockSpec((1, R, P_p), lambda n, t: (n, t, 0)),
        compiler_params=pltpu.CompilerParams(
            dimension_semantics=("parallel", "parallel"),
            vmem_limit_bytes=vmem_limit),
    )(*args)

    out = out_flat[:, :, :P].astype(jnp.float32).reshape(N, H, W, P)
    return jnp.transpose(out, (0, 3, 1, 2))


# --------------------- reference (plain JAX, NCHW, matches module) -----------
def basic_block_reference(x, p, short_cut):
    def conv(x, w, pad):
        return jax.lax.conv_general_dilated(
            x, w, (1, 1), pad, dimension_numbers=('NCHW', 'OIHW', 'NCHW'))

    def bn(x, g, b, m, v):
        s = g / jnp.sqrt(v + _EPS)
        return x * s[None, :, None, None] + (b - m * s)[None, :, None, None]

    out = conv(x, p['w1'], ((1, 1), (1, 1)))
    out = jnp.maximum(bn(out, p['g1'], p['b1'], p['m1'], p['v1']), 0.0)
    out = conv(out, p['w2'], ((1, 1), (1, 1)))
    out = jnp.maximum(bn(out, p['g2'], p['b2'], p['m2'], p['v2']), 0.0)
    if short_cut:
        res = conv(x, p['wsc'], ((0, 0), (0, 0)))
        res = bn(res, p['gsc'], p['bsc'], p['msc'], p['vsc'])
    else:
        res = x
    return jnp.maximum(out + res, 0.0)


# ----------------------------- deterministic params ---------------------------
def init_params(key, inplanes, planes):
    ks = jax.random.split(key, 6)

    def bn_params(k):
        k1, k2, k3, k4 = jax.random.split(k, 4)
        g = 1.0 + 0.1 * jax.random.normal(k1, (planes,), jnp.float32)
        b = 0.1 * jax.random.normal(k2, (planes,), jnp.float32)
        m = 0.1 * jax.random.normal(k3, (planes,), jnp.float32)
        v = 0.5 + 0.5 * jnp.abs(jax.random.normal(k4, (planes,), jnp.float32))
        return g, b, m, v

    w1 = 0.1 * jax.random.normal(ks[0], (planes, inplanes, 3, 3), jnp.float32)
    w2 = 0.1 * jax.random.normal(ks[1], (planes, planes, 3, 3), jnp.float32)
    wsc = 0.1 * jax.random.normal(ks[2], (planes, inplanes, 1, 1), jnp.float32)
    g1, b1, m1, v1 = bn_params(ks[3])
    g2, b2, m2, v2 = bn_params(ks[4])
    gsc, bsc, msc, vsc = bn_params(ks[5])
    return dict(w1=w1, w2=w2, wsc=wsc,
                g1=g1, b1=b1, m1=m1, v1=v1,
                g2=g2, b2=b2, m2=m2, v2=v2,
                gsc=gsc, bsc=bsc, msc=msc, vsc=vsc)


if __name__ == "__main__":
    key = jax.random.PRNGKey(0)
    kx, kp1, kp2 = jax.random.split(key, 3)

    N, H, W = 2, 16, 16

    # bf16 MXU operands / bf16 HBM activations (f32 accumulation) -> loosened
    # tolerances vs a pure-f32 implementation.
    RTOL, ATOL = 5e-2, 1e-1

    # Case 1: short_cut=False (inplanes == planes == 4), auto tile (single row tile).
    x = jax.random.normal(kx, (N, 4, H, W), jnp.float32)
    p1 = init_params(kp1, inplanes=4, planes=4)
    out1 = jax.block_until_ready(basic_block_forward(x, p1, short_cut=False))
    ref1 = jax.block_until_ready(basic_block_reference(x, p1, short_cut=False))
    np.testing.assert_allclose(np.asarray(out1), np.asarray(ref1),
                               rtol=RTOL, atol=ATOL)

    # Case 2: short_cut=True (4 -> 8 channels), forced tile_h=8 to exercise the
    # multi-row-tile halo path (grid (N, 2)).
    p2 = init_params(kp2, inplanes=4, planes=8)
    out2 = jax.block_until_ready(basic_block_forward(x, p2, short_cut=True, tile_h=8))
    ref2 = jax.block_until_ready(basic_block_reference(x, p2, short_cut=True))
    np.testing.assert_allclose(np.asarray(out2), np.asarray(ref2),
                               rtol=RTOL, atol=ATOL)

    print("KERNEL_OK")
</pallas_src>

<mosaic_0001>
module attributes {stable_mosaic.version = 11 : i64} {
  func.func @_basic_block_kernel(%arg0: i32, %arg1: i32, %arg2: memref<1x1x320x128xbf16, #tpu.memory_space<vmem>>, %arg3: memref<1152x128xbf16, #tpu.memory_space<vmem>>, %arg4: memref<1x128xf32, #tpu.memory_space<vmem>>, %arg5: memref<1x128xf32, #tpu.memory_space<vmem>>, %arg6: memref<1152x128xbf16, #tpu.memory_space<vmem>>, %arg7: memref<1x128xf32, #tpu.memory_space<vmem>>, %arg8: memref<1x128xf32, #tpu.memory_space<vmem>>, %arg9: memref<1x256x128xbf16, #tpu.memory_space<vmem>>) attributes {dimension_semantics = [#tpu.dimension_semantics<parallel>, #tpu.dimension_semantics<parallel>], iteration_bounds = array<i64: 2, 1>, scalar_prefetch = 0 : i64, scratch_operands = 0 : i64, tpu.core_type = #tpu.core_type<tc>, window_params = [{transform_indices = @transform_0, window_bounds = array<i64: 1, 1, 320, 128>}, {pipeline_mode = #tpu.pipeline_mode<synchronous>, transform_indices = @transform_1, window_bounds = array<i64: 1152, 128>}, {pipeline_mode = #tpu.pipeline_mode<synchronous>, transform_indices = @transform_2, window_bounds = array<i64: 1, 128>}, {pipeline_mode = #tpu.pipeline_mode<synchronous>, transform_indices = @transform_3, window_bounds = array<i64: 1, 128>}, {pipeline_mode = #tpu.pipeline_mode<synchronous>, transform_indices = @transform_4, window_bounds = array<i64: 1152, 128>}, {pipeline_mode = #tpu.pipeline_mode<synchronous>, transform_indices = @transform_5, window_bounds = array<i64: 1, 128>}, {pipeline_mode = #tpu.pipeline_mode<synchronous>, transform_indices = @transform_6, window_bounds = array<i64: 1, 128>}, {transform_indices = @transform_7, window_bounds = array<i64: 1, 256, 128>}]} {
    %c0 = arith.constant 0 : index
    %c0_0 = arith.constant 0 : index
    %c0_1 = arith.constant 0 : index
    %c0_2 = arith.constant 0 : index
    %0 = vector.load %arg2[%c0, %c0_0, %c0_1, %c0_2] : memref<1x1x320x128xbf16, #tpu.memory_space<vmem>>, vector<1x1x320x128xbf16>
    %1 = vector.shape_cast %0 : vector<1x1x320x128xbf16> to vector<320x128xbf16>
    %cst = arith.constant 0.000000e+00 : bf16
    %2 = vector.broadcast %cst : bf16 to vector<8x128xbf16>
    %3 = tpu.concatenate %2, %1, %2 in 0 : vector<8x128xbf16>, vector<320x128xbf16>, vector<8x128xbf16> -> vector<336x128xbf16>
    %4 = tpu.iota {dimensions = array<i32: 0>} : vector<336x1xi32>
    %c8_i32 = arith.constant 8 : i32
    %5 = vector.broadcast %c8_i32 : i32 to vector<336x1xi32>
    %6 = arith.addi %4, %5 : vector<336x1xi32>
    %c16_i32 = arith.constant 16 : i32
    %c0_i32 = arith.constant 0 : i32
    %7 = arith.cmpi eq, %c16_i32, %c0_i32 : i32
    %c1_i32 = arith.constant 1 : i32
    %8 = arith.select %7, %c1_i32, %c16_i32 : i32
    %9 = vector.broadcast %8 : i32 to vector<336x1xi32>
    %10 = arith.remsi %6, %9 : vector<336x1xi32>
    %c0_i32_3 = arith.constant 0 : i32
    %11 = vector.broadcast %c0_i32_3 : i32 to vector<336x1xi32>
    %12 = arith.cmpi ne, %10, %11 : vector<336x1xi32>
    %c0_i32_4 = arith.constant 0 : i32
    %13 = vector.broadcast %c0_i32_4 : i32 to vector<336x1xi32>
    %14 = arith.cmpi slt, %10, %13 : vector<336x1xi32>
    %c0_i32_5 = arith.constant 0 : i32
    %15 = arith.cmpi slt, %8, %c0_i32_5 : i32
    %16 = vector.broadcast %15 : i1 to vector<336x1xi1>
    %17 = vector.broadcast %16 : vector<336x1xi1> to vector<336x1xi1>
    %18 = arith.xori %14, %17 : vector<336x1xi1>
    %19 = arith.andi %18, %12 : vector<336x1xi1>
    %20 = vector.broadcast %8 : i32 to vector<336x1xi32>
    %21 = arith.addi %10, %20 : vector<336x1xi32>
    %22 = arith.select %19, %21, %10 : vector<336x1xi1>, vector<336x1xi32>
    %c15_i32 = arith.constant 15 : i32
    %23 = vector.broadcast %c15_i32 : i32 to vector<336x1xi32>
    %24 = arith.cmpi ne, %22, %23 : vector<336x1xi32>
    %c0_i32_6 = arith.constant 0 : i32
    %25 = arith.sitofp %c0_i32_6 : i32 to bf16
    %26 = vector.shape_cast %24 : vector<336x1xi1> to vector<336x1xi1>
    %27 = vector.broadcast %26 : vector<336x1xi1> to vector<336x128xi1>
    %28 = vector.broadcast %25 : bf16 to vector<336x128xbf16>
    %29 = arith.select %27, %3, %28 : vector<336x128xi1>, vector<336x128xbf16>
    %c0_i32_7 = arith.constant 0 : i32
    %30 = vector.broadcast %c0_i32_7 : i32 to vector<336x1xi32>
    %31 = arith.cmpi ne, %22, %30 : vector<336x1xi32>
    %c0_i32_8 = arith.constant 0 : i32
    %32 = arith.sitofp %c0_i32_8 : i32 to bf16
    %33 = vector.shape_cast %31 : vector<336x1xi1> to vector<336x1xi1>
    %34 = vector.broadcast %33 : vector<336x1xi1> to vector<336x128xi1>
    %35 = vector.broadcast %32 : bf16 to vector<336x128xbf16>
    %36 = arith.select %34, %3, %35 : vector<336x128xi1>, vector<336x128xbf16>
    %37 = vector.extract_strided_slice %29 {offsets = [7, 0], sizes = [288, 128], strides = [1, 1]} : vector<336x128xbf16> to vector<288x128xbf16>
    %38 = vector.extract_strided_slice %3 {offsets = [8, 0], sizes = [288, 128], strides = [1, 1]} : vector<336x128xbf16> to vector<288x128xbf16>
    %39 = vector.extract_strided_slice %36 {offsets = [9, 0], sizes = [288, 128], strides = [1, 1]} : vector<336x128xbf16> to vector<288x128xbf16>
    %40 = tpu.concatenate %37, %38, %39 in 1 : vector<288x128xbf16>, vector<288x128xbf16>, vector<288x128xbf16> -> vector<288x384xbf16>
    %c0_9 = arith.constant 0 : index
    %c0_10 = arith.constant 0 : index
    %41 = vector.load %arg3[%c0_9, %c0_10] : memref<1152x128xbf16, #tpu.memory_space<vmem>>, vector<384x128xbf16>
    %cst_11 = arith.constant dense<0.000000e+00> : vector<288x128xf32>
    %42 = tpu.matmul %40, %41, %cst_11 {dimension_numbers = #tpu.dot_dimension_numbers<[1], [0], [0], [1], [0, 0, 1, 1], [], []>} : vector<288x384xbf16>, vector<384x128xbf16>, vector<288x128xf32> -> vector<288x128xf32>
    %43 = vector.extract_strided_slice %29 {offsets = [23, 0], sizes = [288, 128], strides = [1, 1]} : vector<336x128xbf16> to vector<288x128xbf16>
    %44 = vector.extract_strided_slice %3 {offsets = [24, 0], sizes = [288, 128], strides = [1, 1]} : vector<336x128xbf16> to vector<288x128xbf16>
    %45 = vector.extract_strided_slice %36 {offsets = [25, 0], sizes = [288, 128], strides = [1, 1]} : vector<336x128xbf16> to vector<288x128xbf16>
    %46 = tpu.concatenate %43, %44, %45 in 1 : vector<288x128xbf16>, vector<288x128xbf16>, vector<288x128xbf16> -> vector<288x384xbf16>
    %c384 = arith.constant 384 : index
    %c0_12 = arith.constant 0 : index
    %47 = vector.load %arg3[%c384, %c0_12] : memref<1152x128xbf16, #tpu.memory_space<vmem>>, vector<384x128xbf16>
    %cst_13 = arith.constant dense<0.000000e+00> : vector<288x128xf32>
    %48 = tpu.matmul %46, %47, %cst_13 {dimension_numbers = #tpu.dot_dimension_numbers<[1], [0], [0], [1], [0, 0, 1, 1], [], []>} : vector<288x384xbf16>, vector<384x128xbf16>, vector<288x128xf32> -> vector<288x128xf32>
    %49 = arith.addf %42, %48 : vector<288x128xf32>
    %50 = vector.extract_strided_slice %29 {offsets = [39, 0], sizes = [288, 128], strides = [1, 1]} : vector<336x128xbf16> to vector<288x128xbf16>
    %51 = vector.extract_strided_slice %3 {offsets = [40, 0], sizes = [288, 128], strides = [1, 1]} : vector<336x128xbf16> to vector<288x128xbf16>
    %52 = vector.extract_strided_slice %36 {offsets = [41, 0], sizes = [288, 128], strides = [1, 1]} : vector<336x128xbf16> to vector<288x128xbf16>
    %53 = tpu.concatenate %50, %51, %52 in 1 : vector<288x128xbf16>, vector<288x128xbf16>, vector<288x128xbf16> -> vector<288x384xbf16>
    %c768 = arith.constant 768 : index
    %c0_14 = arith.constant 0 : index
    %54 = vector.load %arg3[%c768, %c0_14] : memref<1152x128xbf16, #tpu.memory_space<vmem>>, vector<384x128xbf16>
    %cst_15 = arith.constant dense<0.000000e+00> : vector<288x128xf32>
    %55 = tpu.matmul %53, %54, %cst_15 {dimension_numbers = #tpu.dot_dimension_numbers<[1], [0], [0], [1], [0, 0, 1, 1], [], []>} : vector<288x384xbf16>, vector<384x128xbf16>, vector<288x128xf32> -> vector<288x128xf32>
    %56 = arith.addf %49, %55 : vector<288x128xf32>
    %c0_16 = arith.constant 0 : index
    %c0_17 = arith.constant 0 : index
    %57 = vector.load %arg4[%c0_16, %c0_17] : memref<1x128xf32, #tpu.memory_space<vmem>>, vector<1x128xf32>
    %58 = vector.broadcast %57 : vector<1x128xf32> to vector<288x128xf32>
    %59 = arith.mulf %56, %58 : vector<288x128xf32>
    %c0_18 = arith.constant 0 : index
    %c0_19 = arith.constant 0 : index
    %60 = vector.load %arg5[%c0_18, %c0_19] : memref<1x128xf32, #tpu.memory_space<vmem>>, vector<1x128xf32>
    %61 = vector.broadcast %60 : vector<1x128xf32> to vector<288x128xf32>
    %62 = arith.addf %59, %61 : vector<288x128xf32>
    %cst_20 = arith.constant 0.000000e+00 : f32
    %63 = vector.broadcast %cst_20 : f32 to vector<288x128xf32>
    %64 = arith.maximumf %62, %63 : vector<288x128xf32>
    %65 = tpu.iota {dimensions = array<i32: 0>} : vector<288x1xi32>
    %c0_i32_21 = arith.constant 0 : i32
    %66 = arith.cmpi sgt, %arg1, %c0_i32_21 : i32
    %c16_i32_22 = arith.constant 16 : i32
    %67 = vector.broadcast %c16_i32_22 : i32 to vector<288x1xi32>
    %68 = arith.cmpi sge, %65, %67 : vector<288x1xi32>
    %69 = vector.broadcast %66 : i1 to vector<288x1xi1>
    %70 = arith.ori %69, %68 : vector<288x1xi1>
    %c0_i32_23 = arith.constant 0 : i32
    %71 = arith.cmpi slt, %arg1, %c0_i32_23 : i32
    %c272_i32 = arith.constant 272 : i32
    %72 = vector.broadcast %c272_i32 : i32 to vector<288x1xi32>
    %73 = arith.cmpi slt, %65, %72 : vector<288x1xi32>
    %74 = vector.broadcast %71 : i1 to vector<288x1xi1>
    %75 = arith.ori %74, %73 : vector<288x1xi1>
    %76 = arith.andi %70, %75 : vector<288x1xi1>
    %cst_24 = arith.constant 0.000000e+00 : f32
    %77 = vector.shape_cast %76 : vector<288x1xi1> to vector<288x1xi1>
    %78 = vector.broadcast %77 : vector<288x1xi1> to vector<288x128xi1>
    %79 = vector.broadcast %cst_24 : f32 to vector<288x128xf32>
    %80 = arith.select %78, %64, %79 : vector<288x128xi1>, vector<288x128xf32>
    %81 = arith.truncf %80 : vector<288x128xf32> to vector<288x128xbf16>
    %cst_25 = arith.constant 0.000000e+00 : bf16
    %82 = vector.broadcast %cst_25 : bf16 to vector<8x128xbf16>
    %83 = tpu.concatenate %82, %81, %82 in 0 : vector<8x128xbf16>, vector<288x128xbf16>, vector<8x128xbf16> -> vector<304x128xbf16>
    %84 = tpu.iota {dimensions = array<i32: 0>} : vector<304x1xi32>
    %c8_i32_26 = arith.constant 8 : i32
    %85 = vector.broadcast %c8_i32_26 : i32 to vector<304x1xi32>
    %86 = arith.addi %84, %85 : vector<304x1xi32>
    %c16_i32_27 = arith.constant 16 : i32
    %c0_i32_28 = arith.constant 0 : i32
    %87 = arith.cmpi eq, %c16_i32_27, %c0_i32_28 : i32
    %c1_i32_29 = arith.constant 1 : i32
    %88 = arith.select %87, %c1_i32_29, %c16_i32_27 : i32
    %89 = vector.broadcast %88 : i32 to vector<304x1xi32>
    %90 = arith.remsi %86, %89 : vector<304x1xi32>
    %c0_i32_30 = arith.constant 0 : i32
    %91 = vector.broadcast %c0_i32_30 : i32 to vector<304x1xi32>
    %92 = arith.cmpi ne, %90, %91 : vector<304x1xi32>
    %c0_i32_31 = arith.constant 0 : i32
    %93 = vector.broadcast %c0_i32_31 : i32 to vector<304x1xi32>
    %94 = arith.cmpi slt, %90, %93 : vector<304x1xi32>
    %c0_i32_32 = arith.constant 0 : i32
    %95 = arith.cmpi slt, %88, %c0_i32_32 : i32
    %96 = vector.broadcast %95 : i1 to vector<304x1xi1>
    %97 = vector.broadcast %96 : vector<304x1xi1> to vector<304x1xi1>
    %98 = arith.xori %94, %97 : vector<304x1xi1>
    %99 = arith.andi %98, %92 : vector<304x1xi1>
    %100 = vector.broadcast %88 : i32 to vector<304x1xi32>
    %101 = arith.addi %90, %100 : vector<304x1xi32>
    %102 = arith.select %99, %101, %90 : vector<304x1xi1>, vector<304x1xi32>
    %c15_i32_33 = arith.constant 15 : i32
    %103 = vector.broadcast %c15_i32_33 : i32 to vector<304x1xi32>
    %104 = arith.cmpi ne, %102, %103 : vector<304x1xi32>
    %c0_i32_34 = arith.constant 0 : i32
    %105 = arith.sitofp %c0_i32_34 : i32 to bf16
    %106 = vector.shape_cast %104 : vector<304x1xi1> to vector<304x1xi1>
    %107 = vector.broadcast %106 : vector<304x1xi1> to vector<304x128xi1>
    %108 = vector.broadcast %105 : bf16 to vector<304x128xbf16>
    %109 = arith.select %107, %83, %108 : vector<304x128xi1>, vector<304x128xbf16>
    %c0_i32_35 = arith.constant 0 : i32
    %110 = vector.broadcast %c0_i32_35 : i32 to vector<304x1xi32>
    %111 = arith.cmpi ne, %102, %110 : vector<304x1xi32>
    %c0_i32_36 = arith.constant 0 : i32
    %112 = arith.sitofp %c0_i32_36 : i32 to bf16
    %113 = vector.shape_cast %111 : vector<304x1xi1> to vector<304x1xi1>
    %114 = vector.broadcast %113 : vector<304x1xi1> to vector<304x128xi1>
    %115 = vector.broadcast %112 : bf16 to vector<304x128xbf16>
    %116 = arith.select %114, %83, %115 : vector<304x128xi1>, vector<304x128xbf16>
    %117 = vector.extract_strided_slice %109 {offsets = [7, 0], sizes = [256, 128], strides = [1, 1]} : vector<304x128xbf16> to vector<256x128xbf16>
    %118 = vector.extract_strided_slice %83 {offsets = [8, 0], sizes = [256, 128], strides = [1, 1]} : vector<304x128xbf16> to vector<256x128xbf16>
    %119 = vector.extract_strided_slice %116 {offsets = [9, 0], sizes = [256, 128], strides = [1, 1]} : vector<304x128xbf16> to vector<256x128xbf16>
    %120 = tpu.concatenate %117, %118, %119 in 1 : vector<256x128xbf16>, vector<256x128xbf16>, vector<256x128xbf16> -> vector<256x384xbf16>
    %c0_37 = arith.constant 0 : index
    %c0_38 = arith.constant 0 : index
    %121 = vector.load %arg6[%c0_37, %c0_38] : memref<1152x128xbf16, #tpu.memory_space<vmem>>, vector<384x128xbf16>
    %cst_39 = arith.constant dense<0.000000e+00> : vector<256x128xf32>
    %122 = tpu.matmul %120, %121, %cst_39 {dimension_numbers = #tpu.dot_dimension_numbers<[1], [0], [0], [1], [0, 0, 1, 1], [], []>} : vector<256x384xbf16>, vector<384x128xbf16>, vector<256x128xf32> -> vector<256x128xf32>
    %123 = vector.extract_strided_slice %109 {offsets = [23, 0], sizes = [256, 128], strides = [1, 1]} : vector<304x128xbf16> to vector<256x128xbf16>
    %124 = vector.extract_strided_slice %83 {offsets = [24, 0], sizes = [256, 128], strides = [1, 1]} : vector<304x128xbf16> to vector<256x128xbf16>
    %125 = vector.extract_strided_slice %116 {offsets = [25, 0], sizes = [256, 128], strides = [1, 1]} : vector<304x128xbf16> to vector<256x128xbf16>
    %126 = tpu.concatenate %123, %124, %125 in 1 : vector<256x128xbf16>, vector<256x128xbf16>, vector<256x128xbf16> -> vector<256x384xbf16>
    %c384_40 = arith.constant 384 : index
    %c0_41 = arith.constant 0 : index
    %127 = vector.load %arg6[%c384_40, %c0_41] : memref<1152x128xbf16, #tpu.memory_space<vmem>>, vector<384x128xbf16>
    %cst_42 = arith.constant dense<0.000000e+00> : vector<256x128xf32>
    %128 = tpu.matmul %126, %127, %cst_42 {dimension_numbers = #tpu.dot_dimension_numbers<[1], [0], [0], [1], [0, 0, 1, 1], [], []>} : vector<256x384xbf16>, vector<384x128xbf16>, vector<256x128xf32> -> vector<256x128xf32>
    %129 = arith.addf %122, %128 : vector<256x128xf32>
    %130 = vector.extract_strided_slice %109 {offsets = [39, 0], sizes = [256, 128], strides = [1, 1]} : vector<304x128xbf16> to vector<256x128xbf16>
    %131 = vector.extract_strided_slice %83 {offsets = [40, 0], sizes = [256, 128], strides = [1, 1]} : vector<304x128xbf16> to vector<256x128xbf16>
    %132 = vector.extract_strided_slice %116 {offsets = [41, 0], sizes = [256, 128], strides = [1, 1]} : vector<304x128xbf16> to vector<256x128xbf16>
    %133 = tpu.concatenate %130, %131, %132 in 1 : vector<256x128xbf16>, vector<256x128xbf16>, vector<256x128xbf16> -> vector<256x384xbf16>
    %c768_43 = arith.constant 768 : index
    %c0_44 = arith.constant 0 : index
    %134 = vector.load %arg6[%c768_43, %c0_44] : memref<1152x128xbf16, #tpu.memory_space<vmem>>, vector<384x128xbf16>
    %cst_45 = arith.constant dense<0.000000e+00> : vector<256x128xf32>
    %135 = tpu.matmul %133, %134, %cst_45 {dimension_numbers = #tpu.dot_dimension_numbers<[1], [0], [0], [1], [0, 0, 1, 1], [], []>} : vector<256x384xbf16>, vector<384x128xbf16>, vector<256x128xf32> -> vector<256x128xf32>
    %136 = arith.addf %129, %135 : vector<256x128xf32>
    %c0_46 = arith.constant 0 : index
    %c0_47 = arith.constant 0 : index
    %137 = vector.load %arg7[%c0_46, %c0_47] : memref<1x128xf32, #tpu.memory_space<vmem>>, vector<1x128xf32>
    %138 = vector.broadcast %137 : vector<1x128xf32> to vector<256x128xf32>
    %139 = arith.mulf %136, %138 : vector<256x128xf32>
    %c0_48 = arith.constant 0 : index
    %c0_49 = arith.constant 0 : index
    %140 = vector.load %arg8[%c0_48, %c0_49] : memref<1x128xf32, #tpu.memory_space<vmem>>, vector<1x128xf32>
    %141 = vector.broadcast %140 : vector<1x128xf32> to vector<256x128xf32>
    %142 = arith.addf %139, %141 : vector<256x128xf32>
    %cst_50 = arith.constant 0.000000e+00 : f32
    %143 = vector.broadcast %cst_50 : f32 to vector<256x128xf32>
    %144 = arith.maximumf %142, %143 : vector<256x128xf32>
    %145 = vector.extract_strided_slice %1 {offsets = [32, 0], sizes = [256, 128], strides = [1, 1]} : vector<320x128xbf16> to vector<256x128xbf16>
    %146 = arith.extf %145 : vector<256x128xbf16> to vector<256x128xf32>
    %147 = arith.addf %144, %146 : vector<256x128xf32>
    %cst_51 = arith.constant 0.000000e+00 : f32
    %148 = vector.broadcast %cst_51 : f32 to vector<256x128xf32>
    %149 = arith.maximumf %147, %148 : vector<256x128xf32>
    %150 = arith.truncf %149 : vector<256x128xf32> to vector<256x128xbf16>
    %c0_52 = arith.constant 0 : index
    %c0_53 = arith.constant 0 : index
    %c0_54 = arith.constant 0 : index
    %151 = vector.load %arg9[%c0_52, %c0_53, %c0_54] : memref<1x256x128xbf16, #tpu.memory_space<vmem>>, vector<1x256x128xbf16>
    %152 = vector.shape_cast %151 : vector<1x256x128xbf16> to vector<256x128xbf16>
    %153 = vector.shape_cast %150 : vector<256x128xbf16> to vector<1x256x128xbf16>
    tpu.vector_store %arg9[%c0_52, %c0_53, %c0_54], %153 {strides = array<i32>} : memref<1x256x128xbf16, #tpu.memory_space<vmem>>, vector<1x256x128xbf16>,
    return
  }
  func.func @transform_0(%arg0: i32, %arg1: i32) -> (i32, i32, i32, i32) {
    %c0_i32 = arith.constant 0 : i32
    %c0_i32_0 = arith.constant 0 : i32
    %c0_i32_1 = arith.constant 0 : i32
    return %arg0, %arg1, %c0_i32, %c0_i32_0 : i32, i32, i32, i32
  }
  func.func @transform_1(%arg0: i32, %arg1: i32) -> (i32, i32) {
    %c0_i32 = arith.constant 0 : i32
    %c0_i32_0 = arith.constant 0 : i32
    %c0_i32_1 = arith.constant 0 : i32
    return %c0_i32, %c0_i32_0 : i32, i32
  }
  func.func @transform_2(%arg0: i32, %arg1: i32) -> (i32, i32) {
    %c0_i32 = arith.constant 0 : i32
    %c0_i32_0 = arith.constant 0 : i32
    %c0_i32_1 = arith.constant 0 : i32
    return %c0_i32, %c0_i32_0 : i32, i32
  }
  func.func @transform_3(%arg0: i32, %arg1: i32) -> (i32, i32) {
    %c0_i32 = arith.constant 0 : i32
    %c0_i32_0 = arith.constant 0 : i32
    %c0_i32_1 = arith.constant 0 : i32
    return %c0_i32, %c0_i32_0 : i32, i32
  }
  func.func @transform_4(%arg0: i32, %arg1: i32) -> (i32, i32) {
    %c0_i32 = arith.constant 0 : i32
    %c0_i32_0 = arith.constant 0 : i32
    %c0_i32_1 = arith.constant 0 : i32
    return %c0_i32, %c0_i32_0 : i32, i32
  }
  func.func @transform_5(%arg0: i32, %arg1: i32) -> (i32, i32) {
    %c0_i32 = arith.constant 0 : i32
    %c0_i32_0 = arith.constant 0 : i32
    %c0_i32_1 = arith.constant 0 : i32
    return %c0_i32, %c0_i32_0 : i32, i32
  }
  func.func @transform_6(%arg0: i32, %arg1: i32) -> (i32, i32) {
    %c0_i32 = arith.constant 0 : i32
    %c0_i32_0 = arith.constant 0 : i32
    %c0_i32_1 = arith.constant 0 : i32
    return %c0_i32, %c0_i32_0 : i32, i32
  }
  func.func @transform_7(%arg0: i32, %arg1: i32) -> (i32, i32, i32) {
    %c0_i32 = arith.constant 0 : i32
    %c0_i32_0 = arith.constant 0 : i32
    return %arg0, %arg1, %c0_i32 : i32, i32, i32
  }
}

</mosaic_0001>

<bundles_post_ra>
// kernel: tpu_custom_call.1
= control target key start
LH: loop header
LB: loop body
LE: loop exit
PB: predicated region body
PF: predicated region fallthrough
CT: control target
= control target key end

     0   :  { %12 = vsyncpa [#allocation3], 0  ;;  %s12912_s0 = inlined_call_operand.hbm [shape: bf16[2,1,320,128], index: 0, kind: input, shape index: {}]   ;;  %s12913_s1 = inlined_call_operand.hbm [shape: bf16[1152,128], index: 1, kind: input, shape index: {}]   ;;  %s12914_s2 = inlined_call_operand.vmem [shape: f32[1,128], index: 2, kind: input, shape index: {}]   ;;  %s12915_s3 = inlined_call_operand.vmem [shape: f32[1,128], index: 3, kind: input, shape index: {}]   ;;  %s12916_s4 = inlined_call_operand.hbm [shape: bf16[1152,128], index: 4, kind: input, shape index: {}]   ;;  %s12917_s5 = inlined_call_operand.vmem [shape: f32[1,128], index: 5, kind: input, shape index: {}]   ;;  %s12918_s6 = inlined_call_operand.vmem [shape: f32[1,128], index: 6, kind: input, shape index: {}]   ;;  %s12919_s7 = inlined_call_operand.hbm [shape: bf16[2,256,128], index: 7, kind: output, shape index: {}]  }
   0x1   :  { %14 = vsyncpa [#allocation3 + $0x1], 0 }
   0x2   :  { %15 = vsyncpa [#allocation6], 0 }
   0x3   :  { %16 = vsyncpa [#allocation4], 0 }
   0x4   :  { %18 = vsyncpa [#allocation4 + $0x1], 0  ;;  %s9612_s24 = smov 0   ;;  %s9614_s25 = smov 0  }
   0x5   :  { %s9616_s26 = smov 0   ;;  %s9618_s27 = smov 0  }
   0x6   :  { %s9620_s28 = smov 0   ;;  %s9622_s29 = smov 0  }
   0x7 LB: > { %13101 = sst [smem:[#allocation12_spill]] %s9539_s24  ;;  %s7724_s30 = sadd.s32 4294967295, %s9559_s29   ;;  %s9559_s29 = sphi %s9622_s29, %s24_s29   ;;  %s9555_s28 = sphi %s9620_s28, %s13776_s28   ;;  %s9551_s27 = sphi %s9618_s27, %s13775_s27   ;;  %s9547_s26 = sphi %s9616_s26, %s13774_s26   ;;  %s9543_s25 = sphi %s9614_s25, %s13773_s25   ;;  %s9539_s24 = sphi %s9612_s24, %s13772_s24  }
   0x8   : > { %s7725_s8 = sadd.s32 4294967294, %s9559_s29   ;;  %p58_p0 = scmp.ne.s32.totalorder %s9543_s25, %s9539_s24 }
   0x9   : > { %p9646_p1 = scmp.eq.s32.totalorder %s7724_s30, 0  ;;  %p9650_p2 = scmp.eq.s32.totalorder %s7724_s30, 1 }
   0xa   : > { %p216_p3 = scmp.eq.s32.totalorder %s7725_s8, 1  ;;  %p7726_p5 = scmp.ge.s32.totalorder %s9559_s29, 1 }
   0xb   : > { %s13102_s9 = scalar_select %p9646_p1, 1, 0 }
   0xc   : > { %p9656_p4 = por %p9646_p1, %p58_p0  ;;  %p9661_p6 = por %p216_p3, %p58_p0 }
   0xd   : > { %p223_p7 = scmp.lt.s32.totalorder %s9559_s29, 3  ;;  %s9561_s14 = smov [#allocation5]  }
   0xe   : > { %s13104_s11 = scalar_select %p9656_p4, 1, 0 }
   0xf   : > { %s13105_s12 = scalar_select %p9661_p6, 1, 0 }
  0x10   : > { %p9666_p8 = pnand %p7726_p5, %p223_p7  ;;  %s235_s15 = sshll.u32 %s9561_s14, 4  ;;  %s9670_s15 = int_to_ptr.vmem [resolvable:$true] %s235_s15 }
  0x11   : > { %13106 = sst [smem:[#allocation13_spill]] %s13105_s12  ;;  %s9562_s17 = smov [#allocation7]  }
  0x12   : > { %p9108_p9 = pneg %p9666_p8  ;;  %s254_s18 = sshll.u32 %s9562_s17, 4  ;;  %s9681_s18 = int_to_ptr.vmem [resolvable:$true] %s254_s18 }
  0x13   : > { %s9387_s21 = scalar_lea.hbm %s12913_s1, 9216 }
  0x14   : > { %p9677_p11 = pnand %p9108_p9, %p9646_p1  ;;  %p9388_p12 = scmp.ne.s32.totalorder %s12913_s1, %s9387_s21 }
  0x15   : > { %p9394_p5 = scmp.lt.u32.totalorder %s9387_s21, %s12913_s1 }
  0x16   : > { %p9389_p13 = pneg %p9677_p11 }
  0x18   : > { %p9390_p0 = pnand %p9389_p13, %p9388_p12 }
  0x1a   : > { %p9391_p3 = pneg %p9390_p0 }
  0x1c   : > { %p9396_p7 = pnand %p9394_p5, %p9391_p3 }
  0x1e   : > { %9399 = shalt.err (!%p9396_p7)
}
  0x1f   : > { %s9400_s14 = scalar_lea.vmem %s9670_s15, 9216  ;;  %p9408_p1 = scmp.lt.s32.totalorder %s9670_s15, %s9670_s15 }
  0x20   : > { %p9401_p9 = scmp.ne.s32.totalorder %s9670_s15, %s9400_s14  ;;  %p9409_p12 = scmp.lt.s32.totalorder %s9400_s14, %s9400_s14 }
  0x22   : > { %p9403_p10 = pnand %p9401_p9, %p9389_p13  ;;  %p9410_p0 = por %p9409_p12, %p9408_p1 }
  0x24   : > { %p9404_p6 = pneg %p9403_p10 }
  0x26   : > { %p9411_p4 = pnand %p9410_p0, %p9404_p6 }
  0x28   : > { %9414 = shalt.err (!%p9411_p4)
}
  0x29   : > { %s12925_s17 = smov 64   ;;  %s12926_s19 = smov 4  }
  0x2a   : > { %9111 = dma.hbm_to_vmem [thread:$0]  (!%p9677_p11), %s12913_s1, 9216, %s9670_s15, [#allocation6], %s12925_s17, %s12925_s17, %s12926_s19  }
  0x2b   : > { %s9415_s30 = scalar_lea.hbm %s12916_s4, 9216 }
  0x2c   : > { %p9416_p1 = scmp.ne.s32.totalorder %s12916_s4, %s9415_s30  ;;  %p9422_p10 = scmp.lt.u32.totalorder %s9415_s30, %s12916_s4 }
  0x2e   : > { %p9418_p4 = pnand %p9416_p1, %p9389_p13 }
  0x30   : > { %p9419_p6 = pneg %p9418_p4 }
  0x32   : > { %p9424_p3 = pnand %p9422_p10, %p9419_p6 }
  0x34   : > { %9427 = shalt.err (!%p9424_p3)
}
  0x35   : > { %s9428_s15 = scalar_lea.vmem %s9681_s18, 9216  ;;  %p9436_p12 = scmp.lt.s32.totalorder %s9681_s18, %s9681_s18 }
  0x36   : > { %p9429_p5 = scmp.ne.s32.totalorder %s9681_s18, %s9428_s15  ;;  %p9437_p0 = scmp.lt.s32.totalorder %s9428_s15, %s9428_s15 }
  0x38   : > { %p9431_p7 = pnand %p9429_p5, %p9389_p13  ;;  %p9438_p1 = por %p9437_p0, %p9436_p12 }
  0x3a   : > { %p9432_p9 = pneg %p9431_p7 }
  0x3c   : > { %p9439_p4 = pnand %p9438_p1, %p9432_p9 }
  0x3e   : > { %9442 = shalt.err (!%p9439_p4)
}
  0x3f   : > { %9114 = dma.hbm_to_vmem [thread:$0]  (!%p9677_p11), %s12916_s4, 9216, %s9681_s18, [#allocation6], %s12925_s17, %s12925_s17, %s12926_s19  }
  0x40   : > { %s36_s16 = sadd.s32 1, %s9555_s28  ;;  %s45_s20 = sadd.s32 1, %s9547_s26 }
  0x41   : > { %p38_p13 = scmp.ge.s32.totalorder %s36_s16, 2  ;;  %p52_p6 = scmp.ne.s32.totalorder %s9547_s26, %s9543_s25 }
  0x42   : > { %p53_p10 = scmp.eq.s32.totalorder %s9559_s29, 0  ;;  %p9125_p3 = scmp.lt.s32.totalorder %s9559_s29, 2 }
  0x43   : > { %s13778_s16 = smov (%p38_p13, %s36_s16), 0  ;;  %p9751_p7 = por %p9650_p2, %p52_p6 }
  0x44   : > { %p54_p5 = por %p53_p10, %p52_p6  ;;  %s40_s22 = ssub.s32 %s9555_s28, %s13778_s16 }
  0x45   : > { %s13109_s21 = scalar_select %p9751_p7, 1, 0 }
  0x46   : > { %s274_s23 = sand.u32 1, %s9547_s26   ;;  %p43_p9 = scmp.eq.s32.totalorder %s40_s22, 0 }
  0x47   : > { %s9093_s18 = smul.u32 160, %s274_s23  ;;  %p9758_p11 = pnand %p9125_p3, %p54_p5 }
  0x48   : > { %s9763_s8 = scalar_select %p43_p9, %s9547_s26, %s45_s20  }
  0x49   : > { %s9094_s14 = smul.u32 2560, %s9555_s28  ;;  %s278_s15 = scalar_lea.vmem [#allocation2], %s9093_s18 }
  0x4a   : > { %s287_s24 = sshll.u32 %s278_s15, 4  ;;  %s9773_s22 = scalar_lea.sflag [#allocation3], %s274_s23  ;;  %s9771_s24 = int_to_ptr.vmem [resolvable:$true] %s287_s24 }
  0x4b   : > { %s9769_s17 = scalar_lea.hbm %s12912_s0, %s9094_s14  ;;  %p9445_p12 = pneg %p9758_p11 }
  0x4c   : > { %s9443_s19 = scalar_lea.hbm %s9769_s17, 2560  ;;  %s9448_s14 = scalar_lea.hbm %s12912_s0, 5120 }
  0x4d   : > { %p9444_p2 = scmp.ne.s32.totalorder %s9769_s17, %s9443_s19  ;;  %p9449_p4 = scmp.lt.u32.totalorder %s9769_s17, %s12912_s0 }
  0x4e   : > { %p9450_p13 = scmp.lt.u32.totalorder %s9448_s14, %s9443_s19  ;;  %p9452_p10 = scmp.lt.u32.totalorder %s9443_s19, %s9769_s17 }
  0x4f   : > { %p9446_p0 = pnand %p9445_p12, %p9444_p2 }
  0x50   : > { %p9451_p6 = por %p9450_p13, %p9449_p4 }
  0x51   : > { %p9447_p1 = pneg %p9446_p0 }
  0x52   : > { %p9453_p3 = por %p9452_p10, %p9451_p6 }
  0x54   : > { %p9454_p5 = pnand %p9453_p3, %p9447_p1 }
  0x56   : > { %9457 = shalt.err (!%p9454_p5)
}
  0x57   : > { %s9458_s23 = scalar_lea.vmem %s9771_s24, 2560  ;;  %s9565_s12 = smov [#allocation2]  }
  0x58   : > { %p9459_p9 = scmp.ne.s32.totalorder %s9771_s24, %s9458_s23  ;;  %s9463_s20 = sshll.u32 %s9565_s12, 4  ;;  %s9464_s20 = int_to_ptr.vmem [resolvable:$false] %s9463_s20 }
  0x59   : > { %s9465_s18 = scalar_lea.vmem %s9464_s20, 5120  ;;  %p9466_p7 = scmp.lt.s32.totalorder %s9771_s24, %s9464_s20 }
  0x5a   : > { %p9461_p2 = pnand %p9459_p9, %p9445_p12  ;;  %p9467_p4 = scmp.lt.s32.totalorder %s9465_s18, %s9458_s23 }
  0x5c   : > { %p9462_p0 = pneg %p9461_p2  ;;  %p9468_p13 = por %p9467_p4, %p9466_p7 }
  0x5e   : > { %p9469_p6 = pnand %p9468_p13, %p9462_p0 }
  0x60   : > { %9472 = shalt.err (!%p9469_p6)
}
  0x61   : > { %s13111_s19 = smov 4   ;;  %s13112_s14 = smov 64  }
  0x62   : > { %9118 = dma.hbm_to_vmem [thread:$0]  (!%p9758_p11), %s9769_s17, 2560, %s9771_s24, %s9773_s22, %s13112_s14, %s13112_s14, %s13111_s19  }
  0x63   : > { %299 = sbr.rel (%p9666_p8) target bundleno = 1822 (0x71e), region = 48 }
  0x6a   : > { %s9807_s15 = sand.u32 1, %s9543_s25   ;;  %p13113_p7 = scmp.ne.s32.totalorder %s13104_s11, 0 }
  0x6b   : > { %s9095_s10 = smul.u32 160, %s9807_s15  ;;  %s302_s23 = scalar_lea.sflag [#allocation3], %s9807_s15 }
  0x6d   : > { %s9811_s12 = scalar_lea.vmem [#allocation2], %s9095_s10 }
  0x6e   : > { %9526 = dma.done.wait (%p13113_p7), %s302_s23, 2560  }
  0x6f   : > { %9528 = vsyncadd (%p13113_p7), %s302_s23, 4294964736  ;;  %p13114_p11 = scmp.ne.s32.totalorder %s13102_s9, 0 }
  0x71   : > { %9530 = dma.done.wait (%p13114_p11), [#allocation6], 18432  }
  0x72   : > { %9532 = vsyncadd (%p13114_p11), [#allocation6], 4294948864  ;;  %v12929_v0 = vmov 0   ;;  %v9186_v1 = vld [vmem:[#allocation5 + $0xc0] sm:$0xff]   ;;  %v9187_v2 = vld [vmem:[#allocation5 + $0xc8] sm:$0xff]   ;;  %v516_v4 = vlaneseq  ;;  %vm9567_vm4 = vmmov 1  }
  0x73   : > { %2758 = vmatprep.subr.bf16.mxu0 %v12929_v0  ;;  %v9188_v3 = vld [vmem:[#allocation5 + $0xd0] sm:$0xff]   ;;  %v9189_v5 = vld [vmem:[#allocation5 + $0xd8] sm:$0xff]   ;;  %v9190_v7 = vld [vmem:[#allocation5 + $0xe0] sm:$0xff]   ;;  %vm12938_vm0 = vsmask.f32 7424  ;;  %s7734_s18 = sshll.u32 %s9807_s15, 7 }
  0x74   : > { %2759 = vmatpush1.bf16.msra.mxu0 %v9186_v1  ;;  %v9825_v6 = vshrl.u32 %v516_v4, 7  ;;  %v9829_v8 = vld [vmem:[%s9811_s12 + $0xc] sm:$0xff]   ;;  %v9832_v9 = vld [vmem:[%s9811_s12 + $0x14] sm:$0xff]   ;;  %v9835_v10 = vld [vmem:[%s9811_s12 + $0x4] sm:$0xff]   ;;  %vm12940_vm1 = vsmask.f32 4352 }
  0x75   : > { %2760 = vmatprep.subr.bf16.mxu0 %v12929_v0  ;;  %v9191_v12 = vld [vmem:[#allocation5 + $0xe8] sm:$0xff]   ;;  %v1742_v14 = vshll.u32 %v9835_v10, 16  ;;  %v1746_v15 = vshrl.u32 %v9835_v10, 16  ;;  %v1750_v16 = vshll.u32 %v9829_v8, 16  ;;  %v1754_v17 = vshrl.u32 %v9829_v8, 16  ;;  %v9192_v22 = vld [vmem:[#allocation5 + $0xf0] sm:$0xff]   ;;  %vm1231_vm5 = vmpackc.low %vm9567_vm4, %vm9567_vm4 }
  0x76   : > { %v519_v11 = vadd.s32 16, %v9825_v6  ;;  %v521_v13 = vadd.s32 32, %v9825_v6  ;;  %v1758_v18 = vshll.u32 %v9832_v9, 16  ;;  %v523_v27 = vadd.s32 48, %v9825_v6  ;;  %v9193_v31 = vld [vmem:[#allocation5 + $0xf8] sm:$0xff]   ;;  %v9194_v42 = vld [vmem:[#allocation5 + $0x100] sm:$0xff]  }
  0x77   : > { %v9845_v19 = vrot.slane %v1742_v14, 1  ;;  %v1752_v20 = vrot.slane %v1750_v16, 1  ;;  %v9195_v47 = vld [vmem:[#allocation5 + $0x108] sm:$0xff]   ;;  %v525_v50 = vadd.s32 64, %v9825_v6  ;;  %v9880_v51 = vld [vmem:[%s9811_s12 + $0x1c] sm:$0xff]   ;;  %v527_v52 = vadd.s32 80, %v9825_v6 }
  0x78   : > { %2761 = vmatpush1.bf16.msra.mxu0 %v9187_v2  ;;  %v560_v21 = vadd.s32 8, %v519_v11  ;;  %v9847_v23 = vrot.slane %v1758_v18, 1  ;;  %v562_v26 = vadd.s32 8, %v521_v13  ;;  %v564_v37 = vadd.s32 8, %v523_v27  ;;  %v9196_v59 = vld [vmem:[#allocation5 + $0x110] sm:$0xff]   ;;  %v9906_v2 = vld [vmem:[%s9811_s12 + $0x24] sm:$0xff]  }
  0x79   : > { %2762 = vmatprep.subr.bf16.mxu0 %v12929_v0  ;;  %v1748_v24 = vor.u32 %v1746_v15, %v9845_v19  ;;  %v1756_v25 = vor.u32 %v1754_v17, %v1752_v20  ;;  %v9888_v53 = vsel %vm1231_vm5, 65537, %v12929_v0  ;;  %v566_v56 = vadd.s32 8, %v525_v50  ;;  %v9198_v17 = vld [vmem:[#allocation5 + $0x120] sm:$0xff]   ;;  %s12754_s19 = scalar_lea.vmem [#allocation8], %s7734_s18  ;;  %s8015_s14 = sshll.u32 %s9551_s27, 11 }
  0x7a   : > { %v618_v30 = vand.u32 15, %v560_v21  ;;  %v632_v36 = vand.u32 15, %v562_v26  ;;  %v646_v49 = vand.u32 15, %v564_v37  ;;  %13119 = vst [vmem:[#allocation14_spill] sm:$0xff] %v9888_v53  ;;  %v568_v58 = vadd.s32 8, %v527_v52  ;;  %s7618_s10 = sshll.u32 %s12754_s19, 4  ;;  %s12859_s9 = scalar_lea.hbm %s12919_s7, %s8015_s14  ;;  %s12861_s10 = int_to_ptr.vmem [resolvable:$true] %s7618_s10 }
  0x7b   : > { %v1753_v28 = vsel %vm12938_vm0, %v1748_v24, %v1752_v20  ;;  %v1761_v29 = vsel %vm12938_vm0, %v1756_v25, %v9847_v23  ;;  %v529_v60 = vadd.s32 96, %v9825_v6  ;;  %v1762_v63 = vshrl.u32 %v9832_v9, 16  ;;  %s7603_s27 = scalar_lea.sflag [#allocation4], %s9807_s15  ;;  %s9473_s11 = scalar_lea.vmem %s12861_s10, 2048 }
  0x7c   : > { %2763 = vmatpush1.bf16.msra.mxu0 %v9188_v3  ;;  %v2068_v32 = vshrl.u32 %v1753_v28, 16  ;;  %v2071_v33 = vshll.u32 %v1753_v28, 16  ;;  %v2076_v34 = vshrl.u32 %v1761_v29, 16  ;;  %v2079_v35 = vshll.u32 %v1761_v29, 16  ;;  %p9474_p8 = scmp.ne.s32.totalorder %s12861_s10, %s9473_s11  ;;  %p13767_p12 = scmp.ne.s32.totalorder %s13109_s21, 0 }
  0x7d   : > { %2764 = vmatprep.subr.bf16.mxu0 %v12929_v0  ;;  %vm9860_vm2 = vcmp.ne.s32.totalorder %v618_v30, 15  ;;  %vm9865_vm3 = vcmp.ne.s32.totalorder %v632_v36, 15  ;;  %vm9891_vm8 = vcmp.ne.s32.totalorder %v646_v49, 15  ;;  %v1766_v1 = vshll.u32 %v9880_v51, 16  ;;  %v9963_v49 = vld [vmem:[%s9811_s12 + $0x34] sm:$0xff]   ;;  %s9569_s13 = smov [#allocation8]  }
  0x7e   : > { %v2070_v38 = vrot.slane %v2068_v32, 3  ;;  %v2073_v39 = vrot.slane %v2071_v33, 4  ;;  %v2078_v40 = vrot.slane %v2076_v34, 3  ;;  %v2081_v41 = vrot.slane %v2079_v35, 4  ;;  %vm1232_vm6 = vmpackc.low %vm9860_vm2, %vm9860_vm2  ;;  %v9199_v32 = vld [vmem:[#allocation5 + $0x128] sm:$0xff]   ;;  %p9475_p1 = pnand %p9474_p8, %p13767_p12  ;;  %s9477_s17 = sshll.u32 %s9569_s13, 4  ;;  %s9478_s17 = int_to_ptr.vmem [resolvable:$false] %s9477_s17 }
  0x7f   : > { %vm1234_vm7 = vmpackc.low %vm9865_vm3, %vm9865_vm3  ;;  %v1274_v54 = vsel %vm1232_vm6, 65537, %v12929_v0  ;;  %v660_v3 = vand.u32 15, %v566_v56  ;;  %v674_v4 = vand.u32 15, %v568_v58  ;;  %v570_v11 = vadd.s32 8, %v529_v60  ;;  %s9479_s30 = scalar_lea.vmem %s9478_s17, 4096  ;;  %p9480_p3 = scmp.lt.s32.totalorder %s12861_s10, %s9478_s17 }
  0x80   : > { %2765 = vmatpush1.bf16.msra.mxu0 %v9189_v5  ;;  %v9856_v43 = vor.u32 %v2073_v39, %v2070_v38  ;;  %v9858_v44 = vor.u32 %v2081_v41, %v2078_v40  ;;  %v1276_v57 = vsel %vm1234_vm7, 65537, %v12929_v0  ;;  %v7757_v61 = vcombine.low %v1274_v54, %v9888_v53  ;;  %vm1236_vm9 = vmpackc.low %vm9891_vm8, %vm9891_vm8  ;;  %v9197_v5 = vld [vmem:[#allocation5 + $0x118] sm:$0xff]   ;;  %v9200_v40 = vld [vmem:[#allocation5 + $0x130] sm:$0xff]   ;;  %p9476_p10 = pneg %p9475_p1  ;;  %p9481_p5 = scmp.lt.s32.totalorder %s9479_s30, %s9473_s11 }
  0x81   : > { %2766 = vmatprep.subr.bf16.mxu0 %v12929_v0  ;;  %v7758_v62 = vcombine.low %v1276_v57, %v9888_v53  ;;  %v531_v13 = vadd.s32 112, %v9825_v6  ;;  %v13125_v14 = vmov 0  ;;  %v1764_v15 = vor.u32 %v1762_v63, %v9847_v23 }
  0x82   : > { %v9872_v48 = vsel %vm12940_vm1, %v9856_v43, %v9858_v44  ;;  %vm9910_vm10 = vcmp.ne.s16.totalorder %v7757_v61, 0  ;;  %v1768_v16 = vrot.slane %v1766_v1, 1  ;;  %vm9921_vm12 = vcmp.ne.s32.totalorder %v660_v3, 15  ;;  %p9482_p9 = por %p9481_p5, %p9480_p3 }
  0x83   : > { %2790 = vmatprep.mubr.bf16.mxu0 %v9872_v48  ;;  %vm9915_vm11 = vcmp.ne.s16.totalorder %v7758_v62, 0  ;;  %vm9925_vm13 = vcmp.ne.s32.totalorder %v674_v4, 15  ;;  %v688_v24 = vand.u32 15, %v570_v11  ;;  %v572_v25 = vadd.s32 8, %v531_v13  ;;  %vm1238_vm14 = vmpackc.low %vm9921_vm12, %vm9921_vm12  ;;  %v9205_v11 = vld [vmem:[#allocation5 + $0x140] sm:$0xff]  }
  0x84   : > { %2767 = vmatpush1.bf16.msra.mxu0 %v9190_v7  ;;  %v1278_v7 = vsel %vm1236_vm9, 65537, %v12929_v0  ;;  %v13126_v14 = vsel %vm9915_vm11, 4294967295, %v13125_v14  ;;  %v1400_v23 = vsel %vm9915_vm11, %v9829_v8, 0  ;;  %v1769_v26 = vsel %vm12938_vm0, %v1764_v15, %v1768_v16  ;;  %vm1240_vm3 = vmpackc.low %vm9925_vm13, %vm9925_vm13  ;;  %p9483_p2 = pnand %p9482_p9, %p9476_p10 }
  0x85   : > { %2768 = vmatprep.subr.bf16.mxu0 %v12929_v0  ;;  %13127 = vst [vmem:[#allocation16_spill] sm:$0xff] %v13126_v14  ;;  %v7759_v18 = vcombine.low %v1278_v7, %v9888_v53  ;;  %v1770_v27 = vshrl.u32 %v9880_v51, 16  ;;  %v1774_v28 = vshll.u32 %v9906_v2, 16  ;;  %v13132_v30 = vmov 0 }
  0x86   : > { %v2059_v33 = vshrl.u32 %v1400_v23, 16  ;;  %v2062_v34 = vshll.u32 %v1400_v23, 16  ;;  %v533_v35 = vadd.s32 128, %v9825_v6  ;;  %v2111_v36 = vshrl.u32 %v1769_v26, 16 }
  0x87   : > { %vm9942_vm15 = vcmp.ne.s16.totalorder %v7759_v18, 0  ;;  %v2114_v37 = vshll.u32 %v1769_v26, 16  ;;  %v1280_v38 = vsel %vm1238_vm14, 65537, %v12929_v0  ;;  %vm9952_vm2 = vcmp.ne.s32.totalorder %v688_v24, 15 }
  0x88   : > { %2769 = vmatpush1.bf16.msra.mxu0 %v9191_v12  ;;  %v13122_v12 = vmov 0  ;;  %v13133_v30 = vsel %vm9942_vm15, 4294967295, %v13132_v30  ;;  %v1401_v41 = vsel %vm9942_vm15, %v9832_v9, 0  ;;  %v1776_v45 = vrot.slane %v1774_v28, 1  ;;  %vm1242_vm6 = vmpackc.low %vm9952_vm2, %vm9952_vm2 }
  0x89   : > { %2770 = vmatprep.subr.bf16.mxu0 %v12929_v0  ;;  %v13123_v12 = vsel %vm9910_vm10, 4294967295, %v13122_v12  ;;  %13134 = vst [vmem:[#allocation17_spill] sm:$0xff] %v13133_v30  ;;  %v702_v50 = vand.u32 15, %v572_v25  ;;  %v2061_v52 = vrot.slane %v2059_v33, 3  ;;  %v2064_v54 = vrot.slane %v2062_v34, 4  ;;  %v9208_v34 = vld [vmem:[#allocation5 + $0x148] sm:$0xff]  }
  0x8a   : > { %13124 = vst [vmem:[#allocation15_spill] sm:$0xff] %v13123_v12  ;;  %v7760_v55 = vcombine.low %v1280_v38, %v9888_v53  ;;  %v2113_v56 = vrot.slane %v2111_v36, 3  ;;  %v2116_v57 = vrot.slane %v2114_v37, 4  ;;  %v2102_v58 = vshrl.u32 %v1401_v41, 16 }
  0x8b   : > { %v1778_v61 = vshrl.u32 %v9906_v2, 16  ;;  %v2105_v1 = vshll.u32 %v1401_v41, 16  ;;  %vm9973_vm4 = vcmp.ne.s32.totalorder %v702_v50, 15  ;;  %v9977_v4 = vadd.s32 8, %v533_v35 }
  0x8c   : > { %2771 = vmatpush1.bf16.msra.mxu0 %v9192_v22  ;;  %v1399_v22 = vsel %vm9910_vm10, %v9835_v10, 0  ;;  %v2065_v7 = vor.u32 %v2064_v54, %v2061_v52  ;;  %vm9979_vm5 = vcmp.ne.s16.totalorder %v7760_v55, 0  ;;  %v13139_v13 = vmov 0  ;;  %vm1244_vm8 = vmpackc.low %vm9973_vm4, %vm9973_vm4 }
  0x8d   : > { %2772 = vmatprep.subr.bf16.mxu0 %v12929_v0  ;;  %v2051_v29 = vshrl.u32 %v1399_v22, 16  ;;  %v2054_v10 = vshll.u32 %v1399_v22, 16  ;;  %v13140_v13 = vsel %vm9979_vm5, 4294967295, %v13139_v13  ;;  %v2104_v20 = vrot.slane %v2102_v58, 3 }
  0x8e   : > { %13141 = vst [vmem:[#allocation18_spill] sm:$0xff] %v13140_v13  ;;  %v1780_v21 = vor.u32 %v1778_v61, %v1776_v45  ;;  %v2107_v24 = vrot.slane %v2105_v1, 4  ;;  %v1402_v23 = vsel %vm9979_vm5, %v9880_v51, 0  ;;  %v13142_v26 = vmov 0 }
  0x8f   : > { %v2053_v46 = vrot.slane %v2051_v29, 3  ;;  %v1790_v28 = vshll.u32 %v9963_v49, 16  ;;  %v10002_v29 = vld [vmem:[%s9811_s12 + $0x3c] sm:$0xff]   ;;  %v1284_v35 = vsel %vm1242_vm6, 65537, %v12929_v0  ;;  %v2129_v36 = vshrl.u32 %v1402_v23, 16 }
  0x90   : > { %2773 = vmatpush1.bf16.msra.mxu0 %v9193_v31  ;;  %v9947_v31 = vld [vmem:[%s9811_s12 + $0x2c] sm:$0xff]   ;;  %v2132_v37 = vshll.u32 %v1402_v23, 16  ;;  %v2108_v39 = vor.u32 %v2107_v24, %v2104_v20  ;;  %v716_v50 = vand.u32 15, %v9977_v4  ;;  %v1798_v61 = vshll.u32 %v10002_v29, 16 }
  0x91   : > { %2774 = vmatprep.subr.bf16.mxu0 %v12929_v0  ;;  %v1782_v62 = vshll.u32 %v9947_v31, 16  ;;  %v13147_v3 = vmov 0  ;;  %v1794_v4 = vshrl.u32 %v9963_v49, 16  ;;  %v13180_v13 = vmov 0 }
  0x92   : > { %vm10038_vm12 = vcmp.ne.s32.totalorder %v716_v50, 15  ;;  %v1800_v23 = vrot.slane %v1798_v61, 1  ;;  %v13186_v14 = vmov 0  ;;  %vm13260_vm11 = vsmask.f32 4352 }
  0x93   : > { %v1784_v22 = vrot.slane %v1782_v62, 1  ;;  %v1286_v62 = vsel %vm1244_vm8, 65537, %v12929_v0  ;;  %vm1246_vm13 = vmpackc.low %vm10038_vm12, %vm10038_vm12 }
  0x94   : > { %2775 = vmatpush1.bf16.msra.mxu0 %v9194_v42  ;;  %v1772_v42 = vor.u32 %v1770_v27, %v1768_v16  ;;  %v2117_v16 = vor.u32 %v2116_v57, %v2113_v56  ;;  %v1786_v27 = vshrl.u32 %v9947_v31, 16  ;;  %v2131_v56 = vrot.slane %v2129_v36, 3  ;;  %vm13262_vm10 = vmmov %vm13260_vm11 }
  0x95   : > { %2776 = vmatprep.subr.bf16.mxu0 %v12929_v0  ;;  %v1785_v38 = vsel %vm12938_vm0, %v1780_v21, %v1784_v22  ;;  %v2134_v57 = vrot.slane %v2132_v37, 4  ;;  %v7763_v20 = vcombine.low %v1286_v62, %v9888_v53  ;;  %v10046_v21 = vld [vmem:[%s9811_s12 + $0x4c] sm:$0xff]  }
  0x96   : > { %v1777_v60 = vsel %vm12938_vm0, %v1772_v42, %v1776_v45  ;;  %v1788_v41 = vor.u32 %v1786_v27, %v1784_v22  ;;  %v1792_v42 = vrot.slane %v1790_v28, 1  ;;  %v7762_v45 = vcombine.low %v1284_v35, %v9888_v53 }
  0x97   : > { %v2141_v18 = vshll.u32 %v1777_v60, 16  ;;  %v2165_v54 = vshrl.u32 %v1785_v38, 16  ;;  %v2168_v55 = vshll.u32 %v1785_v38, 16  ;;  %v537_v22 = vadd.s32 160, %v9825_v6  ;;  %v9218_v38 = vld [vmem:[#allocation5 + $0x160] sm:$0xff]  }
  0x98   : > { %2777 = vmatpush1.bf16.msra.mxu0 %v9195_v47  ;;  %v2056_v47 = vrot.slane %v2054_v10, 4  ;;  %v10006_v10 = vsel %vm12940_vm1, %v9858_v44, %v2117_v16  ;;  %v535_v44 = vadd.s32 144, %v9825_v6  ;;  %v1793_v1 = vsel %vm12938_vm0, %v1788_v41, %v1792_v42 }
  0x99   : > { %2778 = vmatprep.subr.bf16.mxu0 %v12929_v0  ;;  %13145 = vst [vmem:[#allocation20_spill] sm:$0xff] %v10006_v10  ;;  %v2143_v33 = vrot.slane %v2141_v18, 4  ;;  %vm10030_vm9 = vcmp.ne.s16.totalorder %v7762_v45, 0  ;;  %v10042_v18 = vor.u32 %v2134_v57, %v2131_v56  ;;  %v1802_v27 = vshrl.u32 %v10002_v29, 16  ;;  %v10070_v57 = vld [vmem:[%s9811_s12 + $0x54] sm:$0xff]  }
  0x9a   : > { %v9971_v63 = vor.u32 %v2056_v47, %v2053_v46  ;;  %v9211_v46 = vld [vmem:[#allocation5 + $0x150] sm:$0xff]   ;;  %v10021_v47 = vld [vmem:[%s9811_s12 + $0x44] sm:$0xff]   ;;  %v13148_v3 = vsel %vm10030_vm9, 4294967295, %v13147_v3  ;;  %v1404_v24 = vsel %vm10030_vm9, %v9947_v31, 0  ;;  %v1796_v28 = vor.u32 %v1794_v4, %v1792_v42 }
  0x9b   : > { %13149 = vst [vmem:[#allocation22_spill] sm:$0xff] %v13148_v3  ;;  %v2195_v37 = vshll.u32 %v1793_v1, 16  ;;  %v2186_v41 = vshll.u32 %v1404_v24, 16  ;;  %vm10059_vm14 = vcmp.ne.s16.totalorder %v7763_v20, 0  ;;  %v13153_v45 = vmov 0 }
  0x9c   : > { %2779 = vmatpush1.bf16.msra.mxu0 %v9196_v59  ;;  %v1282_v59 = vsel %vm1240_vm3, 65537, %v12929_v0  ;;  %v9993_v25 = vsel %vm12940_vm1, %v9971_v63, %v2065_v7  ;;  %v13154_v45 = vsel %vm10059_vm14, 4294967295, %v13153_v45  ;;  %v10065_v42 = vsel %vm12940_vm1, %v2108_v39, %v10042_v18 }
  0x9d   : > { %2780 = vmatprep.subr.bf16.mxu0 %v12929_v0  ;;  %v7761_v15 = vcombine.low %v1282_v59, %v9888_v53  ;;  %13155 = vst [vmem:[#allocation24_spill] sm:$0xff] %v13154_v45  ;;  %13156 = vst [vmem:[#allocation25_spill] sm:$0xff] %v10065_v42  ;;  %v1801_v50 = vsel %vm12938_vm0, %v1796_v28, %v1800_v23  ;;  %v2197_v61 = vrot.slane %v2195_v37, 4  ;;  %v1814_v4 = vshll.u32 %v10046_v21, 16 }
  0x9e   : > { %v578_v28 = vadd.s32 8, %v537_v22  ;;  %v539_v37 = vadd.s32 176, %v9825_v6 }
  0x9f   : > { %vm9995_vm7 = vcmp.ne.s16.totalorder %v7761_v15, 0  ;;  %v2170_v15 = vrot.slane %v2168_v55, 4 }
  0xa0   : > { %2781 = vmatpush1.bf16.msra.mxu0 %v9197_v5  ;;  %v9201_v5 = vld [vmem:[#allocation5 + $0x138] sm:$0xff]   ;;  %v13143_v26 = vsel %vm9995_vm7, 4294967295, %v13142_v26 }
  0xa1   : > { %2782 = vmatprep.subr.bf16.mxu0 %v12929_v0  ;;  %13144 = vst [vmem:[#allocation19_spill] sm:$0xff] %v13143_v26 }
  0xa4   : > { %2783 = vmatpush1.bf16.msra.mxu0 %v9198_v17  ;;  %v2138_v17 = vshrl.u32 %v1777_v60, 16  ;;  %v10025_v60 = vsel %vm12940_vm1, %v2065_v7, %v2108_v39  ;;  %v1405_v39 = vsel %vm10059_vm14, %v9963_v49, 0  ;;  %v2219_v7 = vshrl.u32 %v1801_v50, 16 }
  0xa5   : > { %2784 = vmatprep.subr.bf16.mxu0 %v12929_v0  ;;  %13146 = vst [vmem:[#allocation21_spill] sm:$0xff] %v10025_v60 }
  0xa8   : > { %2785 = vmatpush1.bf16.msra.mxu0 %v9199_v32  ;;  %v2140_v32 = vrot.slane %v2138_v17, 3  ;;  %v9214_v17 = vld [vmem:[#allocation5 + $0x158] sm:$0xff]  }
  0xa9   : > { %2786 = vmatprep.subr.bf16.mxu0 %v12929_v0 }
  0xaa   : > { %v2144_v52 = vor.u32 %v2143_v33, %v2140_v32  ;;  %v1806_v32 = vshll.u32 %v10021_v47, 16  ;;  %v576_v33 = vadd.s32 8, %v535_v44  ;;  %v1288_v44 = vsel %vm1246_vm13, 65537, %v12929_v0 }
  0xab   : > { %v7764_v62 = vcombine.low %v1288_v44, %v9888_v53 }
  0xac   : > { %2787 = vmatpush1.bf16.msra.mxu0 %v9200_v40  ;;  %v1403_v40 = vsel %vm9995_vm7, %v9906_v2, 0  ;;  %v1808_v55 = vrot.slane %v1806_v32, 1  ;;  %v730_v56 = vand.u32 15, %v576_v33  ;;  %v9224_v32 = vld [vmem:[#allocation5 + $0x170] sm:$0xff]   ;;  %v13160_v33 = vmov 0 }
  0xad   : > { %2788 = vmatprep.subr.bf16.mxu0 %v12929_v0  ;;  %v2156_v58 = vshrl.u32 %v1403_v40, 16  ;;  %v2159_v59 = vshll.u32 %v1403_v40, 16  ;;  %v2183_v40 = vshrl.u32 %v1404_v24, 16  ;;  %vm10088_vm3 = vcmp.ne.s16.totalorder %v7764_v62, 0  ;;  %v9227_v62 = vld [vmem:[#allocation5 + $0x178] sm:$0xff]  }
  0xae   : > { %vm10084_vm2 = vcmp.ne.s32.totalorder %v730_v56, 15  ;;  %v13161_v33 = vsel %vm10088_vm3, 4294967295, %v13160_v33  ;;  %vm13196_vm7 = vsmask.f32 4352 }
  0xaf   : > { %v2158_v35 = vrot.slane %v2156_v58, 3  ;;  %v2161_v36 = vrot.slane %v2159_v59, 4  ;;  %v9221_v58 = vld [vmem:[#allocation5 + $0x168] sm:$0xff]   ;;  %13162 = vst [vmem:[#allocation27_spill] sm:$0xff] %v13161_v33  ;;  %vm1248_vm4 = vmpackc.low %vm10084_vm2, %vm10084_vm2  ;;  %v13192_v33 = vmov 0 }
  0xb0   : > { %2789 = vmatpush1.bf16.msra.mxu0 %v9201_v5  ;;  %v10036_v5 = vsel %vm12940_vm1, %v2117_v16, %v2144_v52  ;;  %v2192_v16 = vshrl.u32 %v1793_v1, 16  ;;  %v1810_v1 = vshrl.u32 %v10021_v47, 16 }
  0xb1   : > { %8597 = vmatprep.subr.bf16.mxu0 %v9205_v11  ;;  %13150 = vst [vmem:[#allocation23_spill] sm:$0xff] %v10036_v5 }
  0xb3   : > { %2791 = vmatmul.mubr.bf16.vlgmr.msra.gmra.mrb[0].mxu0 %v9993_v25 }
  0xb4   : > { %8598 = vmatpush3.bf16.msra.mxu0 %v9205_v11  ;;  %2798 = vmatprep.mubr.bf16.mxu0 %v10006_v10  ;;  %v2167_v11 = vrot.slane %v2165_v54, 3  ;;  %v1804_v54 = vor.u32 %v1802_v27, %v1800_v23  ;;  %v2188_v23 = vrot.slane %v2186_v41, 4  ;;  %v2213_v27 = vshll.u32 %v1405_v39, 16 }
  0xb5   : > { %8599 = vmatprep.subr.bf16.mxu0 %v9208_v34  ;;  %v1818_v41 = vshrl.u32 %v10046_v21, 16 }
  0xb6   : > { %v1809_v20 = vsel %vm12938_vm0, %v1804_v54, %v1808_v55  ;;  %v2215_v56 = vrot.slane %v2213_v27, 4 }
  0xb7   : > { %v2249_v54 = vshll.u32 %v1809_v20, 16 }
  0xb8   : > { %8600 = vmatpush3.bf16.msra.mxu0 %v9208_v34  ;;  %v2171_v34 = vor.u32 %v2170_v15, %v2167_v11  ;;  %v2162_v11 = vor.u32 %v2161_v36, %v2158_v35  ;;  %v2185_v15 = vrot.slane %v2183_v40, 3  ;;  %v1812_v35 = vor.u32 %v1810_v1, %v1808_v55 }
  0xb9   : > { %8601 = vmatprep.subr.bf16.mxu0 %v9211_v46  ;;  %v1816_v36 = vrot.slane %v1814_v4, 1  ;;  %v2221_v40 = vrot.slane %v2219_v7, 3  ;;  %v1290_v1 = vsel %vm1248_vm4, 65537, %v12929_v0  ;;  %v10111_v4 = vld [vmem:[%s9811_s12 + $0x5c] sm:$0xff]   ;;  %v580_v7 = vadd.s32 8, %v539_v37 }
  0xba   : > { %v10073_v59 = vsel %vm12940_vm1, %v2144_v52, %v2171_v34  ;;  %v2210_v52 = vshrl.u32 %v1405_v39, 16  ;;  %v10098_v22 = vsel %vm12940_vm1, %v10042_v18, %v2162_v11  ;;  %v744_v39 = vand.u32 15, %v578_v28 }
  0xbb   : > { %2799 = vmatmul.mubr.bf16.gmra.mrb[4].mxu0 %v10025_v60  ;;  %13157 = vst [vmem:[#allocation26_spill] sm:$0xff] %v10073_v59  ;;  %13163 = vst [vmem:[#allocation28_spill] sm:$0xff] %v10098_v22  ;;  %v1817_v18 = vsel %vm12938_vm0, %v1812_v35, %v1816_v36  ;;  %v1820_v28 = vor.u32 %v1818_v41, %v1816_v36  ;;  %v7765_v0 = vcombine.low %v1290_v1, %v9888_v53 }
  0xbc   : > { %2806 = vmatprep.mubr.bf16.mxu0 %v10036_v5  ;;  %8602 = vmatpush3.bf16.msra.mxu0 %v9211_v46  ;;  %v2194_v46 = vrot.slane %v2192_v16, 3  ;;  %v2273_v35 = vshrl.u32 %v1817_v18, 16  ;;  %vm10117_vm6 = vcmp.ne.s32.totalorder %v744_v39, 15  ;;  %v2276_v36 = vshll.u32 %v1817_v18, 16 }
  0xbd   : > { %8603 = vmatprep.subr.bf16.mxu0 %v9214_v17  ;;  %vm1250_vm8 = vmpackc.low %vm10117_vm6, %vm10117_vm6  ;;  %vm10134_vm12 = vcmp.ne.s16.totalorder %v7765_v0, 0  ;;  %v1826_v18 = vshrl.u32 %v10070_v57, 16 }
  0xbe   : > { %v2198_v24 = vor.u32 %v2197_v61, %v2194_v46  ;;  %v1822_v46 = vshll.u32 %v10070_v57, 16  ;;  %v1406_v61 = vsel %vm10088_vm3, %v10002_v29, 0  ;;  %v2275_v39 = vrot.slane %v2273_v35, 3 }
  0xbf   : > { %v2237_v16 = vshrl.u32 %v1406_v61, 16  ;;  %v2240_v27 = vshll.u32 %v1406_v61, 16  ;;  %v2278_v0 = vrot.slane %v2276_v36, 4  ;;  %v545_v36 = vadd.s32 224, %v9825_v6 }
  0xc0   : > { %8604 = vmatpush3.bf16.msra.mxu0 %v9214_v17  ;;  %v2222_v17 = vshll.u32 %v1801_v50, 16  ;;  %v2246_v50 = vshrl.u32 %v1809_v20, 16  ;;  %v10103_v55 = vsel %vm12940_vm1, %v2171_v34, %v2198_v24  ;;  %v2189_v34 = vor.u32 %v2188_v23, %v2185_v15 }
  0xc1   : > { %8605 = vmatprep.subr.bf16.mxu0 %v9218_v38  ;;  %13164 = vst [vmem:[#allocation29_spill] sm:$0xff] %v10103_v55  ;;  %v2251_v20 = vrot.slane %v2249_v54, 4  ;;  %v1824_v3 = vrot.slane %v1822_v46, 1  ;;  %v758_v15 = vand.u32 15, %v580_v7  ;;  %v10132_v46 = vld [vmem:[%s9811_s12 + $0x64] sm:$0xff]   ;;  %v2242_v61 = vrot.slane %v2240_v27, 4 }
  0xc2   : > { %v2224_v44 = vrot.slane %v2222_v17, 4 }
  0xc3   : > { %2807 = vmatmul.mubr.bf16.gmra.mrb[8].mxu0 %v10065_v42  ;;  %v1825_v41 = vsel %vm12938_vm0, %v1820_v28, %v1824_v3  ;;  %vm10142_vm13 = vcmp.ne.s32.totalorder %v758_v15, 15  ;;  %v1828_v15 = vor.u32 %v1826_v18, %v1824_v3  ;;  %v10176_v18 = vld [vmem:[%s9811_s12 + $0x74] sm:$0xff]  }
  0xc4   : > { %2814 = vmatprep.mubr.bf16.mxu0 %v10073_v59  ;;  %8606 = vmatpush3.bf16.msra.mxu0 %v9218_v38  ;;  %v2212_v38 = vrot.slane %v2210_v52, 3  ;;  %v2225_v17 = vor.u32 %v2224_v44, %v2221_v40  ;;  %v2248_v52 = vrot.slane %v2246_v50, 3  ;;  %v10122_v40 = vsel %vm12940_vm1, %v2162_v11, %v2189_v34  ;;  %vm1252_vm2 = vmpackc.low %vm10142_vm13, %vm10142_vm13 }
  0xc5   : > { %8607 = vmatprep.subr.bf16.mxu0 %v9221_v58  ;;  %13167 = vst [vmem:[#allocation30_spill] sm:$0xff] %v10122_v40  ;;  %v13169_v11 = vmov 0  ;;  %v1854_v12 = vshll.u32 %v10176_v18, 16 }
  0xc6   : > { %v10125_v44 = vsel %vm12940_vm1, %v2198_v24, %v2225_v17  ;;  %v2216_v50 = vor.u32 %v2215_v56, %v2212_v38  ;;  %v2252_v54 = vor.u32 %v2251_v20, %v2248_v52  ;;  %v13170_v11 = vsel %vm10134_vm12, 4294967295, %v13169_v11  ;;  %v10149_v52 = vld [vmem:[%s9811_s12 + $0x6c] sm:$0xff]  }
  0xc7   : > { %13168 = vst [vmem:[#allocation31_spill] sm:$0xff] %v10125_v44  ;;  %13171 = vst [vmem:[#allocation32_spill] sm:$0xff] %v13170_v11  ;;  %v1830_v24 = vshll.u32 %v10111_v4, 16  ;;  %v543_v38 = vadd.s32 208, %v9825_v6  ;;  %v13172_v56 = vmov 0   ;;  %v1407_v20 = vsel %vm10134_vm12, %v10021_v47, 0 }
  0xc8   : > { %8608 = vmatpush3.bf16.msra.mxu0 %v9221_v58  ;;  %v541_v58 = vadd.s32 192, %v9825_v6  ;;  %v2264_v1 = vshrl.u32 %v1407_v20, 16  ;;  %v1294_v3 = vsel %vm1252_vm2, 65537, %v13172_v56 }
  0xc9   : > { %8609 = vmatprep.subr.bf16.mxu0 %v9224_v32  ;;  %v1832_v28 = vrot.slane %v1830_v24, 1  ;;  %v584_v35 = vadd.s32 8, %v543_v38  ;;  %v1838_v24 = vshll.u32 %v10132_v46, 16  ;;  %v2279_v38 = vor.u32 %v2278_v0, %v2275_v39 }
  0xca   : > { %v582_v23 = vadd.s32 8, %v541_v58  ;;  %v1292_v58 = vsel %vm1250_vm8, 65537, %v13172_v56  ;;  %v586_v0 = vadd.s32 8, %v545_v36 }
  0xcb   : > { %2815 = vmatmul.mubr.bf16.gmra.mrb[12].mxu0 %v10098_v22  ;;  %v7766_v37 = vcombine.low %v1292_v58, %v9888_v53  ;;  %v1833_v39 = vsel %vm12938_vm0, %v1828_v15, %v1832_v28  ;;  %v10197_v30 = vsel %vm12940_vm1, %v2252_v54, %v2279_v38 }
  0xcc   : > { %2822 = vmatprep.mubr.bf16.mxu0 %v10103_v55  ;;  %8610 = vmatpush3.bf16.msra.mxu0 %v9224_v32  ;;  %v2239_v32 = vrot.slane %v2237_v16, 3  ;;  %v772_v7 = vand.u32 15, %v582_v23  ;;  %v2303_v16 = vshll.u32 %v1825_v41, 16  ;;  %v1842_v23 = vshrl.u32 %v10132_v46, 16  ;;  %13183 = vst [vmem:[#allocation37_spill] sm:$0xff] %v10197_v30 }
  0xcd   : > { %8611 = vmatprep.subr.bf16.mxu0 %v9227_v62  ;;  %vm10185_vm8 = vcmp.ne.s16.totalorder %v7766_v37, 0  ;;  %v1846_v37 = vshll.u32 %v10149_v52, 16 }
  0xce   : > { %v10155_v27 = vor.u32 %v2242_v61, %v2239_v32  ;;  %vm10161_vm4 = vcmp.ne.s32.totalorder %v772_v7, 15  ;;  %v10170_v32 = vsel %vm12940_vm1, %v2225_v17, %v2252_v54  ;;  %v1834_v61 = vshrl.u32 %v10111_v4, 16 }
  0xcf   : > { %13178 = vst [vmem:[#allocation34_spill] sm:$0xff] %v10170_v32  ;;  %v2267_v7 = vshll.u32 %v1407_v20, 16  ;;  %v2305_v26 = vrot.slane %v2303_v16, 4  ;;  %vm1254_vm6 = vmpackc.low %vm10161_vm4, %vm10161_vm4  ;;  %v13181_v13 = vsel %vm10185_vm8, 4294967295, %v13180_v13  ;;  %v1840_v16 = vrot.slane %v1838_v24, 1 }
  0xd0   : > { %8612 = vmatpush3.bf16.msra.mxu0 %v9227_v62  ;;  %v2300_v62 = vshrl.u32 %v1825_v41, 16  ;;  %v10167_v41 = vsel %vm12940_vm1, %v2189_v34, %v2216_v50  ;;  %v786_v34 = vand.u32 15, %v584_v35  ;;  %v10183_v17 = vsel %vm12940_vm1, %v2216_v50, %v10155_v27  ;;  %13182 = vst [vmem:[#allocation36_spill] sm:$0xff] %v13181_v13 }
  0xd1   : > { %3306 = vmatprep.subr.bf16.mxu0 %v13172_v56  ;;  %13177 = vst [vmem:[#allocation33_spill] sm:$0xff] %v10167_v41  ;;  %13179 = vst [vmem:[#allocation35_spill] sm:$0xff] %v10183_v17  ;;  %v1836_v20 = vor.u32 %v1834_v61, %v1832_v28  ;;  %v2266_v35 = vrot.slane %v2264_v1, 3  ;;  %v1296_v50 = vsel %vm1254_vm6, 65537, %v13172_v56  ;;  %v2269_v15 = vrot.slane %v2267_v7, 4 }
  0xd2   : > { %v2302_v58 = vrot.slane %v2300_v62, 3  ;;  %v7767_v62 = vcombine.low %v1294_v3, %v9888_v53  ;;  %vm10201_vm13 = vcmp.ne.s32.totalorder %v786_v34, 15  ;;  %v1408_v28 = vsel %vm10185_vm8, %v10046_v21, 0 }
  0xd3   : > { %2823 = vmatmul.mubr.bf16.gmra.mrb[16].mxu0 %v10122_v40  ;;  %v2327_v61 = vshrl.u32 %v1833_v39, 16  ;;  %v2330_v24 = vshll.u32 %v1833_v39, 16  ;;  %v800_v1 = vand.u32 15, %v586_v0  ;;  %v1841_v54 = vsel %vm12938_vm0, %v1836_v20, %v1840_v16  ;;  %vm1256_vm4 = vmpackc.low %vm10201_vm13, %vm10201_vm13  ;;  %v10220_v39 = vld [vmem:[%s9811_s12 + $0x7c] sm:$0xff]  }
  0xd4   : > { %2830 = vmatprep.mubr.bf16.mxu0 %v10125_v44  ;;  %v10199_v36 = vor.u32 %v2305_v26, %v2302_v58  ;;  %vm10208_vm2 = vcmp.ne.s16.totalorder %v7767_v62, 0  ;;  %v7768_v26 = vcombine.low %v1296_v50, %v9888_v53  ;;  %v1844_v7 = vor.u32 %v1842_v23, %v1840_v16 }
  0xd5   : > { %v13187_v14 = vsel %vm10208_vm2, 4294967295, %v13186_v14  ;;  %v1848_v58 = vrot.slane %v1846_v37, 1  ;;  %v1850_v34 = vshrl.u32 %v10149_v52, 16  ;;  %v547_v0 = vadd.s32 240, %v9825_v6 }
  0xd6   : > { %13188 = vst [vmem:[#allocation38_spill] sm:$0xff] %v13187_v14  ;;  %v10223_v62 = vor.u32 %v2269_v15, %v2266_v35  ;;  %v10227_v20 = vsel %vm12940_vm1, %v2279_v38, %v10199_v36  ;;  %v2291_v16 = vshrl.u32 %v1408_v28, 16  ;;  %v2294_v23 = vshll.u32 %v1408_v28, 16 }
  0xd7   : > { %13189 = vst [vmem:[#allocation39_spill] sm:$0xff] %v10227_v20  ;;  %v2329_v50 = vrot.slane %v2327_v61, 3  ;;  %v2332_v37 = vrot.slane %v2330_v24, 4  ;;  %v1409_v13 = vsel %vm10208_vm2, %v10070_v57, 0  ;;  %vm10232_vm6 = vcmp.ne.s32.totalorder %v800_v1, 15 }
  0xd8   : > { %v2354_v35 = vshrl.u32 %v1841_v54, 16  ;;  %v2357_v15 = vshll.u32 %v1841_v54, 16  ;;  %vm10237_vm0 = vcmp.ne.s16.totalorder %v7768_v26, 0  ;;  %v1298_v38 = vsel %vm1256_vm4, 65537, %v13172_v56  ;;  %vm1258_vm9 = vmpackc.low %vm10232_vm6, %vm10232_vm6 }
  0xd9   : > { %v13193_v33 = vsel %vm10237_vm0, 4294967295, %v13192_v33  ;;  %vm13195_vm1 = vsmask.f32 7424  ;;  %v1852_v61 = vor.u32 %v1850_v34, %v1848_v58  ;;  %v1856_v24 = vrot.slane %v1854_v12, 1 }
  0xda   : > { %13194 = vst [vmem:[#allocation40_spill] sm:$0xff] %v13193_v33  ;;  %v1849_v28 = vsel %vm13195_vm1, %v1844_v7, %v1848_v58  ;;  %v588_v1 = vadd.s32 8, %v547_v0  ;;  %v2293_v14 = vrot.slane %v2291_v16, 3  ;;  %v2296_v54 = vrot.slane %v2294_v23, 4 }
  0xdb   : > { %2831 = vmatmul.mubr.bf16.gmra.mrb[20].mxu0 %v10167_v41  ;;  %v2318_v26 = vshrl.u32 %v1409_v13, 16  ;;  %v10255_v3 = vsel %vm13196_vm7, %v10155_v27, %v10223_v62  ;;  %v1410_v45 = vsel %vm10237_vm0, %v10111_v4, 0  ;;  %v7769_v7 = vcombine.low %v1298_v38, %v9888_v53 }
  0xdc   : > { %2838 = vmatprep.mubr.bf16.mxu0 %v10170_v32  ;;  %13197 = vst [vmem:[#allocation41_spill] sm:$0xff] %v10255_v3  ;;  %v549_v12 = vadd.s32 256, %v9825_v6  ;;  %v2321_v58 = vshll.u32 %v1409_v13, 16  ;;  %v2356_v34 = vrot.slane %v2354_v35, 3  ;;  %v2359_v0 = vrot.slane %v2357_v15, 4 }
  0xdd   : > { %v2381_v16 = vshrl.u32 %v1849_v28, 16  ;;  %v2384_v11 = vshll.u32 %v1849_v28, 16  ;;  %v1857_v23 = vsel %vm13195_vm1, %v1852_v61, %v1856_v24  ;;  %v814_v27 = vand.u32 15, %v588_v1  ;;  %v10273_v1 = vld [vmem:[%s9811_s12 + $0x84] sm:$0xff]  }
  0xde   : > { %v2348_v32 = vshll.u32 %v1410_v45, 16  ;;  %v1858_v33 = vshrl.u32 %v10176_v18, 16  ;;  %v1862_v41 = vshll.u32 %v10220_v39, 16  ;;  %v2297_v38 = vor.u32 %v2296_v54, %v2293_v14 }
  0xdf   : > { %v2333_v44 = vor.u32 %v2332_v37, %v2329_v50  ;;  %vm10266_vm7 = vcmp.ne.s16.totalorder %v7769_v7, 0  ;;  %v13198_v13 = vmov 0  ;;  %v590_v35 = vadd.s32 8, %v549_v12 }
  0xe0   : > { %v13199_v13 = vsel %vm10266_vm7, 4294967295, %v13198_v13  ;;  %v2320_v15 = vrot.slane %v2318_v26, 3  ;;  %v2323_v28 = vrot.slane %v2321_v58, 4  ;;  %v2383_v14 = vrot.slane %v2381_v16, 3 }
  0xe1   : > { %13200 = vst [vmem:[#allocation42_spill] sm:$0xff] %v13199_v13  ;;  %v2386_v50 = vrot.slane %v2384_v11, 4  ;;  %v2408_v37 = vshrl.u32 %v1857_v23, 16  ;;  %v1411_v26 = vsel %vm10266_vm7, %v10132_v46, 0  ;;  %v2411_v7 = vshll.u32 %v1857_v23, 16  ;;  %v10289_v11 = vld [vmem:[%s9811_s12 + $0x8c] sm:$0xff]  }
  0xe2   : > { %v1864_v12 = vrot.slane %v1862_v41, 1  ;;  %vm13203_vm13 = vsmask.f32 4352  ;;  %v828_v16 = vand.u32 15, %v590_v35  ;;  %v13207_v40 = vmov 0 }
  0xe3   : > { %2839 = vmatmul.mubr.bf16.gmra.mrb[24].mxu0 %v10183_v17  ;;  %v2345_v17 = vshrl.u32 %v1410_v45, 16  ;;  %v551_v45 = vadd.s32 272, %v9825_v6  ;;  %v10286_v58 = vsel %vm13203_vm13, %v10199_v36, %v2333_v44  ;;  %vm13205_vm4 = vmmov %vm13203_vm13  ;;  %v2324_v41 = vor.u32 %v2323_v28, %v2320_v15 }
  0xe4   : > { %2846 = vmatprep.mubr.bf16.mxu0 %v10197_v30  ;;  %v1300_v30 = vsel %vm1258_vm9, 65537, %v13172_v56  ;;  %vm10277_vm9 = vcmp.ne.s32.totalorder %v814_v27, 15  ;;  %13204 = vst [vmem:[#allocation43_spill] sm:$0xff] %v10286_v58  ;;  %v10293_v27 = vsel %vm13205_vm4, %v10223_v62, %v2297_v38  ;;  %v2360_v36 = vor.u32 %v2359_v0, %v2356_v34 }
  0xe5   : > { %v7770_v61 = vcombine.low %v1300_v30, %v9888_v53  ;;  %v1860_v30 = vor.u32 %v1858_v33, %v1856_v24  ;;  %13206 = vst [vmem:[#allocation44_spill] sm:$0xff] %v10293_v27  ;;  %vm1260_vm1 = vmpackc.low %vm10277_vm9, %vm10277_vm9  ;;  %v592_v33 = vadd.s32 8, %v551_v45  ;;  %v2387_v24 = vor.u32 %v2386_v50, %v2383_v14 }
  0xe6   : > { %v2410_v23 = vrot.slane %v2408_v37, 3  ;;  %v2413_v35 = vrot.slane %v2411_v7, 4  ;;  %vm13210_vm13 = vsmask.f32 7424  ;;  %vm10307_vm4 = vcmp.ne.s32.totalorder %v828_v16, 15 }
  0xe7   : > { %vm10295_vm6 = vcmp.ne.s16.totalorder %v7770_v61, 0  ;;  %v1865_v13 = vsel %vm13210_vm13, %v1860_v30, %v1864_v12  ;;  %v1302_v61 = vsel %vm1260_vm1, 65537, %v13172_v56  ;;  %v1866_v0 = vshrl.u32 %v10220_v39, 16  ;;  %vm1262_vm9 = vmpackc.low %vm10307_vm4, %vm10307_vm4 }
  0xe8   : > { %v13208_v40 = vsel %vm10295_vm6, 4294967295, %v13207_v40  ;;  %v1412_v62 = vsel %vm10295_vm6, %v10149_v52, 0  ;;  %v1870_v15 = vshll.u32 %v10273_v1, 16  ;;  %v842_v28 = vand.u32 15, %v592_v33 }
  0xe9   : > { %13209 = vst [vmem:[#allocation45_spill] sm:$0xff] %v13208_v40  ;;  %v2435_v50 = vshrl.u32 %v1865_v13, 16  ;;  %v2438_v37 = vshll.u32 %v1865_v13, 16  ;;  %v2402_v7 = vshll.u32 %v1412_v62, 16  ;;  %v7771_v30 = vcombine.low %v1302_v61, %v9888_v53 }
  0xea   : > { %vm13213_vm1 = vsmask.f32 4352  ;;  %v1874_v16 = vshrl.u32 %v10273_v1, 16  ;;  %v1878_v33 = vshll.u32 %v10289_v11, 16  ;;  %vm10328_vm6 = vcmp.ne.s32.totalorder %v842_v28, 15 }
  0xeb   : > { %2847 = vmatmul.mubr.bf16.gmra.mrb[28].mxu0 %v10255_v3  ;;  %v2347_v3 = vrot.slane %v2345_v17, 3  ;;  %v2372_v17 = vshrl.u32 %v1411_v26, 16  ;;  %vm13215_vm13 = vmmov %vm13213_vm1  ;;  %v1304_v40 = vsel %vm1262_vm9, 65537, %v13172_v56  ;;  %v2440_v28 = vrot.slane %v2438_v37, 4 }
  0xec   : > { %2854 = vmatprep.mubr.bf16.mxu0 %v10227_v20  ;;  %v2350_v20 = vrot.slane %v2348_v32, 4  ;;  %v2375_v32 = vshll.u32 %v1411_v26, 16  ;;  %v2399_v26 = vshrl.u32 %v1412_v62, 16  ;;  %v10326_v13 = vsel %vm13215_vm13, %v2297_v38, %v2324_v41  ;;  %vm13219_vm7 = vmmov %vm13213_vm1 }
  0xed   : > { %v2374_v45 = vrot.slane %v2372_v17, 3  ;;  %13216 = vst [vmem:[#allocation47_spill] sm:$0xff] %v10326_v13  ;;  %v1868_v17 = vor.u32 %v1866_v0, %v1864_v12  ;;  %vm13221_vm4 = vmmov %vm13213_vm1  ;;  %v2437_v38 = vrot.slane %v2435_v50, 3  ;;  %v13223_v12 = vmov 0 }
  0xee   : > { %v2351_v34 = vor.u32 %v2350_v20, %v2347_v3  ;;  %v2377_v14 = vrot.slane %v2375_v32, 4  ;;  %v553_v20 = vadd.s32 288, %v9825_v6  ;;  %v10321_v3 = vsel %vm13213_vm1, %v2333_v44, %v2360_v36  ;;  %vm13227_vm13 = vmmov %vm13221_vm4 }
  0xef   : > { %13214 = vst [vmem:[#allocation46_spill] sm:$0xff] %v10321_v3  ;;  %v1872_v32 = vrot.slane %v1870_v15, 1  ;;  %v10336_v54 = vsel %vm13221_vm4, %v2360_v36, %v2387_v24  ;;  %v2414_v44 = vor.u32 %v2413_v35, %v2410_v23  ;;  %vm10344_vm1 = vcmp.ne.s16.totalorder %v7771_v30, 0 }
  0xf0   : > { %v10333_v61 = vsel %vm13219_vm7, %v2324_v41, %v2351_v34  ;;  %13222 = vst [vmem:[#allocation49_spill] sm:$0xff] %v10336_v54  ;;  %v13224_v12 = vsel %vm10344_vm1, 4294967295, %v13223_v12  ;;  %v594_v0 = vadd.s32 8, %v553_v20  ;;  %v2401_v15 = vrot.slane %v2399_v26, 3  ;;  %vm1264_vm7 = vmpackc.low %vm10328_vm6, %vm10328_vm6 }
  0xf1   : > { %13220 = vst [vmem:[#allocation48_spill] sm:$0xff] %v10333_v61  ;;  %13225 = vst [vmem:[#allocation50_spill] sm:$0xff] %v13224_v12  ;;  %v1876_v41 = vor.u32 %v1874_v16, %v1872_v32  ;;  %v1880_v55 = vrot.slane %v1878_v33, 1  ;;  %v2404_v36 = vrot.slane %v2402_v7, 4  ;;  %vm13226_vm9 = vsmask.f32 7424 }
  0xf2   : > { %v1873_v23 = vsel %vm13226_vm9, %v1868_v17, %v1872_v32  ;;  %v7772_v35 = vcombine.low %v1304_v40, %v9888_v53  ;;  %v1413_v50 = vsel %vm10344_vm1, %v10176_v18, 0  ;;  %v520_v26 = vadd.s32 24, %v9825_v6  ;;  %vm13229_vm6 = vmmov %vm13221_vm4 }
  0xf3   : > { %2855 = vmatmul.mubr.bf16.gmra.mrb[32].mxu0 %v10293_v27  ;;  %v10342_v27 = vor.u32 %v2377_v14, %v2374_v45  ;;  %v1882_v45 = vshrl.u32 %v10289_v11, 16  ;;  %v10357_v14 = vsel %vm13227_vm13, %v2387_v24, %v2414_v44  ;;  %v1306_v40 = vsel %vm1264_vm7, 65537, %v13172_v56  ;;  %vm13231_vm4 = vmmov %vm13226_vm9 }
  0xf4   : > { %2862 = vmatprep.mubr.bf16.mxu0 %v10286_v58  ;;  %v10340_v58 = vld [vmem:[%s9811_s12 + $0x94] sm:$0xff]   ;;  %13228 = vst [vmem:[#allocation51_spill] sm:$0xff] %v10357_v14  ;;  %v856_v30 = vand.u32 15, %v594_v0  ;;  %v522_v20 = vadd.s32 40, %v9825_v6  ;;  %v10370_v16 = vor.u32 %v2440_v28, %v2437_v38  ;;  %v2462_v24 = vshrl.u32 %v1873_v23, 16  ;;  %vm13238_vm13 = vmmov %vm13229_vm6 }
  0xf5   : > { %v1991_v37 = vshll.u32 %v10340_v58, 16  ;;  %v10366_v7 = vsel %vm13229_vm6, %v2351_v34, %v10342_v27  ;;  %v2465_v33 = vshll.u32 %v1873_v23, 16  ;;  %v1881_v17 = vsel %vm13231_vm4, %v1876_v41, %v1880_v55 }
  0xf6   : > { %13230 = vst [vmem:[#allocation52_spill] sm:$0xff] %v10366_v7  ;;  %v10373_v32 = vor.u32 %v2404_v36, %v2401_v15  ;;  %v2426_v62 = vshrl.u32 %v1413_v50, 16  ;;  %vm10375_vm9 = vcmp.ne.s16.totalorder %v7772_v35, 0  ;;  %v13232_v12 = vmov 0 }
  0xf7   : > { %v13233_v12 = vsel %vm10375_vm9, 4294967295, %v13232_v12  ;;  %v10379_v34 = vor.u32 %v1882_v45, %v1880_v55  ;;  %v1993_v0 = vrot.slane %v1991_v37, 1  ;;  %v561_v38 = vadd.s32 8, %v520_v26 }
  0xf8   : > { %13234 = vst [vmem:[#allocation53_spill] sm:$0xff] %v13233_v12  ;;  %v2429_v28 = vshll.u32 %v1413_v50, 16  ;;  %v2489_v22 = vshrl.u32 %v1881_v17, 16  ;;  %vm10383_vm7 = vcmp.ne.s32.totalorder %v856_v30, 15  ;;  %v563_v15 = vadd.s32 8, %v522_v20 }
  0xf9   : > { %13235 = vst [vmem:[#allocation54_spill] sm:$0xff] %v10379_v34  ;;  %v10389_v41 = vsel %vm13238_vm13, %v2414_v44, %v10370_v16  ;;  %v2464_v36 = vrot.slane %v2462_v24, 3  ;;  %v1995_v55 = vshrl.u32 %v10340_v58, 16  ;;  %v555_v35 = vadd.s32 304, %v9825_v6  ;;  %vm1266_vm13 = vmpackc.low %vm10383_vm7, %vm10383_vm7 }
  0xfa   : > { %13239 = vst [vmem:[#allocation55_spill] sm:$0xff] %v10389_v41  ;;  %v2428_v45 = vrot.slane %v2426_v62, 3  ;;  %v2467_v37 = vrot.slane %v2465_v33, 4  ;;  %v1414_v50 = vsel %vm10375_vm9, %v10220_v39, 0  ;;  %v2492_v26 = vshll.u32 %v1881_v17, 16 }
  0xfb   : > { %2863 = vmatmul.mubr.bf16.gmra.mrb[36].mxu0 %v10326_v13  ;;  %v524_v13 = vadd.s32 56, %v9825_v6  ;;  %v1994_v44 = vsel %vm13231_vm4, %v10379_v34, %v1993_v0  ;;  %v625_v20 = vand.u32 15, %v561_v38  ;;  %v2431_v24 = vrot.slane %v2429_v28, 4 }
  0xfc   : > { %2870 = vmatprep.mubr.bf16.mxu0 %v10321_v3  ;;  %v7773_v3 = vcombine.low %v1306_v40, %v9888_v53  ;;  %v13240_v40 = vmov 0  ;;  %v10407_v33 = vrot.slane %v2489_v22, 3  ;;  %v639_v62 = vand.u32 15, %v563_v15 }
  0xfd   : > { %v565_v30 = vadd.s32 8, %v524_v13  ;;  %v534_v17 = vadd.s32 136, %v9825_v6  ;;  %v2453_v12 = vshrl.u32 %v1414_v50, 16  ;;  %v2516_v23 = vshrl.u32 %v1994_v44, 16 }
  0xfe   : > { %vm10398_vm6 = vcmp.ne.s16.totalorder %v7773_v3, 0  ;;  %v2456_v3 = vshll.u32 %v1414_v50, 16  ;;  %v2519_v59 = vshll.u32 %v1994_v44, 16  ;;  %v1308_v13 = vsel %vm1266_vm13, 65537, %v13172_v56 }
  0xff   : > { %v13241_v40 = vsel %vm10398_vm6, 4294967295, %v13240_v40  ;;  %v1415_v34 = vsel %vm10398_vm6, %v10273_v1, 0  ;;  %v653_v38 = vand.u32 15, %v565_v30  ;;  %vm10416_vm7 = vcmp.ne.s32.totalorder %v625_v20, 0 }
 0x100   : > { %13242 = vst [vmem:[#allocation56_spill] sm:$0xff] %v13241_v40  ;;  %v526_v28 = vadd.s32 72, %v9825_v6  ;;  %v536_v15 = vadd.s32 152, %v9825_v6  ;;  %vm13246_vm4 = vsmask.f32 4352  ;;  %vm10429_vm6 = vcmp.ne.s32.totalorder %v639_v62, 0  ;;  %vm13259_vm15 = vmpackc.low %vm10416_vm7, %vm10416_vm7 }
 0x101   : > { %v575_v50 = vadd.s32 8, %v534_v17  ;;  %v10433_v44 = vor.u32 %v2431_v24, %v2428_v45  ;;  %v10435_v30 = vrot.slane %v2453_v12, 3  ;;  %v10437_v20 = vrot.slane %v2492_v26, 4  ;;  %vm1550_vm9 = vmpackc.low %vm10429_vm6, %vm10429_vm6 }
 0x102   : > { %v2458_v42 = vrot.slane %v2456_v3, 4  ;;  %v2480_v45 = vshrl.u32 %v1415_v34, 16  ;;  %v10454_v24 = vrot.slane %v2516_v23, 3  ;;  %v10456_v62 = vrot.slane %v2519_v59, 4 }
 0x103   : > { %2871 = vmatmul.mubr.bf16.gmra.mrb[40].mxu0 %v10333_v61  ;;  %v596_v61 = vadd.s32 8, %v555_v35  ;;  %v567_v17 = vadd.s32 8, %v526_v28  ;;  %v13256_v12 = vmov 0  ;;  %v1590_v59 = vsel %vm13259_vm15, 65537, %v13172_v56 }
 0x104   : > { %2878 = vmatprep.mubr.bf16.mxu0 %v10336_v54  ;;  %v10410_v54 = vor.u32 %v1995_v55, %v1993_v0  ;;  %v10425_v0 = vsel %vm13246_vm4, %v10342_v27, %v10373_v32  ;;  %v10427_v55 = vor.u32 %v2467_v37, %v2464_v36  ;;  %v7774_v27 = vcombine.low %v1308_v13, %v9888_v53 }
 0x105   : > { %13247 = vst [vmem:[#allocation58_spill] sm:$0xff] %v10425_v0  ;;  %v870_v40 = vand.u32 15, %v596_v61  ;;  %v723_v37 = vand.u32 15, %v575_v50  ;;  %vm10447_vm4 = vcmp.ne.s32.totalorder %v653_v38, 0  ;;  %v577_v61 = vadd.s32 8, %v536_v15 }
 0x106   : > { %13243 = vst [vmem:[#allocation57_spill] sm:$0xff] %v10410_v54  ;;  %v2483_v13 = vshll.u32 %v1415_v34, 16  ;;  %v528_v50 = vadd.s32 88, %v9825_v6  ;;  %vm10467_vm5 = vcmp.ne.s16.totalorder %v7774_v27, 0  ;;  %vm1552_vm6 = vmpackc.low %vm10447_vm4, %vm10447_vm4  ;;  %v1592_v34 = vsel %vm1550_vm9, 65537, %v13172_v56 }
 0x107   : > { %vm10458_vm13 = vcmp.ne.s32.totalorder %v723_v37, 0  ;;  %vm10462_vm1 = vcmp.ne.s32.totalorder %v870_v40, 15  ;;  %v737_v35 = vand.u32 15, %v577_v61  ;;  %v13257_v12 = vsel %vm10467_vm5, 4294967295, %v13256_v12 }
 0x108   : > { %13258 = vst [vmem:[#allocation59_spill] sm:$0xff] %v13257_v12  ;;  %v538_v40 = vadd.s32 168, %v9825_v6  ;;  %v10485_v23 = vsel %vm13260_vm11, %v10373_v32, %v10433_v44  ;;  %v10490_v28 = vsel %vm13262_vm10, %v10370_v16, %v10427_v55  ;;  %v10492_v15 = vrot.slane %v2480_v45, 3  ;;  %vm1562_vm15 = vmpackc.low %vm10458_vm13, %vm10458_vm13 }
 0x109   : > { %13261 = vst [vmem:[#allocation60_spill] sm:$0xff] %v10485_v23  ;;  %13263 = vst [vmem:[#allocation61_spill] sm:$0xff] %v10490_v28  ;;  %v530_v22 = vadd.s32 104, %v9825_v6  ;;  %v667_v27 = vand.u32 15, %v567_v17  ;;  %v1604_v32 = vsel %vm1562_vm15, 65537, %v13172_v56  ;;  %vm1438_vm11 = vcmp.ne.s32.totalorder %v737_v35, 0 }
 0x10a   : > { %vm1268_vm9 = vmpackc.low %vm10462_vm1, %vm10462_vm1  ;;  %v579_v37 = vadd.s32 8, %v538_v40  ;;  %v7778_v16 = vcombine.low %v9888_v53, %v1590_v59  ;;  %v7779_v45 = vcombine.low %v9888_v53, %v1592_v34  ;;  %v569_v61 = vadd.s32 8, %v528_v50 }
 0x10b   : > { %2879 = vmatmul.mubr.bf16.gmra.mrb[44].mxu0 %v10366_v7  ;;  %v7785_v36 = vcombine.low %v9888_v53, %v1604_v32  ;;  %vm1564_vm10 = vmpackc.low %vm1438_vm11, %vm1438_vm11  ;;  %v1594_v17 = vsel %vm1552_vm6, 65537, %v13172_v56  ;;  %v532_v3 = vadd.s32 120, %v9825_v6  ;;  %v10515_v50 = vrot.slane %v2483_v13, 4 }
 0x10c   : > { %2886 = vmatprep.mubr.bf16.mxu0 %v10357_v14  ;;  %v1606_v35 = vsel %vm1564_vm10, 65537, %v13172_v56  ;;  %v751_v59 = vand.u32 15, %v579_v37  ;;  %v10520_v34 = vsel %vm10467_vm5, %v10289_v11, 0  ;;  %v571_v40 = vadd.s32 8, %v530_v22 }
 0x10d   : > { %vm10522_vm7 = vcmp.ne.s16.totalorder %v7785_v36, 0  ;;  %v13264_v32 = vmov 0  ;;  %v1310_v26 = vsel %vm1268_vm9, 65537, %v13172_v56  ;;  %vm10532_vm13 = vcmp.ne.s32.totalorder %v667_v27, 0 }
 0x10e   : > { %v13265_v32 = vsel %vm10522_vm7, 4294967295, %v13264_v32  ;;  %v7786_v37 = vcombine.low %v9888_v53, %v1606_v35  ;;  %vm1440_vm4 = vcmp.ne.s32.totalorder %v751_v59, 0  ;;  %v7780_v22 = vcombine.low %v9888_v53, %v1594_v17  ;;  %vm13286_vm10 = vmpackc.low %vm10532_vm13, %vm10532_vm13 }
 0x10f   : > { %13266 = vst [vmem:[#allocation62_spill] sm:$0xff] %v13265_v32  ;;  %vm10538_vm6 = vcmp.ne.s16.totalorder %v7778_v16, 0  ;;  %v13269_v36 = vmov 0  ;;  %vm10542_vm15 = vcmp.ne.s16.totalorder %v7779_v45, 0  ;;  %v13272_v12 = vmov 0  ;;  %vm1566_vm1 = vmpackc.low %vm1440_vm4, %vm1440_vm4 }
 0x110   : > { %v13270_v36 = vsel %vm10538_vm6, 4294967295, %v13269_v36  ;;  %v13273_v12 = vsel %vm10542_vm15, 4294967295, %v13272_v12  ;;  %v681_v38 = vand.u32 15, %v569_v61  ;;  %v573_v27 = vadd.s32 8, %v532_v3 }
 0x111   : > { %13271 = vst [vmem:[#allocation63_spill] sm:$0xff] %v13270_v36  ;;  %13274 = vst [vmem:[#allocation64_spill] sm:$0xff] %v13273_v12  ;;  %vm10549_vm9 = vcmp.ne.s16.totalorder %v7786_v37, 0  ;;  %v13275_v35 = vmov 0  ;;  %v1608_v16 = vsel %vm1566_vm1, 65537, %v13172_v56  ;;  %v10555_v17 = vor.u32 %v2458_v42, %v10435_v30  ;;  %v9368_v37 = vld [vmem:[%s9811_s12 + $0x4] sm:$0xff]  }
 0x112   : > { %v13276_v35 = vsel %vm10549_vm9, 4294967295, %v13275_v35  ;;  %v695_v45 = vand.u32 15, %v571_v40  ;;  %v1722_v61 = vsel %vm10549_vm9, %v10021_v47, 0  ;;  %v2507_v3 = vshrl.u32 %v10520_v34, 16 }
 0x113   : > { %2887 = vmatmul.mubr.bf16.gmra.mrb[48].mxu0 %v10425_v0  ;;  %13277 = vst [vmem:[#allocation65_spill] sm:$0xff] %v13276_v35  ;;  %v7775_v59 = vcombine.low %v1310_v26, %v9888_v53  ;;  %v1714_v42 = vsel %vm10538_vm6, %v9368_v37, 0  ;;  %vm10569_vm4 = vcmp.ne.s32.totalorder %v681_v38, 0  ;;  %v1922_v32 = vrot.slane %v1722_v61, 1 }
 0x114   : > { %2894 = vmatprep.mubr.bf16.mxu0 %v10389_v41  ;;  %v1721_v41 = vsel %vm10522_vm7, %v10002_v29, 0  ;;  %v7787_v29 = vcombine.low %v9888_v53, %v1608_v16  ;;  %v13280_v47 = vmov 0  ;;  %vm10580_vm11 = vcmp.ne.s16.totalorder %v7780_v22, 0 }
 0x115   : > { %v10573_v40 = vrot.slane %v1721_v41, 1  ;;  %v13283_v26 = vmov 0  ;;  %v1715_v38 = vsel %vm10542_vm15, %v9829_v8, 0  ;;  %v1596_v41 = vsel %vm13286_vm10, 65537, %v13172_v56  ;;  %vm1556_vm10 = vmpackc.low %vm10569_vm4, %vm10569_vm4 }
 0x116   : > { %vm10575_vm1 = vcmp.ne.s16.totalorder %v7787_v29, 0  ;;  %v13284_v26 = vsel %vm10580_vm11, 4294967295, %v13283_v26  ;;  %vm10597_vm5 = vcmp.ne.s32.totalorder %v695_v45, 0  ;;  %v709_v61 = vand.u32 15, %v573_v27 }
 0x117   : > { %v13281_v47 = vsel %vm10575_vm1, 4294967295, %v13280_v47  ;;  %13285 = vst [vmem:[#allocation67_spill] sm:$0xff] %v13284_v26  ;;  %v1723_v16 = vsel %vm10575_vm1, %v10046_v21, 0  ;;  %vm13289_vm15 = vcmask 1046528   ;;  %vm13290_vm13 = vsmask.f32 4352 }
 0x118   : > { %13282 = vst [vmem:[#allocation66_spill] sm:$0xff] %v13281_v47  ;;  %v1923_v8 = vsel %vm13289_vm15, %v10573_v40, %v1922_v32  ;;  %v10603_v29 = vrot.slane %v1723_v16, 1  ;;  %v10608_v13 = vsel %vm13290_vm13, %v10433_v44, %v10555_v17  ;;  %v10612_v21 = vor.u32 %v10437_v20, %v10407_v33  ;;  %vm1558_vm13 = vmpackc.low %vm10597_vm5, %vm10597_vm5 }
 0x119   : > { %13291 = vst [vmem:[#allocation68_spill] sm:$0xff] %v10608_v13  ;;  %v2255_v45 = vshrl.u32 %v1923_v8, 16  ;;  %v2258_v27 = vshll.u32 %v1923_v8, 16  ;;  %vm10617_vm6 = vcmp.ne.s16.totalorder %v7775_v59, 0  ;;  %v1716_v16 = vsel %vm10580_vm11, %v9832_v9, 0 }
 0x11a   : > { %13292 = vst [vmem:[#allocation69_spill] sm:$0xff] %v10612_v21  ;;  %v7781_v44 = vcombine.low %v9888_v53, %v1596_v41  ;;  %v1925_v33 = vsel %vm13289_vm15, %v1922_v32, %v10603_v29  ;;  %v540_v59 = vadd.s32 184, %v9825_v6  ;;  %v10631_v12 = vrot.slane %v1714_v42, 1 }
 0x11b   : > { %2895 = vmatmul.mubr.bf16.gmra.mrb[52].mxu0 %v10485_v23  ;;  %v2257_v20 = vrot.slane %v2255_v45, 3  ;;  %v2260_v30 = vrot.slane %v2258_v27, 4  ;;  %v2282_v8 = vshrl.u32 %v1925_v33, 16  ;;  %v1908_v36 = vrot.slane %v1715_v38, 1 }
 0x11c   : > { %2902 = vmatprep.mubr.bf16.mxu0 %v10490_v28  ;;  %v1598_v26 = vsel %vm1556_vm10, 65537, %v13172_v56  ;;  %v2285_v9 = vshll.u32 %v1925_v33, 16  ;;  %vm13295_vm4 = vsmask.f32 4352  ;;  %v10641_v32 = vor.u32 %v10456_v62, %v10454_v24 }
 0x11d   : > { %v10637_v41 = vsel %vm13295_vm4, %v10427_v55, %v10612_v21  ;;  %vm10643_vm5 = vcmp.ne.s32.totalorder %v709_v61, 0  ;;  %v2284_v45 = vrot.slane %v2282_v8, 3  ;;  %v1910_v42 = vrot.slane %v1716_v16, 1 }
 0x11e   : > { %13296 = vst [vmem:[#allocation70_spill] sm:$0xff] %v10637_v41  ;;  %13297 = vst [vmem:[#allocation71_spill] sm:$0xff] %v10641_v32  ;;  %v1600_v38 = vsel %vm1558_vm13, 65537, %v13172_v56  ;;  %v10648_v27 = vor.u32 %v2260_v30, %v2257_v20  ;;  %v2287_v33 = vrot.slane %v2285_v9, 4  ;;  %v2510_v55 = vshll.u32 %v10520_v34, 16 }
 0x11f   : > { %vm10652_vm10 = vcmp.ne.s16.totalorder %v7781_v44, 0  ;;  %v13300_v47 = vmov 0  ;;  %v7782_v24 = vcombine.low %v9888_v53, %v1598_v26  ;;  %v581_v62 = vadd.s32 8, %v540_v59  ;;  %vm1560_vm15 = vmpackc.low %vm10643_vm5, %vm10643_vm5 }
 0x120   : > { %v13301_v47 = vsel %vm10652_vm10, 4294967295, %v13300_v47  ;;  %v2486_v61 = vor.u32 %v10515_v50, %v10492_v15  ;;  %v13303_v16 = vshrl.u32 %v10410_v54, 16  ;;  %v13304_v30 = vshll.u32 %v10410_v54, 16  ;;  %vm13305_vm13 = vmmov %vm13295_vm4 }
 0x121   : > { %13302 = vst [vmem:[#allocation72_spill] sm:$0xff] %v13301_v47  ;;  %v10667_v34 = vor.u32 %v2287_v33, %v2284_v45  ;;  %v10672_v26 = vsel %vm13305_vm13, %v10612_v21, %v10641_v32  ;;  %v1417_v15 = vsel %vm10617_vm6, %v10340_v58, 0  ;;  %vm13307_vm4 = vcmask 1046528   ;;  %vm13309_vm5 = vmmov %vm13305_vm13 }
 0x122   : > { %v2545_v20 = vrot.slane %v13303_v16, 3  ;;  %v2548_v8 = vrot.slane %v13304_v30, 4  ;;  %13306 = vst [vmem:[#allocation73_spill] sm:$0xff] %v10672_v26  ;;  %v1909_v50 = vsel %vm13307_vm4, %v10631_v12, %v1908_v36  ;;  %v7783_v44 = vcombine.low %v9888_v53, %v1600_v38  ;;  %vm13308_vm11 = vmmov %vm13307_vm4 }
 0x123   : > { %2903 = vmatmul.mubr.bf16.gmra.mrb[56].mxu0 %v10608_v13  ;;  %v2509_v59 = vrot.slane %v2507_v3, 3  ;;  %v1911_v9 = vsel %vm13308_vm11, %v1908_v36, %v1910_v42  ;;  %v1717_v22 = vsel %vm10652_vm10, %v9880_v51, 0  ;;  %v10687_v45 = vsel %vm13309_vm5, %v10648_v27, %v10667_v34  ;;  %vm13313_vm6 = vmmov %vm13309_vm5 }
 0x124   : > { %2910 = vmatprep.mubr.bf16.mxu0 %v10637_v41  ;;  %v2512_v33 = vrot.slane %v2510_v55, 4  ;;  %vm10689_vm13 = vcmp.ne.s16.totalorder %v7782_v24, 0  ;;  %v13310_v58 = vmov 0  ;;  %v1602_v37 = vsel %vm1560_vm15, 65537, %v13172_v56  ;;  %8729 = vmatprep.mubr.bf16.mxu1 %v10687_v45 }
 0x125   : > { %v13311_v58 = vsel %vm10689_vm13, 4294967295, %v13310_v58  ;;  %v765_v38 = vand.u32 15, %v581_v62  ;;  %v10697_v36 = vsel %vm13313_vm6, %v10555_v17, %v2486_v61  ;;  %v2534_v51 = vshrl.u32 %v1417_v15, 16 }
 0x126   : > { %13312 = vst [vmem:[#allocation74_spill] sm:$0xff] %v13311_v58  ;;  %13314 = vst [vmem:[#allocation75_spill] sm:$0xff] %v10697_v36  ;;  %v2537_v3 = vshll.u32 %v1417_v15, 16  ;;  %v2085_v16 = vshrl.u32 %v1909_v50, 16  ;;  %v2088_v30 = vshll.u32 %v1909_v50, 16  ;;  %v2093_v47 = vshrl.u32 %v1911_v9, 16 }
 0x127   : > { %v1912_v35 = vrot.slane %v1717_v22, 1  ;;  %vm10699_vm11 = vcmp.ne.s16.totalorder %v7783_v44, 0  ;;  %v13315_v55 = vmov 0  ;;  %v2096_v24 = vshll.u32 %v1911_v9, 16 }
 0x128   : > { %v13316_v55 = vsel %vm10699_vm11, 4294967295, %v13315_v55  ;;  %v1718_v62 = vsel %vm10689_vm13, %v9906_v2, 0  ;;  %v7784_v54 = vcombine.low %v9888_v53, %v1602_v37  ;;  %v542_v17 = vadd.s32 200, %v9825_v6 }
 0x129   : > { %13317 = vst [vmem:[#allocation76_spill] sm:$0xff] %v13316_v55  ;;  %vm10709_vm15 = vcmp.ne.s32.totalorder %v765_v38, 0  ;;  %v544_v50 = vadd.s32 216, %v9825_v6  ;;  %v2513_v44 = vor.u32 %v2512_v33, %v2509_v59  ;;  %v2549_v9 = vor.u32 %v2548_v8, %v2545_v20 }
 0x12a   : > { %v2536_v22 = vrot.slane %v2534_v51, 3  ;;  %v1719_v2 = vsel %vm10699_vm11, %v9947_v31, 0  ;;  %v2539_v37 = vrot.slane %v2537_v3, 4  ;;  %v2087_v58 = vrot.slane %v2085_v16, 3  ;;  %vm1568_vm6 = vmpackc.low %vm10709_vm15, %vm10709_vm15 }
 0x12b   : > { %2911 = vmatmul.mubr.bf16.gmra.mrb[60].mxu0 %v10697_v36  ;;  %v1913_v21 = vsel %vm13307_vm4, %v1910_v42, %v1912_v35  ;;  %v1914_v36 = vrot.slane %v1718_v62, 1  ;;  %v2090_v38 = vrot.slane %v2088_v30, 4  ;;  %vm10719_vm5 = vcmp.ne.s16.totalorder %v7784_v54, 0 }
 0x12c   : > { %2918 = vmatprep.mubr.bf16.mxu0 %v10672_v26  ;;  %v13320_v41 = vmov 0  ;;  %v583_v20 = vadd.s32 8, %v542_v17  ;;  %v546_v8 = vadd.s32 232, %v9825_v6  ;;  %v2095_v59 = vrot.slane %v2093_v47, 3 }
 0x12d   : > { %v13321_v41 = vsel %vm10719_vm5, 4294967295, %v13320_v41  ;;  %v2098_v33 = vrot.slane %v2096_v24, 4  ;;  %v1916_v31 = vrot.slane %v1719_v2, 1  ;;  %v585_v51 = vadd.s32 8, %v544_v50 }
 0x12e   : > { %13322 = vst [vmem:[#allocation77_spill] sm:$0xff] %v13321_v41  ;;  %vm13323_vm11 = vsmask.f32 4352  ;;  %v2120_v42 = vshrl.u32 %v1913_v21, 16  ;;  %v2123_v16 = vshll.u32 %v1913_v21, 16  ;;  %vm13326_vm13 = vcmask 1046528  }
 0x12f   : > { %v10728_v3 = vsel %vm13323_vm11, %v2486_v61, %v2513_v44  ;;  %vm13325_vm4 = vmmov %vm13323_vm11  ;;  %v1915_v30 = vsel %vm13326_vm13, %v1912_v35, %v1914_v36  ;;  %v1720_v62 = vsel %vm10719_vm5, %v9963_v49, 0  ;;  %v1610_v17 = vsel %vm1568_vm6, 65537, %v13172_v56 }
 0x130   : > { %13324 = vst [vmem:[#allocation78_spill] sm:$0xff] %v10728_v3  ;;  %v2550_v54 = vsel %vm13325_vm4, %v10641_v32, %v2549_v9  ;;  %v548_v47 = vadd.s32 248, %v9825_v6  ;;  %v779_v24 = vand.u32 15, %v583_v20  ;;  %v587_v15 = vadd.s32 8, %v546_v8  ;;  %vm13328_vm11 = vmmov %vm13326_vm13 }
 0x131   : > { %v10739_v61 = vor.u32 %v2539_v37, %v2536_v22  ;;  %v10741_v50 = vor.u32 %v2090_v38, %v2087_v58  ;;  %v1917_v21 = vsel %vm13328_vm11, %v1914_v36, %v1916_v31  ;;  %v793_v9 = vand.u32 15, %v585_v51  ;;  %vm13331_vm15 = vmmov %vm13325_vm4 }
 0x132   : > { %v2099_v35 = vor.u32 %v2098_v33, %v2095_v59  ;;  %v2147_v2 = vshrl.u32 %v1915_v30, 16  ;;  %v2150_v55 = vshll.u32 %v1915_v30, 16  ;;  %v1918_v49 = vrot.slane %v1720_v62, 1 }
 0x133   : > { %2919 = vmatmul.mubr.bf16.gmra.mrb[64].mxu0 %v10728_v3  ;;  %13327 = vst [vmem:[#allocation79_spill] sm:$0xff] %v10739_v61  ;;  %v2122_v41 = vrot.slane %v2120_v42, 3  ;;  %v7788_v32 = vcombine.low %v9888_v53, %v1610_v17  ;;  %v589_v26 = vadd.s32 8, %v548_v47  ;;  %v2125_v20 = vrot.slane %v2123_v16, 4 }
 0x134   : > { %2926 = vmatprep.mubr.bf16.mxu0 %v2550_v54  ;;  %v2174_v8 = vshrl.u32 %v1917_v21, 16  ;;  %vm10745_vm13 = vcmp.ne.s32.totalorder %v779_v24, 0  ;;  %v807_v58 = vand.u32 15, %v587_v15  ;;  %v10751_v36 = vsel %vm13331_vm15, %v2513_v44, %v10739_v61  ;;  %v13414_v61 = vld [vmem:[#allocation37_spill] sm:$0xff] }
 0x135   : > { %13332 = vst [vmem:[#allocation80_spill] sm:$0xff] %v10751_v36  ;;  %vm10753_vm6 = vcmp.ne.s32.totalorder %v793_v9, 0  ;;  %v550_v37 = vadd.s32 264, %v9825_v6  ;;  %v10760_v38 = vsel %vm13325_vm4, %v10741_v50, %v2099_v35  ;;  %v2149_v59 = vrot.slane %v2147_v2, 3  ;;  %vm1570_vm15 = vmpackc.low %vm10745_vm13, %vm10745_vm13  ;;  %v9230_v2 = vld [vmem:[#allocation5] sm:$0xff]  }
 0x136   : > { %v2152_v33 = vrot.slane %v2150_v55, 4  ;;  %v1919_v51 = vsel %vm13328_vm11, %v1916_v31, %v1918_v49  ;;  %v2177_v54 = vshll.u32 %v1917_v21, 16  ;;  %vm10763_vm10 = vcmp.ne.s16.totalorder %v7788_v32, 0  ;;  %vm1572_vm4 = vmpackc.low %vm10753_vm6, %vm10753_vm6  ;;  %v9231_v55 = vld [vmem:[#allocation5 + $0x8] sm:$0xff]  }
 0x137   : > { %v13335_v42 = vmov 0  ;;  %v821_v44 = vand.u32 15, %v589_v26  ;;  %v552_v16 = vadd.s32 280, %v9825_v6  ;;  %v2126_v30 = vor.u32 %v2125_v20, %v2122_v41  ;;  %vm13340_vm13 = vmmov %vm13328_vm11 }
 0x138   : > { %v13336_v42 = vsel %vm10763_vm10, 4294967295, %v13335_v42  ;;  %vm10774_vm1 = vcmp.ne.s32.totalorder %v807_v58, 0  ;;  %v2176_v32 = vrot.slane %v2174_v8, 3  ;;  %v2201_v31 = vshrl.u32 %v1919_v51, 16 }
 0x139   : > { %13337 = vst [vmem:[#allocation81_spill] sm:$0xff] %v13336_v42  ;;  %v2204_v62 = vshll.u32 %v1919_v51, 16  ;;  %v591_v3 = vadd.s32 8, %v550_v37  ;;  %v2153_v26 = vor.u32 %v2152_v33, %v2149_v59  ;;  %v1921_v41 = vsel %vm13340_vm13, %v1918_v49, %v10573_v40  ;;  %vm1574_vm6 = vmpackc.low %vm10774_vm1, %vm10774_vm1  ;;  %v13413_v42 = vld [vmem:[#allocation35_spill] sm:$0xff] }
 0x13a   : > { %v1724_v17 = vsel %vm10763_vm10, %v10070_v57, 0  ;;  %v1612_v47 = vsel %vm1570_vm15, 65537, %v13172_v56  ;;  %v2179_v24 = vrot.slane %v2177_v54, 4  ;;  %v1614_v15 = vsel %vm1572_vm4, 65537, %v13172_v56 }
 0x13b   : > { %2927 = vmatmul.mubr.bf16.gmra.mrb[68].mxu0 %v10751_v36  ;;  %vm10790_vm11 = vcmp.ne.s32.totalorder %v821_v44, 0  ;;  %v593_v9 = vadd.s32 8, %v552_v16  ;;  %v2228_v40 = vshrl.u32 %v1921_v41, 16  ;;  %v10794_v49 = vrot.slane %v1724_v17, 1 }
 0x13c   : > { %8613 = vmatprep.mubr.bf16.mxu0 %v10760_v38  ;;  %v7789_v57 = vcombine.low %v9888_v53, %v1612_v47  ;;  %v835_v20 = vand.u32 15, %v591_v3  ;;  %vm13343_vm15 = vsmask.f32 4352  ;;  %v2203_v58 = vrot.slane %v2201_v31, 3  ;;  %vm1576_vm1 = vmpackc.low %vm10790_vm11, %vm10790_vm11 }
 0x13d   : > { %v10798_v8 = vsel %vm13343_vm15, %v2099_v35, %v2126_v30  ;;  %v2206_v22 = vrot.slane %v2204_v62, 4  ;;  %vm13344_vm4 = vmmov %vm13343_vm15  ;;  %v7790_v59 = vcombine.low %v9888_v53, %v1614_v15  ;;  %v1616_v33 = vsel %vm1574_vm6, 65537, %v13172_v56 }
 0x13e   : > { %v10801_v37 = vsel %vm13344_vm4, %v2126_v30, %v2153_v26  ;;  %v849_v51 = vand.u32 15, %v593_v9  ;;  %v2231_v54 = vshll.u32 %v1921_v41, 16  ;;  %v2180_v44 = vor.u32 %v2179_v24, %v2176_v32  ;;  %v9232_v24 = vld [vmem:[#allocation5 + $0x10] sm:$0xff]  }
 0x13f   : > { %v1927_v35 = vsel %vm13340_vm13, %v10603_v29, %v10794_v49  ;;  %vm10812_vm15 = vcmp.ne.s16.totalorder %v7789_v57, 0  ;;  %v13345_v16 = vmov 0  ;;  %vm10816_vm4 = vcmp.ne.s32.totalorder %v835_v20, 0 }
 0x140   : > { %v13346_v16 = vsel %vm10812_vm15, 4294967295, %v13345_v16  ;;  %v2207_v31 = vor.u32 %v2206_v22, %v2203_v58  ;;  %v2230_v62 = vrot.slane %v2228_v40, 3  ;;  %v7791_v32 = vcombine.low %v9888_v53, %v1616_v33 }
 0x141   : > { %13347 = vst [vmem:[#allocation82_spill] sm:$0xff] %v13346_v16  ;;  %v1618_v3 = vsel %vm1576_vm1, 65537, %v13172_v56  ;;  %vm10824_vm6 = vcmp.ne.s16.totalorder %v7790_v59, 0  ;;  %v13350_v29 = vmov 0  ;;  %vm10828_vm11 = vcmp.ne.s32.totalorder %v849_v51, 0  ;;  %vm1578_vm1 = vmpackc.low %vm10816_vm4, %vm10816_vm4  ;;  %v9233_v59 = vld [vmem:[#allocation5 + $0x18] sm:$0xff]  }
 0x142   : > { %v13351_v29 = vsel %vm10824_vm6, 4294967295, %v13350_v29  ;;  %v554_v17 = vadd.s32 296, %v9825_v6  ;;  %v556_v47 = vadd.s32 312, %v9825_v6  ;;  %v2233_v15 = vrot.slane %v2231_v54, 4 }
 0x143   : > { %8614 = vmatmul.mubr.bf16.vlgmr.msra.gmra.mrb[4].mxu0 %v10798_v8  ;;  %13352 = vst [vmem:[#allocation83_spill] sm:$0xff] %v13351_v29  ;;  %v2309_v21 = vshrl.u32 %v1927_v35, 16  ;;  %v2312_v9 = vshll.u32 %v1927_v35, 16  ;;  %v7792_v40 = vcombine.low %v9888_v53, %v1618_v3  ;;  %vm13355_vm13 = vsmask.f32 4352 }
 0x144   : > { %3307 = vmatpush1.bf16.msra.mxu0 %v9230_v2  ;;  %8617 = vmatprep.mubr.bf16.mxu0 %v10801_v37  ;;  %v1725_v2 = vsel %vm10812_vm15, %v10111_v4, 0  ;;  %v10842_v57 = vsel %vm13355_vm13, %v2153_v26, %v2180_v44  ;;  %v1726_v20 = vsel %vm10824_vm6, %v10132_v46, 0  ;;  %vm10847_vm10 = vcmp.ne.s16.totalorder %v7791_v32, 0  ;;  %vm1580_vm15 = vmpackc.low %vm10828_vm11, %vm10828_vm11 }
 0x145   : > { %3308 = vmatprep.subr.bf16.mxu0 %v13172_v56  ;;  %v13356_v58 = vmov 0  ;;  %vm13359_vm4 = vmmov %vm13355_vm13  ;;  %v595_v22 = vadd.s32 8, %v554_v17  ;;  %v597_v26 = vadd.s32 8, %v556_v47  ;;  %v2311_v33 = vrot.slane %v2309_v21, 3  ;;  %v9234_v17 = vld [vmem:[#allocation5 + $0x20] sm:$0xff]  }
 0x146   : > { %v13357_v58 = vsel %vm10847_vm10, 4294967295, %v13356_v58  ;;  %v10856_v4 = vsel %vm13359_vm4, %v2180_v44, %v2207_v31  ;;  %v2314_v51 = vrot.slane %v2312_v9, 4  ;;  %v1928_v54 = vrot.slane %v1725_v2, 1 }
 0x147   : > { %13358 = vst [vmem:[#allocation84_spill] sm:$0xff] %v13357_v58  ;;  %v1620_v46 = vsel %vm1578_vm1, 65537, %v13172_v56  ;;  %v1930_v35 = vrot.slane %v1726_v20, 1  ;;  %v1727_v30 = vsel %vm10847_vm10, %v10149_v52, 0  ;;  %vm10863_vm11 = vcmp.ne.s16.totalorder %v7792_v40, 0  ;;  %vm13363_vm1 = vmmov %vm13359_vm4 }
 0x148   : > { %3309 = vmatpush1.bf16.msra.mxu0 %v9231_v55  ;;  %v13360_v55 = vmov 0  ;;  %v1622_v44 = vsel %vm1580_vm15, 65537, %v13172_v56  ;;  %v2234_v32 = vor.u32 %v2233_v15, %v2230_v62  ;;  %v863_v3 = vand.u32 15, %v595_v22  ;;  %vm13365_vm15 = vmmov %vm13363_vm1 }
 0x149   : > { %3310 = vmatprep.subr.bf16.mxu0 %v13172_v56  ;;  %v13361_v55 = vsel %vm10863_vm11, 4294967295, %v13360_v55  ;;  %v877_v41 = vand.u32 15, %v597_v26  ;;  %vm13364_vm13 = vcmask 1046528   ;;  %v1728_v15 = vsel %vm10863_vm11, %v10176_v18, 0 }
 0x14a   : > { %13362 = vst [vmem:[#allocation85_spill] sm:$0xff] %v13361_v55  ;;  %v10871_v47 = vsel %vm13363_vm1, %v2207_v31, %v2234_v32  ;;  %v1929_v52 = vsel %vm13364_vm13, %v10794_v49, %v1928_v54  ;;  %vm13367_vm4 = vmmov %vm13364_vm13  ;;  %vm10884_vm10 = vcmp.ne.s32.totalorder %v863_v3, 0  ;;  %v7793_v9 = vcombine.low %v9888_v53, %v1620_v46  ;;  %v13412_v55 = vld [vmem:[#allocation34_spill] sm:$0xff] }
 0x14b   : > { %8618 = vmatmul.mubr.bf16.gmra.mrb[72].mxu0 %v10842_v57  ;;  %v1931_v62 = vsel %vm13367_vm4, %v1928_v54, %v1930_v35  ;;  %v2336_v31 = vshrl.u32 %v1929_v52, 16  ;;  %v2339_v49 = vshll.u32 %v1929_v52, 16  ;;  %vm10890_vm1 = vcmp.ne.s32.totalorder %v877_v41, 0  ;;  %vm1582_vm13 = vmpackc.low %vm10884_vm10, %vm10884_vm10 }
 0x14c   : > { %3311 = vmatpush1.bf16.msra.mxu0 %v9232_v24  ;;  %8621 = vmatprep.mubr.bf16.mxu0 %v10856_v4  ;;  %v10878_v24 = vsel %vm13365_vm15, %v2234_v32, %v10648_v27  ;;  %v9235_v27 = vld [vmem:[#allocation5 + $0x28] sm:$0xff]   ;;  %v2315_v40 = vor.u32 %v2314_v51, %v2311_v33  ;;  %v1932_v18 = vrot.slane %v1727_v30, 1  ;;  %v7794_v20 = vcombine.low %v9888_v53, %v1622_v44  ;;  %vm1584_vm15 = vmpackc.low %vm10890_vm1, %vm10890_vm1  ;;  %v9236_v51 = vld [vmem:[#allocation5 + $0x30] sm:$0xff]  }
 0x14d   : > { %3312 = vmatprep.subr.bf16.mxu0 %v13172_v56  ;;  %13366 = vst [vmem:[#allocation86_spill] sm:$0xff] %v10878_v24  ;;  %v2363_v22 = vshrl.u32 %v1931_v62, 16  ;;  %v2366_v26 = vshll.u32 %v1931_v62, 16  ;;  %v2338_v54 = vrot.slane %v2336_v31, 3  ;;  %v2341_v46 = vrot.slane %v2339_v49, 4  ;;  %v9237_v49 = vld [vmem:[#allocation5 + $0x38] sm:$0xff]  }
 0x14e   : > { %vm10903_vm4 = vcmp.ne.s16.totalorder %v7793_v9, 0  ;;  %v13372_v33 = vmov 0  ;;  %vm13375_vm11 = vsmask.f32 4352  ;;  %vm13376_vm6 = vcmask 1046528  }
 0x14f   : > { %v13373_v33 = vsel %vm10903_vm4, 4294967295, %v13372_v33  ;;  %v10909_v30 = vsel %vm13375_vm11, %v10667_v34, %v2315_v40  ;;  %v1933_v44 = vsel %vm13376_vm6, %v1930_v35, %v1932_v18  ;;  %vm10912_vm0 = vcmp.ne.s16.totalorder %v7794_v20, 0  ;;  %vm13380_vm10 = vmmov %vm13376_vm6 }
 0x150   : > { %3313 = vmatpush1.bf16.msra.mxu0 %v9233_v59  ;;  %v1934_v59 = vrot.slane %v1728_v15, 1  ;;  %13374 = vst [vmem:[#allocation87_spill] sm:$0xff] %v13373_v33  ;;  %v13377_v32 = vmov 0  ;;  %v1624_v3 = vsel %vm1582_vm13, 65537, %v13172_v56  ;;  %v2365_v41 = vrot.slane %v2363_v22, 3 }
 0x151   : > { %3314 = vmatprep.subr.bf16.mxu0 %v13172_v56  ;;  %v13378_v32 = vsel %vm10912_vm0, 4294967295, %v13377_v32  ;;  %v1626_v62 = vsel %vm1584_vm15, 65537, %v13172_v56  ;;  %v1729_v34 = vsel %vm10903_vm4, %v10220_v39, 0  ;;  %v2342_v35 = vor.u32 %v2341_v46, %v2338_v54  ;;  %v9246_v46 = vld [vmem:[%s9811_s12] ss:$0 sps:$4 sm:$0xff]   ;;  %vm13386_vm15 = vmmov %vm13375_vm11 }
 0x152   : > { %13379 = vst [vmem:[#allocation88_spill] sm:$0xff] %v13378_v32  ;;  %v1935_v52 = vsel %vm13380_vm10, %v1932_v18, %v1934_v59  ;;  %v2390_v15 = vshrl.u32 %v1933_v44, 16  ;;  %v1730_v21 = vsel %vm10912_vm0, %v10273_v1, 0  ;;  %v7795_v31 = vcombine.low %v9888_v53, %v1624_v3 }
 0x153   : > { %8622 = vmatmul.mubr.bf16.gmra.mrb[76].mxu0 %v10871_v47  ;;  %v2393_v9 = vshll.u32 %v1933_v44, 16  ;;  %v2417_v2 = vshrl.u32 %v1935_v52, 16  ;;  %v7796_v39 = vcombine.low %v9888_v53, %v1626_v62  ;;  %v1936_v20 = vrot.slane %v1729_v34, 1 }
 0x154   : > { %3315 = vmatpush1.bf16.msra.mxu0 %v9234_v17  ;;  %8625 = vmatprep.mubr.bf16.mxu0 %v10878_v24  ;;  %v2368_v17 = vrot.slane %v2366_v26, 4  ;;  %v1938_v22 = vrot.slane %v1730_v21, 1  ;;  %vm13073_vm6 = vcmask 1043456   ;;  %v10932_v1 = vsel %vm13375_vm11, %v2315_v40, %v2342_v35  ;;  %vm13387_vm11 = vmmov %vm13380_vm10  ;;  %v9369_v21 = vld [vmem:[%s9811_s12 + $0x94] sm:$0xff]  }
 0x155   : > { %3316 = vmatprep.subr.bf16.mxu0 %v13172_v56  ;;  %v2392_v26 = vrot.slane %v2390_v15, 3  ;;  %vm10934_vm1 = vcmp.ne.s16.totalorder %v7795_v31, 0  ;;  %v13381_v54 = vmov 0  ;;  %v2395_v44 = vrot.slane %v2393_v9, 4 }
 0x156   : > { %v2369_v18 = vor.u32 %v2368_v17, %v2365_v41  ;;  %v13382_v54 = vsel %vm10934_vm1, 4294967295, %v13381_v54  ;;  %v2419_v3 = vrot.slane %v2417_v2, 3  ;;  %vm10939_vm13 = vcmp.ne.s16.totalorder %v7796_v39, 0 }
 0x157   : > { %13383 = vst [vmem:[#allocation89_spill] sm:$0xff] %v13382_v54  ;;  %v1937_v17 = vsel %vm13380_vm10, %v1934_v59, %v1936_v20  ;;  %v10949_v62 = vadd.s32 8, %v9825_v6  ;;  %v1939_v34 = vsel %vm13387_vm11, %v1936_v20, %v1938_v22  ;;  %v1731_v15 = vsel %vm10934_vm1, %v10289_v11, 0 }
 0x158   : > { %3317 = vmatpush1.bf16.msra.mxu0 %v9235_v27  ;;  %v2420_v27 = vshll.u32 %v1935_v52, 16  ;;  %v10945_v40 = vsel %vm13386_vm15, %v2342_v35, %v2369_v18  ;;  %v1732_v31 = vsel %vm10939_vm13, %v9369_v21, 0  ;;  %v10960_v35 = vsel %vm13073_vm6, 0, %v9246_v46  ;;  %vm13389_vm13 = vmmov %vm13386_vm15 }
 0x159   : > { %3318 = vmatprep.subr.bf16.mxu0 %v13172_v56  ;;  %v2396_v59 = vor.u32 %v2395_v44, %v2392_v26  ;;  %v2444_v2 = vshrl.u32 %v1937_v17, 16  ;;  %v2471_v11 = vshrl.u32 %v1939_v34, 16  ;;  %v2474_v39 = vshll.u32 %v1939_v34, 16  ;;  %v9240_v26 = vld [vmem:[#allocation5 + $0x50] sm:$0xff]   ;;  %vm13390_vm15 = vmmov %vm13389_vm13 }
 0x15a   : > { %v2422_v52 = vrot.slane %v2420_v27, 4  ;;  %v2447_v27 = vshll.u32 %v1937_v17, 16  ;;  %v10964_v20 = vrot.slane %v1731_v15, 1  ;;  %v604_v41 = vand.u32 15, %v10949_v62 }
 0x15b   : > { %8626 = vmatmul.mubr.bf16.gmra.mrb[80].mxu0 %v10687_v45  ;;  %v10967_v21 = vrot.slane %v1732_v31, 1  ;;  %v1737_v46 = vshll.u32 %v10960_v35, 16  ;;  %v2473_v17 = vrot.slane %v2471_v11, 3  ;;  %v2476_v34 = vrot.slane %v2474_v39, 4 }
 0x15c   : > { %3319 = vmatpush1.bf16.msra.mxu0 %v9236_v51  ;;  %8629 = vmatprep.mubr.bf16.mxu0 %v10909_v30  ;;  %v9238_v51 = vld [vmem:[#allocation5 + $0x40] sm:$0xff]   ;;  %v2423_v9 = vor.u32 %v2422_v52, %v2419_v3  ;;  %v2446_v3 = vrot.slane %v2444_v2, 3  ;;  %v2449_v52 = vrot.slane %v2447_v27, 4  ;;  %v1941_v15 = vsel %vm13380_vm10, %v1938_v22, %v10964_v20  ;;  %v9241_v27 = vld [vmem:[#allocation5 + $0x58] sm:$0xff]  }
 0x15d   : > { %3320 = vmatprep.subr.bf16.mxu0 %v13172_v56  ;;  %13388 = vst [vmem:[#allocation90_spill] sm:$0xff] %v10967_v21  ;;  %vm10979_vm11 = vcmp.ne.s32.totalorder %v604_v41, 15  ;;  %v2498_v11 = vshrl.u32 %v1941_v15, 16  ;;  %v2501_v22 = vshll.u32 %v1941_v15, 16  ;;  %v2477_v39 = vor.u32 %v2476_v34, %v2473_v17 }
 0x15e   : > { %v10974_v44 = vsel %vm13390_vm15, %v2396_v59, %v2423_v9  ;;  %v2450_v2 = vor.u32 %v2449_v52, %v2446_v3  ;;  %vm1230_vm15 = vmpackc.low %vm10979_vm11, %vm10979_vm11  ;;  %v9242_v3 = vld [vmem:[#allocation5 + $0x60] sm:$0xff]   ;;  %vm13396_vm11 = vsmask.f32 7424 }
 0x15f   : > { %v2500_v52 = vrot.slane %v2498_v11, 3  ;;  %v2503_v32 = vrot.slane %v2501_v22, 4  ;;  %v9244_v22 = vld [vmem:[#allocation5 + $0x70] sm:$0xff]  }
 0x160   : > { %3321 = vmatpush1.bf16.msra.mxu0 %v9237_v49  ;;  %v9239_v49 = vld [vmem:[#allocation5 + $0x48] sm:$0xff]  }
 0x161   : > { %3322 = vmatprep.subr.bf16.mxu0 %v13172_v56 }
 0x163   : > { %8630 = vmatmul.mubr.bf16.gmra.mrb[84].mxu0 %v10932_v1 }
 0x164   : > { %3323 = vmatpush1.bf16.msra.mxu0 %v9238_v51  ;;  %8633 = vmatprep.mubr.bf16.mxu0 %v10945_v40  ;;  %v10971_v51 = vsel %vm13389_vm13, %v2369_v18, %v2396_v59  ;;  %vm13393_vm13 = vmmov %vm13380_vm10  ;;  %v1735_v59 = vshrl.u32 %v10960_v35, 16  ;;  %vm13394_vm10 = vsmask.f32 4352 }
 0x165   : > { %3324 = vmatprep.subr.bf16.mxu0 %v13172_v56  ;;  %v2000_v18 = vsel %vm13393_vm13, %v10964_v20, %v10967_v21  ;;  %vm13395_vm13 = vmmov %vm13394_vm10 }
 0x166   : > { %v2525_v41 = vshrl.u32 %v2000_v18, 16  ;;  %v2528_v58 = vshll.u32 %v2000_v18, 16  ;;  %v10999_v15 = vsel %vm13395_vm13, %v2450_v2, %v2477_v39  ;;  %v9243_v18 = vld [vmem:[#allocation5 + $0x68] sm:$0xff]   ;;  %vm13402_vm13 = vmmov %vm13394_vm10 }
 0x168   : > { %3325 = vmatpush1.bf16.msra.mxu0 %v9239_v49  ;;  %v1739_v49 = vrot.slane %v1737_v46, 1  ;;  %v1272_v46 = vsel %vm1230_vm15, 65537, %v13172_v56  ;;  %v2527_v31 = vrot.slane %v2525_v41, 3  ;;  %v2530_v33 = vrot.slane %v2528_v58, 4 }
 0x169   : > { %3326 = vmatprep.subr.bf16.mxu0 %v13172_v56  ;;  %v7756_v34 = vcombine.low %v1272_v46, %v9888_v53 }
 0x16a   : > { %v1740_v54 = vor.u32 %v1739_v49, %v1735_v59  ;;  %v2552_v59 = vshrl.u32 %v10967_v21, 16  ;;  %v2555_v49 = vshll.u32 %v10967_v21, 16  ;;  %v11011_v58 = vor.u32 %v2530_v33, %v2527_v31 }
 0x16b   : > { %8634 = vmatmul.mubr.bf16.gmra.mrb[88].mxu0 %v10971_v51  ;;  %vm11013_vm15 = vcmp.ne.s16.totalorder %v7756_v34, 0 }
 0x16c   : > { %3327 = vmatpush1.bf16.msra.mxu0 %v9240_v26  ;;  %8637 = vmatprep.mubr.bf16.mxu0 %v10974_v44  ;;  %v10995_v26 = vsel %vm13394_vm10, %v2423_v9, %v2450_v2  ;;  %v1745_v17 = vsel %vm13396_vm11, %v1740_v54, %v9845_v19  ;;  %v11006_v9 = vor.u32 %v2503_v32, %v2500_v52  ;;  %v13399_v54 = vmov 0  ;;  %v9245_v52 = vld [vmem:[#allocation5 + $0x78] sm:$0xff]   ;;  %vm13403_vm11 = vmmov %vm13394_vm10 }
 0x16d   : > { %3328 = vmatprep.subr.bf16.mxu0 %v13172_v56  ;;  %13398 = vst [vmem:[#allocation92_spill] sm:$0xff] %v11011_v58  ;;  %v3122_v2 = vshrl.u32 %v1745_v17, 16  ;;  %v3125_v19 = vshll.u32 %v1745_v17, 16  ;;  %v13400_v54 = vsel %vm11013_vm15, 4294967295, %v13399_v54  ;;  %v2554_v32 = vrot.slane %v2552_v59, 3 }
 0x16e   : > { %13397 = vst [vmem:[#allocation91_spill] sm:$0xff] %v11006_v9  ;;  %13401 = vst [vmem:[#allocation93_spill] sm:$0xff] %v13400_v54  ;;  %v2557_v11 = vrot.slane %v2555_v49, 4  ;;  %v11024_v41 = vsel %vm13402_vm13, %v11006_v9, %v11011_v58  ;;  %v9248_v54 = vld [vmem:[#allocation5 + $0x88] sm:$0xff]  }
 0x16f   : > { %v3124_v33 = vrot.slane %v3122_v2, 3  ;;  %v3127_v46 = vrot.slane %v3125_v19, 4  ;;  %vm13404_vm13 = vmmov %vm13394_vm10 }
 0x170   : > { %3329 = vmatpush1.bf16.msra.mxu0 %v9241_v27  ;;  %v11019_v27 = vsel %vm13394_vm10, %v2477_v39, %v11006_v9  ;;  %v2558_v39 = vor.u32 %v2557_v11, %v2554_v32 }
 0x171   : > { %3330 = vmatprep.subr.bf16.mxu0 %v13172_v56  ;;  %v3128_v34 = vor.u32 %v3127_v46, %v3124_v33 }
 0x172   : > { %v2559_v59 = vsel %vm13403_vm11, %v11011_v58, %v2558_v39  ;;  %v9249_v39 = vld [vmem:[#allocation5 + $0x90] sm:$0xff]  }
 0x173   : > { %8638 = vmatmul.mubr.bf16.gmra.mrb[92].mxu0 %v10995_v26  ;;  %v3129_v19 = vsel %vm13394_vm10, %v3128_v34, %v9856_v43  ;;  %v9250_v43 = vld [vmem:[#allocation5 + $0x98] sm:$0xff]  }
 0x174   : > { %8641 = vmatprep.mubr.bf16.mxu0 %v10999_v15  ;;  %3331 = vmatpush1.bf16.msra.mxu0 %v9242_v3  ;;  %v1398_v3 = vsel %vm11013_vm15, %v10960_v35, 0 }
 0x175   : > { %3332 = vmatprep.subr.bf16.mxu0 %v13172_v56  ;;  %v3113_v31 = vshrl.u32 %v1398_v3, 16  ;;  %v3116_v17 = vshll.u32 %v1398_v3, 16 }
 0x177   : > { %v3115_v49 = vrot.slane %v3113_v31, 3  ;;  %v3118_v2 = vrot.slane %v3116_v17, 4 }
 0x178   : > { %3333 = vmatpush1.bf16.msra.mxu0 %v9243_v18  ;;  %v9247_v18 = vld [vmem:[#allocation5 + $0x80] sm:$0xff]  }
 0x179   : > { %3334 = vmatprep.subr.bf16.mxu0 %v13172_v56  ;;  %v3119_v32 = vor.u32 %v3118_v2, %v3115_v49  ;;  %v9254_v2 = vld [vmem:[#allocation5 + $0xb8] sm:$0xff]  }
 0x17b   : > { %8642 = vmatmul.mubr.bf16.gmra.mrb[96].mxu0 %v11019_v27  ;;  %v3120_v33 = vsel %vm13404_vm13, %v3119_v32, %v9971_v63  ;;  %v13406_v32 = vld [vmem:[#allocation26_spill] sm:$0xff] }
 0x17c   : > { %8645 = vmatprep.mubr.bf16.mxu0 %v11024_v41  ;;  %3335 = vmatpush1.bf16.msra.mxu0 %v9244_v22 }
 0x17d   : > { %3336 = vmatprep.subr.bf16.mxu0 %v13172_v56 }
 0x180   : > { %3337 = vmatpush1.bf16.msra.mxu0 %v9245_v52  ;;  %v9251_v52 = vld [vmem:[#allocation5 + $0xa0] sm:$0xff]  }
 0x181   : > { %8649 = vmatprep.subr.bf16.mxu0 %v9247_v18 }
 0x183   : > { %8646 = vmatmul.mubr.bf16.gmra.mrb[100].mxu0 %v2559_v59 }
 0x184   : > { %3338 = vmatprep.mubr.bf16.mxu0 %v3129_v19  ;;  %v13405_v19 = vld [vmem:[#allocation25_spill] sm:$0xff] }
 0x186   : > { %v2792_v11 = vpop.f32.mrb[0].mxu0 }
 0x187   : > { %v2794_v22 = vpop.f32.mrb[1].mxu0 }
 0x188   : > { %v2795_v3 = vpop.f32.mrb[2].mxu0 }
 0x189   : > { %v2797_v46 = vpop.f32.mrb[3].mxu0 }
 0x18a   : > { %v13407_v46 = vld [vmem:[#allocation28_spill] sm:$0xff] }
 0x18b   : > { %3339 = vmatmul.mubr.bf16.vlgmr.msra.gmra.mrb[104].mxu0 %v3120_v33 }
 0x18c   : > { %8650 = vmatpush3.bf16.msra.mxu0 %v9247_v18  ;;  %3346 = vmatprep.mubr.bf16.mxu0 %v9872_v48  ;;  %v9252_v48 = vld [vmem:[#allocation5 + $0xa8] sm:$0xff]  }
 0x18d   : > { %8651 = vmatprep.subr.bf16.mxu0 %v9248_v54 }
 0x190   : > { %8652 = vmatpush3.bf16.msra.mxu0 %v9248_v54 }
 0x191   : > { %8653 = vmatprep.subr.bf16.mxu0 %v9249_v39 }
 0x193   : > { %3347 = vmatmul.mubr.bf16.gmra.mrb[4].mxu0 %v9993_v25  ;;  %v9253_v25 = vld [vmem:[#allocation5 + $0xb0] sm:$0xff]  }
 0x194   : > { %3354 = vmatprep.mubr.bf16.mxu0 %v10006_v10  ;;  %8654 = vmatpush3.bf16.msra.mxu0 %v9249_v39  ;;  %v13408_v39 = vld [vmem:[#allocation29_spill] sm:$0xff] }
 0x195   : > { %8655 = vmatprep.subr.bf16.mxu0 %v9250_v43 }
 0x196   : > { %v11042_v31 = vpop.f32.mrb[8].mxu0 }
 0x197   : > { %v2810_v63 = vpop.f32.mrb[9].mxu0 }
 0x198   : > { %v11044_v17 = vpop.f32.mrb[10].mxu0  ;;  %8656 = vmatpush3.bf16.msra.mxu0 %v9250_v43 }
 0x199   : > { %v2813_v34 = vpop.f32.mrb[11].mxu0  ;;  %8657 = vmatprep.subr.bf16.mxu0 %v9251_v52 }
 0x19b   : > { %3355 = vmatmul.mubr.bf16.gmra.mrb[108].mxu0 %v10025_v60  ;;  %v13421_v60 = vld [vmem:[#allocation48_spill] sm:$0xff] }
 0x19c   : > { %3362 = vmatprep.mubr.bf16.mxu0 %v10036_v5  ;;  %8658 = vmatpush3.bf16.msra.mxu0 %v9251_v52 }
 0x19d   : > { %8659 = vmatprep.subr.bf16.mxu0 %v9252_v48 }
 0x19e   : > { %v11048_v54 = vpop.f32.mrb[12].mxu0 }
 0x19f   : > { %v2818_v18 = vpop.f32.mrb[13].mxu0 }
 0x1a0   : > { %v11050_v59 = vpop.f32.mrb[14].mxu0  ;;  %8660 = vmatpush3.bf16.msra.mxu0 %v9252_v48  ;;  %v13409_v48 = vld [vmem:[#allocation30_spill] sm:$0xff] }
 0x1a1   : > { %v2821_v49 = vpop.f32.mrb[15].mxu0  ;;  %8661 = vmatprep.subr.bf16.mxu0 %v9253_v25 }
 0x1a3   : > { %3363 = vmatmul.mubr.bf16.gmra.mrb[112].mxu0 %v13405_v19  ;;  %v13419_v19 = vld [vmem:[#allocation47_spill] sm:$0xff] }
 0x1a4   : > { %3370 = vmatprep.mubr.bf16.mxu0 %v13406_v32  ;;  %8662 = vmatpush3.bf16.msra.mxu0 %v9253_v25  ;;  %v13410_v25 = vld [vmem:[#allocation31_spill] sm:$0xff] }
 0x1a5   : > { %8663 = vmatprep.subr.bf16.mxu0 %v9254_v2 }
 0x1a6   : > { %v11054_v11 = vpop.f32.mrb[16].mxu0 }
 0x1a7   : > { %v2826_v22 = vpop.f32.mrb[17].mxu0 }
 0x1a8   : > { %v11056_v3 = vpop.f32.mrb[18].mxu0  ;;  %8664 = vmatpush3.bf16.msra.mxu0 %v9254_v2 }
 0x1a9   : > { %v2829_v33 = vpop.f32.mrb[19].mxu0  ;;  %3912 = vmatprep.subr.bf16.mxu0 %v13172_v56 }
 0x1aa   : > { %v13411_v33 = vld [vmem:[#allocation33_spill] sm:$0xff] }
 0x1ab   : > { %3371 = vmatmul.mubr.bf16.gmra.mrb[116].mxu0 %v13407_v46  ;;  %v13417_v46 = vld [vmem:[#allocation44_spill] sm:$0xff] }
 0x1ac   : > { %3378 = vmatprep.mubr.bf16.mxu0 %v13408_v39 }
 0x1ae   : > { %v11061_v43 = vpop.f32.mrb[20].mxu0 }
 0x1af   : > { %v2834_v52 = vpop.f32.mrb[21].mxu0 }
 0x1b0   : > { %v11063_v63 = vpop.f32.mrb[22].mxu0 }
 0x1b1   : > { %v2837_v34 = vpop.f32.mrb[23].mxu0 }
 0x1b3   : > { %3379 = vmatmul.mubr.bf16.gmra.mrb[120].mxu0 %v13409_v48  ;;  %v13415_v48 = vld [vmem:[#allocation41_spill] sm:$0xff] }
 0x1b4   : > { %3386 = vmatprep.mubr.bf16.mxu0 %v13410_v25 }
 0x1b6   : > { %v11067_v18 = vpop.f32.mrb[24].mxu0 }
 0x1b7   : > { %v2842_v49 = vpop.f32.mrb[25].mxu0 }
 0x1b8   : > { %v11069_v2 = vpop.f32.mrb[26].mxu0 }
 0x1b9   : > { %v2845_v22 = vpop.f32.mrb[27].mxu0 }
 0x1bb   : > { %3387 = vmatmul.mubr.bf16.gmra.mrb[124].mxu0 %v13411_v33  ;;  %v13416_v33 = vld [vmem:[#allocation39_spill] sm:$0xff] }
 0x1bc   : > { %3394 = vmatprep.mubr.bf16.mxu0 %v13412_v55 }
 0x1be   : > { %v11073_v29 = vpop.f32.mrb[28].mxu0 }
 0x1bf   : > { %v2850_v52 = vpop.f32.mrb[29].mxu0 }
 0x1c0   : > { %v11075_v16 = vpop.f32.mrb[30].mxu0 }
 0x1c1   : > { %v2853_v34 = vpop.f32.mrb[31].mxu0 }
 0x1c3   : > { %3395 = vmatmul.mubr.bf16.gmra.mrb[128].mxu0 %v13413_v42  ;;  %v13418_v42 = vld [vmem:[#allocation43_spill] sm:$0xff] }
 0x1c4   : > { %3402 = vmatprep.mubr.bf16.mxu0 %v13414_v61 }
 0x1c6   : > { %v11079_v36 = vpop.f32.mrb[32].mxu0 }
 0x1c7   : > { %v2858_v49 = vpop.f32.mrb[33].mxu0 }
 0x1c8   : > { %v11081_v25 = vpop.f32.mrb[34].mxu0 }
 0x1c9   : > { %v2861_v22 = vpop.f32.mrb[35].mxu0 }
 0x1cb   : > { %3403 = vmatmul.mubr.bf16.gmra.mrb[132].mxu0 %v13415_v48  ;;  %v13420_v48 = vld [vmem:[#allocation46_spill] sm:$0xff] }
 0x1cc   : > { %3410 = vmatprep.mubr.bf16.mxu0 %v13416_v33 }
 0x1ce   : > { %v11085_v55 = vpop.f32.mrb[36].mxu0 }
 0x1cf   : > { %v2866_v52 = vpop.f32.mrb[37].mxu0 }
 0x1d0   : > { %v11087_v39 = vpop.f32.mrb[38].mxu0 }
 0x1d1   : > { %v2869_v34 = vpop.f32.mrb[39].mxu0 }
 0x1d3   : > { %3411 = vmatmul.mubr.bf16.gmra.mrb[136].mxu0 %v13417_v46  ;;  %v11103_v46 = vld [vmem:[#allocation5 + $0x200] sm:$0xff]  }
 0x1d4   : > { %3418 = vmatprep.mubr.bf16.mxu0 %v13418_v42  ;;  %v559_v42 = vadd.s32 8, %v10949_v62  ;;  %13422 = vst [vmem:[#allocation94_spill] sm:$0xff] %v11103_v46  ;;  %8897 = vmatprep.subr.bf16.mxu1 %v11103_v46 }
 0x1d5   : > { %8905 = vmatpush3.bf16.msra.mxu1 %v11103_v46 }
 0x1d6   : > { %v11091_v61 = vpop.f32.mrb[40].mxu0 }
 0x1d7   : > { %v2874_v49 = vpop.f32.mrb[41].mxu0 }
 0x1d8   : > { %v11093_v32 = vpop.f32.mrb[42].mxu0  ;;  %v13423_v49 = vld [vmem:[#allocation49_spill] sm:$0xff] }
 0x1d9   : > { %v2877_v22 = vpop.f32.mrb[43].mxu0 }
 0x1db   : > { %3419 = vmatmul.mubr.bf16.gmra.mrb[140].mxu0 %v13419_v19  ;;  %v611_v19 = vand.u32 15, %v559_v42  ;;  %v11120_v42 = vld [vmem:[#allocation5 + $0x208] sm:$0xff]  }
 0x1dc   : > { %3426 = vmatprep.mubr.bf16.mxu0 %v13420_v48  ;;  %13424 = vst [vmem:[#allocation95_spill] sm:$0xff] %v11120_v42  ;;  %8898 = vmatprep.subr.bf16.mxu1 %v11120_v42 }
 0x1dd   : > { %vm1420_vm11 = vcmp.ne.s32.totalorder %v611_v19, 0  ;;  %8906 = vmatpush3.bf16.msra.mxu1 %v11120_v42 }
 0x1de   : > { %v11097_v33 = vpop.f32.mrb[44].mxu0  ;;  %vm1546_vm10 = vmpackc.low %vm1420_vm11, %vm1420_vm11  ;;  %vm13434_vm11 = vcmask 1046528  }
 0x1df   : > { %v2882_v52 = vpop.f32.mrb[45].mxu0  ;;  %v1588_v10 = vsel %vm1546_vm10, 65537, %v13172_v56  ;;  %vm13438_vm10 = vsmask.f32 4352 }
 0x1e0   : > { %v11099_v5 = vpop.f32.mrb[46].mxu0 }
 0x1e1   : > { %v2885_v34 = vpop.f32.mrb[47].mxu0 }
 0x1e3   : > { %3427 = vmatmul.mubr.bf16.gmra.mrb[144].mxu0 %v13421_v60 }
 0x1e4   : > { %3434 = vmatprep.mubr.bf16.mxu0 %v13423_v49 }
 0x1e6   : > { %v11107_v22 = vpop.f32.mrb[48].mxu0 }
 0x1e7   : > { %v2890_v48 = vpop.f32.mrb[49].mxu0 }
 0x1e8   : > { %v11110_v52 = vpop.f32.mrb[50].mxu0  ;;  %v13425_v48 = vld [vmem:[#allocation55_spill] sm:$0xff] }
 0x1e9   : > { %v2893_v58 = vpop.f32.mrb[51].mxu0 }
 0x1ea   : > { %v7777_v58 = vcombine.low %v9888_v53, %v1588_v10 }
 0x1eb   : > { %3435 = vmatmul.mubr.bf16.gmra.mrb[148].mxu0 %v10366_v7 }
 0x1ec   : > { %3442 = vmatprep.mubr.bf16.mxu0 %v10357_v14  ;;  %vm11130_vm13 = vcmp.ne.s16.totalorder %v7777_v58, 0  ;;  %v13432_v58 = vld [vmem:[#allocation54_spill] sm:$0xff] }
 0x1ed   : > { %v1713_v10 = vsel %vm11130_vm13, %v10960_v35, 0  ;;  %v3143_v42 = vshll.u32 %v13432_v58, 16  ;;  %v11153_v35 = vld [vmem:[#allocation5 + $0x220] sm:$0xff]  }
 0x1ee   : > { %v11114_v62 = vpop.f32.mrb[52].mxu0  ;;  %13433 = vst [vmem:[#allocation54_spill] sm:$0xff] %v11153_v35 }
 0x1ef   : > { %v2898_v34 = vpop.f32.mrb[53].mxu0  ;;  %v3145_v46 = vrot.slane %v3143_v42, 4  ;;  %v11169_v42 = vld [vmem:[#allocation5 + $0x230] sm:$0xff]  }
 0x1f0   : > { %v11116_v49 = vpop.f32.mrb[54].mxu0 }
 0x1f1   : > { %v2901_v60 = vpop.f32.mrb[55].mxu0 }
 0x1f2   : > { %v13427_v60 = vmov 0 }
 0x1f3   : > { %3443 = vmatmul.mubr.bf16.gmra.mrb[152].mxu0 %v10425_v0  ;;  %v13428_v60 = vsel %vm11130_vm13, 4294967295, %v13427_v60  ;;  %v11134_v0 = vld [vmem:[#allocation5 + $0x210] sm:$0xff]  }
 0x1f4   : > { %3450 = vmatprep.mubr.bf16.mxu0 %v13425_v48  ;;  %13429 = vst [vmem:[#allocation97_spill] sm:$0xff] %v13428_v60  ;;  %13430 = vst [vmem:[#allocation98_spill] sm:$0xff] %v11134_v0  ;;  %8899 = vmatprep.subr.bf16.mxu1 %v11134_v0  ;;  %v3140_v48 = vshrl.u32 %v13432_v58, 16 }
 0x1f5   : > { %8907 = vmatpush3.bf16.msra.mxu1 %v11134_v0 }
 0x1f6   : > { %v11125_v19 = vpop.f32.mrb[56].mxu0 }
 0x1f7   : > { %v2906_v34 = vpop.f32.mrb[57].mxu0 }
 0x1f8   : > { %v11128_v14 = vpop.f32.mrb[58].mxu0  ;;  %v11143_v34 = vld [vmem:[#allocation5 + $0x218] sm:$0xff]  }
 0x1f9   : > { %13426 = vst [vmem:[#allocation96_spill] sm:$0xff] %v11128_v14  ;;  %v2909_v7 = vpop.f32.mrb[59].mxu0  ;;  %13431 = vst [vmem:[#allocation99_spill] sm:$0xff] %v11143_v34  ;;  %8900 = vmatprep.subr.bf16.mxu1 %v11143_v34 }
 0x1fa   : > { %v1905_v7 = vrot.slane %v1713_v10, 1  ;;  %8908 = vmatpush3.bf16.msra.mxu1 %v11143_v34  ;;  %v13435_v10 = vld [vmem:[#allocation70_spill] sm:$0xff] }
 0x1fb   : > { %3451 = vmatmul.mubr.bf16.gmra.mrb[156].mxu0 %v10485_v23  ;;  %8901 = vmatprep.subr.bf16.mxu1 %v11153_v35 }
 0x1fc   : > { %3458 = vmatprep.mubr.bf16.mxu0 %v10490_v28  ;;  %v3142_v28 = vrot.slane %v3140_v48, 3  ;;  %v1907_v9 = vsel %vm13434_vm11, %v1905_v7, %v10631_v12  ;;  %v13437_v7 = vld [vmem:[#allocation69_spill] sm:$0xff]  ;;  %vm13440_vm11 = vmmov %vm13438_vm10 }
 0x1fd   : > { %v3131_v34 = vshrl.u32 %v1907_v9, 16  ;;  %v3134_v53 = vshll.u32 %v1907_v9, 16  ;;  %v11176_v9 = vld [vmem:[#allocation5 + $0x238] sm:$0xff]  }
 0x1fe   : > { %v11147_v21 = vpop.f32.mrb[60].mxu0  ;;  %8909 = vmatpush3.bf16.msra.mxu1 %v11153_v35  ;;  %v3146_v58 = vor.u32 %v3145_v46, %v3142_v28  ;;  %v13439_v28 = vld [vmem:[#allocation75_spill] sm:$0xff] }
 0x1ff   : > { %v2914_v23 = vpop.f32.mrb[61].mxu0  ;;  %v3136_v35 = vrot.slane %v3134_v53, 4 }
 0x200   : > { %v11151_v60 = vpop.f32.mrb[62].mxu0  ;;  %v11161_v23 = vld [vmem:[#allocation5 + $0x228] sm:$0xff]  }
 0x201   : > { %v2917_v0 = vpop.f32.mrb[63].mxu0  ;;  %13436 = vst [vmem:[#allocation100_spill] sm:$0xff] %v11161_v23  ;;  %8902 = vmatprep.subr.bf16.mxu1 %v11161_v23 }
 0x202   : > { %8910 = vmatpush3.bf16.msra.mxu1 %v11161_v23 }
 0x203   : > { %3459 = vmatmul.mubr.bf16.gmra.mrb[160].mxu0 %v10608_v13  ;;  %v3133_v13 = vrot.slane %v3131_v34, 3  ;;  %8903 = vmatprep.subr.bf16.mxu1 %v11169_v42  ;;  %v13441_v34 = vld [vmem:[#allocation78_spill] sm:$0xff] }
 0x204   : > { %3466 = vmatprep.mubr.bf16.mxu0 %v13435_v10  ;;  %v3147_v10 = vsel %vm13438_vm10, %v13437_v7, %v3146_v58 }
 0x205   : > { %v3137_v46 = vor.u32 %v3136_v35, %v3133_v13  ;;  %v9256_v13 = vld [vmem:[#allocation5 + $0x188] sm:$0xff]  }
 0x206   : > { %v11163_v14 = vpop.f32.mrb[64].mxu0  ;;  %8911 = vmatpush3.bf16.msra.mxu1 %v11169_v42 }
 0x207   : > { %v2922_v0 = vpop.f32.mrb[65].mxu0  ;;  %8904 = vmatprep.subr.bf16.mxu1 %v11176_v9  ;;  %v3138_v53 = vsel %vm13440_vm11, %v3137_v46, %v10741_v50 }
 0x208   : > { %v11167_v12 = vpop.f32.mrb[66].mxu0 }
 0x209   : > { %v2925_v48 = vpop.f32.mrb[67].mxu0 }
 0x20a   : > { %8912 = vmatpush3.bf16.msra.mxu1 %v11176_v9 }
 0x20b   : > { %3467 = vmatmul.mubr.bf16.gmra.mrb[164].mxu0 %v13439_v28 }
 0x20c   : > { %3474 = vmatprep.mubr.bf16.mxu0 %v3147_v10  ;;  %v9255_v10 = vld [vmem:[#allocation5 + $0x180] sm:$0xff]  }
 0x20d   : > { %8730 = vmatmul.mubr.bf16.vlgmr.msra.gmra.mrb[0].mxu1 %v10909_v30 }
 0x20e   : > { %v2928_v0 = vpop.f32.mrb[68].mxu0  ;;  %8733 = vmatprep.mubr.bf16.mxu1 %v10932_v1 }
 0x20f   : > { %v2930_v23 = vpop.f32.mrb[69].mxu0  ;;  %v9257_v0 = vld [vmem:[#allocation5 + $0x190] sm:$0xff]  }
 0x210   : > { %v2931_v48 = vpop.f32.mrb[70].mxu0 }
 0x211   : > { %v2933_v58 = vpop.f32.mrb[71].mxu0 }
 0x213   : > { %3475 = vmatmul.mubr.bf16.gmra.mrb[168].mxu0 %v13441_v34 }
 0x214   : > { %8665 = vmatprep.mubr.bf16.mxu0 %v3138_v53 }
 0x215   : > { %8734 = vmatmul.mubr.bf16.gmra.mrb[4].mxu1 %v10945_v40 }
 0x216   : > { %8737 = vmatprep.mubr.bf16.mxu1 %v10971_v51 }
 0x21b   : > { %8666 = vmatmul.mubr.bf16.vlgmr.msra.gmra.mrb[4].mxu0 %v10760_v38 }
 0x21c   : > { %3913 = vmatpush1.bf16.msra.mxu0 %v9255_v10  ;;  %8669 = vmatprep.mubr.bf16.mxu0 %v10798_v8 }
 0x21d   : > { %3914 = vmatprep.subr.bf16.mxu0 %v13172_v56  ;;  %8738 = vmatmul.mubr.bf16.gmra.mrb[8].mxu1 %v10974_v44 }
 0x21e   : > { %v8619_v50 = vpop.f32.mrb[72].mxu0  ;;  %8741 = vmatprep.mubr.bf16.mxu1 %v10995_v26 }
 0x21f   : > { %v11191_v35 = vadd.f32 %v8619_v50, %v11048_v54  ;;  %v2985_v23 = vpop.f32.mrb[73].mxu0 }
 0x220   : > { %v11194_v7 = vadd.f32 %v2985_v23, %v11042_v31  ;;  %v8620_v46 = vpop.f32.mrb[74].mxu0  ;;  %3915 = vmatpush1.bf16.msra.mxu0 %v9256_v13  ;;  %v9258_v31 = vld [vmem:[#allocation5 + $0x198] sm:$0xff]   ;;  %v9259_v13 = vld [vmem:[#allocation5 + $0x1a0] sm:$0xff]  }
 0x221   : > { %v11197_v38 = vadd.f32 %v8620_v46, %v11050_v59  ;;  %v2988_v48 = vpop.f32.mrb[75].mxu0  ;;  %3916 = vmatprep.subr.bf16.mxu0 %v13172_v56 }
 0x222   : > { %v11201_v58 = vadd.f32 %v2988_v48, %v11044_v17 }
 0x223   : > { %8670 = vmatmul.mubr.bf16.gmra.mrb[172].mxu0 %v10801_v37 }
 0x224   : > { %3917 = vmatpush1.bf16.msra.mxu0 %v9257_v0  ;;  %8673 = vmatprep.mubr.bf16.mxu0 %v10842_v57 }
 0x225   : > { %3918 = vmatprep.subr.bf16.mxu0 %v13172_v56  ;;  %8742 = vmatmul.mubr.bf16.gmra.mrb[12].mxu1 %v10999_v15 }
 0x226   : > { %v8623_v54 = vpop.f32.mrb[76].mxu0  ;;  %8745 = vmatprep.mubr.bf16.mxu1 %v11019_v27 }
 0x227   : > { %v11209_v59 = vadd.f32 %v8623_v54, %v11061_v43  ;;  %v3001_v53 = vpop.f32.mrb[77].mxu0 }
 0x228   : > { %v11212_v17 = vadd.f32 %v3001_v53, %v11054_v11  ;;  %v8624_v10 = vpop.f32.mrb[78].mxu0  ;;  %3919 = vmatpush1.bf16.msra.mxu0 %v9258_v31  ;;  %v9260_v11 = vld [vmem:[#allocation5 + $0x1a8] sm:$0xff]   ;;  %v9261_v31 = vld [vmem:[#allocation5 + $0x1b0] sm:$0xff]  }
 0x229   : > { %v11215_v50 = vadd.f32 %v8624_v10, %v11063_v63  ;;  %v3004_v23 = vpop.f32.mrb[79].mxu0  ;;  %3920 = vmatprep.subr.bf16.mxu0 %v13172_v56 }
 0x22a   : > { %v11219_v46 = vadd.f32 %v3004_v23, %v11056_v3 }
 0x22b   : > { %8674 = vmatmul.mubr.bf16.gmra.mrb[176].mxu0 %v10856_v4 }
 0x22c   : > { %3921 = vmatpush1.bf16.msra.mxu0 %v9259_v13  ;;  %8677 = vmatprep.mubr.bf16.mxu0 %v10871_v47 }
 0x22d   : > { %3922 = vmatprep.subr.bf16.mxu0 %v13172_v56  ;;  %8746 = vmatmul.mubr.bf16.gmra.mrb[16].mxu1 %v11024_v41 }
 0x22e   : > { %v8627_v43 = vpop.f32.mrb[80].mxu0 }
 0x22f   : > { %v11227_v63 = vadd.f32 %v8627_v43, %v11073_v29  ;;  %v3017_v0 = vpop.f32.mrb[81].mxu0  ;;  %v9262_v29 = vld [vmem:[#allocation5 + $0x1b8] sm:$0xff]  }
 0x230   : > { %v11230_v3 = vadd.f32 %v3017_v0, %v11067_v18  ;;  %v8628_v48 = vpop.f32.mrb[82].mxu0  ;;  %3923 = vmatpush1.bf16.msra.mxu0 %v9260_v11  ;;  %v9263_v11 = vld [vmem:[#allocation5 + $0x1c0] sm:$0xff]  }
 0x231   : > { %v11233_v54 = vadd.f32 %v8628_v48, %v11075_v16  ;;  %v3020_v53 = vpop.f32.mrb[83].mxu0  ;;  %3924 = vmatprep.subr.bf16.mxu0 %v13172_v56 }
 0x232   : > { %v11237_v10 = vadd.f32 %v3020_v53, %v11069_v2 }
 0x233   : > { %8678 = vmatmul.mubr.bf16.gmra.mrb[180].mxu0 %v10878_v24 }
 0x234   : > { %3925 = vmatpush1.bf16.msra.mxu0 %v9261_v31  ;;  %8681 = vmatprep.mubr.bf16.mxu0 %v10687_v45 }
 0x235   : > { %3926 = vmatprep.subr.bf16.mxu0 %v13172_v56 }
 0x236   : > { %v8631_v18 = vpop.f32.mrb[84].mxu0 }
 0x237   : > { %v11244_v16 = vadd.f32 %v8631_v18, %v11085_v55  ;;  %v3033_v13 = vpop.f32.mrb[85].mxu0  ;;  %v9264_v55 = vld [vmem:[#allocation5 + $0x1c8] sm:$0xff]  }
 0x238   : > { %v11247_v23 = vadd.f32 %v3033_v13, %v11079_v36  ;;  %v8632_v2 = vpop.f32.mrb[86].mxu0  ;;  %3927 = vmatpush1.bf16.msra.mxu0 %v9262_v29 }
 0x239   : > { %v11250_v41 = vadd.f32 %v8632_v2, %v11087_v39  ;;  %v3036_v43 = vpop.f32.mrb[87].mxu0  ;;  %3928 = vmatprep.subr.bf16.mxu0 %v13172_v56 }
 0x23a   : > { %v11254_v45 = vadd.f32 %v3036_v43, %v11081_v25  ;;  %v9265_v25 = vld [vmem:[#allocation5 + $0x1d0] sm:$0xff]   ;;  %v3152_v43 = vshll.u32 %v10964_v20, 16 }
 0x23b   : > { %8682 = vmatmul.mubr.bf16.gmra.mrb[184].mxu0 %v10909_v30 }
 0x23c   : > { %3929 = vmatpush1.bf16.msra.mxu0 %v9263_v11  ;;  %8685 = vmatprep.mubr.bf16.mxu0 %v10932_v1  ;;  %v3149_v11 = vshrl.u32 %v10964_v20, 16 }
 0x23d   : > { %3930 = vmatprep.subr.bf16.mxu0 %v13172_v56 }
 0x23e   : > { %v8635_v36 = vpop.f32.mrb[88].mxu0 }
 0x23f   : > { %v11260_v0 = vadd.f32 %v8635_v36, %v11097_v33  ;;  %v3049_v39 = vpop.f32.mrb[89].mxu0  ;;  %v9266_v33 = vld [vmem:[#allocation5 + $0x1d8] sm:$0xff]  }
 0x240   : > { %v11263_v48 = vadd.f32 %v3049_v39, %v11091_v61  ;;  %v8636_v31 = vpop.f32.mrb[90].mxu0  ;;  %3931 = vmatpush1.bf16.msra.mxu0 %v9264_v55  ;;  %v9229_v39 = vld [vmem:[%s9811_s12 + $0x9c] ss:$0 sps:$4 sm:$0xff]  }
 0x241   : > { %v11266_v53 = vadd.f32 %v8636_v31, %v11099_v5  ;;  %v3052_v30 = vpop.f32.mrb[91].mxu0  ;;  %3932 = vmatprep.subr.bf16.mxu0 %v13172_v56 }
 0x242   : > { %v11270_v1 = vadd.f32 %v3052_v30, %v11093_v32  ;;  %v9267_v32 = vld [vmem:[#allocation5 + $0x1e0] sm:$0xff]   ;;  %v3154_v30 = vrot.slane %v3152_v43, 4 }
 0x243   : > { %8686 = vmatmul.mubr.bf16.gmra.mrb[188].mxu0 %v10945_v40 }
 0x244   : > { %3933 = vmatpush1.bf16.msra.mxu0 %v9265_v25  ;;  %8689 = vmatprep.mubr.bf16.mxu0 %v10971_v51  ;;  %v3151_v25 = vrot.slane %v3149_v11, 3 }
 0x245   : > { %3934 = vmatprep.subr.bf16.mxu0 %v13172_v56 }
 0x246   : > { %v8639_v61 = vpop.f32.mrb[92].mxu0 }
 0x247   : > { %v11276_v29 = vadd.f32 %v8639_v61, %v11114_v62  ;;  %v3065_v5 = vpop.f32.mrb[93].mxu0  ;;  %v558_v62 = vadd.s32 328, %v9825_v6 }
 0x248   : > { %v11279_v18 = vadd.f32 %v3065_v5, %v11107_v22  ;;  %v8640_v13 = vpop.f32.mrb[94].mxu0  ;;  %3935 = vmatpush1.bf16.msra.mxu0 %v9266_v33  ;;  %v9268_v22 = vld [vmem:[#allocation5 + $0x1e8] sm:$0xff]   ;;  %v9269_v33 = vld [vmem:[#allocation5 + $0x1f0] sm:$0xff]  }
 0x249   : > { %v11282_v40 = vadd.f32 %v8640_v13, %v11116_v49  ;;  %v3068_v2 = vpop.f32.mrb[95].mxu0  ;;  %3936 = vmatprep.subr.bf16.mxu0 %v13172_v56  ;;  %v599_v49 = vadd.s32 8, %v558_v62  ;;  %v13442_v5 = vld [vmem:[#allocation96_spill] sm:$0xff]  ;;  %v9270_v62 = vld [vmem:[#allocation5 + $0x1f8] sm:$0xff]  }
 0x24a   : > { %v11286_v51 = vadd.f32 %v3068_v2, %v11110_v52 }
 0x24b   : > { %8690 = vmatmul.mubr.bf16.gmra.mrb[192].mxu0 %v10974_v44  ;;  %v891_v36 = vand.u32 15, %v599_v49 }
 0x24c   : > { %8693 = vmatprep.mubr.bf16.mxu0 %v10995_v26  ;;  %3937 = vmatpush1.bf16.msra.mxu0 %v9267_v32  ;;  %v13443_v32 = vld [vmem:[#allocation14_spill] sm:$0xff] }
 0x24d   : > { %3938 = vmatprep.subr.bf16.mxu0 %v13172_v56  ;;  %vm1460_vm10 = vcmp.ne.s32.totalorder %v891_v36, 0 }
 0x24e   : > { %v8643_v55 = vpop.f32.mrb[96].mxu0  ;;  %vm1586_vm11 = vmpackc.low %vm1460_vm10, %vm1460_vm10 }
 0x24f   : > { %v11296_v52 = vadd.f32 %v8643_v55, %v11147_v21  ;;  %v3081_v31 = vpop.f32.mrb[97].mxu0  ;;  %v1628_v13 = vsel %vm1586_vm11, 65537, %v13172_v56  ;;  %vm13445_vm11 = vsmask.f32 4352 }
 0x250   : > { %v11299_v44 = vadd.f32 %v3081_v31, %v11125_v19  ;;  %v8644_v26 = vpop.f32.mrb[98].mxu0  ;;  %3939 = vmatpush1.bf16.msra.mxu0 %v9268_v22  ;;  %v11310_v19 = vsel %vm13073_vm6, %v9229_v39, 0  ;;  %v7797_v2 = vcombine.low %v13443_v32, %v1628_v13  ;;  %v13446_v31 = vld [vmem:[#allocation94_spill] sm:$0xff]  ;;  %vm13448_vm6 = vcmask 1046528   ;;  %v13449_v13 = vld [vmem:[#allocation20_spill] sm:$0xff] }
 0x251   : > { %v11302_v20 = vadd.f32 %v8644_v26, %v11151_v60  ;;  %v3084_v61 = vpop.f32.mrb[99].mxu0  ;;  %3940 = vmatprep.subr.bf16.mxu0 %v13172_v56  ;;  %v3155_v60 = vor.u32 %v3154_v30, %v3151_v25  ;;  %v13447_v26 = vld [vmem:[#allocation90_spill] sm:$0xff] }
 0x252   : > { %v11306_v21 = vadd.f32 %v3084_v61, %v13442_v5  ;;  %vm1712_vm10 = vcmp.ne.s16.totalorder %v7797_v2, 0 }
 0x253   : > { %8694 = vmatmul.mubr.bf16.gmra.mrb[196].mxu0 %v10999_v15  ;;  %v1733_v11 = vsel %vm1712_vm10, %v11310_v19, 0  ;;  %v13444_v15 = vld [vmem:[#allocation91_spill] sm:$0xff] }
 0x254   : > { %8697 = vmatprep.mubr.bf16.mxu0 %v11019_v27  ;;  %3941 = vmatpush1.bf16.msra.mxu0 %v9269_v33  ;;  %v3668_v49 = vrot.slane %v1733_v11, 1  ;;  %v3156_v39 = vsel %vm13445_vm11, %v13444_v15, %v3155_v60 }
 0x255   : > { %3942 = vmatprep.subr.bf16.mxu0 %v13172_v56 }
 0x256   : > { %v8647_v22 = vpop.f32.mrb[100].mxu0  ;;  %v3669_v25 = vsel %vm13448_vm6, %v13447_v26, %v3668_v49  ;;  %v3755_v5 = vshrl.u32 %v3668_v49, 16  ;;  %v13450_v26 = vld [vmem:[#allocation92_spill] sm:$0xff]  ;;  %vm13451_vm6 = vmmov %vm13445_vm11 }
 0x257   : > { %v3097_v43 = vpop.f32.mrb[101].mxu0  ;;  %v3728_v33 = vshrl.u32 %v3669_v25, 16  ;;  %v3731_v61 = vshll.u32 %v3669_v25, 16  ;;  %vm13452_vm10 = vmmov %vm13451_vm6  ;;  %v13454_v25 = vld [vmem:[#allocation23_spill] sm:$0xff] }
 0x258   : > { %v11318_v55 = vadd.f32 %v3097_v43, %v11163_v14  ;;  %v8648_v36 = vpop.f32.mrb[102].mxu0  ;;  %3943 = vmatpush1.bf16.msra.mxu0 %v9270_v62  ;;  %v3758_v14 = vshll.u32 %v3668_v49, 16  ;;  %v3757_v60 = vrot.slane %v3755_v5, 3  ;;  %v13453_v49 = vld [vmem:[#allocation21_spill] sm:$0xff]  ;;  %v13458_v5 = vld [vmem:[#allocation26_spill] sm:$0xff] }
 0x259   : > { %v3100_v27 = vpop.f32.mrb[103].mxu0  ;;  %8701 = vmatprep.subr.bf16.mxu0 %v13446_v31  ;;  %v3730_v2 = vrot.slane %v3728_v33, 3  ;;  %v3733_v22 = vrot.slane %v3731_v61, 4  ;;  %v13455_v33 = vld [vmem:[#allocation95_spill] sm:$0xff]  ;;  %v13456_v61 = vld [vmem:[#allocation98_spill] sm:$0xff] }
 0x25a   : > { %v11326_v30 = vadd.f32 %v3100_v27, %v11167_v12  ;;  %v3760_v62 = vrot.slane %v3758_v14, 4  ;;  %v13459_v14 = vld [vmem:[#allocation99_spill] sm:$0xff] }
 0x25b   : > { %8698 = vmatmul.mubr.bf16.gmra.mrb[200].mxu0 %v3156_v39  ;;  %v3734_v43 = vor.u32 %v3733_v22, %v3730_v2 }
 0x25c   : > { %3944 = vmatprep.mubr.bf16.mxu0 %v13449_v13  ;;  %v3761_v15 = vor.u32 %v3760_v62, %v3757_v60 }
 0x25d   : > { %v3735_v12 = vsel %vm13451_vm6, %v13450_v26, %v3734_v43 }
 0x25e   : > { %v3340_v11 = vpop.f32.mrb[104].mxu0  ;;  %8749 = vmatprep.mubr.bf16.mxu1 %v3735_v12  ;;  %v3762_v39 = vsel %vm13452_vm10, %v3734_v43, %v3761_v15  ;;  %v13461_v43 = vld [vmem:[#allocation28_spill] sm:$0xff]  ;;  %vm13485_vm10 = vsmask.f32 7424 }
 0x25f   : > { %v3342_v36 = vpop.f32.mrb[105].mxu0  ;;  %8750 = vmatmul.mubr.bf16.gmra.mrb[20].mxu1 %v3762_v39  ;;  %v13460_v11 = vld [vmem:[#allocation54_spill] sm:$0xff]  ;;  %v13463_v15 = vld [vmem:[#allocation100_spill] sm:$0xff] }
 0x260   : > { %v3343_v24 = vpop.f32.mrb[106].mxu0  ;;  %v13462_v36 = vld [vmem:[#allocation29_spill] sm:$0xff] }
 0x261   : > { %v3345_v27 = vpop.f32.mrb[107].mxu0  ;;  %v13457_v24 = vld [vmem:[#allocation25_spill] sm:$0xff] }
 0x263   : > { %3945 = vmatmul.mubr.bf16.vlgmr.msra.gmra.mrb[204].mxu0 %v13453_v49  ;;  %v13464_v49 = vld [vmem:[#allocation30_spill] sm:$0xff] }
 0x264   : > { %8702 = vmatpush3.bf16.msra.mxu0 %v13446_v31  ;;  %3952 = vmatprep.mubr.bf16.mxu0 %v13454_v25  ;;  %v13465_v25 = vld [vmem:[#allocation31_spill] sm:$0xff] }
 0x265   : > { %8703 = vmatprep.subr.bf16.mxu0 %v13455_v33 }
 0x268   : > { %8704 = vmatpush3.bf16.msra.mxu0 %v13455_v33 }
 0x269   : > { %8705 = vmatprep.subr.bf16.mxu0 %v13456_v61 }
 0x26b   : > { %3953 = vmatmul.mubr.bf16.gmra.mrb[4].mxu0 %v13457_v24 }
 0x26c   : > { %3960 = vmatprep.mubr.bf16.mxu0 %v13458_v5  ;;  %8706 = vmatpush3.bf16.msra.mxu0 %v13456_v61 }
 0x26d   : > { %8707 = vmatprep.subr.bf16.mxu0 %v13459_v14 }
 0x26e   : > { %v3356_v13 = vpop.f32.mrb[108].mxu0 }
 0x26f   : > { %v11343_v2 = vadd.f32 %v3356_v13, %v11194_v7  ;;  %v3358_v31 = vpop.f32.mrb[109].mxu0  ;;  %v13467_v13 = vld [vmem:[#allocation34_spill] sm:$0xff] }
 0x270   : > { %v3359_v22 = vpop.f32.mrb[110].mxu0  ;;  %8708 = vmatpush3.bf16.msra.mxu0 %v13459_v14  ;;  %v13466_v14 = vld [vmem:[#allocation33_spill] sm:$0xff] }
 0x271   : > { %v11347_v60 = vadd.f32 %v3359_v22, %v11201_v58  ;;  %v3361_v62 = vpop.f32.mrb[111].mxu0  ;;  %8709 = vmatprep.subr.bf16.mxu0 %v13460_v11 }
 0x273   : > { %3961 = vmatmul.mubr.bf16.gmra.mrb[208].mxu0 %v13461_v43  ;;  %v13468_v43 = vld [vmem:[#allocation35_spill] sm:$0xff] }
 0x274   : > { %3968 = vmatprep.mubr.bf16.mxu0 %v13462_v36  ;;  %8710 = vmatpush3.bf16.msra.mxu0 %v13460_v11 }
 0x275   : > { %8711 = vmatprep.subr.bf16.mxu0 %v13463_v15 }
 0x276   : > { %v3364_v7 = vpop.f32.mrb[112].mxu0 }
 0x277   : > { %v11355_v26 = vadd.f32 %v3364_v7, %v11191_v35  ;;  %v3366_v12 = vpop.f32.mrb[113].mxu0 }
 0x278   : > { %v3367_v27 = vpop.f32.mrb[114].mxu0  ;;  %8712 = vmatpush3.bf16.msra.mxu0 %v13463_v15 }
 0x279   : > { %v11359_v58 = vadd.f32 %v3367_v27, %v11197_v38  ;;  %v3369_v39 = vpop.f32.mrb[115].mxu0  ;;  %8713 = vmatprep.subr.bf16.mxu0 %v11169_v42  ;;  %v13470_v27 = vld [vmem:[#allocation41_spill] sm:$0xff] }
 0x27a   : > { %v13471_v39 = vld [vmem:[#allocation39_spill] sm:$0xff] }
 0x27b   : > { %3969 = vmatmul.mubr.bf16.gmra.mrb[212].mxu0 %v13464_v49 }
 0x27c   : > { %3976 = vmatprep.mubr.bf16.mxu0 %v13465_v25  ;;  %8714 = vmatpush3.bf16.msra.mxu0 %v11169_v42 }
 0x27d   : > { %8715 = vmatprep.subr.bf16.mxu0 %v11176_v9 }
 0x27e   : > { %v3372_v35 = vpop.f32.mrb[116].mxu0 }
 0x27f   : > { %v11367_v33 = vadd.f32 %v3372_v35, %v11212_v17  ;;  %v3374_v61 = vpop.f32.mrb[117].mxu0 }
 0x280   : > { %v3375_v24 = vpop.f32.mrb[118].mxu0  ;;  %8716 = vmatpush3.bf16.msra.mxu0 %v11176_v9  ;;  %v13469_v9 = vld [vmem:[#allocation37_spill] sm:$0xff] }
 0x281   : > { %v11371_v38 = vadd.f32 %v3375_v24, %v11219_v46  ;;  %v3377_v5 = vpop.f32.mrb[119].mxu0  ;;  %v13472_v24 = vld [vmem:[#allocation44_spill] sm:$0xff] }
 0x282   : > { %v13473_v5 = vld [vmem:[#allocation43_spill] sm:$0xff] }
 0x283   : > { %3977 = vmatmul.mubr.bf16.gmra.mrb[216].mxu0 %v13466_v14 }
 0x284   : > { %3984 = vmatprep.mubr.bf16.mxu0 %v13467_v13 }
 0x286   : > { %v3380_v31 = vpop.f32.mrb[120].mxu0 }
 0x287   : > { %v11376_v42 = vadd.f32 %v3380_v31, %v11209_v59  ;;  %v3382_v22 = vpop.f32.mrb[121].mxu0 }
 0x288   : > { %v3383_v62 = vpop.f32.mrb[122].mxu0 }
 0x289   : > { %v11379_v17 = vadd.f32 %v3383_v62, %v11215_v50  ;;  %v3385_v11 = vpop.f32.mrb[123].mxu0  ;;  %v13474_v62 = vld [vmem:[#allocation47_spill] sm:$0xff] }
 0x28a   : > { %v13475_v11 = vld [vmem:[#allocation46_spill] sm:$0xff] }
 0x28b   : > { %3985 = vmatmul.mubr.bf16.gmra.mrb[220].mxu0 %v13468_v43 }
 0x28c   : > { %3992 = vmatprep.mubr.bf16.mxu0 %v13469_v9 }
 0x28e   : > { %v3388_v46 = vpop.f32.mrb[124].mxu0 }
 0x28f   : > { %v11384_v36 = vadd.f32 %v3388_v46, %v11230_v3  ;;  %v3390_v15 = vpop.f32.mrb[125].mxu0 }
 0x290   : > { %v3391_v7 = vpop.f32.mrb[126].mxu0 }
 0x291   : > { %v11387_v12 = vadd.f32 %v3391_v7, %v11237_v10  ;;  %v3393_v59 = vpop.f32.mrb[127].mxu0  ;;  %v13476_v7 = vld [vmem:[#allocation48_spill] sm:$0xff] }
 0x292   : > { %v13477_v59 = vld [vmem:[#allocation49_spill] sm:$0xff] }
 0x293   : > { %3993 = vmatmul.mubr.bf16.gmra.mrb[224].mxu0 %v13470_v27 }
 0x294   : > { %4000 = vmatprep.mubr.bf16.mxu0 %v13471_v39 }
 0x296   : > { %v3396_v50 = vpop.f32.mrb[128].mxu0 }
 0x297   : > { %v11392_v49 = vadd.f32 %v3396_v50, %v11227_v63  ;;  %v3398_v25 = vpop.f32.mrb[129].mxu0 }
 0x298   : > { %v3399_v35 = vpop.f32.mrb[130].mxu0 }
 0x299   : > { %v11395_v61 = vadd.f32 %v3399_v35, %v11233_v54  ;;  %v3401_v3 = vpop.f32.mrb[131].mxu0  ;;  %v13478_v35 = vld [vmem:[#allocation52_spill] sm:$0xff] }
 0x29a   : > { %v13479_v3 = vld [vmem:[#allocation51_spill] sm:$0xff] }
 0x29b   : > { %4001 = vmatmul.mubr.bf16.gmra.mrb[228].mxu0 %v13472_v24 }
 0x29c   : > { %4008 = vmatprep.mubr.bf16.mxu0 %v13473_v5 }
 0x29e   : > { %v3404_v10 = vpop.f32.mrb[132].mxu0 }
 0x29f   : > { %v11400_v14 = vadd.f32 %v3404_v10, %v11247_v23  ;;  %v3406_v13 = vpop.f32.mrb[133].mxu0 }
 0x2a0   : > { %v3407_v31 = vpop.f32.mrb[134].mxu0 }
 0x2a1   : > { %v11403_v22 = vadd.f32 %v3407_v31, %v11254_v45  ;;  %v3409_v63 = vpop.f32.mrb[135].mxu0  ;;  %v557_v31 = vadd.s32 320, %v9825_v6  ;;  %v13483_v6 = vld [vmem:[#allocation61_spill] sm:$0xff] }
 0x2a2   : > { %v13480_v63 = vld [vmem:[#allocation58_spill] sm:$0xff] }
 0x2a3   : > { %4009 = vmatmul.mubr.bf16.gmra.mrb[232].mxu0 %v13474_v62 }
 0x2a4   : > { %4016 = vmatprep.mubr.bf16.mxu0 %v13475_v11  ;;  %v598_v11 = vadd.s32 8, %v557_v31 }
 0x2a6   : > { %v3412_v54 = vpop.f32.mrb[136].mxu0 }
 0x2a7   : > { %v11408_v43 = vadd.f32 %v3412_v54, %v11244_v16  ;;  %v3414_v9 = vpop.f32.mrb[137].mxu0 }
 0x2a8   : > { %v3415_v46 = vpop.f32.mrb[138].mxu0 }
 0x2a9   : > { %v11411_v15 = vadd.f32 %v3415_v46, %v11250_v41  ;;  %v3417_v23 = vpop.f32.mrb[139].mxu0 }
 0x2ab   : > { %4017 = vmatmul.mubr.bf16.gmra.mrb[236].mxu0 %v13476_v7  ;;  %v884_v7 = vand.u32 15, %v598_v11 }
 0x2ac   : > { %4024 = vmatprep.mubr.bf16.mxu0 %v13477_v59  ;;  %v13482_v59 = vld [vmem:[#allocation60_spill] sm:$0xff] }
 0x2ad   : > { %vm1144_vm11 = vcmp.ne.s32.totalorder %v884_v7, 15 }
 0x2ae   : > { %v3420_v45 = vpop.f32.mrb[140].mxu0  ;;  %vm1270_vm6 = vmpackc.low %vm1144_vm11, %vm1144_vm11 }
 0x2af   : > { %v11416_v27 = vadd.f32 %v3420_v45, %v11263_v48  ;;  %v3422_v39 = vpop.f32.mrb[141].mxu0 }
 0x2b0   : > { %v3423_v50 = vpop.f32.mrb[142].mxu0 }
 0x2b1   : > { %v11419_v25 = vadd.f32 %v3423_v50, %v11270_v1  ;;  %v3425_v16 = vpop.f32.mrb[143].mxu0  ;;  %v13481_v1 = vld [vmem:[#allocation55_spill] sm:$0xff] }
 0x2b3   : > { %4025 = vmatmul.mubr.bf16.gmra.mrb[240].mxu0 %v13478_v35 }
 0x2b4   : > { %4032 = vmatprep.mubr.bf16.mxu0 %v13479_v3  ;;  %v13484_v3 = vld [vmem:[#allocation57_spill] sm:$0xff] }
 0x2b6   : > { %v3428_v41 = vpop.f32.mrb[144].mxu0 }
 0x2b7   : > { %v11424_v24 = vadd.f32 %v3428_v41, %v11260_v0  ;;  %v3430_v5 = vpop.f32.mrb[145].mxu0 }
 0x2b8   : > { %v3431_v10 = vpop.f32.mrb[146].mxu0  ;;  %v13486_v5 = vld [vmem:[#allocation68_spill] sm:$0xff] }
 0x2b9   : > { %v11427_v13 = vadd.f32 %v3431_v10, %v11266_v53  ;;  %v3433_v48 = vpop.f32.mrb[147].mxu0  ;;  %v3660_v53 = vshll.u32 %v11310_v19, 16  ;;  %v13487_v10 = vld [vmem:[#allocation70_spill] sm:$0xff] }
 0x2ba   : > { %v1312_v48 = vsel %vm1270_vm6, 65537, %v13172_v56  ;;  %v13488_v56 = vld [vmem:[#allocation73_spill] sm:$0xff]  ;;  %vm13490_vm6 = vsmask.f32 4352 }
 0x2bb   : > { %4033 = vmatmul.mubr.bf16.gmra.mrb[244].mxu0 %v13480_v63  ;;  %v3662_v39 = vrot.slane %v3660_v53, 1  ;;  %v7776_v11 = vcombine.low %v1312_v48, %v13443_v32 }
 0x2bc   : > { %4040 = vmatprep.mubr.bf16.mxu0 %v13481_v1 }
 0x2bd   : > { %v3663_v41 = vsel %vm13485_vm10, %v13484_v3, %v3662_v39  ;;  %vm1397_vm11 = vcmp.ne.s16.totalorder %v7776_v11, 0  ;;  %vm13491_vm10 = vmmov %vm13490_vm6 }
 0x2be   : > { %v3436_v62 = vpop.f32.mrb[148].mxu0  ;;  %v3719_v31 = vshrl.u32 %v3663_v41, 16  ;;  %v3722_v63 = vshll.u32 %v3663_v41, 16  ;;  %v13489_v41 = vld [vmem:[#allocation71_spill] sm:$0xff] }
 0x2bf   : > { %v11433_v54 = vadd.f32 %v3436_v62, %v11279_v18  ;;  %v3438_v9 = vpop.f32.mrb[149].mxu0 }
 0x2c0   : > { %v3439_v0 = vpop.f32.mrb[150].mxu0  ;;  %v3721_v53 = vrot.slane %v3719_v31, 3  ;;  %v3724_v7 = vrot.slane %v3722_v63, 4 }
 0x2c1   : > { %v11436_v46 = vadd.f32 %v3439_v0, %v11286_v51  ;;  %v3441_v23 = vpop.f32.mrb[151].mxu0 }
 0x2c3   : > { %4041 = vmatmul.mubr.bf16.gmra.mrb[248].mxu0 %v13482_v59 }
 0x2c4   : > { %4048 = vmatprep.mubr.bf16.mxu0 %v13483_v6  ;;  %v3725_v6 = vor.u32 %v3724_v7, %v3721_v53  ;;  %v13492_v53 = vld [vmem:[#allocation80_spill] sm:$0xff] }
 0x2c6   : > { %v3444_v45 = vpop.f32.mrb[152].mxu0 }
 0x2c7   : > { %v11442_v50 = vadd.f32 %v3444_v45, %v11276_v29  ;;  %v3446_v18 = vpop.f32.mrb[153].mxu0  ;;  %v3664_v29 = vshrl.u32 %v11310_v19, 16 }
 0x2c8   : > { %v3447_v16 = vpop.f32.mrb[154].mxu0 }
 0x2c9   : > { %v11445_v35 = vadd.f32 %v3447_v16, %v11282_v40  ;;  %v3449_v51 = vpop.f32.mrb[155].mxu0  ;;  %v3666_v59 = vor.u32 %v3664_v29, %v3662_v39 }
 0x2cb   : > { %4049 = vmatmul.mubr.bf16.gmra.mrb[252].mxu0 %v13486_v5  ;;  %v3746_v45 = vshrl.u32 %v3666_v59, 16 }
 0x2cc   : > { %4056 = vmatprep.mubr.bf16.mxu0 %v13487_v10 }
 0x2cd   : > { %v3748_v5 = vrot.slane %v3746_v45, 3 }
 0x2ce   : > { %v3452_v1 = vpop.f32.mrb[156].mxu0 }
 0x2cf   : > { %v11454_v62 = vadd.f32 %v3452_v1, %v11299_v44  ;;  %v3454_v40 = vpop.f32.mrb[157].mxu0  ;;  %v3749_v44 = vshll.u32 %v3666_v59, 16 }
 0x2d0   : > { %v3455_v9 = vpop.f32.mrb[158].mxu0 }
 0x2d1   : > { %v11458_v0 = vadd.f32 %v3455_v9, %v11306_v21  ;;  %v3457_v23 = vpop.f32.mrb[159].mxu0  ;;  %v1418_v21 = vsel %vm1397_vm11, %v11310_v19, 0  ;;  %v3751_v10 = vrot.slane %v3749_v44, 4  ;;  %v13493_v44 = vld [vmem:[#allocation79_spill] sm:$0xff]  ;;  %vm13494_vm11 = vmmov %vm13490_vm6 }
 0x2d2   : > { %v3737_v48 = vshrl.u32 %v1418_v21, 16  ;;  %v3740_v31 = vshll.u32 %v1418_v21, 16 }
 0x2d3   : > { %4057 = vmatmul.mubr.bf16.gmra.mrb[0].mxu0 %v13439_v28  ;;  %v3726_v28 = vsel %vm13490_vm6, %v13489_v41, %v3725_v6  ;;  %vm13507_vm6 = vcmask 1043456  }
 0x2d4   : > { %4064 = vmatprep.mubr.bf16.mxu0 %v13488_v56  ;;  %v3739_v1 = vrot.slane %v3737_v48, 3 }
 0x2d6   : > { %v3460_v18 = vpop.f32.mrb[160].mxu0 }
 0x2d7   : > { %v11463_v16 = vadd.f32 %v3460_v18, %v11296_v52  ;;  %v3462_v32 = vpop.f32.mrb[161].mxu0  ;;  %v3752_v52 = vor.u32 %v3751_v10, %v3748_v5 }
 0x2d8   : > { %v3463_v51 = vpop.f32.mrb[162].mxu0 }
 0x2d9   : > { %v11467_v3 = vadd.f32 %v3463_v51, %v11302_v20  ;;  %v3465_v39 = vpop.f32.mrb[163].mxu0  ;;  %v3742_v20 = vrot.slane %v3740_v31, 4  ;;  %v3753_v23 = vsel %vm13491_vm10, %v3725_v6, %v3752_v52 }
 0x2db   : > { %4065 = vmatmul.mubr.bf16.gmra.mrb[8].mxu0 %v13441_v34  ;;  %v3743_v34 = vor.u32 %v3742_v20, %v3739_v1  ;;  %v13501_v20 = vld [vmem:[#allocation86_spill] sm:$0xff] }
 0x2dc   : > { %4072 = vmatprep.mubr.bf16.mxu0 %v3726_v28 }
 0x2dd   : > { %v3744_v18 = vsel %vm13494_vm11, %v13493_v44, %v3743_v34 }
 0x2de   : > { %v3468_v63 = vpop.f32.mrb[164].mxu0 }
 0x2df   : > { %v11473_v29 = vadd.f32 %v3468_v63, %v11318_v55  ;;  %v3470_v19 = vpop.f32.mrb[165].mxu0 }
 0x2e0   : > { %v3471_v40 = vpop.f32.mrb[166].mxu0  ;;  %v11480_v7 = vpop.f32.mrb[0].mxu1 }
 0x2e1   : > { %v11476_v11 = vadd.f32 %v3471_v40, %v11326_v30  ;;  %v3473_v9 = vpop.f32.mrb[167].mxu0  ;;  %v11482_v56 = vpop.f32.mrb[1].mxu1 }
 0x2e2   : > { %v11484_v45 = vpop.f32.mrb[2].mxu1 }
 0x2e3   : > { %4073 = vmatmul.mubr.bf16.gmra.mrb[12].mxu0 %v13492_v53  ;;  %v11488_v32 = vpop.f32.mrb[3].mxu1 }
 0x2e4   : > { %4080 = vmatprep.mubr.bf16.mxu0 %v3753_v23 }
 0x2e6   : > { %v3476_v59 = vpop.f32.mrb[168].mxu0 }
 0x2e7   : > { %v3478_v55 = vpop.f32.mrb[169].mxu0 }
 0x2e8   : > { %v3479_v30 = vpop.f32.mrb[170].mxu0  ;;  %v11493_v6 = vpop.f32.mrb[4].mxu1 }
 0x2e9   : > { %v3481_v21 = vpop.f32.mrb[171].mxu0  ;;  %v11495_v39 = vpop.f32.mrb[5].mxu1 }
 0x2ea   : > { %v11500_v5 = vpop.f32.mrb[6].mxu1 }
 0x2eb   : > { %4081 = vmatmul.mubr.bf16.gmra.mrb[16].mxu0 %v3744_v18 }
 0x2ec   : > { %8717 = vmatprep.mubr.bf16.mxu0 %v10798_v8  ;;  %v11505_v8 = vpop.f32.mrb[7].mxu1 }
 0x2f3   : > { %8718 = vmatmul.mubr.bf16.vlgmr.msra.gmra.mrb[4].mxu0 %v10801_v37 }
 0x2f4   : > { %8721 = vmatprep.mubr.bf16.mxu0 %v10842_v57 }
 0x2f6   : > { %v8671_v51 = vpop.f32.mrb[172].mxu0 }
 0x2f7   : > { %v11498_v41 = vadd.f32 %v8671_v51, %v11355_v26  ;;  %v3533_v28 = vpop.f32.mrb[173].mxu0 }
 0x2f8   : > { %v11503_v10 = vadd.f32 %v3533_v28, %v11343_v2  ;;  %v8672_v48 = vpop.f32.mrb[174].mxu0 }
 0x2f9   : > { %v11508_v37 = vadd.f32 %v8672_v48, %v11359_v58  ;;  %v3536_v57 = vpop.f32.mrb[175].mxu0 }
 0x2fa   : > { %v11511_v31 = vadd.f32 %v3536_v57, %v11347_v60 }
 0x2fb   : > { %13495 = vst [vmem:[#allocation69_spill] sm:$0xff] %v11508_v37  ;;  %8722 = vmatmul.mubr.bf16.gmra.mrb[20].mxu0 %v10856_v4  ;;  %v11528_v4 = vpop.f32.mrb[8].mxu1  ;;  %v9290_v37 = vld [vmem:[#allocation7 + $0xe8] sm:$0xff]  }
 0x2fc   : > { %13496 = vst [vmem:[#allocation75_spill] sm:$0xff] %v11511_v31  ;;  %8725 = vmatprep.mubr.bf16.mxu0 %v10871_v47  ;;  %v11530_v40 = vpop.f32.mrb[9].mxu1 }
 0x2fd   : > { %v11535_v9 = vpop.f32.mrb[10].mxu1 }
 0x2fe   : > { %v8675_v26 = vpop.f32.mrb[176].mxu0  ;;  %v11540_v53 = vpop.f32.mrb[11].mxu1 }
 0x2ff   : > { %v11516_v52 = vadd.f32 %v8675_v26, %v11376_v42  ;;  %v3549_v2 = vpop.f32.mrb[177].mxu0  ;;  %v11560_v51 = vpop.f32.mrb[12].mxu1 }
 0x300   : > { %v11519_v63 = vadd.f32 %v3549_v2, %v11367_v33  ;;  %v8676_v19 = vpop.f32.mrb[178].mxu0  ;;  %v11562_v28 = vpop.f32.mrb[13].mxu1 }
 0x301   : > { %13497 = vst [vmem:[#allocation78_spill] sm:$0xff] %v11516_v52  ;;  %v11522_v58 = vadd.f32 %v8676_v19, %v11379_v17  ;;  %v3552_v1 = vpop.f32.mrb[179].mxu0  ;;  %v11567_v57 = vpop.f32.mrb[14].mxu1 }
 0x302   : > { %13498 = vst [vmem:[#allocation96_spill] sm:$0xff] %v11519_v63  ;;  %v11525_v60 = vadd.f32 %v3552_v1, %v11371_v38  ;;  %v11572_v26 = vpop.f32.mrb[15].mxu1 }
 0x303   : > { %13499 = vst [vmem:[#allocation14_spill] sm:$0xff] %v11522_v58  ;;  %8726 = vmatmul.mubr.bf16.gmra.mrb[24].mxu0 %v13501_v20 }
 0x304   : > { %13500 = vst [vmem:[#allocation91_spill] sm:$0xff] %v11525_v60 }
 0x306   : > { %v8679_v47 = vpop.f32.mrb[180].mxu0 }
 0x307   : > { %v11533_v42 = vadd.f32 %v8679_v47, %v11392_v49  ;;  %v3565_v33 = vpop.f32.mrb[181].mxu0 }
 0x308   : > { %v11538_v17 = vadd.f32 %v3565_v33, %v11384_v36  ;;  %v8680_v23 = vpop.f32.mrb[182].mxu0 }
 0x309   : > { %v11543_v38 = vadd.f32 %v8680_v23, %v11395_v61  ;;  %v3568_v34 = vpop.f32.mrb[183].mxu0 }
 0x30a   : > { %v11546_v59 = vadd.f32 %v3568_v34, %v11387_v12  ;;  %v11592_v34 = vpop.f32.mrb[16].mxu1 }
 0x30e   : > { %v8683_v55 = vpop.f32.mrb[184].mxu0 }
 0x30f   : > { %v11549_v49 = vadd.f32 %v8683_v55, %v11408_v43  ;;  %v3581_v44 = vpop.f32.mrb[185].mxu0  ;;  %v11594_v55 = vpop.f32.mrb[17].mxu1 }
 0x310   : > { %v11552_v18 = vadd.f32 %v3581_v44, %v11400_v14  ;;  %v8684_v36 = vpop.f32.mrb[186].mxu0 }
 0x311   : > { %v11555_v30 = vadd.f32 %v8684_v36, %v11411_v15  ;;  %v3584_v21 = vpop.f32.mrb[187].mxu0  ;;  %v11599_v36 = vpop.f32.mrb[18].mxu1 }
 0x312   : > { %v11558_v61 = vadd.f32 %v3584_v21, %v11403_v22  ;;  %v11604_v21 = vpop.f32.mrb[19].mxu1 }
 0x316   : > { %v8687_v12 = vpop.f32.mrb[188].mxu0 }
 0x317   : > { %v11565_v43 = vadd.f32 %v8687_v12, %v11424_v24  ;;  %v3597_v48 = vpop.f32.mrb[189].mxu0 }
 0x318   : > { %v11570_v14 = vadd.f32 %v3597_v48, %v11416_v27  ;;  %v8688_v15 = vpop.f32.mrb[190].mxu0 }
 0x319   : > { %v11575_v22 = vadd.f32 %v8688_v15, %v11427_v13  ;;  %v3600_v2 = vpop.f32.mrb[191].mxu0 }
 0x31a   : > { %v11578_v19 = vadd.f32 %v3600_v2, %v11419_v25 }
 0x31e   : > { %v8691_v1 = vpop.f32.mrb[192].mxu0 }
 0x31f   : > { %v11581_v24 = vadd.f32 %v8691_v1, %v11442_v50  ;;  %v3613_v20 = vpop.f32.mrb[193].mxu0 }
 0x320   : > { %v11584_v47 = vadd.f32 %v3613_v20, %v11433_v54  ;;  %v8692_v27 = vpop.f32.mrb[194].mxu0 }
 0x321   : > { %v11587_v33 = vadd.f32 %v8692_v27, %v11445_v35  ;;  %v3616_v23 = vpop.f32.mrb[195].mxu0 }
 0x322   : > { %v11590_v13 = vadd.f32 %v3616_v23, %v11436_v46 }
 0x326   : > { %v8695_v25 = vpop.f32.mrb[196].mxu0 }
 0x327   : > { %v11597_v50 = vadd.f32 %v8695_v25, %v11463_v16  ;;  %v3629_v44 = vpop.f32.mrb[197].mxu0 }
 0x328   : > { %v11602_v54 = vadd.f32 %v3629_v44, %v11454_v62  ;;  %v8696_v35 = vpop.f32.mrb[198].mxu0 }
 0x329   : > { %v11607_v46 = vadd.f32 %v8696_v35, %v11467_v3  ;;  %v3632_v12 = vpop.f32.mrb[199].mxu0 }
 0x32a   : > { %v11610_v48 = vadd.f32 %v3632_v12, %v11458_v0 }
 0x32e   : > { %v8699_v15 = vpop.f32.mrb[200].mxu0 }
 0x32f   : > { %v3645_v2 = vpop.f32.mrb[201].mxu0 }
 0x330   : > { %v11613_v16 = vadd.f32 %v3645_v2, %v11473_v29  ;;  %v8700_v1 = vpop.f32.mrb[202].mxu0  ;;  %v9279_v29 = vld [vmem:[#allocation7 + $0x100] sm:$0xff]  }
 0x331   : > { %v3648_v20 = vpop.f32.mrb[203].mxu0  ;;  %v9280_v2 = vld [vmem:[#allocation7 + $0xc0] sm:$0xff]   ;;  %8189 = vmatprep.subr.bf16.mxu1 %v9279_v29  ;;  %v9285_v29 = vld [vmem:[#allocation7 + $0x118] sm:$0xff]  }
 0x332   : > { %v11616_v62 = vadd.f32 %v3648_v20, %v11476_v11  ;;  %v8751_v27 = vpop.f32.mrb[20].mxu1  ;;  %8190 = vmatpush3.bf16.msra.mxu1 %v9280_v2  ;;  %v9281_v11 = vld [vmem:[#allocation7 + $0x108] sm:$0xff]   ;;  %v9286_v2 = vld [vmem:[#allocation7 + $0xd8] sm:$0xff]  }
 0x333   : > { %v11618_v25 = vpop.f32.mrb[21].mxu1  ;;  %v9282_v20 = vld [vmem:[#allocation7 + $0xc8] sm:$0xff]   ;;  %8191 = vmatprep.subr.bf16.mxu1 %v9281_v11 }
 0x334   : > { %v8752_v44 = vpop.f32.mrb[22].mxu1 }
 0x335   : > { %v11620_v60 = vpop.f32.mrb[23].mxu1 }
 0x336   : > { %v3946_v23 = vpop.f32.mrb[204].mxu0  ;;  %8192 = vmatpush3.bf16.msra.mxu1 %v9282_v20 }
 0x337   : > { %v3948_v3 = vpop.f32.mrb[205].mxu0 }
 0x338   : > { %v3949_v35 = vpop.f32.mrb[206].mxu0 }
 0x339   : > { %v3951_v0 = vpop.f32.mrb[207].mxu0 }
 0x33a   : > { %v9283_v0 = vld [vmem:[#allocation7 + $0x110] sm:$0xff]  }
 0x33b   : > { %8193 = vmatprep.subr.bf16.mxu1 %v9283_v0 }
 0x346   : > { %v11622_v12 = vpop.f32.mrb[208].mxu0 }
 0x347   : > { %v3964_v15 = vpop.f32.mrb[209].mxu0 }
 0x348   : > { %v11624_v1 = vpop.f32.mrb[210].mxu0  ;;  %v9284_v15 = vld [vmem:[#allocation7 + $0xd0] sm:$0xff]  }
 0x349   : > { %13502 = vst [vmem:[#allocation94_spill] sm:$0xff] %v11624_v1  ;;  %v3967_v58 = vpop.f32.mrb[211].mxu0  ;;  %8194 = vmatpush3.bf16.msra.mxu1 %v9284_v15 }
 0x34a   : > { %8195 = vmatprep.subr.bf16.mxu1 %v9285_v29  ;;  %v9291_v29 = vld [vmem:[#allocation7 + $0x130] sm:$0xff]  }
 0x34d   : > { %8196 = vmatpush3.bf16.msra.mxu1 %v9286_v2  ;;  %v11642_v2 = vld [vmem:[%s12914_s2] ss:$0 sm:$0xff] }
 0x34e   : > { %v11626_v27 = vpop.f32.mrb[212].mxu0 }
 0x34f   : > { %v3972_v23 = vpop.f32.mrb[213].mxu0 }
 0x350   : > { %v11628_v3 = vpop.f32.mrb[214].mxu0  ;;  %v9287_v23 = vld [vmem:[#allocation7 + $0x120] sm:$0xff]  }
 0x351   : > { %v3975_v44 = vpop.f32.mrb[215].mxu0  ;;  %8197 = vmatprep.subr.bf16.mxu1 %v9287_v23 }
 0x352   : > { %v9288_v44 = vld [vmem:[#allocation7 + $0xe0] sm:$0xff]  }
 0x353   : > { %8198 = vmatpush3.bf16.msra.mxu1 %v9288_v44 }
 0x356   : > { %v11630_v35 = vpop.f32.mrb[216].mxu0 }
 0x357   : > { %13503 = vst [vmem:[#allocation90_spill] sm:$0xff] %v11630_v35  ;;  %v3980_v63 = vpop.f32.mrb[217].mxu0 }
 0x358   : > { %v11632_v52 = vpop.f32.mrb[218].mxu0  ;;  %v9289_v63 = vld [vmem:[#allocation7 + $0x128] sm:$0xff]  }
 0x359   : > { %13504 = vst [vmem:[#allocation20_spill] sm:$0xff] %v11632_v52  ;;  %v3983_v58 = vpop.f32.mrb[219].mxu0  ;;  %8199 = vmatprep.subr.bf16.mxu1 %v9289_v63  ;;  %v9292_v52 = vld [vmem:[#allocation7 + $0xf0] sm:$0xff]   ;;  %v9293_v63 = vld [vmem:[#allocation7 + $0x138] sm:$0xff]  }
 0x35a   : > { %8200 = vmatpush3.bf16.msra.mxu1 %v9290_v37  ;;  %v9294_v37 = vld [vmem:[#allocation7 + $0xf8] sm:$0xff]  }
 0x35b   : > { %8201 = vmatprep.subr.bf16.mxu1 %v9291_v29 }
 0x35e   : > { %v11634_v11 = vpop.f32.mrb[220].mxu0  ;;  %8202 = vmatpush3.bf16.msra.mxu1 %v9292_v52 }
 0x35f   : > { %13505 = vst [vmem:[#allocation92_spill] sm:$0xff] %v11634_v11  ;;  %v3988_v20 = vpop.f32.mrb[221].mxu0  ;;  %8203 = vmatprep.subr.bf16.mxu1 %v9293_v63 }
 0x360   : > { %v11636_v31 = vpop.f32.mrb[222].mxu0 }
 0x361   : > { %13506 = vst [vmem:[#allocation21_spill] sm:$0xff] %v11636_v31  ;;  %v3991_v35 = vpop.f32.mrb[223].mxu0 }
 0x362   : > { %8204 = vmatpush3.bf16.msra.mxu1 %v9294_v37 }
 0x366   : > { %v3994_v0 = vpop.f32.mrb[224].mxu0 }
 0x367   : > { %v4172_v15 = vadd.f32 %v11482_v56, %v3994_v0  ;;  %v3996_v58 = vpop.f32.mrb[225].mxu0  ;;  %v11649_v56 = vld [vmem:[%s12915_s3] ss:$0 sm:$0xff] }
 0x368   : > { %v3997_v20 = vpop.f32.mrb[226].mxu0 }
 0x369   : > { %v4278_v35 = vadd.f32 %v4172_v15, %v11538_v17  ;;  %v4175_v23 = vadd.f32 %v11488_v32, %v3997_v20  ;;  %v3999_v44 = vpop.f32.mrb[227].mxu0 }
 0x36b   : > { %v4321_v0 = vmul.f32 %v11642_v2, %v4278_v35  ;;  %v4279_v58 = vadd.f32 %v4175_v23, %v11546_v59  ;;  %v11659_v23 = vld [vmem:[#allocation7 + $0x140] sm:$0xff]  }
 0x36c   : > { %8753 = vmatprep.subr.bf16.mxu1 %v11659_v23 }
 0x36d   : > { %v4364_v31 = vadd.f32 %v11649_v56, %v4321_v0  ;;  %v4322_v17 = vmul.f32 %v11642_v2, %v4279_v58 }
 0x36e   : > { %v4002_v32 = vpop.f32.mrb[228].mxu0 }
 0x36f   : > { %v4365_v15 = vadd.f32 %v11649_v56, %v4322_v17  ;;  %v4180_v29 = vadd.f32 %v11480_v7, %v4002_v32  ;;  %v4004_v20 = vpop.f32.mrb[229].mxu0  ;;  %v4400_v11 = vmax.f32 %v4364_v31, 0.0 }
 0x370   : > { %v4005_v44 = vpop.f32.mrb[230].mxu0 }
 0x371   : > { %v4401_v52 = vmax.f32 %v4365_v15, 0.0  ;;  %v4280_v1 = vadd.f32 %v4180_v29, %v11533_v42  ;;  %v4183_v35 = vadd.f32 %v11484_v45, %v4005_v44  ;;  %v4007_v59 = vpop.f32.mrb[231].mxu0 }
 0x373   : > { %v11661_v63 = vpack.c.bf16 %v4401_v52, %v4400_v11  ;;  %v4323_v0 = vmul.f32 %v11642_v2, %v4280_v1  ;;  %v4281_v37 = vadd.f32 %v4183_v35, %v11543_v38 }
 0x375   : > { %v4366_v7 = vadd.f32 %v11649_v56, %v4323_v0  ;;  %v4324_v31 = vmul.f32 %v11642_v2, %v4281_v37  ;;  %v13075_v35 = vrot.slane %v11661_v63, 4 }
 0x376   : > { %v4010_v58 = vpop.f32.mrb[232].mxu0 }
 0x377   : > { %v4367_v42 = vadd.f32 %v11649_v56, %v4324_v31  ;;  %v4188_v45 = vadd.f32 %v11495_v39, %v4010_v58  ;;  %v4012_v17 = vpop.f32.mrb[233].mxu0  ;;  %v4402_v15 = vmax.f32 %v4366_v7, 0.0 }
 0x378   : > { %v4013_v32 = vpop.f32.mrb[234].mxu0 }
 0x379   : > { %v4403_v11 = vmax.f32 %v4367_v42, 0.0  ;;  %v4282_v29 = vadd.f32 %v4188_v45, %v11552_v18  ;;  %v4191_v1 = vadd.f32 %v11505_v8, %v4013_v32  ;;  %v4015_v38 = vpop.f32.mrb[235].mxu0 }
 0x37b   : > { %v4727_v20 = vpack.c.bf16 %v4403_v11, %v4402_v15  ;;  %v4325_v44 = vmul.f32 %v11642_v2, %v4282_v29  ;;  %v4283_v52 = vadd.f32 %v4191_v1, %v11558_v61 }
 0x37d   : > { %v4770_v59 = vrot.slane %v4727_v20, 4  ;;  %v4368_v0 = vadd.f32 %v11649_v56, %v4325_v44  ;;  %v4326_v39 = vmul.f32 %v11642_v2, %v4283_v52 }
 0x37e   : > { %v4018_v37 = vpop.f32.mrb[236].mxu0 }
 0x37f   : > { %v4771_v18 = vsel %vm13507_vm6, %v13075_v35, %v4770_v59  ;;  %v4369_v8 = vadd.f32 %v11649_v56, %v4326_v39  ;;  %v4196_v7 = vadd.f32 %v11493_v6, %v4018_v37  ;;  %v4020_v31 = vpop.f32.mrb[237].mxu0  ;;  %v4404_v45 = vmax.f32 %v4368_v0, 0.0 }
 0x380   : > { %v4021_v58 = vpop.f32.mrb[238].mxu0  ;;  %v4822_v61 = vsel %vm10059_vm14, %v4771_v18, 0  ;;  %v4908_v29 = vshll.u32 %v4771_v18, 16  ;;  %v4841_v20 = vsel %vm10719_vm5, %v4771_v18, 0  ;;  %vm13510_vm14 = vmmov %vm13507_vm6 }
 0x381   : > { %v4405_v17 = vmax.f32 %v4369_v8, 0.0  ;;  %v4284_v32 = vadd.f32 %v4196_v7, %v11549_v49  ;;  %v4199_v15 = vadd.f32 %v11500_v5, %v4021_v58  ;;  %v4023_v11 = vpop.f32.mrb[239].mxu0  ;;  %v5304_v1 = vshrl.u32 %v4822_v61, 16  ;;  %vm13515_vm5 = vmmov %vm13507_vm6 }
 0x382   : > { %v5307_v39 = vshll.u32 %v4822_v61, 16  ;;  %v11692_v7 = vrot.slane %v4908_v29, 1  ;;  %v4912_v5 = vshrl.u32 %v4771_v18, 16  ;;  %v11694_v58 = vrot.slane %v4841_v20, 1  ;;  %vm13520_vm6 = vmmov %vm13491_vm10 }
 0x383   : > { %v4728_v44 = vpack.c.bf16 %v4405_v17, %v4404_v45  ;;  %v4327_v6 = vmul.f32 %v11642_v2, %v4284_v32  ;;  %v4285_v52 = vadd.f32 %v4199_v15, %v11555_v30  ;;  %v5306_v31 = vrot.slane %v5304_v1, 3 }
 0x384   : > { %v5309_v61 = vrot.slane %v5307_v39, 4 }
 0x385   : > { %v4772_v37 = vrot.slane %v4728_v44, 4  ;;  %v4370_v0 = vadd.f32 %v11649_v56, %v4327_v6  ;;  %v4328_v8 = vmul.f32 %v11642_v2, %v4285_v52 }
 0x386   : > { %v4026_v49 = vpop.f32.mrb[240].mxu0 }
 0x387   : > { %v4773_v42 = vsel %vm13510_vm14, %v4770_v59, %v4772_v37  ;;  %v4371_v45 = vadd.f32 %v11649_v56, %v4328_v8  ;;  %v4204_v17 = vadd.f32 %v11530_v40, %v4026_v49  ;;  %v4028_v30 = vpop.f32.mrb[241].mxu0  ;;  %v4406_v32 = vmax.f32 %v4370_v0, 0.0  ;;  %vm13522_vm14 = vmmov %vm13520_vm6 }
 0x388   : > { %v4029_v15 = vpop.f32.mrb[242].mxu0  ;;  %v4916_v11 = vshll.u32 %v4773_v42, 16  ;;  %v4823_v44 = vsel %vm10088_vm3, %v4773_v42, 0  ;;  %v4842_v18 = vsel %vm10522_vm7, %v4773_v42, 0  ;;  %v4914_v40 = vor.u32 %v4912_v5, %v11692_v7 }
 0x389   : > { %v4407_v1 = vmax.f32 %v4371_v45, 0.0  ;;  %v4286_v20 = vadd.f32 %v4204_v17, %v11570_v14  ;;  %v4207_v59 = vadd.f32 %v11540_v53, %v4029_v15  ;;  %v4031_v6 = vpop.f32.mrb[243].mxu0  ;;  %v5331_v52 = vshrl.u32 %v4823_v44, 16 }
 0x38a   : > { %v4918_v8 = vrot.slane %v4916_v11, 1  ;;  %v5334_v39 = vshll.u32 %v4823_v44, 16  ;;  %v11706_v0 = vrot.slane %v4842_v18, 1  ;;  %vm13513_vm3 = vsmask.f32 7424 }
 0x38b   : > { %v4729_v49 = vpack.c.bf16 %v4407_v1, %v4406_v32  ;;  %v4329_v30 = vmul.f32 %v11642_v2, %v4286_v20  ;;  %v4287_v38 = vadd.f32 %v4207_v59, %v11578_v19  ;;  %v5333_v29 = vrot.slane %v5331_v52, 3  ;;  %vm13518_vm11 = vmmov %vm13513_vm3 }
 0x38c   : > { %v4919_v45 = vsel %vm13513_vm3, %v4914_v40, %v4918_v8  ;;  %v5336_v35 = vrot.slane %v5334_v39, 4  ;;  %vm13514_vm7 = vcmask 1046528   ;;  %v11718_v15 = vor.u32 %v5309_v61, %v5306_v31 }
 0x38d   : > { %v11714_v53 = vsel %vm13514_vm7, %v11694_v58, %v11706_v0  ;;  %v4774_v14 = vrot.slane %v4729_v49, 4  ;;  %v4372_v5 = vadd.f32 %v11649_v56, %v4329_v30  ;;  %v4330_v17 = vmul.f32 %v11642_v2, %v4287_v38  ;;  %vm13526_vm7 = vmmov %vm13520_vm6 }
 0x38e   : > { %v4034_v32 = vpop.f32.mrb[244].mxu0  ;;  %v5313_v11 = vshrl.u32 %v4919_v45, 16  ;;  %v5316_v44 = vshll.u32 %v4919_v45, 16  ;;  %v4920_v19 = vshrl.u32 %v4773_v42, 16  ;;  %v5337_v18 = vor.u32 %v5336_v35, %v5333_v29 }
 0x38f   : > { %v11721_v1 = vsel %vm13515_vm5, %v4772_v37, %v4774_v14  ;;  %v4373_v20 = vadd.f32 %v11649_v56, %v4330_v17  ;;  %v4212_v59 = vadd.f32 %v11528_v4, %v4034_v32  ;;  %v4036_v6 = vpop.f32.mrb[245].mxu0  ;;  %v4408_v61 = vmax.f32 %v4372_v5, 0.0 }
 0x390   : > { %v4037_v52 = vpop.f32.mrb[246].mxu0  ;;  %v4922_v40 = vor.u32 %v4920_v19, %v4918_v8  ;;  %v4924_v39 = vshll.u32 %v11721_v1, 16  ;;  %v11728_v31 = vsel %vm13491_vm10, %v11718_v15, %v5337_v18  ;;  %v5315_v30 = vrot.slane %v5313_v11, 3  ;;  %vm13532_vm10 = vmmov %vm13520_vm6 }
 0x391   : > { %13516 = vst [vmem:[#allocation23_spill] sm:$0xff] %v11728_v31  ;;  %v4409_v49 = vmax.f32 %v4373_v20, 0.0  ;;  %v4288_v35 = vadd.f32 %v4212_v59, %v11565_v43  ;;  %v4215_v37 = vadd.f32 %v11535_v9, %v4037_v52  ;;  %v4039_v42 = vpop.f32.mrb[247].mxu0  ;;  %v5318_v38 = vrot.slane %v5316_v44, 4 }
 0x392   : > { %v4926_v29 = vrot.slane %v4924_v39, 1  ;;  %v4824_v8 = vsel %vm10134_vm12, %v11721_v1, 0  ;;  %v4928_v43 = vshrl.u32 %v11721_v1, 16  ;;  %vm13519_vm12 = vmmov %vm13515_vm5 }
 0x393   : > { %v4730_v45 = vpack.c.bf16 %v4409_v49, %v4408_v61  ;;  %v4331_v17 = vmul.f32 %v11642_v2, %v4288_v35  ;;  %v4289_v32 = vadd.f32 %v4215_v37, %v11575_v22  ;;  %v5358_v19 = vshrl.u32 %v4824_v8, 16 }
 0x394   : > { %v4927_v5 = vsel %vm13518_vm11, %v4922_v40, %v4926_v29  ;;  %v5361_v20 = vshll.u32 %v4824_v8, 16  ;;  %v11741_v52 = vor.u32 %v5318_v38, %v5315_v30  ;;  %v4930_v42 = vor.u32 %v4928_v43, %v4926_v29 }
 0x395   : > { %v4776_v9 = vrot.slane %v4730_v45, 4  ;;  %v4374_v11 = vadd.f32 %v11649_v56, %v4331_v17  ;;  %v4332_v44 = vmul.f32 %v11642_v2, %v4289_v32  ;;  %v5340_v59 = vshrl.u32 %v4927_v5, 16 }
 0x396   : > { %v4042_v6 = vpop.f32.mrb[248].mxu0  ;;  %v5343_v39 = vshll.u32 %v4927_v5, 16  ;;  %v5360_v61 = vrot.slane %v5358_v19, 3  ;;  %v5363_v49 = vrot.slane %v5361_v20, 4 }
 0x397   : > { %v11744_v22 = vsel %vm13519_vm12, %v4774_v14, %v4776_v9  ;;  %v4375_v40 = vadd.f32 %v11649_v56, %v4332_v44  ;;  %v4220_v35 = vadd.f32 %v11562_v28, %v4042_v6  ;;  %v4044_v37 = vpop.f32.mrb[249].mxu0  ;;  %v5342_v8 = vrot.slane %v5340_v59, 3  ;;  %vm13535_vm12 = vmmov %vm13520_vm6 }
 0x398   : > { %v4045_v4 = vpop.f32.mrb[250].mxu0  ;;  %v5345_v45 = vrot.slane %v5343_v39, 4  ;;  %v4932_v17 = vshll.u32 %v11744_v22, 16  ;;  %v5364_v32 = vor.u32 %v5363_v49, %v5360_v61  ;;  %v4410_v30 = vmax.f32 %v4374_v11, 0.0 }
 0x399   : > { %v4411_v38 = vmax.f32 %v4375_v40, 0.0  ;;  %v4290_v19 = vadd.f32 %v4220_v35, %v11584_v47  ;;  %v4223_v5 = vadd.f32 %v11572_v26, %v4045_v4  ;;  %v4047_v14 = vpop.f32.mrb[251].mxu0  ;;  %v4825_v29 = vsel %vm10185_vm8, %v11744_v22, 0  ;;  %vm13524_vm8 = vmmov %vm13515_vm5 }
 0x39a   : > { %v5346_v20 = vor.u32 %v5345_v45, %v5342_v8  ;;  %v4934_v31 = vrot.slane %v4932_v17, 1  ;;  %v11752_v44 = vsel %vm13520_vm6, %v5337_v18, %v5364_v32  ;;  %v5385_v6 = vshrl.u32 %v4825_v29, 16  ;;  %vm13530_vm5 = vmmov %vm13513_vm3 }
 0x39b   : > { %v4731_v43 = vpack.c.bf16 %v4411_v38, %v4410_v30  ;;  %v4333_v59 = vmul.f32 %v11642_v2, %v4290_v19  ;;  %v4291_v11 = vadd.f32 %v4223_v5, %v11590_v13  ;;  %v4936_v39 = vshrl.u32 %v11744_v22, 16 }
 0x39c   : > { %v11761_v47 = vsel %vm13522_vm14, %v11741_v52, %v5346_v20  ;;  %v4935_v26 = vsel %vm13513_vm3, %v4930_v42, %v4934_v31  ;;  %v5388_v18 = vshll.u32 %v4825_v29, 16  ;;  %v5387_v13 = vrot.slane %v5385_v6, 3 }
 0x39d   : > { %13523 = vst [vmem:[#allocation95_spill] sm:$0xff] %v11761_v47  ;;  %v4778_v61 = vrot.slane %v4731_v43, 4  ;;  %v4376_v49 = vadd.f32 %v11649_v56, %v4333_v59  ;;  %v4334_v40 = vmul.f32 %v11642_v2, %v4291_v11  ;;  %v5367_v35 = vshrl.u32 %v4935_v26, 16 }
 0x39e   : > { %v4050_v37 = vpop.f32.mrb[252].mxu0  ;;  %v5370_v4 = vshll.u32 %v4935_v26, 16  ;;  %v4938_v8 = vor.u32 %v4936_v39, %v4934_v31  ;;  %v5390_v45 = vrot.slane %v5388_v18, 4  ;;  %v4843_v5 = vsel %vm10549_vm9, %v11721_v1, 0  ;;  %vm13528_vm9 = vmmov %vm13520_vm6 }
 0x39f   : > { %v11768_v17 = vsel %vm13524_vm8, %v4776_v9, %v4778_v61  ;;  %v4377_v30 = vadd.f32 %v11649_v56, %v4334_v40  ;;  %v4228_v42 = vadd.f32 %v11560_v51, %v4050_v37  ;;  %v4052_v38 = vpop.f32.mrb[253].mxu0  ;;  %v5369_v28 = vrot.slane %v5367_v35, 3  ;;  %vm13536_vm6 = vmmov %vm13513_vm3 }
 0x3a0   : > { %v4053_v14 = vpop.f32.mrb[254].mxu0  ;;  %v5372_v29 = vrot.slane %v5370_v4, 4  ;;  %v4940_v43 = vshll.u32 %v11768_v17, 16  ;;  %v5391_v31 = vor.u32 %v5390_v45, %v5387_v13  ;;  %v4412_v59 = vmax.f32 %v4376_v49, 0.0 }
 0x3a1   : > { %v4413_v11 = vmax.f32 %v4377_v30, 0.0  ;;  %v4292_v9 = vadd.f32 %v4228_v42, %v11581_v24  ;;  %v4231_v6 = vadd.f32 %v11567_v57, %v4053_v14  ;;  %v4055_v26 = vpop.f32.mrb[255].mxu0  ;;  %v4826_v40 = vsel %vm10208_vm2, %v11768_v17, 0  ;;  %vm13531_vm2 = vmmov %vm13524_vm8 }
 0x3a2   : > { %v5373_v39 = vor.u32 %v5372_v29, %v5369_v28  ;;  %v4942_v51 = vrot.slane %v4940_v43, 1  ;;  %v11779_v18 = vsel %vm13526_vm7, %v5364_v32, %v5391_v31  ;;  %v5412_v4 = vshrl.u32 %v4826_v40, 16  ;;  %vm13538_vm3 = vmmov %vm13531_vm2 }
 0x3a3   : > { %v4732_v35 = vpack.c.bf16 %v4413_v11, %v4412_v59  ;;  %v4335_v37 = vmul.f32 %v11642_v2, %v4292_v9  ;;  %v4293_v49 = vadd.f32 %v4231_v6, %v11587_v33  ;;  %v4944_v13 = vshrl.u32 %v11768_v17, 16  ;;  %vm13539_vm8 = vmmov %vm13526_vm7 }
 0x3a4   : > { %v11787_v24 = vsel %vm13528_vm9, %v5346_v20, %v5373_v39  ;;  %v4943_v57 = vsel %vm13530_vm5, %v4938_v8, %v4942_v51  ;;  %v5415_v45 = vshll.u32 %v4826_v40, 16  ;;  %v5414_v29 = vrot.slane %v5412_v4, 3  ;;  %vm13541_vm9 = vmmov %vm13530_vm5 }
 0x3a5   : > { %13529 = vst [vmem:[#allocation98_spill] sm:$0xff] %v11787_v24  ;;  %v4780_v32 = vrot.slane %v4732_v35, 4  ;;  %v4378_v30 = vadd.f32 %v11649_v56, %v4335_v37  ;;  %v4336_v42 = vmul.f32 %v11642_v2, %v4293_v49  ;;  %v5394_v38 = vshrl.u32 %v4943_v57, 16  ;;  %vm13542_vm5 = vmmov %vm13531_vm2 }
 0x3a6   : > { %v4058_v19 = vpop.f32.mrb[0].mxu0  ;;  %v5397_v14 = vshll.u32 %v4943_v57, 16  ;;  %v4946_v28 = vor.u32 %v4944_v13, %v4942_v51  ;;  %v5417_v33 = vrot.slane %v5415_v45, 4  ;;  %v11798_v11 = vrot.slane %v4843_v5, 1  ;;  %v13533_v5 = vld [vmem:[#allocation40_spill] sm:$0xff] }
 0x3a7   : > { %v11794_v43 = vsel %vm13531_vm2, %v4778_v61, %v4780_v32  ;;  %v4379_v20 = vadd.f32 %v11649_v56, %v4336_v42  ;;  %v4236_v8 = vadd.f32 %v11594_v55, %v4058_v19  ;;  %v4060_v59 = vpop.f32.mrb[1].mxu0  ;;  %v5396_v6 = vrot.slane %v5394_v38, 3  ;;  %vm13543_vm2 = vmmov %vm13526_vm7 }
 0x3a8   : > { %v4061_v9 = vpop.f32.mrb[2].mxu0  ;;  %v5399_v26 = vrot.slane %v5397_v14, 4  ;;  %v4948_v1 = vshll.u32 %v11794_v43, 16  ;;  %v5418_v40 = vor.u32 %v5417_v33, %v5414_v29  ;;  %v4414_v35 = vmax.f32 %v4378_v30, 0.0 }
 0x3a9   : > { %v4415_v51 = vmax.f32 %v4379_v20, 0.0  ;;  %v4294_v37 = vadd.f32 %v4236_v8, %v11602_v54  ;;  %v4239_v61 = vadd.f32 %v11604_v21, %v4061_v9  ;;  %v4063_v49 = vpop.f32.mrb[3].mxu0  ;;  %vm13534_vm11 = vnez %v13533_v5 }
 0x3aa   : > { %v5400_v4 = vor.u32 %v5399_v26, %v5396_v6  ;;  %v4950_v57 = vrot.slane %v4948_v1, 1  ;;  %v11804_v55 = vsel %vm13532_vm10, %v5391_v31, %v5418_v40  ;;  %v4827_v13 = vsel %vm13534_vm11, %v11794_v43, 0  ;;  %vm13544_vm10 = vmmov %vm13538_vm3 }
 0x3ab   : > { %v4733_v45 = vpack.c.bf16 %v4415_v51, %v4414_v35  ;;  %v4337_v42 = vmul.f32 %v11642_v2, %v4294_v37  ;;  %v4295_v30 = vadd.f32 %v4239_v61, %v11610_v48  ;;  %v5439_v38 = vshrl.u32 %v4827_v13, 16 }
 0x3ac   : > { %v11812_v54 = vsel %vm13535_vm12, %v5373_v39, %v5400_v4  ;;  %v4951_v21 = vsel %vm13536_vm6, %v4946_v28, %v4950_v57  ;;  %v5442_v19 = vshll.u32 %v4827_v13, 16  ;;  %vm13537_vm14 = vcmask 1046528   ;;  %vm13548_vm6 = vmmov %vm13538_vm3 }
 0x3ad   : > { %v4782_v14 = vrot.slane %v4733_v45, 4  ;;  %v4380_v31 = vadd.f32 %v11649_v56, %v4337_v42  ;;  %v4338_v29 = vmul.f32 %v11642_v2, %v4295_v30  ;;  %v5421_v33 = vshrl.u32 %v4951_v21, 16  ;;  %vm13547_vm12 = vmmov %vm13537_vm14 }
 0x3ae   : > { %v4066_v20 = vpop.f32.mrb[8].mxu0  ;;  %v5424_v8 = vshll.u32 %v4951_v21, 16  ;;  %v5441_v59 = vrot.slane %v5439_v38, 3  ;;  %v5444_v9 = vrot.slane %v5442_v19, 4  ;;  %v11820_v48 = vsel %vm13537_vm14, %v11706_v0, %v11798_v11  ;;  %vm13549_vm14 = vmmov %vm13543_vm2 }
 0x3af   : > { %v11823_v39 = vsel %vm13538_vm3, %v4780_v32, %v4782_v14  ;;  %v4381_v28 = vadd.f32 %v11649_v56, %v4338_v29  ;;  %v4244_v6 = vadd.f32 %v11592_v34, %v4066_v20  ;;  %v4068_v26 = vpop.f32.mrb[9].mxu0  ;;  %v4952_v1 = vshrl.u32 %v11794_v43, 16 }
 0x3b0   : > { %v4069_v35 = vpop.f32.mrb[10].mxu0  ;;  %v5423_v51 = vrot.slane %v5421_v33, 3  ;;  %v5426_v37 = vrot.slane %v5424_v8, 4  ;;  %v4956_v61 = vshll.u32 %v11823_v39, 16  ;;  %v11829_v49 = vor.u32 %v5444_v9, %v5441_v59 }
 0x3b1   : > { %v4416_v5 = vmax.f32 %v4380_v31, 0.0  ;;  %v4417_v0 = vmax.f32 %v4381_v28, 0.0  ;;  %v4296_v13 = vadd.f32 %v4244_v6, %v11597_v50  ;;  %v4247_v32 = vadd.f32 %v11599_v36, %v4069_v35  ;;  %v4071_v45 = vpop.f32.mrb[11].mxu0 }
 0x3b2   : > { %v5427_v42 = vor.u32 %v5426_v37, %v5423_v51  ;;  %v4954_v30 = vor.u32 %v4952_v1, %v4950_v57  ;;  %v11833_v34 = vrot.slane %v4956_v61, 1  ;;  %v11837_v38 = vsel %vm13539_vm8, %v5418_v40, %v11829_v49 }
 0x3b3   : > { %13540 = vst [vmem:[#allocation25_spill] sm:$0xff] %v11837_v38  ;;  %v4734_v21 = vpack.c.bf16 %v4417_v0, %v4416_v5  ;;  %v4339_v19 = vmul.f32 %v11642_v2, %v4296_v13  ;;  %v4297_v29 = vadd.f32 %v4247_v32, %v11607_v46 }
 0x3b4   : > { %v11842_v31 = vsel %vm13526_vm7, %v5400_v4, %v5427_v42  ;;  %v4959_v50 = vsel %vm13541_vm9, %v4954_v30, %v11833_v34  ;;  %vm13563_vm7 = vmmov %vm13538_vm3 }
 0x3b5   : > { %v4784_v36 = vrot.slane %v4734_v21, 4  ;;  %v4382_v57 = vadd.f32 %v11649_v56, %v4339_v19  ;;  %v4340_v33 = vmul.f32 %v11642_v2, %v4297_v29  ;;  %v5448_v20 = vshrl.u32 %v4959_v50, 16  ;;  %vm13564_vm9 = vmmov %vm13538_vm3 }
 0x3b6   : > { %v4074_v8 = vpop.f32.mrb[12].mxu0  ;;  %v5451_v40 = vshll.u32 %v4959_v50, 16 }
 0x3b7   : > { %v11849_v59 = vsel %vm13542_vm5, %v4782_v14, %v4784_v36  ;;  %v4383_v9 = vadd.f32 %v11649_v56, %v4340_v33  ;;  %v4252_v46 = vadd.f32 %v11618_v25, %v4074_v8  ;;  %v4076_v4 = vpop.f32.mrb[13].mxu0  ;;  %v5450_v6 = vrot.slane %v5448_v20, 3  ;;  %v13545_v33 = vld [vmem:[#allocation66_spill] sm:$0xff] }
 0x3b8   : > { %v4077_v28 = vpop.f32.mrb[14].mxu0  ;;  %v5453_v26 = vrot.slane %v5451_v40, 4  ;;  %v4418_v1 = vmax.f32 %v4382_v57, 0.0  ;;  %vm13546_vm11 = vnez %v13545_v33  ;;  %v5349_v20 = vshrl.u32 %v11820_v48, 16 }
 0x3b9   : > { %v4419_v35 = vmax.f32 %v4383_v9, 0.0  ;;  %v4298_v51 = vadd.f32 %v4252_v46, %v11613_v16  ;;  %v4255_v37 = vadd.f32 %v11620_v60, %v4077_v28  ;;  %v4079_v61 = vpop.f32.mrb[15].mxu0  ;;  %v5352_v8 = vshll.u32 %v11820_v48, 16 }
 0x3ba   : > { %v11855_v5 = vor.u32 %v5453_v26, %v5450_v6  ;;  %v5325_v46 = vshll.u32 %v11714_v53, 16  ;;  %v5351_v6 = vrot.slane %v5349_v20, 3  ;;  %v9568_v33 = vmov 0.0|0.0  }
 0x3bb   : > { %v4735_v0 = vpack.c.bf16 %v4419_v35, %v4418_v1  ;;  %v4341_v14 = vmul.f32 %v11642_v2, %v4298_v51  ;;  %v4299_v13 = vadd.f32 %v4255_v37, %v11616_v62  ;;  %v5354_v26 = vrot.slane %v5352_v8, 4 }
 0x3bc   : > { %v11861_v25 = vsel %vm13543_vm2, %v5427_v42, %v11855_v5  ;;  %v4844_v42 = vsel %vm13546_vm11, %v11744_v22, 0  ;;  %v5327_v37 = vrot.slane %v5325_v46, 4  ;;  %vm13571_vm11 = vmmov %vm13538_vm3 }
 0x3bd   : > { %v4786_v32 = vrot.slane %v4735_v0, 4  ;;  %v4384_v45 = vadd.f32 %v11649_v56, %v4341_v14  ;;  %v4342_v30 = vmul.f32 %v11642_v2, %v4299_v13  ;;  %v11876_v9 = vrot.slane %v4844_v42, 1 }
 0x3be   : > { %v4082_v16 = vpop.f32.mrb[16].mxu0  ;;  %v11894_v13 = vor.u32 %v5354_v26, %v5351_v6  ;;  %v11908_v42 = vrot.slane %v9568_v33, 4  ;;  %v13550_v6 = vld [vmem:[#allocation94_spill] sm:$0xff]  ;;  %v13555_v33 = vld [vmem:[#allocation15_spill] sm:$0xff] }
 0x3bf   : > { %v11866_v60 = vsel %vm13544_vm10, %v4784_v36, %v4786_v32  ;;  %v4385_v21 = vadd.f32 %v11649_v56, %v4342_v30  ;;  %v4084_v19 = vpop.f32.mrb[17].mxu0  ;;  %v4420_v50 = vmax.f32 %v4384_v45, 0.0  ;;  %v5322_v36 = vshrl.u32 %v11714_v53, 16 }
 0x3c0   : > { %v4085_v29 = vpop.f32.mrb[18].mxu0  ;;  %v11884_v22 = vsel %vm13547_vm12, %v11798_v11, %v11876_v9  ;;  %vm13556_vm8 = vnez %v13555_v33  ;;  %v13562_v33 = vld [vmem:[#allocation91_spill] sm:$0xff]  ;;  %vm13569_vm10 = vsmask.f32 7424  ;;  %vm13572_vm12 = vmmov %vm13538_vm3 }
 0x3c1   : > { %v4421_v57 = vmax.f32 %v4385_v21, 0.0  ;;  %v4087_v62 = vpop.f32.mrb[19].mxu0  ;;  %v5324_v53 = vrot.slane %v5322_v36, 3 }
 0x3c3   : > { %v11874_v40 = vpack.c.bf16 %v4421_v57, %v4420_v50  ;;  %v11897_v45 = vor.u32 %v5327_v37, %v5324_v53 }
 0x3c5   : > { %v13077_v4 = vrot.slane %v11874_v40, 4  ;;  %v11902_v21 = vsel %vm13549_vm14, %v11897_v45, %v11894_v13  ;;  %vm13574_vm14 = vmmov %vm13569_vm10 }
 0x3c6   : > { %v8719_v28 = vpop.f32.mrb[4].mxu0 }
 0x3c7   : > { %v11889_v48 = vsel %vm13548_vm6, %v4786_v32, %v13077_v4  ;;  %v4311_v1 = vmul.f32 %v8719_v28, %v11642_v2  ;;  %v4123_v35 = vpop.f32.mrb[5].mxu0  ;;  %vm13573_vm6 = vmmov %vm13538_vm3 }
 0x3c8   : > { %v8720_v51 = vpop.f32.mrb[6].mxu0 }
 0x3c9   : > { %v4354_v61 = vadd.f32 %v11649_v56, %v4311_v1  ;;  %v4312_v0 = vmul.f32 %v8720_v51, %v11642_v2  ;;  %v4126_v14 = vpop.f32.mrb[7].mxu0  ;;  %v13551_v1 = vld [vmem:[#allocation69_spill] sm:$0xff] }
 0x3cb   : > { %v4355_v11 = vadd.f32 %v11649_v56, %v4312_v0  ;;  %v4390_v30 = vmax.f32 %v4354_v61, 0.0 }
 0x3cd   : > { %v4391_v32 = vmax.f32 %v4355_v11, 0.0 }
 0x3ce   : > { %v8723_v16 = vpop.f32.mrb[20].mxu0 }
 0x3cf   : > { %v11904_v19 = vpack.c.bf16 %v4391_v32, %v4390_v30  ;;  %v4148_v29 = vadd.f32 %v8723_v16, %v11626_v27  ;;  %v4139_v50 = vpop.f32.mrb[21].mxu0  ;;  %v13553_v30 = vld [vmem:[#allocation92_spill] sm:$0xff] }
 0x3d0   : > { %v4140_v57 = vadd.f32 %v4139_v50, %v11622_v12  ;;  %v8724_v62 = vpop.f32.mrb[22].mxu0  ;;  %v13554_v50 = vld [vmem:[#allocation90_spill] sm:$0xff] }
 0x3d1   : > { %v4758_v20 = vrot.slane %v11904_v19, 4  ;;  %v4272_v8 = vadd.f32 %v4148_v29, %v11498_v41  ;;  %v4151_v36 = vadd.f32 %v8724_v62, %v11628_v3  ;;  %v4142_v46 = vpop.f32.mrb[23].mxu0  ;;  %v13552_v3 = vld [vmem:[#allocation75_spill] sm:$0xff] }
 0x3d2   : > { %v4270_v28 = vadd.f32 %v4140_v57, %v11503_v10  ;;  %v4143_v26 = vadd.f32 %v4142_v46, %v13550_v6 }
 0x3d3   : > { %v11917_v27 = vsel %vm13538_vm3, %v11908_v42, %v4758_v20  ;;  %v4315_v12 = vmul.f32 %v11642_v2, %v4272_v8  ;;  %v4273_v35 = vadd.f32 %v4151_v36, %v13551_v1  ;;  %vm13576_vm3 = vsmask.f32 4352 }
 0x3d4   : > { %v4313_v51 = vmul.f32 %v11642_v2, %v4270_v28  ;;  %v4271_v37 = vadd.f32 %v4143_v26, %v13552_v3  ;;  %v4860_v10 = vshll.u32 %v11917_v27, 16  ;;  %v4864_v19 = vshrl.u32 %v11917_v27, 16  ;;  %v13557_v28 = vld [vmem:[#allocation78_spill] sm:$0xff]  ;;  %v13558_v26 = vld [vmem:[#allocation21_spill] sm:$0xff]  ;;  %v13560_v3 = vld [vmem:[#allocation20_spill] sm:$0xff] }
 0x3d5   : > { %v4358_v53 = vadd.f32 %v11649_v56, %v4315_v12  ;;  %v4316_v41 = vmul.f32 %v11642_v2, %v4273_v35  ;;  %v4816_v8 = vsel %vm13556_vm8, %v11917_v27, 0 }
 0x3d6   : > { %v4356_v61 = vadd.f32 %v11649_v56, %v4313_v51  ;;  %v8727_v0 = vpop.f32.mrb[24].mxu0  ;;  %v4314_v11 = vmul.f32 %v11642_v2, %v4271_v37  ;;  %v11938_v35 = vrot.slane %v4860_v10, 1 }
 0x3d7   : > { %v4359_v14 = vadd.f32 %v11649_v56, %v4316_v41  ;;  %v4164_v32 = vadd.f32 %v8727_v0, %v13553_v30  ;;  %v4155_v16 = vpop.f32.mrb[25].mxu0  ;;  %v4394_v29 = vmax.f32 %v4358_v53, 0.0  ;;  %v13559_v41 = vld [vmem:[#allocation96_spill] sm:$0xff] }
 0x3d8   : > { %v4156_v57 = vadd.f32 %v4155_v16, %v13554_v50  ;;  %v8728_v62 = vpop.f32.mrb[26].mxu0  ;;  %v4357_v46 = vadd.f32 %v11649_v56, %v4314_v11  ;;  %v4392_v51 = vmax.f32 %v4356_v61, 0.0  ;;  %v13561_v50 = vld [vmem:[#allocation14_spill] sm:$0xff] }
 0x3d9   : > { %v4395_v36 = vmax.f32 %v4359_v14, 0.0  ;;  %v4276_v6 = vadd.f32 %v4164_v32, %v13557_v28  ;;  %v4167_v12 = vadd.f32 %v8728_v62, %v13558_v26  ;;  %v4158_v1 = vpop.f32.mrb[27].mxu0  ;;  %v5145_v28 = vshrl.u32 %v4816_v8, 16 }
 0x3da   : > { %v4274_v53 = vadd.f32 %v4156_v57, %v13559_v41  ;;  %v4159_v37 = vadd.f32 %v4158_v1, %v13560_v3  ;;  %v4393_v30 = vmax.f32 %v4357_v46, 0.0  ;;  %v5148_v62 = vshll.u32 %v4816_v8, 16 }
 0x3db   : > { %v4723_v0 = vpack.c.bf16 %v4395_v36, %v4394_v29  ;;  %v4319_v16 = vmul.f32 %v11642_v2, %v4276_v6  ;;  %v4277_v14 = vadd.f32 %v4167_v12, %v13561_v50  ;;  %v4866_v6 = vor.u32 %v4864_v19, %v11938_v35 }
 0x3dc   : > { %v4317_v11 = vmul.f32 %v11642_v2, %v4274_v53  ;;  %v4275_v32 = vadd.f32 %v4159_v37, %v13562_v33  ;;  %v4722_v10 = vpack.c.bf16 %v4393_v30, %v4392_v51  ;;  %v5147_v53 = vrot.slane %v5145_v28, 3 }
 0x3dd   : > { %v4762_v26 = vrot.slane %v4723_v0, 4  ;;  %v4362_v61 = vadd.f32 %v11649_v56, %v4319_v16  ;;  %v4320_v57 = vmul.f32 %v11642_v2, %v4277_v14  ;;  %v5150_v8 = vrot.slane %v5148_v62, 4 }
 0x3de   : > { %v4360_v1 = vadd.f32 %v11649_v56, %v4317_v11  ;;  %v4318_v29 = vmul.f32 %v11642_v2, %v4275_v32  ;;  %v4760_v36 = vrot.slane %v4722_v10, 4  ;;  %v13567_v11 = vld [vmem:[#allocation17_spill] sm:$0xff] }
 0x3df   : > { %v4363_v46 = vadd.f32 %v11649_v56, %v4320_v57  ;;  %v4398_v12 = vmax.f32 %v4362_v61, 0.0  ;;  %vm13568_vm2 = vnez %v13567_v11 }
 0x3e0   : > { %v4361_v41 = vadd.f32 %v11649_v56, %v4318_v29  ;;  %v11954_v51 = vsel %vm13563_vm7, %v4758_v20, %v4760_v36  ;;  %v11957_v3 = vsel %vm13564_vm9, %v4760_v36, %v4762_v26  ;;  %v4396_v37 = vmax.f32 %v4360_v1, 0.0  ;;  %v13565_v56 = vld [vmem:[#allocation16_spill] sm:$0xff]  ;;  %vm13580_vm7 = vmmov %vm13569_vm10 }
 0x3e1   : > { %v4399_v0 = vmax.f32 %v4363_v46, 0.0  ;;  %v4868_v2 = vshll.u32 %v11954_v51, 16  ;;  %v4872_v16 = vshrl.u32 %v11954_v51, 16  ;;  %v4876_v19 = vshll.u32 %v11957_v3, 16  ;;  %vm13581_vm9 = vmmov %vm13576_vm3 }
 0x3e2   : > { %v4397_v30 = vmax.f32 %v4361_v41, 0.0  ;;  %vm13566_vm5 = vnez %v13565_v56  ;;  %v4880_v20 = vshrl.u32 %v11957_v3, 16  ;;  %v4818_v33 = vsel %vm13568_vm2, %v11957_v3, 0  ;;  %vm13584_vm2 = vmmov %vm13580_vm7 }
 0x3e3   : > { %v4725_v50 = vpack.c.bf16 %v4399_v0, %v4398_v12  ;;  %v4817_v14 = vsel %vm13566_vm5, %v11954_v51, 0  ;;  %v4870_v28 = vrot.slane %v4868_v2, 1  ;;  %v4878_v62 = vrot.slane %v4876_v19, 1  ;;  %vm13582_vm5 = vmmov %vm13576_vm3 }
 0x3e4   : > { %v4724_v32 = vpack.c.bf16 %v4397_v30, %v4396_v37  ;;  %v5153_v10 = vshrl.u32 %v4817_v14, 16  ;;  %v5156_v57 = vshll.u32 %v4817_v14, 16  ;;  %v5196_v1 = vshrl.u32 %v4818_v33, 16 }
 0x3e5   : > { %v4766_v61 = vrot.slane %v4725_v50, 4  ;;  %v5199_v29 = vshll.u32 %v4818_v33, 16  ;;  %v4871_v46 = vsel %vm13569_vm10, %v4866_v6, %v4870_v28  ;;  %v4874_v12 = vor.u32 %v4872_v16, %v4870_v28 }
 0x3e6   : > { %v4764_v36 = vrot.slane %v4724_v32, 4  ;;  %v5155_v41 = vrot.slane %v5153_v10, 3  ;;  %v13570_v0 = vrot.slane %v11661_v63, 4  ;;  %v5162_v11 = vshrl.u32 %v4871_v46, 16 }
 0x3e7   : > { %v5165_v4 = vshll.u32 %v4871_v46, 16  ;;  %v5158_v37 = vrot.slane %v5156_v57, 4  ;;  %v4879_v19 = vsel %vm13574_vm14, %v4874_v12, %v4878_v62  ;;  %v11982_v50 = vor.u32 %v5150_v8, %v5147_v53  ;;  %vm13590_vm14 = vmmov %vm13576_vm3 }
 0x3e8   : > { %v11973_v56 = vsel %vm13571_vm11, %v4766_v61, %v13570_v0  ;;  %v11976_v30 = vsel %vm13572_vm12, %v4762_v26, %v4764_v36  ;;  %v11979_v2 = vsel %vm13573_vm6, %v4764_v36, %v4766_v61  ;;  %v5164_v6 = vrot.slane %v5162_v11, 3  ;;  %vm13587_vm11 = vmmov %vm13584_vm2 }
 0x3e9   : > { %13575 = vst [vmem:[#allocation26_spill] sm:$0xff] %v11982_v50  ;;  %v5167_v16 = vrot.slane %v5165_v4, 4  ;;  %v5170_v14 = vshrl.u32 %v4879_v19, 16  ;;  %v4882_v63 = vor.u32 %v4880_v20, %v4878_v62  ;;  %v5173_v33 = vshll.u32 %v4879_v19, 16  ;;  %v13578_v62 = vld [vmem:[#allocation18_spill] sm:$0xff]  ;;  %vm13588_vm12 = vmmov %vm13576_vm3 }
 0x3ea   : > { %v5159_v32 = vor.u32 %v5158_v37, %v5155_v41  ;;  %v4884_v28 = vshll.u32 %v11976_v30, 16  ;;  %v5198_v10 = vrot.slane %v5196_v1, 3  ;;  %v5201_v46 = vrot.slane %v5199_v29, 4  ;;  %vm13589_vm6 = vmmov %vm13576_vm3 }
 0x3eb   : > { %v11985_v57 = vor.u32 %v5167_v16, %v5164_v6  ;;  %v5172_v26 = vrot.slane %v5170_v14, 3  ;;  %v4888_v61 = vshrl.u32 %v11976_v30, 16  ;;  %v5175_v36 = vrot.slane %v5173_v33, 4 }
 0x3ec   : > { %v11990_v53 = vsel %vm13576_vm3, %v11982_v50, %v5159_v32  ;;  %v4886_v8 = vrot.slane %v4884_v28, 1  ;;  %v4892_v4 = vshll.u32 %v11979_v2, 16  ;;  %v5202_v20 = vor.u32 %v5201_v46, %v5198_v10  ;;  %v9296_v46 = vld [vmem:[#allocation7 + $0x148] sm:$0xff]  }
 0x3ed   : > { %13577 = vst [vmem:[#allocation99_spill] sm:$0xff] %v11990_v53  ;;  %vm13579_vm8 = vnez %v13578_v62  ;;  %v4896_v1 = vshrl.u32 %v11979_v2, 16  ;;  %v4900_v41 = vshll.u32 %v11973_v56, 16  ;;  %v5176_v29 = vor.u32 %v5175_v36, %v5172_v26 }
 0x3ee   : > { %v4819_v12 = vsel %vm13579_vm8, %v11976_v30, 0  ;;  %v4887_v0 = vsel %vm13580_vm7, %v4882_v63, %v4886_v8  ;;  %v4890_v11 = vor.u32 %v4888_v61, %v4886_v8  ;;  %v4894_v37 = vrot.slane %v4892_v4, 1  ;;  %vm13593_vm8 = vmmov %vm13584_vm2 }
 0x3ef   : > { %v5205_v19 = vshrl.u32 %v4887_v0, 16  ;;  %v5208_v6 = vshll.u32 %v4887_v0, 16  ;;  %v12000_v16 = vsel %vm13581_vm9, %v5159_v32, %v5202_v20  ;;  %v5223_v14 = vshrl.u32 %v4819_v12, 16  ;;  %v13585_v0 = vld [vmem:[#allocation19_spill] sm:$0xff]  ;;  %vm13596_vm9 = vmmov %vm13582_vm5 }
 0x3f0   : > { %v12004_v33 = vsel %vm13582_vm5, %v11985_v57, %v5176_v29  ;;  %v4895_v28 = vsel %vm13584_vm2, %v4890_v11, %v4894_v37  ;;  %v5226_v10 = vshll.u32 %v4819_v12, 16  ;;  %v4898_v62 = vor.u32 %v4896_v1, %v4894_v37 }
 0x3f1   : > { %13583 = vst [vmem:[#allocation54_spill] sm:$0xff] %v12004_v33  ;;  %5824 = vmatprep.mubr.bf16.mxu1 %v12004_v33  ;;  %v5207_v63 = vrot.slane %v5205_v19, 3  ;;  %v5210_v26 = vrot.slane %v5208_v6, 4  ;;  %v5232_v61 = vshrl.u32 %v4895_v28, 16  ;;  %v5235_v36 = vshll.u32 %v4895_v28, 16 }
 0x3f2   : > { %5825 = vmatmul.mubr.bf16.vlgmr.msra.gmra.mrb[24].mxu1 %v11990_v53  ;;  %v5225_v32 = vrot.slane %v5223_v14, 3  ;;  %v5228_v8 = vrot.slane %v5226_v10, 4  ;;  %v4902_v4 = vrot.slane %v4900_v41, 1  ;;  %vm13586_vm10 = vnez %v13585_v0  ;;  %v9297_v14 = vld [vmem:[#allocation7 + $0x150] sm:$0xff]  }
 0x3f3   : > { %v4820_v50 = vsel %vm13586_vm10, %v11979_v2, 0  ;;  %8754 = vmatpush3.bf16.msra.mxu1 %v11659_v23  ;;  %v5211_v12 = vor.u32 %v5210_v26, %v5207_v63  ;;  %v5234_v11 = vrot.slane %v5232_v61, 3  ;;  %v5237_v1 = vrot.slane %v5235_v36, 4 }
 0x3f4   : > { %v5250_v37 = vshrl.u32 %v4820_v50, 16  ;;  %v5229_v33 = vor.u32 %v5228_v8, %v5225_v32  ;;  %8755 = vmatprep.subr.bf16.mxu1 %v9296_v46  ;;  %v4903_v19 = vsel %vm13587_vm11, %v4898_v62, %v4902_v4  ;;  %v5253_v6 = vshll.u32 %v4820_v50, 16 }
 0x3f5   : > { %v4904_v28 = vshrl.u32 %v11973_v56, 16  ;;  %v12016_v41 = vsel %vm13588_vm12, %v5176_v29, %v5211_v12  ;;  %v5238_v10 = vor.u32 %v5237_v1, %v5234_v11  ;;  %v5259_v0 = vshrl.u32 %v4903_v19, 16  ;;  %v13591_v29 = vld [vmem:[#allocation22_spill] sm:$0xff]  ;;  %vm13603_vm12 = vmmov %vm13582_vm5 }
 0x3f6   : > { %v5262_v53 = vshll.u32 %v4903_v19, 16  ;;  %5832 = vmatprep.mubr.bf16.mxu1 %v12016_v41  ;;  %v12020_v23 = vsel %vm13589_vm6, %v5202_v20, %v5229_v33  ;;  %v5252_v63 = vrot.slane %v5250_v37, 3  ;;  %v5255_v26 = vrot.slane %v5253_v6, 4  ;;  %v9298_v37 = vld [vmem:[#allocation7 + $0x158] sm:$0xff]   ;;  %vm13604_vm6 = vmmov %vm13582_vm5 }
 0x3f7   : > { %v4906_v61 = vor.u32 %v4904_v28, %v4902_v4  ;;  %v12023_v62 = vsel %vm13590_vm14, %v5211_v12, %v5238_v10  ;;  %v5261_v50 = vrot.slane %v5259_v0, 3  ;;  %8756 = vmatpush3.bf16.msra.mxu1 %v9296_v46  ;;  %vm13592_vm3 = vnez %v13591_v29  ;;  %v13594_v12 = vld [vmem:[#allocation63_spill] sm:$0xff]  ;;  %vm13606_vm14 = vmmov %vm13582_vm5 }
 0x3f8   : > { %v5264_v36 = vrot.slane %v5262_v53, 4  ;;  %v4821_v32 = vsel %vm13592_vm3, %v11973_v56, 0  ;;  %v5256_v8 = vor.u32 %v5255_v26, %v5252_v63  ;;  %8757 = vmatprep.subr.bf16.mxu1 %v9297_v14  ;;  %vm13595_vm7 = vnez %v13594_v12  ;;  %vm13607_vm3 = vmmov %vm13582_vm5  ;;  %v13610_v12 = vld [vmem:[#allocation81_spill] sm:$0xff] }
 0x3f9   : > { %v4911_v11 = vsel %vm13593_vm8, %v4906_v61, %v11692_v7  ;;  %v5277_v1 = vshrl.u32 %v4821_v32, 16  ;;  %v5280_v20 = vshll.u32 %v4821_v32, 16  ;;  %v4835_v53 = vsel %vm13595_vm7, %v11917_v27, 0  ;;  %v13597_v27 = vld [vmem:[#allocation64_spill] sm:$0xff] }
 0x3fa   : > { %v5265_v19 = vor.u32 %v5264_v36, %v5261_v50  ;;  %v5286_v4 = vshrl.u32 %v4911_v11, 16  ;;  %v5289_v6 = vshll.u32 %v4911_v11, 16  ;;  %5833 = vmatmul.mubr.bf16.gmra.mrb[28].mxu1 %v12000_v16  ;;  %v12035_v46 = vsel %vm13596_vm9, %v5229_v33, %v5256_v8  ;;  %v9299_v50 = vld [vmem:[#allocation7 + $0x160] sm:$0xff]   ;;  %v13599_v33 = vld [vmem:[#allocation67_spill] sm:$0xff]  ;;  %v13601_v32 = vld [vmem:[#allocation72_spill] sm:$0xff] }
 0x3fb   : > { %v5279_v28 = vrot.slane %v5277_v1, 3  ;;  %v5282_v0 = vrot.slane %v5280_v20, 4  ;;  %5840 = vmatprep.mubr.bf16.mxu1 %v12023_v62  ;;  %8758 = vmatpush3.bf16.msra.mxu1 %v9297_v14  ;;  %vm13598_vm2 = vnez %v13597_v27  ;;  %vm13600_vm10 = vnez %v13599_v33 }
 0x3fc   : > { %v12039_v7 = vsel %vm13582_vm5, %v5238_v10, %v5265_v19  ;;  %v5288_v63 = vrot.slane %v5286_v4, 3  ;;  %v5291_v26 = vrot.slane %v5289_v6, 4  ;;  %8759 = vmatprep.subr.bf16.mxu1 %v9298_v37  ;;  %v4836_v36 = vsel %vm13598_vm2, %v11954_v51, 0 }
 0x3fd   : > { %v5283_v61 = vor.u32 %v5282_v0, %v5279_v28  ;;  %v4837_v29 = vsel %vm13600_vm10, %v11957_v3, 0  ;;  %vm13602_vm11 = vnez %v13601_v32  ;;  %v12050_v1 = vrot.slane %v4835_v53, 1  ;;  %v9300_v53 = vld [vmem:[#allocation7 + $0x168] sm:$0xff]  }
 0x3fe   : > { %v4838_v11 = vsel %vm13602_vm11, %v11976_v30, 0  ;;  %v5292_v10 = vor.u32 %v5291_v26, %v5288_v63  ;;  %v5007_v20 = vrot.slane %v4836_v36, 1  ;;  %v5009_v51 = vrot.slane %v4837_v29, 1 }
 0x3ff   : > { %v12053_v14 = vsel %vm13603_vm12, %v5256_v8, %v5283_v61  ;;  %v12057_v4 = vsel %vm13604_vm6, %v5283_v61, %v11718_v15  ;;  %8760 = vmatpush3.bf16.msra.mxu1 %v9298_v37  ;;  %vm13609_vm8 = vcmask 1046528   ;;  %vm13611_vm7 = vnez %v13610_v12  ;;  %v13615_v61 = vld [vmem:[#allocation82_spill] sm:$0xff]  ;;  %v13619_v12 = vld [vmem:[#allocation76_spill] sm:$0xff]  ;;  %vm13621_vm6 = vmmov %vm13607_vm3 }
 0x400   : > { %13605 = vst [vmem:[#allocation28_spill] sm:$0xff] %v12057_v4  ;;  %v12060_v6 = vsel %vm13606_vm14, %v5265_v19, %v5292_v10  ;;  %v12064_v3 = vsel %vm13607_vm3, %v5292_v10, %v11741_v52  ;;  %v5008_v30 = vsel %vm13609_vm8, %v12050_v1, %v5007_v20  ;;  %v4845_v8 = vsel %vm13611_vm7, %v11768_v17, 0  ;;  %8761 = vmatprep.subr.bf16.mxu1 %v9299_v50  ;;  %vm13612_vm9 = vmmov %vm13609_vm8  ;;  %v13613_v52 = vld [vmem:[#allocation74_spill] sm:$0xff] }
 0x401   : > { %13608 = vst [vmem:[#allocation29_spill] sm:$0xff] %v12064_v3  ;;  %v5010_v15 = vsel %vm13612_vm9, %v5007_v20, %v5009_v51  ;;  %v5179_v28 = vshrl.u32 %v5008_v30, 16  ;;  %v5182_v0 = vshll.u32 %v5008_v30, 16  ;;  %v5011_v19 = vrot.slane %v4838_v11, 1  ;;  %vm13617_vm10 = vmmov %vm13609_vm8 }
 0x402   : > { %v5187_v63 = vshrl.u32 %v5010_v15, 16  ;;  %v5190_v26 = vshll.u32 %v5010_v15, 16  ;;  %vm13614_vm5 = vnez %v13613_v52  ;;  %vm13616_vm2 = vnez %v13615_v61  ;;  %5841 = vmatmul.mubr.bf16.gmra.mrb[32].mxu1 %v12020_v23  ;;  %vm13618_vm11 = vmmov %vm13609_vm8 }
 0x403   : > { %v4839_v37 = vsel %vm13614_vm5, %v11979_v2, 0  ;;  %v4846_v27 = vsel %vm13616_vm2, %v11794_v43, 0  ;;  %v5181_v17 = vrot.slane %v5179_v28, 3  ;;  %v5184_v36 = vrot.slane %v5182_v0, 4  ;;  %5848 = vmatprep.mubr.bf16.mxu1 %v12039_v7  ;;  %8762 = vmatpush3.bf16.msra.mxu1 %v9299_v50  ;;  %v9301_v2 = vld [vmem:[#allocation7 + $0x170] sm:$0xff]   ;;  %vm13622_vm14 = vmmov %vm13609_vm8 }
 0x404   : > { %v5012_v33 = vsel %vm13617_vm10, %v5009_v51, %v5011_v19  ;;  %v5013_v29 = vrot.slane %v4839_v37, 1  ;;  %v5189_v32 = vrot.slane %v5187_v63, 3  ;;  %v5192_v11 = vrot.slane %v5190_v26, 4  ;;  %8763 = vmatprep.subr.bf16.mxu1 %v9300_v53  ;;  %vm13623_vm3 = vmmov %vm13609_vm8 }
 0x405   : > { %v5214_v10 = vshrl.u32 %v5012_v33, 16  ;;  %v5217_v20 = vshll.u32 %v5012_v33, 16  ;;  %v12081_v30 = vor.u32 %v5184_v36, %v5181_v17  ;;  %vm13620_vm12 = vnez %v13619_v12  ;;  %vm13624_vm8 = vmmov %vm13621_vm6 }
 0x406   : > { %v5014_v43 = vsel %vm13618_vm11, %v5011_v19, %v5013_v29  ;;  %v4840_v15 = vsel %vm13620_vm12, %v11973_v56, 0  ;;  %v5376_v51 = vshrl.u32 %v11884_v22, 16  ;;  %v5193_v28 = vor.u32 %v5192_v11, %v5189_v32  ;;  %v9302_v56 = vld [vmem:[#allocation7 + $0x178] sm:$0xff]   ;;  %vm13625_vm7 = vmmov %vm13623_vm3 }
 0x407   : > { %v5216_v0 = vrot.slane %v5214_v10, 3  ;;  %v5219_v52 = vrot.slane %v5217_v20, 4  ;;  %v5241_v50 = vshrl.u32 %v5014_v43, 16  ;;  %v5244_v63 = vshll.u32 %v5014_v43, 16  ;;  %8764 = vmatpush3.bf16.msra.mxu1 %v9300_v53  ;;  %vm13626_vm9 = vmmov %vm13621_vm6 }
 0x408   : > { %v5015_v26 = vrot.slane %v4840_v15, 1  ;;  %v5378_v37 = vrot.slane %v5376_v51, 3  ;;  %v5379_v61 = vshll.u32 %v11884_v22, 16  ;;  %v12091_v17 = vsel %vm13621_vm6, %v12081_v30, %v5193_v28  ;;  %8765 = vmatprep.subr.bf16.mxu1 %v9301_v2  ;;  %vm13627_vm5 = vmmov %vm13621_vm6 }
 0x409   : > { %v5220_v19 = vor.u32 %v5219_v52, %v5216_v0  ;;  %v5243_v36 = vrot.slane %v5241_v50, 3  ;;  %v5025_v33 = vrot.slane %v4845_v8, 1  ;;  %v5246_v12 = vrot.slane %v5244_v63, 4  ;;  %vm13630_vm10 = vmmov %vm13627_vm5 }
 0x40a   : > { %v5016_v32 = vsel %vm13622_vm14, %v5013_v29, %v5015_v26  ;;  %v5018_v11 = vsel %vm13623_vm3, %v5015_v26, %v11694_v58  ;;  %v5381_v10 = vrot.slane %v5379_v61, 4  ;;  %5849 = vmatmul.mubr.bf16.gmra.mrb[36].mxu1 %v12035_v46  ;;  %vm13631_vm11 = vmmov %vm13623_vm3 }
 0x40b   : > { %v12097_v20 = vsel %vm13624_vm8, %v5193_v28, %v5220_v19  ;;  %v5268_v22 = vshrl.u32 %v5016_v32, 16  ;;  %v5271_v53 = vshll.u32 %v5016_v32, 16  ;;  %v5295_v43 = vshrl.u32 %v5018_v11, 16  ;;  %5856 = vmatprep.mubr.bf16.mxu1 %v12060_v6  ;;  %8766 = vmatpush3.bf16.msra.mxu1 %v9301_v2  ;;  %v9303_v28 = vld [vmem:[#allocation7 + $0x40] sm:$0xff]   ;;  %v13628_v2 = vld [vmem:[#allocation83_spill] sm:$0xff]  ;;  %vm13632_vm12 = vmmov %vm13627_vm5 }
 0x40c   : > { %v5247_v15 = vor.u32 %v5246_v12, %v5243_v36  ;;  %v5298_v51 = vshll.u32 %v5018_v11, 16  ;;  %v5382_v8 = vor.u32 %v5381_v10, %v5378_v37  ;;  %v5026_v0 = vsel %vm13625_vm7, %v11876_v9, %v5025_v33  ;;  %8767 = vmatprep.subr.bf16.mxu1 %v9302_v56  ;;  %vm13633_vm6 = vmmov %vm13627_vm5 }
 0x40d   : > { %v5270_v29 = vrot.slane %v5268_v22, 3  ;;  %v5273_v58 = vrot.slane %v5271_v53, 4  ;;  %v5297_v52 = vrot.slane %v5295_v43, 3  ;;  %v5403_v50 = vshrl.u32 %v5026_v0, 16  ;;  %vm13634_vm14 = vmmov %vm13623_vm3 }
 0x40e   : > { %v12104_v63 = vsel %vm13626_vm9, %v5220_v19, %v5247_v15  ;;  %v5300_v26 = vrot.slane %v5298_v51, 4  ;;  %v12108_v61 = vsel %vm13627_vm5, %v11894_v13, %v5382_v8  ;;  %v5406_v37 = vshll.u32 %v5026_v0, 16  ;;  %vm13635_vm3 = vmmov %vm13627_vm5 }
 0x40f   : > { %v5274_v36 = vor.u32 %v5273_v58, %v5270_v29  ;;  %v5405_v9 = vrot.slane %v5403_v50, 3  ;;  %v5027_v12 = vrot.slane %v4846_v27, 1  ;;  %vm13629_vm2 = vnez %v13628_v2  ;;  %8768 = vmatpush3.bf16.msra.mxu1 %v9302_v56  ;;  %vm13639_vm7 = vmmov %vm13635_vm3 }
 0x410   : > { %v4847_v32 = vsel %vm13629_vm2, %v11823_v39, 0  ;;  %v5301_v11 = vor.u32 %v5300_v26, %v5297_v52  ;;  %v5408_v10 = vrot.slane %v5406_v37, 4  ;;  %8325 = vmatprep.subr.bf16.mxu1 %v9303_v28  ;;  %v13636_v26 = vld [vmem:[#allocation85_spill] sm:$0xff]  ;;  %vm13640_vm9 = vmmov %vm13635_vm3  ;;  %vm13642_vm5 = vcmask 1043456  }
 0x411   : > { %v12113_v22 = vrot.slane %v4847_v32, 1  ;;  %v12116_v19 = vsel %vm13630_vm10, %v5247_v15, %v5274_v36  ;;  %v5028_v53 = vsel %vm13631_vm11, %v5025_v33, %v5027_v12  ;;  %vm13637_vm8 = vnez %v13636_v26  ;;  %vm13645_vm2 = vmmov %vm13642_vm5  ;;  %v13647_v26 = vld [vmem:[#allocation23_spill] sm:$0xff] }
 0x412   : > { %v12120_v13 = vsel %vm13632_vm12, %v5274_v36, %v5301_v11  ;;  %v12124_v27 = vsel %vm13633_vm6, %v5301_v11, %v11897_v45  ;;  %v5409_v43 = vor.u32 %v5408_v10, %v5405_v9  ;;  %v5430_v51 = vshrl.u32 %v5028_v53, 16  ;;  %5857 = vmatmul.mubr.bf16.gmra.mrb[40].mxu1 %v12053_v14  ;;  %vm13655_vm12 = vmmov %vm13635_vm3 }
 0x413   : > { %v5433_v0 = vshll.u32 %v5028_v53, 16  ;;  %v5030_v29 = vsel %vm13634_vm14, %v5027_v12, %v12113_v22  ;;  %5864 = vmatprep.mubr.bf16.mxu1 %v12064_v3  ;;  %v4849_v37 = vsel %vm13637_vm8, %v11866_v60, 0  ;;  %v4850_v9 = vsel %vm10903_vm4, %v11889_v48, 0  ;;  %vm13643_vm4 = vmmov %vm13631_vm11 }
 0x414   : > { %v12130_v56 = vsel %vm13635_vm3, %v5382_v8, %v5409_v43  ;;  %v5432_v33 = vrot.slane %v5430_v51, 3  ;;  %v5457_v15 = vshrl.u32 %v5030_v29, 16  ;;  %v5460_v58 = vshll.u32 %v5030_v29, 16  ;;  %vm13653_vm11 = vmmov %vm13635_vm3 }
 0x415   : > { %v5435_v52 = vrot.slane %v5433_v0, 4  ;;  %v5035_v8 = vrot.slane %v4850_v9, 1  ;;  %v12148_v11 = vrot.slane %v4849_v37, 1  ;;  %v13641_v10 = vrot.slane %v11874_v40, 4  ;;  %vm13659_vm14 = vmmov %vm13635_vm3 }
 0x416   : > { %v5459_v50 = vrot.slane %v5457_v15, 3  ;;  %v5462_v45 = vrot.slane %v5460_v58, 4  ;;  %v12165_v15 = vsel %vm13645_vm2, 0, %v11908_v42 }
 0x417   : > { %v5436_v28 = vor.u32 %v5435_v52, %v5432_v33  ;;  %v12154_v53 = vsel %vm13642_vm5, %v13641_v10, %v11908_v42  ;;  %v5036_v51 = vsel %vm13643_vm4, %v12148_v11, %v5035_v8  ;;  %v4834_v52 = vsel %vm11130_vm13, %v12165_v15, 0  ;;  %vm13650_vm13 = vmmov %vm13645_vm2 }
 0x418   : > { %v12139_v12 = vor.u32 %v5462_v45, %v5459_v50  ;;  %v5541_v0 = vshll.u32 %v5036_v51, 16  ;;  %v4851_v33 = vsel %vm10912_vm0, %v12154_v53, 0  ;;  %v6151_v37 = vshrl.u32 %v5035_v8, 16  ;;  %vm13648_vm0 = vmmov %vm13643_vm4 }
 0x419   : > { %v12142_v2 = vsel %vm13639_vm7, %v5409_v43, %v5436_v28  ;;  %v5538_v43 = vshrl.u32 %v5036_v51, 16  ;;  %v12167_v40 = vrot.slane %v4851_v33, 1  ;;  %v6154_v36 = vshll.u32 %v5035_v8, 16  ;;  %vm13649_vm10 = vmmov %vm13648_vm0 }
 0x41a   : > { %v12146_v32 = vsel %vm13640_vm9, %v5436_v28, %v12139_v12  ;;  %5865 = vmatmul.mubr.bf16.gmra.mrb[44].mxu1 %v12057_v4  ;;  %v5543_v45 = vrot.slane %v5541_v0, 4  ;;  %v5004_v28 = vrot.slane %v4834_v52, 1  ;;  %v6153_v33 = vrot.slane %v6151_v37, 3  ;;  %vm13657_vm6 = vmmov %vm13648_vm0 }
 0x41b   : > { %5872 = vmatprep.mubr.bf16.mxu1 %v11761_v47  ;;  %v5540_v50 = vrot.slane %v5538_v43, 3  ;;  %v5095_v10 = vsel %vm13649_vm10, %v5035_v8, %v12167_v40  ;;  %v6156_v43 = vrot.slane %v6154_v36, 4  ;;  %vm13665_vm9 = vmmov %vm13635_vm3 }
 0x41c   : > { %v5006_v9 = vsel %vm13648_vm0, %v5004_v28, %v12050_v1  ;;  %v5565_v47 = vshrl.u32 %v5095_v10, 16  ;;  %vm13670_vm2 = vmmov %vm13635_vm3 }
 0x41d   : > { %v6133_v51 = vshrl.u32 %v5006_v9, 16  ;;  %v6136_v29 = vshll.u32 %v5006_v9, 16  ;;  %v12178_v58 = vor.u32 %v5543_v45, %v5540_v50  ;;  %v6157_v4 = vor.u32 %v6156_v43, %v6153_v33  ;;  %vm13672_vm0 = vmmov %vm13670_vm2 }
 0x41e   : > { %v4964_v45 = vshll.u32 %v11849_v59, 16  ;;  %v5567_v37 = vrot.slane %v5565_v47, 3 }
 0x41f   : > { %v6135_v0 = vrot.slane %v6133_v51, 3  ;;  %v6138_v52 = vrot.slane %v6136_v29, 4  ;;  %v12189_v28 = vsel %vm13653_vm11, %v12178_v58, %v6157_v4  ;;  %v4960_v4 = vshrl.u32 %v11823_v39, 16  ;;  %vm13677_vm11 = vmmov %vm13672_vm0 }
 0x420   : > { %13654 = vst [vmem:[#allocation30_spill] sm:$0xff] %v12189_v28  ;;  %v4966_v33 = vrot.slane %v4964_v45, 1 }
 0x421   : > { %v6139_v3 = vor.u32 %v6138_v52, %v6135_v0  ;;  %v4962_v1 = vor.u32 %v4960_v4, %v11833_v34  ;;  %v4968_v34 = vshrl.u32 %v11849_v59, 16  ;;  %v13662_v4 = vld [vmem:[#allocation42_spill] sm:$0xff] }
 0x422   : > { %5873 = vmatmul.mubr.bf16.gmra.mrb[48].mxu1 %v13647_v26  ;;  %v12182_v26 = vsel %vm13650_vm13, %v11908_v42, 0  ;;  %vm13663_vm8 = vnez %v13662_v4 }
 0x423   : > { %5880 = vmatprep.mubr.bf16.mxu1 %v11787_v24  ;;  %13651 = vst [vmem:[#allocation100_spill] sm:$0xff] %v12182_v26  ;;  %v5568_v24 = vshll.u32 %v5095_v10, 16  ;;  %v4852_v8 = vsel %vm10934_vm1, %v12182_v26, 0  ;;  %v12194_v50 = vsel %vm13655_vm12, %v6139_v3, %v12081_v30  ;;  %vm13658_vm1 = vsmask.f32 7424 }
 0x424   : > { %13656 = vst [vmem:[#allocation31_spill] sm:$0xff] %v12194_v50  ;;  %v6638_v42 = vrot.slane %v4852_v8, 1  ;;  %vm13664_vm7 = vmmov %vm13658_vm1 }
 0x425   : > { %v5570_v36 = vrot.slane %v5568_v24, 4  ;;  %v4967_v24 = vsel %vm13658_vm1, %v4962_v1, %v4966_v33  ;;  %v4980_v1 = vshll.u32 %v11889_v48, 16  ;;  %vm13669_vm4 = vmmov %vm13658_vm1 }
 0x426   : > { %v6639_v9 = vsel %vm13657_vm6, %v12167_v40, %v6638_v42  ;;  %v6725_v29 = vshrl.u32 %v6638_v42, 16  ;;  %v6728_v52 = vshll.u32 %v6638_v42, 16  ;;  %vm13676_vm13 = vmmov %vm13658_vm1 }
 0x427   : > { %v6698_v10 = vshrl.u32 %v6639_v9, 16  ;;  %v6701_v51 = vshll.u32 %v6639_v9, 16  ;;  %v12201_v43 = vor.u32 %v5570_v36, %v5567_v37  ;;  %v4972_v9 = vshll.u32 %v11866_v60, 16  ;;  %vm13680_vm6 = vmmov %vm13672_vm0 }
 0x428   : > { %v6727_v0 = vrot.slane %v6725_v29, 3  ;;  %v6730_v47 = vrot.slane %v6728_v52, 4  ;;  %v5475_v36 = vshrl.u32 %v4967_v24, 16  ;;  %v4828_v29 = vsel %vm13663_vm8, %v11823_v39, 0  ;;  %vm13683_vm1 = vmmov %vm13672_vm0 }
 0x429   : > { %v6700_v3 = vrot.slane %v6698_v10, 3  ;;  %v6703_v30 = vrot.slane %v6701_v51, 4  ;;  %v5478_v10 = vshll.u32 %v4967_v24, 16  ;;  %v4974_v51 = vrot.slane %v4972_v9, 1  ;;  %vm13688_vm8 = vmmov %vm13672_vm0 }
 0x42a   : > { %5881 = vmatmul.mubr.bf16.gmra.mrb[52].mxu1 %v11752_v44  ;;  %v6731_v37 = vor.u32 %v6730_v47, %v6727_v0  ;;  %v5469_v47 = vshll.u32 %v4828_v29, 16  ;;  %v4982_v4 = vrot.slane %v4980_v1, 1 }
 0x42b   : > { %5888 = vmatprep.mubr.bf16.mxu1 %v11812_v54  ;;  %v6704_v8 = vor.u32 %v6703_v30, %v6700_v3  ;;  %v4970_v3 = vor.u32 %v4968_v34, %v4966_v33  ;;  %v5477_v30 = vrot.slane %v5475_v36, 3  ;;  %v5480_v52 = vrot.slane %v5478_v10, 4 }
 0x42c   : > { %v5471_v33 = vrot.slane %v5469_v47, 4 }
 0x42d   : > { %v12210_v45 = vsel %vm13659_vm14, %v12201_v43, %v6704_v8  ;;  %v12213_v42 = vsel %vm13635_vm3, %v6704_v8, %v6731_v37  ;;  %v4975_v0 = vsel %vm13664_vm7, %v4970_v3, %v4974_v51  ;;  %v5466_v8 = vshrl.u32 %v4828_v29, 16  ;;  %vm13684_vm14 = vmmov %vm13672_vm0 }
 0x42e   : > { %13660 = vst [vmem:[#allocation33_spill] sm:$0xff] %v12210_v45  ;;  %13661 = vst [vmem:[#allocation34_spill] sm:$0xff] %v12213_v42  ;;  %v5481_v24 = vor.u32 %v5480_v52, %v5477_v30  ;;  %v5502_v37 = vshrl.u32 %v4975_v0, 16  ;;  %v5505_v9 = vshll.u32 %v4975_v0, 16  ;;  %v4976_v42 = vshrl.u32 %v11866_v60, 16  ;;  %v13667_v45 = vld [vmem:[#allocation45_spill] sm:$0xff] }
 0x42f   : > { %v5468_v39 = vrot.slane %v5466_v8, 3  ;;  %vm13668_vm5 = vnez %v13667_v45  ;;  %vm13689_vm7 = vmmov %vm13672_vm0 }
 0x430   : > { %v4978_v34 = vor.u32 %v4976_v42, %v4974_v51  ;;  %v12227_v36 = vsel %vm13665_vm9, %v11855_v5, %v5481_v24  ;;  %v5504_v10 = vrot.slane %v5502_v37, 3  ;;  %v5507_v3 = vrot.slane %v5505_v9, 4  ;;  %vm13691_vm9 = vmmov %vm13672_vm0 }
 0x431   : > { %13666 = vst [vmem:[#allocation35_spill] sm:$0xff] %v12227_v36  ;;  %v4829_v29 = vsel %vm13668_vm5, %v11849_v59, 0  ;;  %v5472_v52 = vor.u32 %v5471_v33, %v5468_v39  ;;  %v4984_v42 = vshrl.u32 %v11889_v48, 16  ;;  %v5086_v51 = vshll.u32 %v12154_v53, 16 }
 0x432   : > { %5889 = vmatmul.mubr.bf16.gmra.mrb[56].mxu1 %v11779_v18  ;;  %v4983_v30 = vsel %vm13669_vm4, %v4978_v34, %v4982_v4  ;;  %v5493_v0 = vshrl.u32 %v4829_v29, 16  ;;  %v5496_v1 = vshll.u32 %v4829_v29, 16  ;;  %v5508_v8 = vor.u32 %v5507_v3, %v5504_v10  ;;  %v13674_v10 = vld [vmem:[#allocation50_spill] sm:$0xff] }
 0x433   : > { %5896 = vmatprep.mubr.bf16.mxu1 %v11842_v31  ;;  %v5529_v5 = vshrl.u32 %v4983_v30, 16  ;;  %v5532_v47 = vshll.u32 %v4983_v30, 16  ;;  %v12236_v37 = vor.u32 %v4984_v42, %v4982_v4  ;;  %v12240_v45 = vsel %vm13670_vm2, %v11829_v49, %v5472_v52 }
 0x434   : > { %13671 = vst [vmem:[#allocation37_spill] sm:$0xff] %v12240_v45  ;;  %v5495_v9 = vrot.slane %v5493_v0, 3  ;;  %v5498_v26 = vrot.slane %v5496_v1, 4  ;;  %v5088_v28 = vrot.slane %v5086_v51, 1  ;;  %v12244_v39 = vsel %vm13672_vm0, %v5481_v24, %v5508_v8 }
 0x435   : > { %13673 = vst [vmem:[#allocation41_spill] sm:$0xff] %v12244_v39  ;;  %v5531_v33 = vrot.slane %v5529_v5, 3  ;;  %v5534_v34 = vrot.slane %v5532_v47, 4  ;;  %vm13675_vm10 = vnez %v13674_v10  ;;  %v5090_v24 = vshrl.u32 %v12154_v53, 16 }
 0x436   : > { %v4830_v3 = vsel %vm13675_vm10, %v11866_v60, 0  ;;  %v5089_v49 = vsel %vm13676_vm13, %v12236_v37, %v5088_v28  ;;  %v5499_v4 = vor.u32 %v5498_v26, %v5495_v9  ;;  %v13678_v60 = vld [vmem:[#allocation53_spill] sm:$0xff]  ;;  %vm13695_vm4 = vcmask 1046528   ;;  %vm13697_vm10 = vmmov %vm13672_vm0 }
 0x437   : > { %v5520_v29 = vshrl.u32 %v4830_v3, 16  ;;  %v5523_v30 = vshll.u32 %v4830_v3, 16  ;;  %v12252_v0 = vor.u32 %v5534_v34, %v5531_v33  ;;  %v5556_v1 = vshrl.u32 %v5089_v49, 16  ;;  %vm13696_vm2 = vmmov %vm13695_vm4 }
 0x438   : > { %v5559_v42 = vshll.u32 %v5089_v49, 16  ;;  %v12256_v51 = vsel %vm13677_vm11, %v5472_v52, %v5499_v4  ;;  %vm13679_vm12 = vnez %v13678_v60  ;;  %v12266_v34 = vor.u32 %v5090_v24, %v5088_v28  ;;  %v13686_v24 = vld [vmem:[#allocation56_spill] sm:$0xff]  ;;  %vm13698_vm11 = vmmov %vm13672_vm0 }
 0x439   : > { %v5522_v5 = vrot.slane %v5520_v29, 3  ;;  %v5525_v47 = vrot.slane %v5523_v30, 4  ;;  %v4831_v10 = vsel %vm13679_vm12, %v11889_v48, 0  ;;  %v12264_v26 = vsel %vm13680_vm6, %v5508_v8, %v12252_v0  ;;  %vm13699_vm12 = vmmov %vm13672_vm0 }
 0x43a   : > { %5897 = vmatmul.mubr.bf16.gmra.mrb[60].mxu1 %v11804_v55  ;;  %v5558_v9 = vrot.slane %v5556_v1, 3  ;;  %v5561_v33 = vrot.slane %v5559_v42, 4  ;;  %13681 = vst [vmem:[#allocation39_spill] sm:$0xff] %v12266_v34  ;;  %v5547_v3 = vshrl.u32 %v4831_v10, 16  ;;  %v5550_v49 = vshll.u32 %v4831_v10, 16  ;;  %vm13702_vm6 = vmmov %vm13672_vm0 }
 0x43b   : > { %5904 = vmatprep.mubr.bf16.mxu1 %v11861_v25  ;;  %v5526_v52 = vor.u32 %v5525_v47, %v5522_v5  ;;  %v5583_v30 = vshrl.u32 %v12266_v34, 16  ;;  %v5586_v48 = vshll.u32 %v12266_v34, 16  ;;  %vm13687_vm3 = vnez %v13686_v24  ;;  %v9309_v24 = vld [vmem:[#allocation7 + $0x58] sm:$0xff]  }
 0x43c   : > { %v12269_v29 = vor.u32 %v5561_v33, %v5558_v9  ;;  %v5549_v8 = vrot.slane %v5547_v3, 3  ;;  %v5552_v50 = vrot.slane %v5550_v49, 4  ;;  %v4832_v5 = vsel %vm13687_vm3, %v12154_v53, 0  ;;  %vm13747_vm3 = vmmov %vm13676_vm13 }
 0x43d   : > { %v12274_v60 = vsel %vm13683_vm1, %v5499_v4, %v5526_v52  ;;  %v5585_v1 = vrot.slane %v5583_v30, 3  ;;  %v5588_v42 = vrot.slane %v5586_v48, 4  ;;  %v5574_v4 = vshrl.u32 %v4832_v5, 16  ;;  %vm13703_vm1 = vmmov %vm13672_vm0 }
 0x43e   : > { %13682 = vst [vmem:[#allocation44_spill] sm:$0xff] %v12269_v29  ;;  %v12280_v28 = vsel %vm13684_vm14, %v12252_v0, %v12269_v29  ;;  %v5553_v47 = vor.u32 %v5552_v50, %v5549_v8  ;;  %v5577_v10 = vshll.u32 %v4832_v5, 16  ;;  %v9304_v50 = vld [vmem:[#allocation7] sm:$0xff]   ;;  %v9306_v8 = vld [vmem:[#allocation7 + $0x8] sm:$0xff]   ;;  %v9310_v5 = vld [vmem:[#allocation7 + $0x18] sm:$0xff]  }
 0x43f   : > { %13685 = vst [vmem:[#allocation43_spill] sm:$0xff] %v12280_v28  ;;  %v5589_v9 = vor.u32 %v5588_v42, %v5585_v1  ;;  %v5576_v3 = vrot.slane %v5574_v4, 3  ;;  %v9307_v1 = vld [vmem:[#allocation7 + $0x50] sm:$0xff]   ;;  %v9312_v4 = vld [vmem:[#allocation7 + $0x20] sm:$0xff]   ;;  %vm13725_vm14 = vmmov %vm13672_vm0 }
 0x440   : > { %v12287_v33 = vsel %vm13688_vm8, %v5526_v52, %v5553_v47  ;;  %v5579_v49 = vrot.slane %v5577_v10, 4  ;;  %v9305_v52 = vld [vmem:[#allocation7 + $0x48] sm:$0xff]   ;;  %v9308_v42 = vld [vmem:[#allocation7 + $0x10] sm:$0xff]   ;;  %vm13752_vm8 = vmmov %vm13672_vm0 }
 0x441   : > { %v5590_v30 = vsel %vm13689_vm7, %v12269_v29, %v5589_v9  ;;  %v9313_v10 = vld [vmem:[#allocation7 + $0x68] sm:$0xff]   ;;  %v13693_v9 = vld [vmem:[#allocation84_spill] sm:$0xff] }
 0x442   : > { %5905 = vmatmul.mubr.bf16.gmra.mrb[64].mxu1 %v11837_v38  ;;  %v12292_v48 = vor.u32 %v5579_v49, %v5576_v3  ;;  %vm13694_vm5 = vnez %v13693_v9  ;;  %v9314_v49 = vld [vmem:[#allocation7 + $0x28] sm:$0xff]  }
 0x443   : > { %5912 = vmatprep.mubr.bf16.mxu1 %v12227_v36  ;;  %v4848_v3 = vsel %vm13694_vm5, %v11849_v59, 0  ;;  %v9318_v59 = vld [vmem:[#allocation7 + $0x38] sm:$0xff]   ;;  %vm13759_vm5 = vmmov %vm13672_vm0 }
 0x444   : > { %13690 = vst [vmem:[#allocation47_spill] sm:$0xff] %v12292_v48  ;;  %v12296_v53 = vsel %vm13691_vm9, %v5553_v47, %v12292_v48  ;;  %v9311_v47 = vld [vmem:[#allocation7 + $0x60] sm:$0xff]   ;;  %vm13757_vm9 = vmmov %vm13672_vm0 }
 0x445   : > { %13692 = vst [vmem:[#allocation46_spill] sm:$0xff] %v12296_v53  ;;  %v13704_v48 = vld [vmem:[#allocation26_spill] sm:$0xff] }
 0x44a   : > { %5913 = vmatmul.mubr.bf16.gmra.mrb[68].mxu1 %v12240_v45 }
 0x44b   : > { %5920 = vmatprep.mubr.bf16.mxu1 %v12244_v39 }
 0x452   : > { %5921 = vmatmul.mubr.bf16.gmra.mrb[72].mxu1 %v12256_v51 }
 0x453   : > { %5928 = vmatprep.mubr.bf16.mxu1 %v12264_v26 }
 0x45a   : > { %5929 = vmatmul.mubr.bf16.gmra.mrb[76].mxu1 %v12274_v60 }
 0x45b   : > { %5936 = vmatprep.mubr.bf16.mxu1 %v12280_v28 }
 0x462   : > { %5937 = vmatmul.mubr.bf16.gmra.mrb[80].mxu1 %v12287_v33 }
 0x463   : > { %5944 = vmatprep.mubr.bf16.mxu1 %v5590_v30  ;;  %v9315_v30 = vld [vmem:[#allocation7 + $0x70] sm:$0xff]  }
 0x46a   : > { %5945 = vmatmul.mubr.bf16.gmra.mrb[84].mxu1 %v12296_v53 }
 0x46b   : > { %8769 = vmatprep.mubr.bf16.mxu1 %v12091_v17 }
 0x472   : > { %8770 = vmatmul.mubr.bf16.vlgmr.msra.gmra.mrb[88].mxu1 %v12097_v20 }
 0x473   : > { %8773 = vmatprep.mubr.bf16.mxu1 %v12104_v63  ;;  %8326 = vmatpush3.bf16.msra.mxu1 %v9304_v50  ;;  %v5031_v50 = vrot.slane %v4848_v3, 1 }
 0x474   : > { %8327 = vmatprep.subr.bf16.mxu1 %v9305_v52  ;;  %v9316_v52 = vld [vmem:[#allocation7 + $0x30] sm:$0xff]  }
 0x477   : > { %8328 = vmatpush3.bf16.msra.mxu1 %v9306_v8  ;;  %v9317_v8 = vld [vmem:[#allocation7 + $0x78] sm:$0xff]  }
 0x478   : > { %8329 = vmatprep.subr.bf16.mxu1 %v9307_v1  ;;  %v5032_v1 = vsel %vm13695_vm4, %v12113_v22, %v5031_v50 }
 0x47a   : > { %8774 = vmatmul.mubr.bf16.gmra.mrb[92].mxu1 %v12116_v19 }
 0x47b   : > { %8777 = vmatprep.mubr.bf16.mxu1 %v12120_v13  ;;  %8330 = vmatpush3.bf16.msra.mxu1 %v9308_v42  ;;  %v5034_v42 = vsel %vm13696_vm2, %v5031_v50, %v12148_v11  ;;  %v4853_v50 = vshrl.u32 %v12165_v15, 16 }
 0x47c   : > { %8331 = vmatprep.subr.bf16.mxu1 %v9309_v24  ;;  %v9319_v24 = vld [vmem:[#allocation7 + $0x80] sm:$0xff]  }
 0x47f   : > { %8332 = vmatpush3.bf16.msra.mxu1 %v9310_v5  ;;  %v5484_v5 = vshrl.u32 %v5032_v1, 16 }
 0x480   : > { %8333 = vmatprep.subr.bf16.mxu1 %v9311_v47  ;;  %v5487_v47 = vshll.u32 %v5032_v1, 16 }
 0x481   : > { %v5486_v9 = vrot.slane %v5484_v5, 3  ;;  %v5592_v5 = vshrl.u32 %v12167_v40, 16 }
 0x482   : > { %8778 = vmatmul.mubr.bf16.gmra.mrb[96].mxu1 %v12124_v27  ;;  %v5489_v3 = vrot.slane %v5487_v47, 4  ;;  %v5595_v47 = vshll.u32 %v12167_v40, 16 }
 0x483   : > { %8781 = vmatprep.mubr.bf16.mxu1 %v11902_v21  ;;  %8334 = vmatpush3.bf16.msra.mxu1 %v9312_v4  ;;  %v5511_v4 = vshrl.u32 %v5034_v42, 16 }
 0x484   : > { %8335 = vmatprep.subr.bf16.mxu1 %v9313_v10  ;;  %v5514_v10 = vshll.u32 %v5034_v42, 16  ;;  %v5490_v11 = vor.u32 %v5489_v3, %v5486_v9  ;;  %v5594_v3 = vrot.slane %v5592_v5, 3 }
 0x485   : > { %v5513_v22 = vrot.slane %v5511_v4, 3 }
 0x486   : > { %v12321_v1 = vsel %vm13672_vm0, %v12139_v12, %v5490_v11 }
 0x487   : > { %8336 = vmatpush3.bf16.msra.mxu1 %v9314_v49  ;;  %v4855_v49 = vshll.u32 %v12165_v15, 16 }
 0x488   : > { %8337 = vmatprep.subr.bf16.mxu1 %v9315_v30  ;;  %v5516_v30 = vrot.slane %v5514_v10, 4 }
 0x48a   : > { %8782 = vmatmul.mubr.bf16.gmra.mrb[100].mxu1 %v12108_v61 }
 0x48b   : > { %8785 = vmatprep.mubr.bf16.mxu1 %v12130_v56  ;;  %8338 = vmatpush3.bf16.msra.mxu1 %v9316_v52  ;;  %v4857_v52 = vrot.slane %v4855_v49, 1  ;;  %v5597_v49 = vrot.slane %v5595_v47, 4 }
 0x48c   : > { %8339 = vmatprep.subr.bf16.mxu1 %v9317_v8  ;;  %v5517_v8 = vor.u32 %v5516_v30, %v5513_v22  ;;  %v12340_v22 = vsel %vm13699_vm12, %v12178_v58, %v12201_v43  ;;  %v4815_v30 = vsel %vm11013_vm15, %v12165_v15, 0  ;;  %v9320_v15 = vld [vmem:[#allocation7 + $0x88] sm:$0xff]   ;;  %vm13705_vm15 = vmmov %vm13672_vm0 }
 0x48d   : > { %v4858_v42 = vor.u32 %v4857_v52, %v4853_v50  ;;  %13700 = vst [vmem:[#allocation48_spill] sm:$0xff] %v12340_v22  ;;  %v5598_v50 = vor.u32 %v5597_v49, %v5594_v3  ;;  %v6115_v52 = vshrl.u32 %v4815_v30, 16  ;;  %v9321_v3 = vld [vmem:[#allocation7 + $0x90] sm:$0xff]   ;;  %v13707_v49 = vld [vmem:[#allocation99_spill] sm:$0xff] }
 0x48e   : > { %v12334_v12 = vsel %vm13698_vm11, %v5517_v8, %v12178_v58 }
 0x48f   : > { %8340 = vmatpush3.bf16.msra.mxu1 %v9318_v59  ;;  %v12325_v59 = vsel %vm13697_vm10, %v5490_v11, %v5517_v8  ;;  %v4863_v4 = vsel %vm13676_vm13, %v4858_v42, %v11938_v35  ;;  %v6118_v8 = vshll.u32 %v4815_v30, 16  ;;  %v5599_v5 = vsel %vm13702_vm6, %v12201_v43, %v5598_v50  ;;  %v9322_v43 = vld [vmem:[#allocation7 + $0x98] sm:$0xff]   ;;  %v9324_v30 = vld [vmem:[#allocation7 + $0xa8] sm:$0xff]  }
 0x490   : > { %8801 = vmatprep.subr.bf16.mxu1 %v9319_v24  ;;  %v6124_v10 = vshrl.u32 %v4863_v4, 16  ;;  %v6127_v9 = vshll.u32 %v4863_v4, 16  ;;  %v6117_v47 = vrot.slane %v6115_v52, 3 }
 0x491   : > { %v6120_v4 = vrot.slane %v6118_v8, 4  ;;  %v9326_v8 = vld [vmem:[#allocation7 + $0xb8] sm:$0xff]  }
 0x492   : > { %8786 = vmatmul.mubr.bf16.gmra.mrb[104].mxu1 %v12142_v2  ;;  %v6126_v35 = vrot.slane %v6124_v10, 3  ;;  %v6129_v11 = vrot.slane %v6127_v9, 4  ;;  %v13706_v9 = vld [vmem:[#allocation54_spill] sm:$0xff] }
 0x493   : > { %8789 = vmatprep.mubr.bf16.mxu1 %v12146_v32  ;;  %v6121_v40 = vor.u32 %v6120_v4, %v6117_v47 }
 0x494   : > { %v6130_v42 = vor.u32 %v6129_v11, %v6126_v35 }
 0x495   : > { %v6122_v10 = vsel %vm13705_vm15, %v6121_v40, %v13704_v48  ;;  %v9325_v48 = vld [vmem:[#allocation7 + $0xb0] sm:$0xff]  }
 0x496   : > { %v6131_v58 = vsel %vm13703_vm1, %v6130_v42, %v11985_v57  ;;  %v9323_v57 = vld [vmem:[#allocation7 + $0xa0] sm:$0xff]  }
 0x49a   : > { %8790 = vmatmul.mubr.bf16.gmra.mrb[108].mxu1 %v12321_v1 }
 0x49b   : > { %8793 = vmatprep.mubr.bf16.mxu1 %v12325_v59 }
 0x4a2   : > { %8794 = vmatmul.mubr.bf16.gmra.mrb[112].mxu1 %v12334_v12 }
 0x4a3   : > { %8797 = vmatprep.mubr.bf16.mxu1 %v12340_v22  ;;  %v13712_v22 = vld [vmem:[#allocation23_spill] sm:$0xff] }
 0x4aa   : > { %8798 = vmatmul.mubr.bf16.gmra.mrb[116].mxu1 %v5599_v5  ;;  %v9327_v5 = vld [vmem:[#allocation7 + $0x1c0] sm:$0xff]  }
 0x4ab   : > { %6340 = vmatprep.mubr.bf16.mxu1 %v6131_v58 }
 0x4b2   : > { %6341 = vmatmul.mubr.bf16.vlgmr.msra.gmra.mrb[120].mxu1 %v6122_v10 }
 0x4b3   : > { %6348 = vmatprep.mubr.bf16.mxu1 %v13706_v9  ;;  %8802 = vmatpush3.bf16.msra.mxu1 %v9319_v24 }
 0x4b4   : > { %8803 = vmatprep.subr.bf16.mxu1 %v9320_v15 }
 0x4b7   : > { %8804 = vmatpush3.bf16.msra.mxu1 %v9320_v15 }
 0x4b8   : > { %8805 = vmatprep.subr.bf16.mxu1 %v9321_v3 }
 0x4ba   : > { %6349 = vmatmul.mubr.bf16.gmra.mrb[124].mxu1 %v13707_v49 }
 0x4bb   : > { %6356 = vmatprep.mubr.bf16.mxu1 %v12016_v41  ;;  %8806 = vmatpush3.bf16.msra.mxu1 %v9321_v3 }
 0x4bc   : > { %8807 = vmatprep.subr.bf16.mxu1 %v9322_v43 }
 0x4bf   : > { %8808 = vmatpush3.bf16.msra.mxu1 %v9322_v43 }
 0x4c0   : > { %8809 = vmatprep.subr.bf16.mxu1 %v9323_v57 }
 0x4c2   : > { %6357 = vmatmul.mubr.bf16.gmra.mrb[128].mxu1 %v12000_v16 }
 0x4c3   : > { %6364 = vmatprep.mubr.bf16.mxu1 %v12023_v62  ;;  %8810 = vmatpush3.bf16.msra.mxu1 %v9323_v57 }
 0x4c4   : > { %8811 = vmatprep.subr.bf16.mxu1 %v9324_v30 }
 0x4c5   : > { %v8205_v24 = vpop.f32.mrb[24].mxu1 }
 0x4c6   : > { %v8206_v35 = vpop.f32.mrb[25].mxu1 }
 0x4c7   : > { %v12357_v11 = vadd.f32 %v8206_v35, %v8205_v24  ;;  %v8208_v50 = vpop.f32.mrb[26].mxu1  ;;  %8812 = vmatpush3.bf16.msra.mxu1 %v9324_v30 }
 0x4c8   : > { %v8209_v52 = vpop.f32.mrb[27].mxu1  ;;  %8813 = vmatprep.subr.bf16.mxu1 %v9325_v48 }
 0x4c9   : > { %v12359_v42 = vadd.f32 %v8209_v52, %v8208_v50 }
 0x4ca   : > { %6365 = vmatmul.mubr.bf16.gmra.mrb[132].mxu1 %v12020_v23 }
 0x4cb   : > { %6372 = vmatprep.mubr.bf16.mxu1 %v12039_v7  ;;  %8814 = vmatpush3.bf16.msra.mxu1 %v9325_v48  ;;  %v13708_v48 = vld [vmem:[#allocation29_spill] sm:$0xff] }
 0x4cc   : > { %8815 = vmatprep.subr.bf16.mxu1 %v9326_v8 }
 0x4cd   : > { %v8211_v47 = vpop.f32.mrb[28].mxu1 }
 0x4ce   : > { %v8212_v4 = vpop.f32.mrb[29].mxu1 }
 0x4cf   : > { %v12363_v58 = vadd.f32 %v8212_v4, %v8211_v47  ;;  %v8214_v40 = vpop.f32.mrb[30].mxu1  ;;  %8816 = vmatpush3.bf16.msra.mxu1 %v9326_v8  ;;  %v13709_v47 = vld [vmem:[#allocation28_spill] sm:$0xff]  ;;  %v13710_v4 = vld [vmem:[#allocation95_spill] sm:$0xff] }
 0x4d0   : > { %v8215_v15 = vpop.f32.mrb[31].mxu1  ;;  %8461 = vmatprep.subr.bf16.mxu1 %v9327_v5 }
 0x4d1   : > { %v12365_v10 = vadd.f32 %v8215_v15, %v8214_v40 }
 0x4d2   : > { %6373 = vmatmul.mubr.bf16.gmra.mrb[136].mxu1 %v12035_v46 }
 0x4d3   : > { %6380 = vmatprep.mubr.bf16.mxu1 %v12060_v6 }
 0x4d5   : > { %v8217_v9 = vpop.f32.mrb[32].mxu1 }
 0x4d6   : > { %v8218_v3 = vpop.f32.mrb[33].mxu1 }
 0x4d7   : > { %v12369_v43 = vadd.f32 %v8218_v3, %v8217_v9  ;;  %v8220_v49 = vpop.f32.mrb[34].mxu1 }
 0x4d8   : > { %v8221_v57 = vpop.f32.mrb[35].mxu1 }
 0x4d9   : > { %v12371_v30 = vadd.f32 %v8221_v57, %v8220_v49 }
 0x4da   : > { %6381 = vmatmul.mubr.bf16.gmra.mrb[140].mxu1 %v12053_v14 }
 0x4db   : > { %6388 = vmatprep.mubr.bf16.mxu1 %v13708_v48 }
 0x4dd   : > { %v8223_v24 = vpop.f32.mrb[36].mxu1 }
 0x4de   : > { %v8224_v35 = vpop.f32.mrb[37].mxu1 }
 0x4df   : > { %v12375_v50 = vadd.f32 %v8224_v35, %v8223_v24  ;;  %v8226_v52 = vpop.f32.mrb[38].mxu1  ;;  %v13713_v24 = vld [vmem:[#allocation98_spill] sm:$0xff] }
 0x4e0   : > { %v8227_v8 = vpop.f32.mrb[39].mxu1 }
 0x4e1   : > { %v12377_v5 = vadd.f32 %v8227_v8, %v8226_v52 }
 0x4e2   : > { %6389 = vmatmul.mubr.bf16.gmra.mrb[144].mxu1 %v13709_v47 }
 0x4e3   : > { %6396 = vmatprep.mubr.bf16.mxu1 %v13710_v4 }
 0x4e5   : > { %v8229_v40 = vpop.f32.mrb[40].mxu1 }
 0x4e6   : > { %v8230_v15 = vpop.f32.mrb[41].mxu1 }
 0x4e7   : > { %v12381_v9 = vadd.f32 %v8230_v15, %v8229_v40  ;;  %v8232_v3 = vpop.f32.mrb[42].mxu1 }
 0x4e8   : > { %v8233_v49 = vpop.f32.mrb[43].mxu1 }
 0x4e9   : > { %v12383_v57 = vadd.f32 %v8233_v49, %v8232_v3 }
 0x4ea   : > { %6397 = vmatmul.mubr.bf16.gmra.mrb[148].mxu1 %v13712_v22 }
 0x4eb   : > { %13711 = vst [vmem:[#allocation49_spill] sm:$0xff] %v12383_v57  ;;  %6404 = vmatprep.mubr.bf16.mxu1 %v13713_v24 }
 0x4ed   : > { %v8235_v35 = vpop.f32.mrb[44].mxu1 }
 0x4ee   : > { %v8236_v53 = vpop.f32.mrb[45].mxu1 }
 0x4ef   : > { %v12387_v52 = vadd.f32 %v8236_v53, %v8235_v35  ;;  %v8238_v8 = vpop.f32.mrb[46].mxu1 }
 0x4f0   : > { %v8239_v29 = vpop.f32.mrb[47].mxu1 }
 0x4f1   : > { %13714 = vst [vmem:[#allocation52_spill] sm:$0xff] %v12387_v52  ;;  %v12389_v28 = vadd.f32 %v8239_v29, %v8238_v8 }
 0x4f2   : > { %6405 = vmatmul.mubr.bf16.gmra.mrb[152].mxu1 %v11752_v44 }
 0x4f3   : > { %13715 = vst [vmem:[#allocation51_spill] sm:$0xff] %v12389_v28  ;;  %6412 = vmatprep.mubr.bf16.mxu1 %v11812_v54 }
 0x4f5   : > { %v8241_v40 = vpop.f32.mrb[48].mxu1 }
 0x4f6   : > { %v8242_v15 = vpop.f32.mrb[49].mxu1 }
 0x4f7   : > { %v12393_v3 = vadd.f32 %v8242_v15, %v8241_v40  ;;  %v8244_v49 = vpop.f32.mrb[50].mxu1 }
 0x4f8   : > { %v8245_v34 = vpop.f32.mrb[51].mxu1 }
 0x4f9   : > { %13716 = vst [vmem:[#allocation58_spill] sm:$0xff] %v12393_v3  ;;  %v12395_v57 = vadd.f32 %v8245_v34, %v8244_v49 }
 0x4fa   : > { %6413 = vmatmul.mubr.bf16.gmra.mrb[156].mxu1 %v11779_v18 }
 0x4fb   : > { %13717 = vst [vmem:[#allocation55_spill] sm:$0xff] %v12395_v57  ;;  %6420 = vmatprep.mubr.bf16.mxu1 %v11842_v31 }
 0x4fd   : > { %v8247_v53 = vpop.f32.mrb[52].mxu1 }
 0x4fe   : > { %v8248_v35 = vpop.f32.mrb[53].mxu1 }
 0x4ff   : > { %v12399_v29 = vadd.f32 %v8248_v35, %v8247_v53  ;;  %v8250_v8 = vpop.f32.mrb[54].mxu1 }
 0x500   : > { %v8251_v28 = vpop.f32.mrb[55].mxu1 }
 0x501   : > { %13718 = vst [vmem:[#allocation60_spill] sm:$0xff] %v12399_v29  ;;  %v12401_v52 = vadd.f32 %v8251_v28, %v8250_v8 }
 0x502   : > { %6421 = vmatmul.mubr.bf16.gmra.mrb[160].mxu1 %v11804_v55 }
 0x503   : > { %13719 = vst [vmem:[#allocation61_spill] sm:$0xff] %v12401_v52  ;;  %6428 = vmatprep.mubr.bf16.mxu1 %v11861_v25 }
 0x505   : > { %v8253_v40 = vpop.f32.mrb[56].mxu1 }
 0x506   : > { %v8254_v15 = vpop.f32.mrb[57].mxu1 }
 0x507   : > { %v12405_v34 = vadd.f32 %v8254_v15, %v8253_v40  ;;  %v8256_v49 = vpop.f32.mrb[58].mxu1 }
 0x508   : > { %v8257_v57 = vpop.f32.mrb[59].mxu1 }
 0x509   : > { %13720 = vst [vmem:[#allocation57_spill] sm:$0xff] %v12405_v34  ;;  %v12407_v3 = vadd.f32 %v8257_v57, %v8256_v49  ;;  %v6142_v57 = vshrl.u32 %v12236_v37, 16  ;;  %v6145_v49 = vshll.u32 %v12236_v37, 16 }
 0x50a   : > { %6429 = vmatmul.mubr.bf16.gmra.mrb[164].mxu1 %v11837_v38 }
 0x50b   : > { %13721 = vst [vmem:[#allocation68_spill] sm:$0xff] %v12407_v3  ;;  %6436 = vmatprep.mubr.bf16.mxu1 %v12227_v36 }
 0x50d   : > { %v8259_v53 = vpop.f32.mrb[60].mxu1 }
 0x50e   : > { %v8260_v35 = vpop.f32.mrb[61].mxu1 }
 0x50f   : > { %v12411_v28 = vadd.f32 %v8260_v35, %v8259_v53  ;;  %v8262_v8 = vpop.f32.mrb[62].mxu1  ;;  %v6147_v35 = vrot.slane %v6145_v49, 4 }
 0x510   : > { %v8263_v52 = vpop.f32.mrb[63].mxu1 }
 0x511   : > { %13722 = vst [vmem:[#allocation70_spill] sm:$0xff] %v12411_v28  ;;  %v12413_v29 = vadd.f32 %v8263_v52, %v8262_v8  ;;  %v6144_v52 = vrot.slane %v6142_v57, 3 }
 0x512   : > { %6437 = vmatmul.mubr.bf16.gmra.mrb[168].mxu1 %v12240_v45 }
 0x513   : > { %13723 = vst [vmem:[#allocation73_spill] sm:$0xff] %v12413_v29  ;;  %6444 = vmatprep.mubr.bf16.mxu1 %v12244_v39  ;;  %v6148_v28 = vor.u32 %v6147_v35, %v6144_v52 }
 0x515   : > { %v8265_v40 = vpop.f32.mrb[64].mxu1 }
 0x516   : > { %v8266_v15 = vpop.f32.mrb[65].mxu1 }
 0x517   : > { %v12419_v3 = vadd.f32 %v8266_v15, %v8265_v40  ;;  %v8268_v34 = vpop.f32.mrb[66].mxu1 }
 0x518   : > { %v8269_v36 = vpop.f32.mrb[67].mxu1 }
 0x519   : > { %v12421_v53 = vadd.f32 %v8269_v36, %v8268_v34  ;;  %v6149_v36 = vsel %vm13725_vm14, %v12252_v0, %v6148_v28  ;;  %v9329_v28 = vld [vmem:[#allocation7 + $0x1c8] sm:$0xff]  }
 0x51a   : > { %6445 = vmatmul.mubr.bf16.gmra.mrb[172].mxu1 %v12256_v51 }
 0x51b   : > { %13724 = vst [vmem:[#allocation71_spill] sm:$0xff] %v12421_v53  ;;  %6452 = vmatprep.mubr.bf16.mxu1 %v12264_v26 }
 0x51d   : > { %v8271_v8 = vpop.f32.mrb[68].mxu1 }
 0x51e   : > { %v8272_v29 = vpop.f32.mrb[69].mxu1 }
 0x51f   : > { %v12425_v39 = vadd.f32 %v8272_v29, %v8271_v8  ;;  %v8274_v45 = vpop.f32.mrb[70].mxu1  ;;  %v13727_v29 = vld [vmem:[#allocation31_spill] sm:$0xff]  ;;  %v9328_v8 = vld [vmem:[#allocation7 + $0x180] sm:$0xff]  }
 0x520   : > { %v8275_v38 = vpop.f32.mrb[71].mxu1 }
 0x521   : > { %v12427_v37 = vadd.f32 %v8275_v38, %v8274_v45 }
 0x522   : > { %6453 = vmatmul.mubr.bf16.gmra.mrb[176].mxu1 %v12274_v60 }
 0x523   : > { %6460 = vmatprep.mubr.bf16.mxu1 %v6149_v36 }
 0x525   : > { %v8277_v34 = vpop.f32.mrb[72].mxu1 }
 0x526   : > { %v8278_v40 = vpop.f32.mrb[73].mxu1 }
 0x527   : > { %v12432_v15 = vadd.f32 %v8278_v40, %v8277_v34  ;;  %v8280_v57 = vpop.f32.mrb[74].mxu1  ;;  %v9330_v34 = vld [vmem:[#allocation7 + $0x188] sm:$0xff]   ;;  %v9331_v40 = vld [vmem:[#allocation7 + $0x1d0] sm:$0xff]  }
 0x528   : > { %v8281_v49 = vpop.f32.mrb[75].mxu1 }
 0x529   : > { %v12434_v53 = vadd.f32 %v8281_v49, %v8280_v57 }
 0x52a   : > { %6461 = vmatmul.mubr.bf16.gmra.mrb[180].mxu1 %v12287_v33 }
 0x52b   : > { %13726 = vst [vmem:[#allocation80_spill] sm:$0xff] %v12434_v53  ;;  %8817 = vmatprep.mubr.bf16.mxu1 %v13727_v29  ;;  %v9333_v53 = vld [vmem:[#allocation7 + $0x1d8] sm:$0xff]  }
 0x52d   : > { %v8283_v38 = vpop.f32.mrb[76].mxu1 }
 0x52e   : > { %v8284_v45 = vpop.f32.mrb[77].mxu1 }
 0x52f   : > { %v12438_v52 = vadd.f32 %v8284_v45, %v8283_v38  ;;  %v8286_v35 = vpop.f32.mrb[78].mxu1  ;;  %v9332_v45 = vld [vmem:[#allocation7 + $0x190] sm:$0xff]  }
 0x530   : > { %v8287_v0 = vpop.f32.mrb[79].mxu1 }
 0x531   : > { %13728 = vst [vmem:[#allocation79_spill] sm:$0xff] %v12438_v52  ;;  %v12440_v36 = vadd.f32 %v8287_v0, %v8286_v35 }
 0x532   : > { %8818 = vmatmul.mubr.bf16.vlgmr.msra.gmra.mrb[88].mxu1 %v12091_v17  ;;  %v9334_v17 = vld [vmem:[#allocation7 + $0x198] sm:$0xff]  }
 0x533   : > { %8821 = vmatprep.mubr.bf16.mxu1 %v12097_v20  ;;  %8462 = vmatpush3.bf16.msra.mxu1 %v9328_v8  ;;  %v9335_v8 = vld [vmem:[#allocation7 + $0x1e0] sm:$0xff]  }
 0x534   : > { %8463 = vmatprep.subr.bf16.mxu1 %v9329_v28 }
 0x535   : > { %v8289_v57 = vpop.f32.mrb[80].mxu1 }
 0x536   : > { %v8290_v49 = vpop.f32.mrb[81].mxu1 }
 0x537   : > { %v12444_v29 = vadd.f32 %v8290_v49, %v8289_v57  ;;  %v8292_v38 = vpop.f32.mrb[82].mxu1  ;;  %8464 = vmatpush3.bf16.msra.mxu1 %v9330_v34  ;;  %v9336_v34 = vld [vmem:[#allocation7 + $0x1a0] sm:$0xff]  }
 0x538   : > { %v8293_v52 = vpop.f32.mrb[83].mxu1  ;;  %8465 = vmatprep.subr.bf16.mxu1 %v9331_v40  ;;  %v9337_v40 = vld [vmem:[#allocation7 + $0x1e8] sm:$0xff]  }
 0x539   : > { %13729 = vst [vmem:[#allocation86_spill] sm:$0xff] %v12444_v29  ;;  %v12446_v35 = vadd.f32 %v8293_v52, %v8292_v38  ;;  %v9338_v38 = vld [vmem:[#allocation7 + $0x1a8] sm:$0xff]  }
 0x53a   : > { %8822 = vmatmul.mubr.bf16.gmra.mrb[92].mxu1 %v12104_v63 }
 0x53b   : > { %8825 = vmatprep.mubr.bf16.mxu1 %v12116_v19  ;;  %8466 = vmatpush3.bf16.msra.mxu1 %v9332_v45  ;;  %v9340_v45 = vld [vmem:[#allocation7 + $0x1b0] sm:$0xff]  }
 0x53c   : > { %8467 = vmatprep.subr.bf16.mxu1 %v9333_v53  ;;  %v9339_v53 = vld [vmem:[#allocation7 + $0x1f0] sm:$0xff]  }
 0x53d   : > { %v8295_v0 = vpop.f32.mrb[84].mxu1 }
 0x53e   : > { %v8296_v28 = vpop.f32.mrb[85].mxu1 }
 0x53f   : > { %v12450_v57 = vadd.f32 %v8296_v28, %v8295_v0  ;;  %v8298_v49 = vpop.f32.mrb[86].mxu1  ;;  %8468 = vmatpush3.bf16.msra.mxu1 %v9334_v17  ;;  %v9341_v0 = vld [vmem:[#allocation7 + $0x1f8] sm:$0xff]   ;;  %v9344_v28 = vld [vmem:[#allocation7 + $0x208] sm:$0xff]  }
 0x540   : > { %v8299_v29 = vpop.f32.mrb[87].mxu1  ;;  %8469 = vmatprep.subr.bf16.mxu1 %v9335_v8  ;;  %v9342_v17 = vld [vmem:[#allocation7 + $0x1b8] sm:$0xff]   ;;  %v13730_v8 = vld [vmem:[#allocation30_spill] sm:$0xff] }
 0x541   : > { %v12452_v52 = vadd.f32 %v8299_v29, %v8298_v49  ;;  %v9343_v29 = vld [vmem:[#allocation7 + $0x200] sm:$0xff]   ;;  %v9345_v49 = vld [vmem:[#allocation7 + $0x210] sm:$0xff]  }
 0x542   : > { %8826 = vmatmul.mubr.bf16.gmra.mrb[96].mxu1 %v12120_v13 }
 0x543   : > { %8829 = vmatprep.mubr.bf16.mxu1 %v12124_v27  ;;  %8470 = vmatpush3.bf16.msra.mxu1 %v9336_v34  ;;  %v9346_v34 = vld [vmem:[#allocation7 + $0x218] sm:$0xff]  }
 0x544   : > { %8471 = vmatprep.subr.bf16.mxu1 %v9337_v40  ;;  %v9347_v40 = vld [vmem:[#allocation7 + $0x220] sm:$0xff]  }
 0x547   : > { %8472 = vmatpush3.bf16.msra.mxu1 %v9338_v38 }
 0x548   : > { %8473 = vmatprep.subr.bf16.mxu1 %v9339_v53 }
 0x54a   : > { %8830 = vmatmul.mubr.bf16.gmra.mrb[100].mxu1 %v11902_v21 }
 0x54b   : > { %8833 = vmatprep.mubr.bf16.mxu1 %v12108_v61  ;;  %8474 = vmatpush3.bf16.msra.mxu1 %v9340_v45 }
 0x54c   : > { %8475 = vmatprep.subr.bf16.mxu1 %v9341_v0 }
 0x54f   : > { %8476 = vmatpush3.bf16.msra.mxu1 %v9342_v17 }
 0x550   : > { %8849 = vmatprep.subr.bf16.mxu1 %v9343_v29 }
 0x552   : > { %8834 = vmatmul.mubr.bf16.gmra.mrb[104].mxu1 %v12130_v56 }
 0x553   : > { %8837 = vmatprep.mubr.bf16.mxu1 %v12142_v2 }
 0x55a   : > { %8838 = vmatmul.mubr.bf16.gmra.mrb[108].mxu1 %v12146_v32 }
 0x55b   : > { %8841 = vmatprep.mubr.bf16.mxu1 %v12321_v1 }
 0x562   : > { %8842 = vmatmul.mubr.bf16.gmra.mrb[112].mxu1 %v12325_v59 }
 0x563   : > { %8845 = vmatprep.mubr.bf16.mxu1 %v12334_v12 }
 0x56a   : > { %8846 = vmatmul.mubr.bf16.gmra.mrb[116].mxu1 %v13730_v8 }
 0x56b   : > { %6914 = vmatprep.mubr.bf16.mxu1 %v12016_v41  ;;  %v9348_v41 = vld [vmem:[#allocation7 + $0x228] sm:$0xff]  }
 0x572   : > { %6915 = vmatmul.mubr.bf16.vlgmr.msra.gmra.mrb[184].mxu1 %v12000_v16  ;;  %v9349_v16 = vld [vmem:[#allocation7 + $0x230] sm:$0xff]  }
 0x573   : > { %6922 = vmatprep.mubr.bf16.mxu1 %v12023_v62  ;;  %8850 = vmatpush3.bf16.msra.mxu1 %v9343_v29 }
 0x574   : > { %8851 = vmatprep.subr.bf16.mxu1 %v9344_v28 }
 0x577   : > { %8852 = vmatpush3.bf16.msra.mxu1 %v9344_v28 }
 0x578   : > { %8853 = vmatprep.subr.bf16.mxu1 %v9345_v49 }
 0x57a   : > { %6923 = vmatmul.mubr.bf16.gmra.mrb[188].mxu1 %v12020_v23 }
 0x57b   : > { %6930 = vmatprep.mubr.bf16.mxu1 %v12039_v7  ;;  %8854 = vmatpush3.bf16.msra.mxu1 %v9345_v49  ;;  %v9350_v7 = vld [vmem:[#allocation7 + $0x238] sm:$0xff]  }
 0x57c   : > { %8855 = vmatprep.subr.bf16.mxu1 %v9346_v34 }
 0x57f   : > { %8856 = vmatpush3.bf16.msra.mxu1 %v9346_v34 }
 0x580   : > { %8857 = vmatprep.subr.bf16.mxu1 %v9347_v40 }
 0x582   : > { %6931 = vmatmul.mubr.bf16.gmra.mrb[192].mxu1 %v12035_v46 }
 0x583   : > { %6938 = vmatprep.mubr.bf16.mxu1 %v12060_v6  ;;  %8858 = vmatpush3.bf16.msra.mxu1 %v9347_v40 }
 0x584   : > { %8859 = vmatprep.subr.bf16.mxu1 %v9348_v41 }
 0x585   : > { %v8341_v62 = vpop.f32.mrb[120].mxu1 }
 0x586   : > { %v8342_v38 = vpop.f32.mrb[121].mxu1 }
 0x587   : > { %v8343_v53 = vadd.f32 %v8342_v38, %v8341_v62  ;;  %v8344_v45 = vpop.f32.mrb[122].mxu1  ;;  %8860 = vmatpush3.bf16.msra.mxu1 %v9348_v41 }
 0x588   : > { %v8345_v23 = vpop.f32.mrb[123].mxu1  ;;  %8861 = vmatprep.subr.bf16.mxu1 %v9349_v16 }
 0x589   : > { %v12473_v0 = vadd.f32 %v8343_v53, %v12357_v11  ;;  %v8346_v17 = vadd.f32 %v8345_v23, %v8344_v45 }
 0x58a   : > { %6939 = vmatmul.mubr.bf16.gmra.mrb[196].mxu1 %v12053_v14 }
 0x58b   : > { %v12477_v46 = vadd.f32 %v8346_v17, %v12359_v42  ;;  %6946 = vmatprep.mubr.bf16.mxu1 %v13708_v48  ;;  %8862 = vmatpush3.bf16.msra.mxu1 %v9349_v16 }
 0x58c   : > { %8863 = vmatprep.subr.bf16.mxu1 %v9350_v7 }
 0x58d   : > { %v8347_v6 = vpop.f32.mrb[124].mxu1 }
 0x58e   : > { %v8348_v29 = vpop.f32.mrb[125].mxu1 }
 0x58f   : > { %v8349_v8 = vadd.f32 %v8348_v29, %v8347_v6  ;;  %v8350_v28 = vpop.f32.mrb[126].mxu1  ;;  %8864 = vmatpush3.bf16.msra.mxu1 %v9350_v7 }
 0x590   : > { %v8351_v49 = vpop.f32.mrb[127].mxu1 }
 0x591   : > { %v12481_v34 = vadd.f32 %v8349_v8, %v12363_v58  ;;  %v8352_v11 = vadd.f32 %v8351_v49, %v8350_v28 }
 0x592   : > { %6947 = vmatmul.mubr.bf16.gmra.mrb[200].mxu1 %v13709_v47 }
 0x593   : > { %v12485_v14 = vadd.f32 %v8352_v11, %v12365_v10  ;;  %6954 = vmatprep.mubr.bf16.mxu1 %v13710_v4 }
 0x595   : > { %v8353_v42 = vpop.f32.mrb[128].mxu1 }
 0x596   : > { %v8354_v48 = vpop.f32.mrb[129].mxu1 }
 0x597   : > { %v8355_v40 = vadd.f32 %v8354_v48, %v8353_v42  ;;  %v8356_v41 = vpop.f32.mrb[130].mxu1  ;;  %v13732_v42 = vld [vmem:[#allocation52_spill] sm:$0xff] }
 0x598   : > { %v8357_v16 = vpop.f32.mrb[131].mxu1 }
 0x599   : > { %v12489_v62 = vadd.f32 %v8355_v40, %v12369_v43  ;;  %v8358_v38 = vadd.f32 %v8357_v16, %v8356_v41 }
 0x59a   : > { %6955 = vmatmul.mubr.bf16.gmra.mrb[204].mxu1 %v13712_v22 }
 0x59b   : > { %v12493_v58 = vadd.f32 %v8358_v38, %v12371_v30  ;;  %6962 = vmatprep.mubr.bf16.mxu1 %v13713_v24 }
 0x59d   : > { %v8359_v10 = vpop.f32.mrb[132].mxu1 }
 0x59e   : > { %v8360_v47 = vpop.f32.mrb[133].mxu1 }
 0x59f   : > { %v8361_v53 = vadd.f32 %v8360_v47, %v8359_v10  ;;  %v8362_v4 = vpop.f32.mrb[134].mxu1  ;;  %v13734_v47 = vld [vmem:[#allocation58_spill] sm:$0xff] }
 0x5a0   : > { %v8363_v45 = vpop.f32.mrb[135].mxu1 }
 0x5a1   : > { %v12497_v23 = vadd.f32 %v8361_v53, %v12375_v50  ;;  %v8364_v7 = vadd.f32 %v8363_v45, %v8362_v4  ;;  %v13731_v50 = vld [vmem:[#allocation49_spill] sm:$0xff] }
 0x5a2   : > { %6963 = vmatmul.mubr.bf16.gmra.mrb[208].mxu1 %v11752_v44  ;;  %v13735_v45 = vld [vmem:[#allocation25_spill] sm:$0xff] }
 0x5a3   : > { %v12501_v43 = vadd.f32 %v8364_v7, %v12377_v5  ;;  %6970 = vmatprep.mubr.bf16.mxu1 %v11812_v54  ;;  %v13736_v7 = vld [vmem:[#allocation55_spill] sm:$0xff] }
 0x5a5   : > { %v8365_v22 = vpop.f32.mrb[136].mxu1 }
 0x5a6   : > { %v8366_v30 = vpop.f32.mrb[137].mxu1 }
 0x5a7   : > { %v8367_v17 = vadd.f32 %v8366_v30, %v8365_v22  ;;  %v8368_v24 = vpop.f32.mrb[138].mxu1 }
 0x5a8   : > { %v8369_v6 = vpop.f32.mrb[139].mxu1 }
 0x5a9   : > { %v12505_v29 = vadd.f32 %v8367_v17, %v12381_v9  ;;  %v8370_v8 = vadd.f32 %v8369_v6, %v8368_v24  ;;  %v13733_v9 = vld [vmem:[#allocation51_spill] sm:$0xff] }
 0x5aa   : > { %6971 = vmatmul.mubr.bf16.gmra.mrb[212].mxu1 %v11779_v18 }
 0x5ab   : > { %v12509_v28 = vadd.f32 %v8370_v8, %v13731_v50  ;;  %6978 = vmatprep.mubr.bf16.mxu1 %v11842_v31  ;;  %v13738_v8 = vld [vmem:[#allocation60_spill] sm:$0xff] }
 0x5ad   : > { %v8371_v44 = vpop.f32.mrb[140].mxu1 }
 0x5ae   : > { %v8372_v5 = vpop.f32.mrb[141].mxu1 }
 0x5af   : > { %v8373_v49 = vadd.f32 %v8372_v5, %v8371_v44  ;;  %v8374_v54 = vpop.f32.mrb[142].mxu1  ;;  %v13739_v5 = vld [vmem:[#allocation37_spill] sm:$0xff] }
 0x5b0   : > { %v8375_v11 = vpop.f32.mrb[143].mxu1 }
 0x5b1   : > { %v12513_v48 = vadd.f32 %v8373_v49, %v13732_v42  ;;  %v8376_v40 = vadd.f32 %v8375_v11, %v8374_v54  ;;  %v13740_v49 = vld [vmem:[#allocation61_spill] sm:$0xff]  ;;  %v13742_v42 = vld [vmem:[#allocation100_spill] sm:$0xff] }
 0x5b2   : > { %6979 = vmatmul.mubr.bf16.gmra.mrb[216].mxu1 %v11804_v55  ;;  %v13737_v55 = vld [vmem:[#allocation35_spill] sm:$0xff]  ;;  %v13741_v11 = vld [vmem:[#allocation41_spill] sm:$0xff] }
 0x5b3   : > { %v12517_v41 = vadd.f32 %v8376_v40, %v13733_v9  ;;  %6986 = vmatprep.mubr.bf16.mxu1 %v11861_v25  ;;  %v6630_v40 = vshll.u32 %v13742_v42, 16 }
 0x5b5   : > { %v8377_v18 = vpop.f32.mrb[144].mxu1 }
 0x5b6   : > { %v8378_v16 = vpop.f32.mrb[145].mxu1 }
 0x5b7   : > { %v8379_v38 = vadd.f32 %v8378_v16, %v8377_v18  ;;  %v8380_v31 = vpop.f32.mrb[146].mxu1 }
 0x5b8   : > { %v8381_v10 = vpop.f32.mrb[147].mxu1 }
 0x5b9   : > { %v12521_v53 = vadd.f32 %v8379_v38, %v13734_v47  ;;  %v8382_v4 = vadd.f32 %v8381_v10, %v8380_v31  ;;  %v6632_v31 = vrot.slane %v6630_v40, 1  ;;  %v13743_v47 = vld [vmem:[#allocation57_spill] sm:$0xff]  ;;  %v13748_v40 = vld [vmem:[#allocation70_spill] sm:$0xff] }
 0x5ba   : > { %6987 = vmatmul.mubr.bf16.gmra.mrb[220].mxu1 %v13735_v45 }
 0x5bb   : > { %v12525_v22 = vadd.f32 %v8382_v4, %v13736_v7  ;;  %6994 = vmatprep.mubr.bf16.mxu1 %v13737_v55  ;;  %v13744_v7 = vld [vmem:[#allocation68_spill] sm:$0xff] }
 0x5bd   : > { %v8383_v30 = vpop.f32.mrb[148].mxu1 }
 0x5be   : > { %v8384_v17 = vpop.f32.mrb[149].mxu1 }
 0x5bf   : > { %v8385_v24 = vadd.f32 %v8384_v17, %v8383_v30  ;;  %v8386_v25 = vpop.f32.mrb[150].mxu1  ;;  %v13746_v30 = vld [vmem:[#allocation39_spill] sm:$0xff] }
 0x5c0   : > { %v8387_v6 = vpop.f32.mrb[151].mxu1  ;;  %v6633_v17 = vsel %vm13747_vm3, %v13746_v30, %v6632_v31 }
 0x5c1   : > { %v12529_v50 = vadd.f32 %v8385_v24, %v13738_v8  ;;  %v8388_v44 = vadd.f32 %v8387_v6, %v8386_v25  ;;  %v6689_v6 = vshrl.u32 %v6633_v17, 16  ;;  %v6692_v8 = vshll.u32 %v6633_v17, 16 }
 0x5c2   : > { %6995 = vmatmul.mubr.bf16.gmra.mrb[224].mxu1 %v13739_v5 }
 0x5c3   : > { %v12533_v54 = vadd.f32 %v8388_v44, %v13740_v49  ;;  %7002 = vmatprep.mubr.bf16.mxu1 %v13741_v11  ;;  %v6634_v44 = vshrl.u32 %v13742_v42, 16 }
 0x5c5   : > { %v8389_v9 = vpop.f32.mrb[152].mxu1 }
 0x5c6   : > { %v8390_v18 = vpop.f32.mrb[153].mxu1 }
 0x5c7   : > { %v8391_v16 = vadd.f32 %v8390_v18, %v8389_v9  ;;  %v8392_v38 = vpop.f32.mrb[154].mxu1  ;;  %v6691_v18 = vrot.slane %v6689_v6, 3 }
 0x5c8   : > { %v8393_v10 = vpop.f32.mrb[155].mxu1 }
 0x5c9   : > { %v12538_v4 = vadd.f32 %v8391_v16, %v13743_v47  ;;  %v8394_v45 = vadd.f32 %v8393_v10, %v8392_v38  ;;  %v6636_v16 = vor.u32 %v6634_v44, %v6632_v31  ;;  %v13749_v38 = vld [vmem:[#allocation73_spill] sm:$0xff]  ;;  %v13750_v47 = vld [vmem:[#allocation43_spill] sm:$0xff]  ;;  %v13751_v31 = vld [vmem:[#allocation44_spill] sm:$0xff] }
 0x5ca   : > { %7003 = vmatmul.mubr.bf16.gmra.mrb[228].mxu1 %v12256_v51 }
 0x5cb   : > { %v12542_v55 = vadd.f32 %v8394_v45, %v13744_v7  ;;  %7010 = vmatprep.mubr.bf16.mxu1 %v12264_v26  ;;  %v6694_v26 = vrot.slane %v6692_v8, 4  ;;  %v6716_v17 = vshrl.u32 %v6636_v16, 16 }
 0x5cd   : > { %13745 = vst [vmem:[#allocation24_spill] sm:$0xff] %v12542_v55  ;;  %v8395_v24 = vpop.f32.mrb[156].mxu1  ;;  %v6695_v30 = vor.u32 %v6694_v26, %v6691_v18  ;;  %v6718_v8 = vrot.slane %v6716_v17, 3 }
 0x5ce   : > { %v8396_v25 = vpop.f32.mrb[157].mxu1 }
 0x5cf   : > { %v8397_v5 = vadd.f32 %v8396_v25, %v8395_v24  ;;  %v8398_v49 = vpop.f32.mrb[158].mxu1  ;;  %v6719_v24 = vshll.u32 %v6636_v16, 16  ;;  %v6696_v6 = vsel %vm13752_vm8, %v13751_v31, %v6695_v30 }
 0x5d0   : > { %v8399_v11 = vpop.f32.mrb[159].mxu1 }
 0x5d1   : > { %v12549_v9 = vadd.f32 %v8397_v5, %v13748_v40  ;;  %v8400_v51 = vadd.f32 %v8399_v11, %v8398_v49  ;;  %v6721_v44 = vrot.slane %v6719_v24, 4  ;;  %v13753_v11 = vld [vmem:[#allocation59_spill] sm:$0xff] }
 0x5d2   : > { %7011 = vmatmul.mubr.bf16.gmra.mrb[232].mxu1 %v12274_v60  ;;  %vm13754_vm7 = vnez %v13753_v11 }
 0x5d3   : > { %v12553_v10 = vadd.f32 %v8400_v51, %v13749_v38  ;;  %7018 = vmatprep.mubr.bf16.mxu1 %v13750_v47  ;;  %v4833_v40 = vsel %vm13754_vm7, %v13742_v42, 0  ;;  %v13755_v51 = vld [vmem:[#allocation71_spill] sm:$0xff] }
 0x5d4   : > { %v6707_v16 = vshrl.u32 %v4833_v40, 16 }
 0x5d5   : > { %v8401_v45 = vpop.f32.mrb[160].mxu1 }
 0x5d6   : > { %v8402_v7 = vpop.f32.mrb[161].mxu1  ;;  %v6709_v24 = vrot.slane %v6707_v16, 3 }
 0x5d7   : > { %v8403_v25 = vadd.f32 %v8402_v7, %v8401_v45  ;;  %v8404_v55 = vpop.f32.mrb[162].mxu1 }
 0x5d8   : > { %v8405_v5 = vpop.f32.mrb[163].mxu1 }
 0x5d9   : > { %v12557_v49 = vadd.f32 %v8403_v25, %v12419_v3  ;;  %v8406_v60 = vadd.f32 %v8405_v5, %v8404_v55  ;;  %v6710_v3 = vshll.u32 %v4833_v40, 16  ;;  %v6722_v55 = vor.u32 %v6721_v44, %v6718_v8  ;;  %v13756_v5 = vld [vmem:[#allocation46_spill] sm:$0xff] }
 0x5da   : > { %7019 = vmatmul.mubr.bf16.gmra.mrb[236].mxu1 %v12287_v33 }
 0x5db   : > { %v12566_v18 = vadd.f32 %v8406_v60, %v13755_v51  ;;  %7026 = vmatprep.mubr.bf16.mxu1 %v6696_v6  ;;  %v6712_v25 = vrot.slane %v6710_v3, 4  ;;  %v6723_v42 = vsel %vm13757_vm9, %v6695_v30, %v6722_v55  ;;  %v13760_v3 = vld [vmem:[#allocation80_spill] sm:$0xff] }
 0x5dd   : > { %v8407_v26 = vpop.f32.mrb[164].mxu1  ;;  %v6713_v6 = vor.u32 %v6712_v25, %v6709_v24 }
 0x5de   : > { %v8408_v38 = vpop.f32.mrb[165].mxu1 }
 0x5df   : > { %v8409_v47 = vadd.f32 %v8408_v38, %v8407_v26  ;;  %v8410_v33 = vpop.f32.mrb[166].mxu1  ;;  %v13758_v26 = vld [vmem:[#allocation47_spill] sm:$0xff] }
 0x5e0   : > { %v8411_v45 = vpop.f32.mrb[167].mxu1  ;;  %v6714_v16 = vsel %vm13759_vm5, %v13758_v26, %v6713_v6  ;;  %v13762_v6 = vld [vmem:[#allocation86_spill] sm:$0xff] }
 0x5e1   : > { %v12569_v7 = vadd.f32 %v8409_v47, %v12425_v39  ;;  %v8412_v17 = vadd.f32 %v8411_v45, %v8410_v33  ;;  %v13761_v45 = vld [vmem:[#allocation79_spill] sm:$0xff] }
 0x5e2   : > { %7027 = vmatmul.mubr.bf16.gmra.mrb[240].mxu1 %v13756_v5 }
 0x5e3   : > { %v12574_v60 = vadd.f32 %v8412_v17, %v12427_v37  ;;  %7034 = vmatprep.mubr.bf16.mxu1 %v6723_v42 }
 0x5e5   : > { %v8413_v31 = vpop.f32.mrb[168].mxu1 }
 0x5e6   : > { %v8414_v8 = vpop.f32.mrb[169].mxu1 }
 0x5e7   : > { %v8415_v44 = vadd.f32 %v8414_v8, %v8413_v31  ;;  %v8416_v11 = vpop.f32.mrb[170].mxu1 }
 0x5e8   : > { %v8417_v40 = vpop.f32.mrb[171].mxu1 }
 0x5e9   : > { %v12577_v39 = vadd.f32 %v8415_v44, %v12432_v15  ;;  %v8418_v51 = vadd.f32 %v8417_v40, %v8416_v11 }
 0x5ea   : > { %7035 = vmatmul.mubr.bf16.gmra.mrb[244].mxu1 %v6714_v16 }
 0x5eb   : > { %v12582_v30 = vadd.f32 %v8418_v51, %v13760_v3  ;;  %8865 = vmatprep.mubr.bf16.mxu1 %v12097_v20 }
 0x5ed   : > { %v8419_v37 = vpop.f32.mrb[172].mxu1 }
 0x5ee   : > { %v8420_v38 = vpop.f32.mrb[173].mxu1 }
 0x5ef   : > { %v8421_v55 = vadd.f32 %v8420_v38, %v8419_v37  ;;  %v8422_v47 = vpop.f32.mrb[174].mxu1 }
 0x5f0   : > { %v8423_v33 = vpop.f32.mrb[175].mxu1 }
 0x5f1   : > { %v12586_v17 = vadd.f32 %v8421_v55, %v13761_v45  ;;  %v8424_v15 = vadd.f32 %v8423_v33, %v8422_v47 }
 0x5f2   : > { %8866 = vmatmul.mubr.bf16.vlgmr.msra.gmra.mrb[88].mxu1 %v12104_v63 }
 0x5f3   : > { %v12590_v24 = vadd.f32 %v8424_v15, %v12440_v36  ;;  %8869 = vmatprep.mubr.bf16.mxu1 %v12116_v19 }
 0x5f5   : > { %v8425_v25 = vpop.f32.mrb[176].mxu1 }
 0x5f6   : > { %v8426_v5 = vpop.f32.mrb[177].mxu1 }
 0x5f7   : > { %v8427_v42 = vadd.f32 %v8426_v5, %v8425_v25  ;;  %v8428_v20 = vpop.f32.mrb[178].mxu1 }
 0x5f8   : > { %v8429_v31 = vpop.f32.mrb[179].mxu1 }
 0x5f9   : > { %v12594_v8 = vadd.f32 %v8427_v42, %v13762_v6  ;;  %v8430_v44 = vadd.f32 %v8429_v31, %v8428_v20 }
 0x5fa   : > { %8870 = vmatmul.mubr.bf16.gmra.mrb[92].mxu1 %v12120_v13  ;;  %v13763_v13 = vld [vmem:[#allocation48_spill] sm:$0xff] }
 0x5fb   : > { %v12598_v11 = vadd.f32 %v8430_v44, %v12446_v35  ;;  %8873 = vmatprep.mubr.bf16.mxu1 %v12124_v27  ;;  %v13765_v27 = vld [vmem:[#allocation34_spill] sm:$0xff] }
 0x5fd   : > { %v8431_v63 = vpop.f32.mrb[180].mxu1 }
 0x5fe   : > { %v8432_v36 = vpop.f32.mrb[181].mxu1 }
 0x5ff   : > { %v8433_v40 = vadd.f32 %v8432_v36, %v8431_v63  ;;  %v8434_v19 = vpop.f32.mrb[182].mxu1 }
 0x600   : > { %v8435_v51 = vpop.f32.mrb[183].mxu1 }
 0x601   : > { %v12602_v26 = vadd.f32 %v8433_v40, %v12450_v57  ;;  %v8436_v16 = vadd.f32 %v8435_v51, %v8434_v19 }
 0x602   : > { %8874 = vmatmul.mubr.bf16.gmra.mrb[96].mxu1 %v11902_v21  ;;  %v13764_v21 = vld [vmem:[#allocation33_spill] sm:$0xff] }
 0x603   : > { %v12606_v3 = vadd.f32 %v8436_v16, %v12452_v52  ;;  %8877 = vmatprep.mubr.bf16.mxu1 %v12108_v61 }
 0x60a   : > { %8878 = vmatmul.mubr.bf16.gmra.mrb[100].mxu1 %v12130_v56 }
 0x60b   : > { %8881 = vmatprep.mubr.bf16.mxu1 %v12142_v2 }
 0x612   : > { %8882 = vmatmul.mubr.bf16.gmra.mrb[104].mxu1 %v12146_v32 }
 0x613   : > { %8885 = vmatprep.mubr.bf16.mxu1 %v12321_v1 }
 0x61a   : > { %8886 = vmatmul.mubr.bf16.gmra.mrb[108].mxu1 %v12325_v59 }
 0x61b   : > { %8889 = vmatprep.mubr.bf16.mxu1 %v12334_v12 }
 0x622   : > { %8890 = vmatmul.mubr.bf16.gmra.mrb[112].mxu1 %v13763_v13 }
 0x623   : > { %8893 = vmatprep.mubr.bf16.mxu1 %v13764_v21 }
 0x62a   : > { %8894 = vmatmul.mubr.bf16.gmra.mrb[116].mxu1 %v13765_v27 }
 0x645   : > { %v8477_v35 = vpop.f32.mrb[184].mxu1 }
 0x646   : > { %v8478_v61 = vpop.f32.mrb[185].mxu1 }
 0x647   : > { %v8479_v57 = vadd.f32 %v8478_v61, %v8477_v35  ;;  %v8480_v56 = vpop.f32.mrb[186].mxu1 }
 0x648   : > { %v8481_v52 = vpop.f32.mrb[187].mxu1 }
 0x649   : > { %v8482_v2 = vadd.f32 %v8481_v52, %v8480_v56  ;;  %v12619_v32 = vadd.f32 %v12473_v0, %v8479_v57 }
 0x64b   : > { %v12622_v1 = vadd.f32 %v12477_v46, %v8482_v2 }
 0x64d   : > { %v8483_v59 = vpop.f32.mrb[188].mxu1 }
 0x64e   : > { %v8484_v12 = vpop.f32.mrb[189].mxu1 }
 0x64f   : > { %v8485_v37 = vadd.f32 %v8484_v12, %v8483_v59  ;;  %v8486_v38 = vpop.f32.mrb[190].mxu1 }
 0x650   : > { %v8487_v55 = vpop.f32.mrb[191].mxu1 }
 0x651   : > { %v8488_v47 = vadd.f32 %v8487_v55, %v8486_v38  ;;  %v12625_v33 = vadd.f32 %v12481_v34, %v8485_v37 }
 0x653   : > { %v12628_v45 = vadd.f32 %v12485_v14, %v8488_v47 }
 0x655   : > { %v8489_v15 = vpop.f32.mrb[192].mxu1 }
 0x656   : > { %v8490_v25 = vpop.f32.mrb[193].mxu1 }
 0x657   : > { %v8491_v5 = vadd.f32 %v8490_v25, %v8489_v15  ;;  %v8492_v0 = vpop.f32.mrb[194].mxu1 }
 0x658   : > { %v8493_v42 = vpop.f32.mrb[195].mxu1 }
 0x659   : > { %v8494_v20 = vadd.f32 %v8493_v42, %v8492_v0  ;;  %v12631_v46 = vadd.f32 %v12489_v62, %v8491_v5 }
 0x65b   : > { %v12634_v31 = vadd.f32 %v12493_v58, %v8494_v20 }
 0x65d   : > { %v8495_v6 = vpop.f32.mrb[196].mxu1 }
 0x65e   : > { %v8496_v44 = vpop.f32.mrb[197].mxu1 }
 0x65f   : > { %v8497_v63 = vadd.f32 %v8496_v44, %v8495_v6  ;;  %v8498_v34 = vpop.f32.mrb[198].mxu1 }
 0x660   : > { %v8499_v36 = vpop.f32.mrb[199].mxu1 }
 0x661   : > { %v8500_v40 = vadd.f32 %v8499_v36, %v8498_v34  ;;  %v12637_v14 = vadd.f32 %v12497_v23, %v8497_v63 }
 0x663   : > { %v12640_v19 = vadd.f32 %v12501_v43, %v8500_v40 }
 0x665   : > { %v8501_v51 = vpop.f32.mrb[200].mxu1 }
 0x666   : > { %v8502_v16 = vpop.f32.mrb[201].mxu1 }
 0x667   : > { %v8503_v13 = vadd.f32 %v8502_v16, %v8501_v51  ;;  %v8504_v62 = vpop.f32.mrb[202].mxu1  ;;  %v13766_v51 = vld [vmem:[#allocation24_spill] sm:$0xff] }
 0x668   : > { %v8505_v21 = vpop.f32.mrb[203].mxu1 }
 0x669   : > { %v8506_v27 = vadd.f32 %v8505_v21, %v8504_v62  ;;  %v12643_v58 = vadd.f32 %v12505_v29, %v8503_v13 }
 0x66b   : > { %v12646_v35 = vadd.f32 %v12509_v28, %v8506_v27 }
 0x66d   : > { %v8507_v61 = vpop.f32.mrb[204].mxu1 }
 0x66e   : > { %v8508_v57 = vpop.f32.mrb[205].mxu1 }
 0x66f   : > { %v8509_v56 = vadd.f32 %v8508_v57, %v8507_v61  ;;  %v8510_v23 = vpop.f32.mrb[206].mxu1 }
 0x670   : > { %v8511_v52 = vpop.f32.mrb[207].mxu1 }
 0x671   : > { %v8512_v2 = vadd.f32 %v8511_v52, %v8510_v23  ;;  %v12649_v43 = vadd.f32 %v12513_v48, %v8509_v56 }
 0x673   : > { %v12652_v59 = vadd.f32 %v12517_v41, %v8512_v2 }
 0x675   : > { %v8513_v12 = vpop.f32.mrb[208].mxu1 }
 0x676   : > { %v8514_v37 = vpop.f32.mrb[209].mxu1 }
 0x677   : > { %v8515_v38 = vadd.f32 %v8514_v37, %v8513_v12  ;;  %v8516_v29 = vpop.f32.mrb[210].mxu1 }
 0x678   : > { %v8517_v55 = vpop.f32.mrb[211].mxu1 }
 0x679   : > { %v8518_v47 = vadd.f32 %v8517_v55, %v8516_v29  ;;  %v12655_v28 = vadd.f32 %v12521_v53, %v8515_v38 }
 0x67b   : > { %v12658_v15 = vadd.f32 %v12525_v22, %v8518_v47 }
 0x67d   : > { %v8519_v25 = vpop.f32.mrb[212].mxu1 }
 0x67e   : > { %v8520_v5 = vpop.f32.mrb[213].mxu1 }
 0x67f   : > { %v8521_v0 = vadd.f32 %v8520_v5, %v8519_v25  ;;  %v8522_v48 = vpop.f32.mrb[214].mxu1 }
 0x680   : > { %v8523_v42 = vpop.f32.mrb[215].mxu1 }
 0x681   : > { %v8524_v20 = vadd.f32 %v8523_v42, %v8522_v48  ;;  %v12661_v41 = vadd.f32 %v12529_v50, %v8521_v0 }
 0x683   : > { %v12664_v6 = vadd.f32 %v12533_v54, %v8524_v20 }
 0x685   : > { %v8525_v44 = vpop.f32.mrb[216].mxu1 }
 0x686   : > { %v8526_v63 = vpop.f32.mrb[217].mxu1 }
 0x687   : > { %v8527_v34 = vadd.f32 %v8526_v63, %v8525_v44  ;;  %v8528_v53 = vpop.f32.mrb[218].mxu1 }
 0x688   : > { %v8529_v36 = vpop.f32.mrb[219].mxu1 }
 0x689   : > { %v8530_v40 = vadd.f32 %v8529_v36, %v8528_v53  ;;  %v12667_v22 = vadd.f32 %v12538_v4, %v8527_v34 }
 0x68b   : > { %v12670_v16 = vadd.f32 %v13766_v51, %v8530_v40 }
 0x68d   : > { %v8531_v13 = vpop.f32.mrb[220].mxu1 }
 0x68e   : > { %v8532_v62 = vpop.f32.mrb[221].mxu1 }
 0x68f   : > { %v8533_v21 = vadd.f32 %v8532_v62, %v8531_v13  ;;  %v8534_v50 = vpop.f32.mrb[222].mxu1 }
 0x690   : > { %v8535_v27 = vpop.f32.mrb[223].mxu1 }
 0x691   : > { %v8536_v61 = vadd.f32 %v8535_v27, %v8534_v50  ;;  %v12673_v54 = vadd.f32 %v12549_v9, %v8533_v21 }
 0x693   : > { %v12676_v57 = vadd.f32 %v12553_v10, %v8536_v61 }
 0x695   : > { %v8537_v56 = vpop.f32.mrb[224].mxu1 }
 0x696   : > { %v8538_v23 = vpop.f32.mrb[225].mxu1 }
 0x697   : > { %v8539_v52 = vadd.f32 %v8538_v23, %v8537_v56  ;;  %v8540_v4 = vpop.f32.mrb[226].mxu1 }
 0x698   : > { %v8541_v2 = vpop.f32.mrb[227].mxu1 }
 0x699   : > { %v8542_v12 = vadd.f32 %v8541_v2, %v8540_v4  ;;  %v12679_v37 = vadd.f32 %v12557_v49, %v8539_v52 }
 0x69b   : > { %v12682_v38 = vadd.f32 %v12566_v18, %v8542_v12 }
 0x69d   : > { %v8543_v29 = vpop.f32.mrb[228].mxu1 }
 0x69e   : > { %v8544_v55 = vpop.f32.mrb[229].mxu1 }
 0x69f   : > { %v8545_v47 = vadd.f32 %v8544_v55, %v8543_v29  ;;  %v8546_v9 = vpop.f32.mrb[230].mxu1 }
 0x6a0   : > { %v8547_v25 = vpop.f32.mrb[231].mxu1 }
 0x6a1   : > { %v8548_v5 = vadd.f32 %v8547_v25, %v8546_v9  ;;  %v12685_v10 = vadd.f32 %v12569_v7, %v8545_v47  ;;  %v12723_v25 = vld [vmem:[%s12918_s6] ss:$0 sm:$0xff] }
 0x6a3   : > { %v12688_v0 = vadd.f32 %v12574_v60, %v8548_v5 }
 0x6a5   : > { %v8549_v48 = vpop.f32.mrb[232].mxu1 }
 0x6a6   : > { %v8550_v42 = vpop.f32.mrb[233].mxu1 }
 0x6a7   : > { %v8551_v20 = vadd.f32 %v8550_v42, %v8549_v48  ;;  %v8552_v49 = vpop.f32.mrb[234].mxu1 }
 0x6a8   : > { %v8553_v44 = vpop.f32.mrb[235].mxu1 }
 0x6a9   : > { %v8554_v63 = vadd.f32 %v8553_v44, %v8552_v49  ;;  %v12691_v18 = vadd.f32 %v12577_v39, %v8551_v20  ;;  %v9370_v44 = vld [vmem:[%s9811_s12 + $0x14] sm:$0xff]  }
 0x6ab   : > { %v12694_v34 = vadd.f32 %v12582_v30, %v8554_v63  ;;  %v7348_v63 = vunpack.c.h.bf16 %v9370_v44 }
 0x6ad   : > { %v8555_v53 = vpop.f32.mrb[236].mxu1 }
 0x6ae   : > { %v8556_v36 = vpop.f32.mrb[237].mxu1 }
 0x6af   : > { %v8557_v40 = vadd.f32 %v8556_v36, %v8555_v53  ;;  %v8558_v7 = vpop.f32.mrb[238].mxu1 }
 0x6b0   : > { %v8559_v51 = vpop.f32.mrb[239].mxu1 }
 0x6b1   : > { %v8560_v13 = vadd.f32 %v8559_v51, %v8558_v7  ;;  %v12697_v60 = vadd.f32 %v12586_v17, %v8557_v40 }
 0x6b3   : > { %v12700_v62 = vadd.f32 %v12590_v24, %v8560_v13  ;;  %v9372_v13 = vld [vmem:[%s9811_s12 + $0x1c] sm:$0xff]  }
 0x6b5   : > { %v8561_v21 = vpop.f32.mrb[240].mxu1 }
 0x6b6   : > { %v8562_v50 = vpop.f32.mrb[241].mxu1 }
 0x6b7   : > { %v8563_v27 = vadd.f32 %v8562_v50, %v8561_v21  ;;  %v8564_v39 = vpop.f32.mrb[242].mxu1  ;;  %v7349_v21 = vunpack.c.l.bf16 %v9372_v13 }
 0x6b8   : > { %v8565_v61 = vpop.f32.mrb[243].mxu1 }
 0x6b9   : > { %v8566_v56 = vadd.f32 %v8565_v61, %v8564_v39  ;;  %v12703_v30 = vadd.f32 %v12594_v8, %v8563_v27  ;;  %v12717_v8 = vld [vmem:[%s12917_s5] ss:$0 sm:$0xff]  ;;  %v7347_v27 = vunpack.c.l.bf16 %v9370_v44 }
 0x6bb   : > { %v12706_v23 = vadd.f32 %v12598_v11, %v8566_v56 }
 0x6bd   : > { %v8567_v52 = vpop.f32.mrb[244].mxu1 }
 0x6be   : > { %v8568_v4 = vpop.f32.mrb[245].mxu1 }
 0x6bf   : > { %v8569_v2 = vadd.f32 %v8568_v4, %v8567_v52  ;;  %v8570_v17 = vpop.f32.mrb[246].mxu1 }
 0x6c0   : > { %v8571_v12 = vpop.f32.mrb[247].mxu1 }
 0x6c1   : > { %v8572_v29 = vadd.f32 %v8571_v12, %v8570_v17  ;;  %v12709_v24 = vadd.f32 %v12602_v26, %v8569_v2 }
 0x6c3   : > { %v12712_v55 = vadd.f32 %v12606_v3, %v8572_v29 }
 0x6c5   : > { %v8867_v47 = vpop.f32.mrb[88].mxu1 }
 0x6c6   : > { %v8915_v11 = vadd.f32 %v12625_v33, %v8867_v47  ;;  %v7077_v9 = vpop.f32.mrb[89].mxu1 }
 0x6c7   : > { %v8918_v26 = vadd.f32 %v12619_v32, %v7077_v9  ;;  %v8868_v5 = vpop.f32.mrb[90].mxu1  ;;  %v9371_v32 = vld [vmem:[%s9811_s12 + $0xc] sm:$0xff]   ;;  %v9373_v9 = vld [vmem:[%s9811_s12 + $0x24] sm:$0xff]  }
 0x6c8   : > { %v7245_v3 = vmul.f32 %v8915_v11, %v12717_v8  ;;  %v8921_v48 = vadd.f32 %v12628_v45, %v8868_v5  ;;  %v7080_v42 = vpop.f32.mrb[91].mxu1  ;;  %v7346_v40 = vunpack.c.h.bf16 %v9371_v32 }
 0x6c9   : > { %v7243_v20 = vmul.f32 %v8918_v26, %v12717_v8  ;;  %v8924_v49 = vadd.f32 %v12622_v1, %v7080_v42  ;;  %v7352_v26 = vunpack.c.h.bf16 %v9373_v9 }
 0x6ca   : > { %v7284_v33 = vadd.f32 %v12723_v25, %v7245_v3  ;;  %v7246_v53 = vmul.f32 %v8921_v48, %v12717_v8 }
 0x6cb   : > { %v7282_v36 = vadd.f32 %v12723_v25, %v7243_v20  ;;  %v7244_v7 = vmul.f32 %v8924_v49, %v12717_v8 }
 0x6cc   : > { %v7316_v51 = vmax.f32 %v7284_v33, 0.0  ;;  %v7285_v45 = vadd.f32 %v12723_v25, %v7246_v53 }
 0x6cd   : > { %v7314_v1 = vmax.f32 %v7282_v36, 0.0  ;;  %v7283_v50 = vadd.f32 %v12723_v25, %v7244_v7  ;;  %v8871_v39 = vpop.f32.mrb[92].mxu1 }
 0x6ce   : > { %v7380_v61 = vadd.f32 %v7348_v63, %v7316_v51  ;;  %v7317_v56 = vmax.f32 %v7285_v45, 0.0  ;;  %v8927_v52 = vadd.f32 %v12637_v14, %v8871_v39  ;;  %v7093_v4 = vpop.f32.mrb[93].mxu1  ;;  %v7350_v14 = vunpack.c.h.bf16 %v9372_v13  ;;  %v9374_v51 = vld [vmem:[%s9811_s12 + $0x2c] sm:$0xff]  }
 0x6cf   : > { %v7378_v2 = vadd.f32 %v7346_v40, %v7314_v1  ;;  %v7315_v17 = vmax.f32 %v7283_v50, 0.0  ;;  %v8930_v12 = vadd.f32 %v12631_v46, %v7093_v4  ;;  %v8872_v29 = vpop.f32.mrb[94].mxu1  ;;  %v7353_v45 = vunpack.c.l.bf16 %v9374_v51 }
 0x6d0   : > { %v7381_v47 = vadd.f32 %v7349_v21, %v7317_v56  ;;  %v7249_v11 = vmul.f32 %v8927_v52, %v12717_v8  ;;  %v8933_v5 = vadd.f32 %v12640_v19, %v8872_v29  ;;  %v7096_v3 = vpop.f32.mrb[95].mxu1  ;;  %v7412_v49 = vmax.f32 %v7380_v61, 0.0 }
 0x6d1   : > { %v7379_v48 = vadd.f32 %v7347_v27, %v7315_v17  ;;  %v7247_v42 = vmul.f32 %v8930_v12, %v12717_v8  ;;  %v8936_v20 = vadd.f32 %v12634_v31, %v7096_v3  ;;  %v7410_v63 = vmax.f32 %v7378_v2, 0.0 }
 0x6d2   : > { %v7413_v33 = vmax.f32 %v7381_v47, 0.0  ;;  %v7288_v46 = vadd.f32 %v12723_v25, %v7249_v11  ;;  %v7250_v44 = vmul.f32 %v8933_v5, %v12717_v8  ;;  %v7351_v1 = vunpack.c.l.bf16 %v9373_v9  ;;  %v9375_v47 = vld [vmem:[%s9811_s12 + $0x34] sm:$0xff]  }
 0x6d3   : > { %v7411_v53 = vmax.f32 %v7379_v48, 0.0  ;;  %v7286_v36 = vadd.f32 %v12723_v25, %v7247_v42  ;;  %v7248_v19 = vmul.f32 %v8936_v20, %v12717_v8  ;;  %v7356_v11 = vunpack.c.h.bf16 %v9375_v47 }
 0x6d4   : > { %v8024_v32 = vpack.c.bf16 %v7413_v33, %v7412_v49  ;;  %v7320_v40 = vmax.f32 %v7288_v46, 0.0  ;;  %v7289_v7 = vadd.f32 %v12723_v25, %v7250_v44 }
 0x6d5   : > { %v8019_v13 = vpack.c.bf16 %v7411_v53, %v7410_v63  ;;  %v7318_v31 = vmax.f32 %v7286_v36, 0.0  ;;  %v7287_v21 = vadd.f32 %v12723_v25, %v7248_v19  ;;  %v8875_v50 = vpop.f32.mrb[96].mxu1  ;;  %v9376_v36 = vld [vmem:[%s9811_s12 + $0x3c] sm:$0xff]  }
 0x6d6   : > { %8096 = vst [vmem:[%s12754_s19 + $0x8] sm:$0xff] %v8024_v32   ;;  %v7384_v27 = vadd.f32 %v7352_v26, %v7320_v40  ;;  %v7321_v39 = vmax.f32 %v7289_v7, 0.0  ;;  %v8939_v61 = vadd.f32 %v12649_v43, %v8875_v50  ;;  %v7109_v56 = vpop.f32.mrb[97].mxu1  ;;  %v7354_v43 = vunpack.c.h.bf16 %v9374_v51 }
 0x6d7   : > { %8020 = vst [vmem:[%s12754_s19] sm:$0xff] %v8019_v13   ;;  %v7382_v52 = vadd.f32 %v7350_v14, %v7318_v31  ;;  %v7319_v4 = vmax.f32 %v7287_v21, 0.0  ;;  %v8942_v2 = vadd.f32 %v12643_v58, %v7109_v56  ;;  %v8876_v17 = vpop.f32.mrb[98].mxu1  ;;  %v7355_v7 = vunpack.c.l.bf16 %v9375_v47 }
 0x6d8   : > { %v7385_v12 = vadd.f32 %v7353_v45, %v7321_v39  ;;  %v7253_v29 = vmul.f32 %v8939_v61, %v12717_v8  ;;  %v8945_v9 = vadd.f32 %v12652_v59, %v8876_v17  ;;  %v7112_v5 = vpop.f32.mrb[99].mxu1  ;;  %v7416_v42 = vmax.f32 %v7384_v27, 0.0 }
 0x6d9   : > { %v7383_v26 = vadd.f32 %v7351_v1, %v7319_v4  ;;  %v7251_v3 = vmul.f32 %v8942_v2, %v12717_v8  ;;  %v8948_v48 = vadd.f32 %v12646_v35, %v7112_v5  ;;  %v7414_v49 = vmax.f32 %v7382_v52, 0.0  ;;  %v9377_v52 = vld [vmem:[%s9811_s12 + $0x44] sm:$0xff]  }
 0x6da   : > { %v7417_v14 = vmax.f32 %v7385_v12, 0.0  ;;  %v7292_v58 = vadd.f32 %v12723_v25, %v7253_v29  ;;  %v7254_v20 = vmul.f32 %v8945_v9, %v12717_v8  ;;  %v7357_v35 = vunpack.c.l.bf16 %v9376_v36 }
 0x6db   : > { %v7415_v33 = vmax.f32 %v7383_v26, 0.0  ;;  %v7290_v46 = vadd.f32 %v12723_v25, %v7251_v3  ;;  %v7252_v59 = vmul.f32 %v8948_v48, %v12717_v8  ;;  %v7360_v4 = vunpack.c.h.bf16 %v9377_v52 }
 0x6dc   : > { %v8034_v44 = vpack.c.bf16 %v7417_v14, %v7416_v42  ;;  %v7324_v63 = vmax.f32 %v7292_v58, 0.0  ;;  %v7293_v53 = vadd.f32 %v12723_v25, %v7254_v20  ;;  %v9378_v58 = vld [vmem:[%s9811_s12 + $0x4c] sm:$0xff]  }
 0x6dd   : > { %v8029_v19 = vpack.c.bf16 %v7415_v33, %v7414_v49  ;;  %v7322_v32 = vmax.f32 %v7290_v46, 0.0  ;;  %v7291_v40 = vadd.f32 %v12723_v25, %v7252_v59  ;;  %v8879_v51 = vpop.f32.mrb[100].mxu1  ;;  %v7359_v46 = vunpack.c.l.bf16 %v9377_v52 }
 0x6de   : > { %8098 = vst [vmem:[%s12754_s19 + $0x18] sm:$0xff] %v8034_v44   ;;  %v7388_v45 = vadd.f32 %v7356_v11, %v7324_v63  ;;  %v7325_v13 = vmax.f32 %v7293_v53, 0.0  ;;  %v8951_v31 = vadd.f32 %v12661_v41, %v8879_v51  ;;  %v7125_v21 = vpop.f32.mrb[101].mxu1  ;;  %v7358_v41 = vunpack.c.h.bf16 %v9376_v36 }
 0x6df   : > { %8097 = vst [vmem:[%s12754_s19 + $0x10] sm:$0xff] %v8029_v19   ;;  %v7386_v1 = vadd.f32 %v7354_v43, %v7322_v32  ;;  %v7323_v50 = vmax.f32 %v7291_v40, 0.0  ;;  %v8954_v27 = vadd.f32 %v12655_v28, %v7125_v21  ;;  %v8880_v39 = vpop.f32.mrb[102].mxu1 }
 0x6e0   : > { %v7389_v61 = vadd.f32 %v7357_v35, %v7325_v13  ;;  %v7257_v56 = vmul.f32 %v8951_v31, %v12717_v8  ;;  %v8957_v2 = vadd.f32 %v12664_v6, %v8880_v39  ;;  %v7128_v17 = vpop.f32.mrb[103].mxu1  ;;  %v7420_v11 = vmax.f32 %v7388_v45, 0.0  ;;  %v9379_v45 = vld [vmem:[%s9811_s12 + $0x54] sm:$0xff]  }
 0x6e1   : > { %v7387_v12 = vadd.f32 %v7355_v7, %v7323_v50  ;;  %v7255_v29 = vmul.f32 %v8954_v27, %v12717_v8  ;;  %v8960_v47 = vadd.f32 %v12658_v15, %v7128_v17  ;;  %v7418_v26 = vmax.f32 %v7386_v1, 0.0 }
 0x6e2   : > { %v7421_v9 = vmax.f32 %v7389_v61, 0.0  ;;  %v7296_v28 = vadd.f32 %v12723_v25, %v7257_v56  ;;  %v7258_v5 = vmul.f32 %v8957_v2, %v12717_v8  ;;  %v7361_v15 = vunpack.c.l.bf16 %v9378_v58 }
 0x6e3   : > { %v7419_v3 = vmax.f32 %v7387_v12, 0.0  ;;  %v7294_v43 = vadd.f32 %v12723_v25, %v7255_v29  ;;  %v7256_v6 = vmul.f32 %v8960_v47, %v12717_v8  ;;  %v7364_v13 = vunpack.c.h.bf16 %v9379_v45 }
 0x6e4   : > { %v8044_v48 = vpack.c.bf16 %v7421_v9, %v7420_v11  ;;  %v7328_v42 = vmax.f32 %v7296_v28, 0.0  ;;  %v7297_v14 = vadd.f32 %v12723_v25, %v7258_v5  ;;  %v7363_v28 = vunpack.c.l.bf16 %v9379_v45 }
 0x6e5   : > { %v8039_v20 = vpack.c.bf16 %v7419_v3, %v7418_v26  ;;  %v7326_v49 = vmax.f32 %v7294_v43, 0.0  ;;  %v7295_v33 = vadd.f32 %v12723_v25, %v7256_v6  ;;  %v8883_v59 = vpop.f32.mrb[104].mxu1 }
 0x6e6   : > { %8100 = vst [vmem:[%s12754_s19 + $0x28] sm:$0xff] %v8044_v48   ;;  %v7392_v44 = vadd.f32 %v7360_v4, %v7328_v42  ;;  %v7329_v63 = vmax.f32 %v7297_v14, 0.0  ;;  %v8963_v53 = vadd.f32 %v12673_v54, %v8883_v59  ;;  %v7141_v36 = vpop.f32.mrb[105].mxu1  ;;  %v7362_v54 = vunpack.c.h.bf16 %v9378_v58 }
 0x6e7   : > { %8099 = vst [vmem:[%s12754_s19 + $0x20] sm:$0xff] %v8039_v20   ;;  %v7390_v35 = vadd.f32 %v7358_v41, %v7326_v49  ;;  %v7327_v19 = vmax.f32 %v7295_v33, 0.0  ;;  %v8966_v32 = vadd.f32 %v12667_v22, %v7141_v36  ;;  %v8884_v40 = vpop.f32.mrb[106].mxu1  ;;  %v9380_v41 = vld [vmem:[%s9811_s12 + $0x5c] sm:$0xff]   ;;  %v9381_v49 = vld [vmem:[%s9811_s12 + $0x64] sm:$0xff]  }
 0x6e8   : > { %v7393_v7 = vadd.f32 %v7361_v15, %v7329_v63  ;;  %v7261_v51 = vmul.f32 %v8963_v53, %v12717_v8  ;;  %v8969_v31 = vadd.f32 %v12676_v57, %v8884_v40  ;;  %v7144_v21 = vpop.f32.mrb[107].mxu1  ;;  %v7424_v39 = vmax.f32 %v7392_v44, 0.0 }
 0x6e9   : > { %v7391_v1 = vadd.f32 %v7359_v46, %v7327_v19  ;;  %v7259_v50 = vmul.f32 %v8966_v32, %v12717_v8  ;;  %v8972_v27 = vadd.f32 %v12670_v16, %v7144_v21  ;;  %v7422_v52 = vmax.f32 %v7390_v35, 0.0 }
 0x6ea   : > { %v7425_v61 = vmax.f32 %v7393_v7, 0.0  ;;  %v7300_v22 = vadd.f32 %v12723_v25, %v7261_v51  ;;  %v7262_v56 = vmul.f32 %v8969_v31, %v12717_v8  ;;  %v7365_v16 = vunpack.c.l.bf16 %v9380_v41  ;;  %v9382_v31 = vld [vmem:[%s9811_s12 + $0x6c] sm:$0xff]  }
 0x6eb   : > { %v7423_v4 = vmax.f32 %v7391_v1, 0.0  ;;  %v7298_v2 = vadd.f32 %v12723_v25, %v7259_v50  ;;  %v7260_v57 = vmul.f32 %v8972_v27, %v12717_v8  ;;  %v7368_v33 = vunpack.c.h.bf16 %v9381_v49 }
 0x6ec   : > { %v8054_v17 = vpack.c.bf16 %v7425_v61, %v7424_v39  ;;  %v7332_v12 = vmax.f32 %v7300_v22, 0.0  ;;  %v7301_v29 = vadd.f32 %v12723_v25, %v7262_v56 }
 0x6ed   : > { %v8049_v47 = vpack.c.bf16 %v7423_v4, %v7422_v52  ;;  %v7330_v11 = vmax.f32 %v7298_v2, 0.0  ;;  %v7299_v9 = vadd.f32 %v12723_v25, %v7260_v57  ;;  %v8887_v5 = vpop.f32.mrb[108].mxu1 }
 0x6ee   : > { %8102 = vst [vmem:[%s12754_s19 + $0x38] sm:$0xff] %v8054_v17   ;;  %v7396_v26 = vadd.f32 %v7364_v13, %v7332_v12  ;;  %v7333_v3 = vmax.f32 %v7301_v29, 0.0  ;;  %v8975_v43 = vadd.f32 %v12685_v10, %v8887_v5  ;;  %v7157_v6 = vpop.f32.mrb[109].mxu1  ;;  %v7366_v10 = vunpack.c.h.bf16 %v9380_v41  ;;  %v9383_v29 = vld [vmem:[%s9811_s12 + $0x74] sm:$0xff]  }
 0x6ef   : > { %8101 = vst [vmem:[%s12754_s19 + $0x30] sm:$0xff] %v8049_v47   ;;  %v7394_v48 = vadd.f32 %v7362_v54, %v7330_v11  ;;  %v7331_v42 = vmax.f32 %v7299_v9, 0.0  ;;  %v8978_v14 = vadd.f32 %v12679_v37, %v7157_v6  ;;  %v8888_v58 = vpop.f32.mrb[110].mxu1  ;;  %v7367_v54 = vunpack.c.l.bf16 %v9381_v49 }
 0x6f0   : > { %v7397_v15 = vadd.f32 %v7365_v16, %v7333_v3  ;;  %v7265_v20 = vmul.f32 %v8975_v43, %v12717_v8  ;;  %v8981_v46 = vadd.f32 %v12688_v0, %v8888_v58  ;;  %v7160_v59 = vpop.f32.mrb[111].mxu1  ;;  %v7428_v36 = vmax.f32 %v7396_v26, 0.0 }
 0x6f1   : > { %v7395_v44 = vadd.f32 %v7363_v28, %v7331_v42  ;;  %v7263_v63 = vmul.f32 %v8978_v14, %v12717_v8  ;;  %v8984_v53 = vadd.f32 %v12682_v38, %v7160_v59  ;;  %v7426_v32 = vmax.f32 %v7394_v48, 0.0 }
 0x6f2   : > { %v7429_v35 = vmax.f32 %v7397_v15, 0.0  ;;  %v7304_v37 = vadd.f32 %v12723_v25, %v7265_v20  ;;  %v7266_v19 = vmul.f32 %v8981_v46, %v12717_v8  ;;  %v7369_v38 = vunpack.c.l.bf16 %v9382_v31  ;;  %v9384_v15 = vld [vmem:[%s9811_s12 + $0x7c] sm:$0xff]  }
 0x6f3   : > { %v7427_v40 = vmax.f32 %v7395_v44, 0.0  ;;  %v7302_v7 = vadd.f32 %v12723_v25, %v7263_v63  ;;  %v7264_v0 = vmul.f32 %v8984_v53, %v12717_v8  ;;  %v7372_v41 = vunpack.c.h.bf16 %v9383_v29 }
 0x6f4   : > { %v8064_v51 = vpack.c.bf16 %v7429_v35, %v7428_v36  ;;  %v7336_v45 = vmax.f32 %v7304_v37, 0.0  ;;  %v7305_v13 = vadd.f32 %v12723_v25, %v7266_v19  ;;  %v7371_v46 = vunpack.c.l.bf16 %v9383_v29 }
 0x6f5   : > { %v8059_v21 = vpack.c.bf16 %v7427_v40, %v7426_v32  ;;  %v7334_v1 = vmax.f32 %v7302_v7, 0.0  ;;  %v7303_v50 = vadd.f32 %v12723_v25, %v7264_v0  ;;  %v8891_v27 = vpop.f32.mrb[112].mxu1  ;;  %v9385_v7 = vld [vmem:[%s9811_s12 + $0x84] sm:$0xff]  }
 0x6f6   : > { %8104 = vst [vmem:[%s12754_s19 + $0x48] sm:$0xff] %v8064_v51   ;;  %v7400_v39 = vadd.f32 %v7368_v33, %v7336_v45  ;;  %v7337_v61 = vmax.f32 %v7305_v13, 0.0  ;;  %v8987_v22 = vadd.f32 %v12697_v60, %v8891_v27  ;;  %v7173_v56 = vpop.f32.mrb[113].mxu1  ;;  %v7370_v60 = vunpack.c.h.bf16 %v9382_v31 }
 0x6f7   : > { %8103 = vst [vmem:[%s12754_s19 + $0x40] sm:$0xff] %v8059_v21   ;;  %v7398_v52 = vadd.f32 %v7366_v10, %v7334_v1  ;;  %v7335_v4 = vmax.f32 %v7303_v50, 0.0  ;;  %v8990_v2 = vadd.f32 %v12691_v18, %v7173_v56  ;;  %v8892_v57 = vpop.f32.mrb[114].mxu1  ;;  %v7376_v0 = vunpack.c.h.bf16 %v9385_v7 }
 0x6f8   : > { %v7401_v17 = vadd.f32 %v7369_v38, %v7337_v61  ;;  %v7269_v12 = vmul.f32 %v8987_v22, %v12717_v8  ;;  %v8993_v16 = vadd.f32 %v12700_v62, %v8892_v57  ;;  %v7176_v47 = vpop.f32.mrb[115].mxu1  ;;  %v7432_v5 = vmax.f32 %v7400_v39, 0.0 }
 0x6f9   : > { %v7399_v11 = vadd.f32 %v7367_v54, %v7335_v4  ;;  %v7267_v9 = vmul.f32 %v8990_v2, %v12717_v8  ;;  %v8996_v28 = vadd.f32 %v12694_v34, %v7176_v47  ;;  %v7430_v43 = vmax.f32 %v7398_v52, 0.0 }
 0x6fa   : > { %v7433_v26 = vmax.f32 %v7401_v17, 0.0  ;;  %v7308_v18 = vadd.f32 %v12723_v25, %v7269_v12  ;;  %v7270_v3 = vmul.f32 %v8993_v16, %v12717_v8  ;;  %v7373_v34 = vunpack.c.l.bf16 %v9384_v15 }
 0x6fb   : > { %v7431_v6 = vmax.f32 %v7399_v11, 0.0  ;;  %v7306_v48 = vadd.f32 %v12723_v25, %v7267_v9  ;;  %v7268_v62 = vmul.f32 %v8996_v28, %v12717_v8  ;;  %v7375_v17 = vunpack.c.l.bf16 %v9385_v7 }
 0x6fc   : > { %v8074_v42 = vpack.c.bf16 %v7433_v26, %v7432_v5  ;;  %v7340_v14 = vmax.f32 %v7308_v18, 0.0  ;;  %v7309_v58 = vadd.f32 %v12723_v25, %v7270_v3 }
 0x6fd   : > { %v8069_v20 = vpack.c.bf16 %v7431_v6, %v7430_v43  ;;  %v7338_v49 = vmax.f32 %v7306_v48, 0.0  ;;  %v7307_v33 = vadd.f32 %v12723_v25, %v7268_v62  ;;  %v8895_v59 = vpop.f32.mrb[116].mxu1 }
 0x6fe   : > { %8106 = vst [vmem:[%s12754_s19 + $0x58] sm:$0xff] %v8074_v42   ;;  %v7404_v44 = vadd.f32 %v7372_v41, %v7340_v14  ;;  %v7341_v63 = vmax.f32 %v7309_v58, 0.0  ;;  %v8999_v10 = vadd.f32 %v12709_v24, %v8895_v59  ;;  %v7189_v53 = vpop.f32.mrb[117].mxu1  ;;  %v7374_v24 = vunpack.c.h.bf16 %v9384_v15 }
 0x6ff   : > { %8105 = vst [vmem:[%s12754_s19 + $0x50] sm:$0xff] %v8069_v20   ;;  %v7402_v36 = vadd.f32 %v7370_v60, %v7338_v49  ;;  %v7339_v35 = vmax.f32 %v7307_v33, 0.0  ;;  %v9002_v37 = vadd.f32 %v12703_v30, %v7189_v53  ;;  %v8896_v19 = vpop.f32.mrb[118].mxu1 }
 0x700   : > { %v7405_v32 = vadd.f32 %v7373_v34, %v7341_v63  ;;  %v7273_v40 = vmul.f32 %v8999_v10, %v12717_v8  ;;  %v9005_v51 = vadd.f32 %v12712_v55, %v8896_v19  ;;  %v7192_v45 = vpop.f32.mrb[119].mxu1  ;;  %v7436_v21 = vmax.f32 %v7404_v44, 0.0 }
 0x701   : > { %v7403_v13 = vadd.f32 %v7371_v46, %v7339_v35  ;;  %v7271_v31 = vmul.f32 %v9002_v37, %v12717_v8  ;;  %v9008_v38 = vadd.f32 %v12706_v23, %v7192_v45  ;;  %v7434_v54 = vmax.f32 %v7402_v36, 0.0  ;;  %v9386_v23 = vld [vmem:[%s9811_s12 + $0x8c] sm:$0xff]  }
 0x702   : > { %v7437_v1 = vmax.f32 %v7405_v32, 0.0  ;;  %v7312_v30 = vadd.f32 %v12723_v25, %v7273_v40  ;;  %v7274_v50 = vmul.f32 %v9005_v51, %v12717_v8  ;;  %v7377_v52 = vunpack.c.l.bf16 %v9386_v23 }
 0x703   : > { %v7435_v27 = vmax.f32 %v7403_v13, 0.0  ;;  %v7310_v55 = vadd.f32 %v12723_v25, %v7271_v31  ;;  %v7272_v39 = vmul.f32 %v9008_v38, %v12717_v8 }
 0x704   : > { %v8084_v61 = vpack.c.bf16 %v7437_v1, %v7436_v21  ;;  %v7344_v22 = vmax.f32 %v7312_v30, 0.0  ;;  %v7313_v56 = vadd.f32 %v12723_v25, %v7274_v50 }
 0x705   : > { %v8079_v4 = vpack.c.bf16 %v7435_v27, %v7434_v54  ;;  %v7342_v2 = vmax.f32 %v7310_v55, 0.0  ;;  %v7311_v57 = vadd.f32 %v12723_v25, %v7272_v39 }
 0x706   : > { %8108 = vst [vmem:[%s12754_s19 + $0x68] sm:$0xff] %v8084_v61   ;;  %v7408_v12 = vadd.f32 %v7376_v0, %v7344_v22  ;;  %v7345_v29 = vmax.f32 %v7313_v56, 0.0 }
 0x707   : > { %8107 = vst [vmem:[%s12754_s19 + $0x60] sm:$0xff] %v8079_v4   ;;  %v7406_v8 = vadd.f32 %v7374_v24, %v7342_v2  ;;  %v7343_v41 = vmax.f32 %v7311_v57, 0.0 }
 0x708   : > { %v7409_v16 = vadd.f32 %v7377_v52, %v7345_v29  ;;  %v7440_v11 = vmax.f32 %v7408_v12, 0.0 }
 0x709   : > { %v7407_v47 = vadd.f32 %v7375_v17, %v7343_v41  ;;  %v7438_v60 = vmax.f32 %v7406_v8, 0.0 }
 0x70a   : > { %v7441_v9 = vmax.f32 %v7409_v16, 0.0 }
 0x70b   : > { %v7439_v28 = vmax.f32 %v7407_v47, 0.0 }
 0x70c   : > { %v8094_v25 = vpack.c.bf16 %v7441_v9, %v7440_v11 }
 0x70d   : > { %v8089_v5 = vpack.c.bf16 %v7439_v28, %v7438_v60 }
 0x70e   : > { %8110 = vst [vmem:[%s12754_s19 + $0x78] sm:$0xff] %v8094_v25  }
 0x70f   : > { %8109 = vst [vmem:[%s12754_s19 + $0x70] sm:$0xff] %v8089_v5  }
 0x710   : > { %9486 = shalt.err (!%p9483_p2)
}
 0x711   : > { %s9487_s24 = scalar_lea.hbm %s12859_s9, 2048  ;;  %s9491_s18 = scalar_lea.hbm %s12919_s7, 4096 }
 0x712   : > { %p9488_p0 = scmp.ne.s32.totalorder %s12859_s9, %s9487_s24  ;;  %p9492_p6 = scmp.lt.u32.totalorder %s12859_s9, %s12919_s7 }
 0x713   : > { %p9493_p7 = scmp.lt.u32.totalorder %s9491_s18, %s9487_s24  ;;  %p9495_p8 = scmp.lt.u32.totalorder %s9487_s24, %s12859_s9 }
 0x714   : > { %p9489_p4 = pnand %p9488_p0, %p13767_p12 }
 0x715   : > { %p9494_p11 = por %p9493_p7, %p9492_p6 }
 0x716   : > { %p9490_p13 = pneg %p9489_p4 }
 0x717   : > { %p9496_p1 = por %p9495_p8, %p9494_p11 }
 0x719   : > { %p9497_p10 = pnand %p9496_p1, %p9490_p13 }
 0x71b   : > { %9500 = shalt.err (!%p9497_p10)
}
 0x71c   : > { %s9570_s23 = smov 64   ;;  %s9571_s12 = smov 4  }
 0x71d   : > { %9106 = dma.vmem_to_hbm [thread:$0]  (%p13767_p12), %s12861_s10, 2048, %s12859_s9, %s7603_s27, %s9570_s23, %s9570_s23, %s9571_s12  }
 0x71e PF: > { %s13768_s11 = sld [smem:[#allocation12_spill]]  ;;  %s13769_s13 = sld [smem:[#allocation13_spill]] }
 0x71f   : > { %p13771_p5 = scmp.ge.s32.totalorder %s9559_s29, 2 }
 0x724   : > { %s7633_s17 = sand.u32 1, %s13768_s11   ;;  %p13770_p3 = scmp.ne.s32.totalorder %s13769_s13, 0 }
 0x725   : > { %s7634_s30 = scalar_lea.sflag [#allocation4], %s7633_s17 }
 0x726   : > { %p9120_p9 = pnand %p13771_p5, %p13770_p3 }
 0x728   : > { %9534 = dma.done.wait (!%p9120_p9), %s7634_s30, 2048  }
 0x729   : > { %9536 = vsyncadd (!%p9120_p9), %s7634_s30, 4294965248  ;;  %s24_s29 = sadd.s32 1, %s9559_s29   ;;  %s13772_s24 = smov %s9543_s25 }
 0x72a   : > { %p21_p2 = scmp.ge.s32.totalorder %s24_s29, 4   ;;  %s13773_s25 = smov %s9547_s26 }
 0x72b   : > { %s13774_s26 = smov %s9763_s8  ;;  %s13775_s27 = smov %s9555_s28 }
 0x72c   : > { %s13776_s28 = smov %s13778_s16  ;;  %23 = sbr.rel (!%p21_p2) target bundleno = 7 (0x7), region = 101 }
 0x733   :  { %7639 = vsyncpa [#allocation3], 1 }
 0x734   :  { %7641 = vsyncpa [#allocation3 + $0x1], 1 }
 0x735   :  { %7642 = vsyncpa [#allocation6], 1 }
 0x736   :  { %7643 = vsyncpa [#allocation4], 1 }
 0x737   :  { %7645 = vsyncpa [#allocation4 + $0x1], 1 }

</bundles_post_ra>
